<compile_context>
chip_gen: v7x
topology: tpu7x:2x2x1
jax: 0.10.0
libtpu: 0.0.40
codegen_flags: <defaults>
</compile_context>

<pallas_src>
import jax
import jax.numpy as jnp
from jax import lax
from jax.experimental import pallas as pl
from jax.experimental.pallas import tpu as pltpu


# ---------------------------------------------------------------------------
# Network geometry (fixed by the PyTorch module + 18x18 input)
# ---------------------------------------------------------------------------
KH = KW = 3
CIN1, COUT1 = 3, 6
CIN2, COUT2 = 6, 16
H0 = W0 = 18            # input spatial
H1 = W1 = 16            # after conv1
HP1 = WP1 = 8           # after pool1
H2 = W2 = 6             # after conv2
HP2 = WP2 = 3           # after pool2
NPOS = HP2 * WP2        # 9 pooled spatial positions feeding fc1
CPOS = 16               # positions padded 9 -> 16 so the sublane fold is tile-aligned
NFEAT = COUT2 * NPOS    # 144 = 16*3*3, what fc1 expects
FC1K = COUT2 * CPOS     # 256, padded fc1 contraction dim (extra columns are zero)
FPAD = 128              # fc hidden/output dims padded to one lane group


# ---------------------------------------------------------------------------
# Fused Pallas kernel (one batch block of `nb` samples per grid step)
# ---------------------------------------------------------------------------
def _net_fused_kernel(x_ref, cw1_ref, cb1_ref, cw2_ref, cb2_ref,
                      fw1_ref, fb1_ref, fw2_ref, fb2_ref, fw3_ref, fb3_ref,
                      o_ref, p1_ref, feat_ref):
    nb = x_ref.shape[-1]                       # batch block size (lanes)

    # Padded feature rows (positions 9..15 per channel) must hold finite zeros:
    # their fw1 columns are zero, but garbage could be NaN/Inf.
    feat_ref[...] = jnp.zeros((COUT2, CPOS, nb), jnp.float32)

    # ---- conv1 (3x3 valid, 3->6) + pool 2x2 + bias + ReLU -------------------
    # One output channel per fori iteration (keeps the accumulator in vregs
    # and the traced op count small).  Weights are SMEM scalars broadcast on
    # the VPU; bias/ReLU are applied after pooling (they commute with max).
    def conv1_body(co, carry):
        acc = jnp.zeros((H1, W1, nb), jnp.float32)
        for ci in range(CIN1):
            for kx in range(KW):
                xv = x_ref[ci, :, kx:kx + W1, :]                 # (18, 16, nb)
                for ky in range(KH):
                    w = cw1_ref[co * (CIN1 * KH * KW) + ci * (KH * KW) + ky * KW + kx]
                    acc = acc + w * xv[ky:ky + H1]               # (16, 16, nb)
        # 2x2 max pool: H (leading dim) via index pairs, W (sublane dim) via
        # 1-wide slice pairs folded back with stack+reshape.
        rows = [jnp.maximum(acc[2 * i], acc[2 * i + 1]) for i in range(HP1)]
        v = jnp.stack(rows, axis=0)                              # (8, 16, nb)
        cols = [jnp.maximum(v[:, 2 * j:2 * j + 1, :], v[:, 2 * j + 1:2 * j + 2, :])
                for j in range(WP1)]
        pooled = jnp.stack(cols, axis=1).reshape(HP1, WP1, nb)   # (8, 8, nb)
        p1_ref[co] = jnp.maximum(pooled + cb1_ref[co], 0.0)
        return carry

    lax.fori_loop(0, COUT1, conv1_body, 0)

    # ---- conv2 (3x3 valid, 6->16) + pool 2x2 + bias + ReLU + flatten --------
    # The pooled features are written straight into the fc1 feature scratch in
    # PyTorch (c, i, j) order (positions padded 9->16 per channel).
    def conv2_body(co, carry):
        acc = jnp.zeros((H2, W2, nb), jnp.float32)
        for ci in range(CIN2):
            for kx in range(KW):
                pv = p1_ref[ci, :, kx:kx + W2, :]                # (8, 6, nb)
                for ky in range(KH):
                    w = cw2_ref[co * (CIN2 * KH * KW) + ci * (KH * KW) + ky * KW + kx]
                    acc = acc + w * pv[ky:ky + H2]               # (6, 6, nb)
        b = cb2_ref[co]
        for i in range(HP2):
            for j in range(WP2):
                m = jnp.maximum(
                    jnp.maximum(acc[2 * i,     2 * j:2 * j + 1, :],
                                acc[2 * i,     2 * j + 1:2 * j + 2, :]),
                    jnp.maximum(acc[2 * i + 1, 2 * j:2 * j + 1, :],
                                acc[2 * i + 1, 2 * j + 1:2 * j + 2, :]))   # (1, nb)
                feat_ref[co, pl.ds(i * WP2 + j, 1), :] = jnp.maximum(m + b, 0.0)
        return carry

    lax.fori_loop(0, COUT2, conv2_body, 0)

    # ---- fc1 -> relu -> fc2 -> relu -> fc3 (single MXU dot per layer) -------
    # Weight-stationary orientation: (out_features, K) @ (K, nb).  bf16
    # operands, f32 accumulation; padded rows/cols are zero so they propagate
    # zeros through the ReLUs.
    feat = feat_ref[...].reshape(FC1K, nb).astype(jnp.bfloat16)  # (256, nb)
    h = jnp.dot(fw1_ref[...], feat, preferred_element_type=jnp.float32)
    h = jnp.maximum(h + fb1_ref[...], 0.0)                       # (128, nb)
    h = jnp.dot(fw2_ref[...], h.astype(jnp.bfloat16),
                preferred_element_type=jnp.float32)
    h = jnp.maximum(h + fb2_ref[...], 0.0)                       # (128, nb)
    h = jnp.dot(fw3_ref[...], h.astype(jnp.bfloat16),
                preferred_element_type=jnp.float32)
    o_ref[...] = h + fb3_ref[...]                                # (128, nb); rows 10.. are 0


# ---------------------------------------------------------------------------
# Wrapper
# ---------------------------------------------------------------------------
def net_forward(x_nchw, pk, block_n=128):
    """Forward pass of Net.  x is NCHW (PyTorch layout); returns (N, 10) logits."""
    n = x_nchw.shape[0]
    n_pad = pl.cdiv(n, block_n) * block_n
    # Batch-in-lanes layout (C, H, W, N), zero-padded batch.
    x = jnp.transpose(x_nchw.astype(jnp.float32), (1, 2, 3, 0))
    x = jnp.pad(x, ((0, 0), (0, 0), (0, 0), (0, n_pad - n)))

    out = pl.pallas_call(
        _net_fused_kernel,
        out_shape=jax.ShapeDtypeStruct((FPAD, n_pad), jnp.float32),
        grid_spec=pltpu.PrefetchScalarGridSpec(
            num_scalar_prefetch=0,
            grid=(n_pad // block_n,),
            in_specs=[
                # activations: blocked over the batch (lane) axis
                pl.BlockSpec((CIN1, H0, W0, block_n), lambda b: (0, 0, 0, b)),
                # conv weights/biases: SMEM scalars
                pl.BlockSpec(memory_space=pltpu.MemorySpace.SMEM),   # cw1 (162,)
                pl.BlockSpec(memory_space=pltpu.MemorySpace.SMEM),   # cb1 (6,)
                pl.BlockSpec(memory_space=pltpu.MemorySpace.SMEM),   # cw2 (864,)
                pl.BlockSpec(memory_space=pltpu.MemorySpace.SMEM),   # cb2 (16,)
                # fc weights/biases: constant block index -> resident in VMEM
                pl.BlockSpec((FPAD, FC1K), lambda b: (0, 0)),        # fw1 (128,256) bf16
                pl.BlockSpec((FPAD, 1), lambda b: (0, 0)),           # fb1 (128,1)
                pl.BlockSpec((FPAD, FPAD), lambda b: (0, 0)),        # fw2 (128,128) bf16
                pl.BlockSpec((FPAD, 1), lambda b: (0, 0)),           # fb2 (128,1)
                pl.BlockSpec((FPAD, FPAD), lambda b: (0, 0)),        # fw3 (128,128) bf16
                pl.BlockSpec((FPAD, 1), lambda b: (0, 0)),           # fb3 (128,1)
            ],
            out_specs=pl.BlockSpec((FPAD, block_n), lambda b: (0, b)),
            scratch_shapes=[
                pltpu.VMEM((COUT1, HP1, WP1, block_n), jnp.float32),  # pooled conv1 acts
                pltpu.VMEM((COUT2, CPOS, block_n), jnp.float32),      # fc1 feature slab
            ],
        ),
        compiler_params=pltpu.CompilerParams(
            dimension_semantics=("parallel",)),   # v7x: batch blocks split across TCs
    )(x, pk["cw1"], pk["cb1"], pk["cw2"], pk["cb2"],
      pk["fw1"], pk["fb1"], pk["fw2"], pk["fb2"], pk["fw3"], pk["fb3"])
    return out[:10, :n].T


# ---------------------------------------------------------------------------
# Parameters: PyTorch-style init + one-time packing into kernel layouts
# ---------------------------------------------------------------------------
def init_params(key):
    """PyTorch-default-style U(-1/sqrt(fan_in), +1/sqrt(fan_in)) init,
    stored in PyTorch-native layouts."""
    def unif(k, shape, fan_in):
        bound = 1.0 / jnp.sqrt(jnp.float32(fan_in))
        return jax.random.uniform(k, shape, jnp.float32, -bound, bound)

    ks = jax.random.split(key, 10)
    return {
        "conv1_w": unif(ks[0], (COUT1, CIN1, KH, KW), CIN1 * KH * KW),
        "conv1_b": unif(ks[1], (COUT1,), CIN1 * KH * KW),
        "conv2_w": unif(ks[2], (COUT2, CIN2, KH, KW), CIN2 * KH * KW),
        "conv2_b": unif(ks[3], (COUT2,), CIN2 * KH * KW),
        "fc1_w": unif(ks[4], (120, NFEAT), NFEAT),
        "fc1_b": unif(ks[5], (120,), NFEAT),
        "fc2_w": unif(ks[6], (84, 120), 120),
        "fc2_b": unif(ks[7], (84,), 120),
        "fc3_w": unif(ks[8], (10, 84), 84),
        "fc3_b": unif(ks[9], (10,), 84),
    }


def pack_params(p):
    """Pack PyTorch-layout params into the kernel's layouts (done once)."""
    pk = {}
    # conv weights flattened to 1-D f32 for SMEM; index = ((co*Cin+ci)*KH+ky)*KW+kx
    pk["cw1"] = p["conv1_w"].reshape(-1)          # (162,)
    pk["cb1"] = p["conv1_b"]                      # (6,)
    pk["cw2"] = p["conv2_w"].reshape(-1)          # (864,)
    pk["cb2"] = p["conv2_b"]                      # (16,)
    # fc1: keep PyTorch (c, i, j) column order; pad positions 9->16 per channel
    # and out-dim 120->128.  Weight-stationary (out, in) orientation, bf16.
    w1 = p["fc1_w"].reshape(120, COUT2, NPOS)                       # (120, 16, 9)
    w1 = jnp.pad(w1, ((0, FPAD - 120), (0, 0), (0, CPOS - NPOS)))   # (128, 16, 16)
    pk["fw1"] = w1.reshape(FPAD, FC1K).astype(jnp.bfloat16)         # (128, 256)
    pk["fb1"] = jnp.pad(p["fc1_b"], (0, FPAD - 120)).reshape(FPAD, 1)
    pk["fw2"] = jnp.pad(p["fc2_w"],
                        ((0, FPAD - 84), (0, FPAD - 120))).astype(jnp.bfloat16)
    pk["fb2"] = jnp.pad(p["fc2_b"], (0, FPAD - 84)).reshape(FPAD, 1)
    pk["fw3"] = jnp.pad(p["fc3_w"],
                        ((0, FPAD - 10), (0, FPAD - 84))).astype(jnp.bfloat16)
    pk["fb3"] = jnp.pad(p["fc3_b"], (0, FPAD - 10)).reshape(FPAD, 1)
    return pk


# ---------------------------------------------------------------------------
# Pure-JAX f32 reference (sanity check)
# ---------------------------------------------------------------------------
def _conv2d_valid_ref(x, w, b):
    kh, kw, cin, cout = w.shape
    ho, wo = x.shape[1] - kh + 1, x.shape[2] - kw + 1
    cols = [x[:, i:i + ho, j:j + wo, :] for i in range(kh) for j in range(kw)]
    patches = jnp.concatenate(cols, axis=-1)
    return patches @ w.reshape(kh * kw * cin, cout) + b


def net_forward_ref(x_nchw, p):
    x = jnp.transpose(x_nchw, (0, 2, 3, 1)).astype(jnp.float32)
    n = x.shape[0]
    y = jnp.maximum(_conv2d_valid_ref(
        x, jnp.transpose(p["conv1_w"], (2, 3, 1, 0)), p["conv1_b"]), 0.0)
    y = y.reshape(n, HP1, 2, WP1, 2, COUT1).max(axis=(2, 4))
    y = jnp.maximum(_conv2d_valid_ref(
        y, jnp.transpose(p["conv2_w"], (2, 3, 1, 0)), p["conv2_b"]), 0.0)
    y = y.reshape(n, HP2, 2, WP2, 2, COUT2).max(axis=(2, 4))
    feat = jnp.transpose(y, (0, 3, 1, 2)).reshape(n, NFEAT)   # PyTorch (C,H,W) flatten
    h = jnp.maximum(feat @ p["fc1_w"].T + p["fc1_b"], 0.0)
    h = jnp.maximum(h @ p["fc2_w"].T + p["fc2_b"], 0.0)
    return h @ p["fc3_w"].T + p["fc3_b"]


if __name__ == "__main__":
    key = jax.random.PRNGKey(0)
    k_x, k_p = jax.random.split(key)

    # 18x18 input: 18 -conv3-> 16 -pool-> 8 -conv3-> 6 -pool-> 3, so the
    # flattened feature size is exactly 16*3*3 = 144 (what fc1 expects).
    x = jax.random.normal(k_x, (2, CIN1, H0, W0), dtype=jnp.float32)   # NCHW
    params = init_params(k_p)
    packed = pack_params(params)

    out = jax.jit(net_forward)(x, packed)
    out = jax.block_until_ready(out)
    assert out.shape == (2, 10), out.shape

    ref = net_forward_ref(x, params)
    err = float(jnp.max(jnp.abs(out - ref)))
    assert jnp.allclose(out, ref, atol=5e-2, rtol=5e-2), \
        f"mismatch vs reference (max abs err {err})"

    print("KERNEL_OK")
</pallas_src>

<mosaic_0001>
module attributes {stable_mosaic.version = 11 : i64} {
  func.func @_net_fused_kernel(%arg0: i32, %arg1: memref<3x18x18x128xf32, #tpu.memory_space<vmem>>, %arg2: memref<162xf32, #tpu.memory_space<smem>>, %arg3: memref<6xf32, #tpu.memory_space<smem>>, %arg4: memref<864xf32, #tpu.memory_space<smem>>, %arg5: memref<16xf32, #tpu.memory_space<smem>>, %arg6: memref<128x256xbf16, #tpu.memory_space<vmem>>, %arg7: memref<128x1xf32, #tpu.memory_space<vmem>>, %arg8: memref<128x128xbf16, #tpu.memory_space<vmem>>, %arg9: memref<128x1xf32, #tpu.memory_space<vmem>>, %arg10: memref<128x128xbf16, #tpu.memory_space<vmem>>, %arg11: memref<128x1xf32, #tpu.memory_space<vmem>>, %arg12: memref<128x128xf32, #tpu.memory_space<vmem>>, %arg13: memref<6x8x8x128xf32, #tpu.memory_space<vmem>>, %arg14: memref<16x16x128xf32, #tpu.memory_space<vmem>>) attributes {dimension_semantics = [#tpu.dimension_semantics<parallel>], iteration_bounds = array<i64: 1>, scalar_prefetch = 0 : i64, scratch_operands = 2 : i64, tpu.core_type = #tpu.core_type<tc>, window_params = [{transform_indices = @transform_0, window_bounds = array<i64: 3, 18, 18, 128>}, {transform_indices = @transform_1, window_bounds = array<i64: 162>}, {transform_indices = @transform_2, window_bounds = array<i64: 6>}, {transform_indices = @transform_3, window_bounds = array<i64: 864>}, {transform_indices = @transform_4, window_bounds = array<i64: 16>}, {pipeline_mode = #tpu.pipeline_mode<synchronous>, transform_indices = @transform_5, window_bounds = array<i64: 128, 256>}, {pipeline_mode = #tpu.pipeline_mode<synchronous>, transform_indices = @transform_6, window_bounds = array<i64: 128, 1>}, {pipeline_mode = #tpu.pipeline_mode<synchronous>, transform_indices = @transform_7, window_bounds = array<i64: 128, 128>}, {pipeline_mode = #tpu.pipeline_mode<synchronous>, transform_indices = @transform_8, window_bounds = array<i64: 128, 1>}, {pipeline_mode = #tpu.pipeline_mode<synchronous>, transform_indices = @transform_9, window_bounds = array<i64: 128, 128>}, {pipeline_mode = #tpu.pipeline_mode<synchronous>, transform_indices = @transform_10, window_bounds = array<i64: 128, 1>}, {transform_indices = @transform_11, window_bounds = array<i64: 128, 128>}]} {
    %cst = arith.constant 0.000000e+00 : f32
    %0 = vector.broadcast %cst : f32 to vector<16x16x128xf32>
    %c0 = arith.constant 0 : index
    %c0_0 = arith.constant 0 : index
    %c0_1 = arith.constant 0 : index
    %1 = vector.load %arg14[%c0, %c0_0, %c0_1] : memref<16x16x128xf32, #tpu.memory_space<vmem>>, vector<16x16x128xf32>
    tpu.vector_store %arg14[%c0, %c0_0, %c0_1], %0 {strides = array<i32>} : memref<16x16x128xf32, #tpu.memory_space<vmem>>, vector<16x16x128xf32>,
    %c0_i32 = arith.constant 0 : i32
    %c6_i32 = arith.constant 6 : i32
    %2 = arith.addi %c0_i32, %c6_i32 : i32
    %c1_i32 = arith.constant 1 : i32
    scf.for %arg15 = %c0_i32 to %2 step %c1_i32  : i32 {
      %cst_28 = arith.constant 0.000000e+00 : f32
      %29 = vector.broadcast %cst_28 : f32 to vector<16x16x128xf32>
      %c0_29 = arith.constant 0 : index
      %c0_30 = arith.constant 0 : index
      %c0_31 = arith.constant 0 : index
      %c0_32 = arith.constant 0 : index
      %30 = vector.load %arg1[%c0_29, %c0_30, %c0_31, %c0_32] : memref<3x18x18x128xf32, #tpu.memory_space<vmem>>, vector<1x18x16x128xf32>
      %31 = vector.shape_cast %30 : vector<1x18x16x128xf32> to vector<18x16x128xf32>
      %c27_i32 = arith.constant 27 : i32
      %32 = arith.muli %arg15, %c27_i32 : i32
      %c0_i32_33 = arith.constant 0 : i32
      %33 = arith.addi %32, %c0_i32_33 : i32
      %c0_i32_34 = arith.constant 0 : i32
      %34 = arith.addi %33, %c0_i32_34 : i32
      %c0_i32_35 = arith.constant 0 : i32
      %35 = arith.addi %34, %c0_i32_35 : i32
      %36 = arith.index_cast %35 : i32 to index
      %37 = memref.load %arg2[%36] : memref<162xf32, #tpu.memory_space<smem>>
      %38 = vector.extract_strided_slice %31 {offsets = [0, 0, 0], sizes = [16, 16, 128], strides = [1, 1, 1]} : vector<18x16x128xf32> to vector<16x16x128xf32>
      %39 = vector.broadcast %37 : f32 to vector<16x16x128xf32>
      %40 = arith.mulf %39, %38 : vector<16x16x128xf32>
      %41 = arith.addf %29, %40 : vector<16x16x128xf32>
      %c27_i32_36 = arith.constant 27 : i32
      %42 = arith.muli %arg15, %c27_i32_36 : i32
      %c0_i32_37 = arith.constant 0 : i32
      %43 = arith.addi %42, %c0_i32_37 : i32
      %c3_i32 = arith.constant 3 : i32
      %44 = arith.addi %43, %c3_i32 : i32
      %c0_i32_38 = arith.constant 0 : i32
      %45 = arith.addi %44, %c0_i32_38 : i32
      %46 = arith.index_cast %45 : i32 to index
      %47 = memref.load %arg2[%46] : memref<162xf32, #tpu.memory_space<smem>>
      %48 = vector.extract_strided_slice %31 {offsets = [1, 0, 0], sizes = [16, 16, 128], strides = [1, 1, 1]} : vector<18x16x128xf32> to vector<16x16x128xf32>
      %49 = vector.broadcast %47 : f32 to vector<16x16x128xf32>
      %50 = arith.mulf %49, %48 : vector<16x16x128xf32>
      %51 = arith.addf %41, %50 : vector<16x16x128xf32>
      %c27_i32_39 = arith.constant 27 : i32
      %52 = arith.muli %arg15, %c27_i32_39 : i32
      %c0_i32_40 = arith.constant 0 : i32
      %53 = arith.addi %52, %c0_i32_40 : i32
      %c6_i32_41 = arith.constant 6 : i32
      %54 = arith.addi %53, %c6_i32_41 : i32
      %c0_i32_42 = arith.constant 0 : i32
      %55 = arith.addi %54, %c0_i32_42 : i32
      %56 = arith.index_cast %55 : i32 to index
      %57 = memref.load %arg2[%56] : memref<162xf32, #tpu.memory_space<smem>>
      %58 = vector.extract_strided_slice %31 {offsets = [2, 0, 0], sizes = [16, 16, 128], strides = [1, 1, 1]} : vector<18x16x128xf32> to vector<16x16x128xf32>
      %59 = vector.broadcast %57 : f32 to vector<16x16x128xf32>
      %60 = arith.mulf %59, %58 : vector<16x16x128xf32>
      %61 = arith.addf %51, %60 : vector<16x16x128xf32>
      %c0_43 = arith.constant 0 : index
      %c0_44 = arith.constant 0 : index
      %c1 = arith.constant 1 : index
      %c0_45 = arith.constant 0 : index
      %62 = vector.load %arg1[%c0_43, %c0_44, %c1, %c0_45] : memref<3x18x18x128xf32, #tpu.memory_space<vmem>>, vector<1x18x16x128xf32>
      %63 = vector.shape_cast %62 : vector<1x18x16x128xf32> to vector<18x16x128xf32>
      %c27_i32_46 = arith.constant 27 : i32
      %64 = arith.muli %arg15, %c27_i32_46 : i32
      %c0_i32_47 = arith.constant 0 : i32
      %65 = arith.addi %64, %c0_i32_47 : i32
      %c0_i32_48 = arith.constant 0 : i32
      %66 = arith.addi %65, %c0_i32_48 : i32
      %c1_i32_49 = arith.constant 1 : i32
      %67 = arith.addi %66, %c1_i32_49 : i32
      %68 = arith.index_cast %67 : i32 to index
      %69 = memref.load %arg2[%68] : memref<162xf32, #tpu.memory_space<smem>>
      %70 = vector.extract_strided_slice %63 {offsets = [0, 0, 0], sizes = [16, 16, 128], strides = [1, 1, 1]} : vector<18x16x128xf32> to vector<16x16x128xf32>
      %71 = vector.broadcast %69 : f32 to vector<16x16x128xf32>
      %72 = arith.mulf %71, %70 : vector<16x16x128xf32>
      %73 = arith.addf %61, %72 : vector<16x16x128xf32>
      %c27_i32_50 = arith.constant 27 : i32
      %74 = arith.muli %arg15, %c27_i32_50 : i32
      %c0_i32_51 = arith.constant 0 : i32
      %75 = arith.addi %74, %c0_i32_51 : i32
      %c3_i32_52 = arith.constant 3 : i32
      %76 = arith.addi %75, %c3_i32_52 : i32
      %c1_i32_53 = arith.constant 1 : i32
      %77 = arith.addi %76, %c1_i32_53 : i32
      %78 = arith.index_cast %77 : i32 to index
      %79 = memref.load %arg2[%78] : memref<162xf32, #tpu.memory_space<smem>>
      %80 = vector.extract_strided_slice %63 {offsets = [1, 0, 0], sizes = [16, 16, 128], strides = [1, 1, 1]} : vector<18x16x128xf32> to vector<16x16x128xf32>
      %81 = vector.broadcast %79 : f32 to vector<16x16x128xf32>
      %82 = arith.mulf %81, %80 : vector<16x16x128xf32>
      %83 = arith.addf %73, %82 : vector<16x16x128xf32>
      %c27_i32_54 = arith.constant 27 : i32
      %84 = arith.muli %arg15, %c27_i32_54 : i32
      %c0_i32_55 = arith.constant 0 : i32
      %85 = arith.addi %84, %c0_i32_55 : i32
      %c6_i32_56 = arith.constant 6 : i32
      %86 = arith.addi %85, %c6_i32_56 : i32
      %c1_i32_57 = arith.constant 1 : i32
      %87 = arith.addi %86, %c1_i32_57 : i32
      %88 = arith.index_cast %87 : i32 to index
      %89 = memref.load %arg2[%88] : memref<162xf32, #tpu.memory_space<smem>>
      %90 = vector.extract_strided_slice %63 {offsets = [2, 0, 0], sizes = [16, 16, 128], strides = [1, 1, 1]} : vector<18x16x128xf32> to vector<16x16x128xf32>
      %91 = vector.broadcast %89 : f32 to vector<16x16x128xf32>
      %92 = arith.mulf %91, %90 : vector<16x16x128xf32>
      %93 = arith.addf %83, %92 : vector<16x16x128xf32>
      %c0_58 = arith.constant 0 : index
      %c0_59 = arith.constant 0 : index
      %c2 = arith.constant 2 : index
      %c0_60 = arith.constant 0 : index
      %94 = vector.load %arg1[%c0_58, %c0_59, %c2, %c0_60] : memref<3x18x18x128xf32, #tpu.memory_space<vmem>>, vector<1x18x16x128xf32>
      %95 = vector.shape_cast %94 : vector<1x18x16x128xf32> to vector<18x16x128xf32>
      %c27_i32_61 = arith.constant 27 : i32
      %96 = arith.muli %arg15, %c27_i32_61 : i32
      %c0_i32_62 = arith.constant 0 : i32
      %97 = arith.addi %96, %c0_i32_62 : i32
      %c0_i32_63 = arith.constant 0 : i32
      %98 = arith.addi %97, %c0_i32_63 : i32
      %c2_i32 = arith.constant 2 : i32
      %99 = arith.addi %98, %c2_i32 : i32
      %100 = arith.index_cast %99 : i32 to index
      %101 = memref.load %arg2[%100] : memref<162xf32, #tpu.memory_space<smem>>
      %102 = vector.extract_strided_slice %95 {offsets = [0, 0, 0], sizes = [16, 16, 128], strides = [1, 1, 1]} : vector<18x16x128xf32> to vector<16x16x128xf32>
      %103 = vector.broadcast %101 : f32 to vector<16x16x128xf32>
      %104 = arith.mulf %103, %102 : vector<16x16x128xf32>
      %105 = arith.addf %93, %104 : vector<16x16x128xf32>
      %c27_i32_64 = arith.constant 27 : i32
      %106 = arith.muli %arg15, %c27_i32_64 : i32
      %c0_i32_65 = arith.constant 0 : i32
      %107 = arith.addi %106, %c0_i32_65 : i32
      %c3_i32_66 = arith.constant 3 : i32
      %108 = arith.addi %107, %c3_i32_66 : i32
      %c2_i32_67 = arith.constant 2 : i32
      %109 = arith.addi %108, %c2_i32_67 : i32
      %110 = arith.index_cast %109 : i32 to index
      %111 = memref.load %arg2[%110] : memref<162xf32, #tpu.memory_space<smem>>
      %112 = vector.extract_strided_slice %95 {offsets = [1, 0, 0], sizes = [16, 16, 128], strides = [1, 1, 1]} : vector<18x16x128xf32> to vector<16x16x128xf32>
      %113 = vector.broadcast %111 : f32 to vector<16x16x128xf32>
      %114 = arith.mulf %113, %112 : vector<16x16x128xf32>
      %115 = arith.addf %105, %114 : vector<16x16x128xf32>
      %c27_i32_68 = arith.constant 27 : i32
      %116 = arith.muli %arg15, %c27_i32_68 : i32
      %c0_i32_69 = arith.constant 0 : i32
      %117 = arith.addi %116, %c0_i32_69 : i32
      %c6_i32_70 = arith.constant 6 : i32
      %118 = arith.addi %117, %c6_i32_70 : i32
      %c2_i32_71 = arith.constant 2 : i32
      %119 = arith.addi %118, %c2_i32_71 : i32
      %120 = arith.index_cast %119 : i32 to index
      %121 = memref.load %arg2[%120] : memref<162xf32, #tpu.memory_space<smem>>
      %122 = vector.extract_strided_slice %95 {offsets = [2, 0, 0], sizes = [16, 16, 128], strides = [1, 1, 1]} : vector<18x16x128xf32> to vector<16x16x128xf32>
      %123 = vector.broadcast %121 : f32 to vector<16x16x128xf32>
      %124 = arith.mulf %123, %122 : vector<16x16x128xf32>
      %125 = arith.addf %115, %124 : vector<16x16x128xf32>
      %c1_72 = arith.constant 1 : index
      %c0_73 = arith.constant 0 : index
      %c0_74 = arith.constant 0 : index
      %c0_75 = arith.constant 0 : index
      %126 = vector.load %arg1[%c1_72, %c0_73, %c0_74, %c0_75] : memref<3x18x18x128xf32, #tpu.memory_space<vmem>>, vector<1x18x16x128xf32>
      %127 = vector.shape_cast %126 : vector<1x18x16x128xf32> to vector<18x16x128xf32>
      %c27_i32_76 = arith.constant 27 : i32
      %128 = arith.muli %arg15, %c27_i32_76 : i32
      %c9_i32 = arith.constant 9 : i32
      %129 = arith.addi %128, %c9_i32 : i32
      %c0_i32_77 = arith.constant 0 : i32
      %130 = arith.addi %129, %c0_i32_77 : i32
      %c0_i32_78 = arith.constant 0 : i32
      %131 = arith.addi %130, %c0_i32_78 : i32
      %132 = arith.index_cast %131 : i32 to index
      %133 = memref.load %arg2[%132] : memref<162xf32, #tpu.memory_space<smem>>
      %134 = vector.extract_strided_slice %127 {offsets = [0, 0, 0], sizes = [16, 16, 128], strides = [1, 1, 1]} : vector<18x16x128xf32> to vector<16x16x128xf32>
      %135 = vector.broadcast %133 : f32 to vector<16x16x128xf32>
      %136 = arith.mulf %135, %134 : vector<16x16x128xf32>
      %137 = arith.addf %125, %136 : vector<16x16x128xf32>
      %c27_i32_79 = arith.constant 27 : i32
      %138 = arith.muli %arg15, %c27_i32_79 : i32
      %c9_i32_80 = arith.constant 9 : i32
      %139 = arith.addi %138, %c9_i32_80 : i32
      %c3_i32_81 = arith.constant 3 : i32
      %140 = arith.addi %139, %c3_i32_81 : i32
      %c0_i32_82 = arith.constant 0 : i32
      %141 = arith.addi %140, %c0_i32_82 : i32
      %142 = arith.index_cast %141 : i32 to index
      %143 = memref.load %arg2[%142] : memref<162xf32, #tpu.memory_space<smem>>
      %144 = vector.extract_strided_slice %127 {offsets = [1, 0, 0], sizes = [16, 16, 128], strides = [1, 1, 1]} : vector<18x16x128xf32> to vector<16x16x128xf32>
      %145 = vector.broadcast %143 : f32 to vector<16x16x128xf32>
      %146 = arith.mulf %145, %144 : vector<16x16x128xf32>
      %147 = arith.addf %137, %146 : vector<16x16x128xf32>
      %c27_i32_83 = arith.constant 27 : i32
      %148 = arith.muli %arg15, %c27_i32_83 : i32
      %c9_i32_84 = arith.constant 9 : i32
      %149 = arith.addi %148, %c9_i32_84 : i32
      %c6_i32_85 = arith.constant 6 : i32
      %150 = arith.addi %149, %c6_i32_85 : i32
      %c0_i32_86 = arith.constant 0 : i32
      %151 = arith.addi %150, %c0_i32_86 : i32
      %152 = arith.index_cast %151 : i32 to index
      %153 = memref.load %arg2[%152] : memref<162xf32, #tpu.memory_space<smem>>
      %154 = vector.extract_strided_slice %127 {offsets = [2, 0, 0], sizes = [16, 16, 128], strides = [1, 1, 1]} : vector<18x16x128xf32> to vector<16x16x128xf32>
      %155 = vector.broadcast %153 : f32 to vector<16x16x128xf32>
      %156 = arith.mulf %155, %154 : vector<16x16x128xf32>
      %157 = arith.addf %147, %156 : vector<16x16x128xf32>
      %c1_87 = arith.constant 1 : index
      %c0_88 = arith.constant 0 : index
      %c1_89 = arith.constant 1 : index
      %c0_90 = arith.constant 0 : index
      %158 = vector.load %arg1[%c1_87, %c0_88, %c1_89, %c0_90] : memref<3x18x18x128xf32, #tpu.memory_space<vmem>>, vector<1x18x16x128xf32>
      %159 = vector.shape_cast %158 : vector<1x18x16x128xf32> to vector<18x16x128xf32>
      %c27_i32_91 = arith.constant 27 : i32
      %160 = arith.muli %arg15, %c27_i32_91 : i32
      %c9_i32_92 = arith.constant 9 : i32
      %161 = arith.addi %160, %c9_i32_92 : i32
      %c0_i32_93 = arith.constant 0 : i32
      %162 = arith.addi %161, %c0_i32_93 : i32
      %c1_i32_94 = arith.constant 1 : i32
      %163 = arith.addi %162, %c1_i32_94 : i32
      %164 = arith.index_cast %163 : i32 to index
      %165 = memref.load %arg2[%164] : memref<162xf32, #tpu.memory_space<smem>>
      %166 = vector.extract_strided_slice %159 {offsets = [0, 0, 0], sizes = [16, 16, 128], strides = [1, 1, 1]} : vector<18x16x128xf32> to vector<16x16x128xf32>
      %167 = vector.broadcast %165 : f32 to vector<16x16x128xf32>
      %168 = arith.mulf %167, %166 : vector<16x16x128xf32>
      %169 = arith.addf %157, %168 : vector<16x16x128xf32>
      %c27_i32_95 = arith.constant 27 : i32
      %170 = arith.muli %arg15, %c27_i32_95 : i32
      %c9_i32_96 = arith.constant 9 : i32
      %171 = arith.addi %170, %c9_i32_96 : i32
      %c3_i32_97 = arith.constant 3 : i32
      %172 = arith.addi %171, %c3_i32_97 : i32
      %c1_i32_98 = arith.constant 1 : i32
      %173 = arith.addi %172, %c1_i32_98 : i32
      %174 = arith.index_cast %173 : i32 to index
      %175 = memref.load %arg2[%174] : memref<162xf32, #tpu.memory_space<smem>>
      %176 = vector.extract_strided_slice %159 {offsets = [1, 0, 0], sizes = [16, 16, 128], strides = [1, 1, 1]} : vector<18x16x128xf32> to vector<16x16x128xf32>
      %177 = vector.broadcast %175 : f32 to vector<16x16x128xf32>
      %178 = arith.mulf %177, %176 : vector<16x16x128xf32>
      %179 = arith.addf %169, %178 : vector<16x16x128xf32>
      %c27_i32_99 = arith.constant 27 : i32
      %180 = arith.muli %arg15, %c27_i32_99 : i32
      %c9_i32_100 = arith.constant 9 : i32
      %181 = arith.addi %180, %c9_i32_100 : i32
      %c6_i32_101 = arith.constant 6 : i32
      %182 = arith.addi %181, %c6_i32_101 : i32
      %c1_i32_102 = arith.constant 1 : i32
      %183 = arith.addi %182, %c1_i32_102 : i32
      %184 = arith.index_cast %183 : i32 to index
      %185 = memref.load %arg2[%184] : memref<162xf32, #tpu.memory_space<smem>>
      %186 = vector.extract_strided_slice %159 {offsets = [2, 0, 0], sizes = [16, 16, 128], strides = [1, 1, 1]} : vector<18x16x128xf32> to vector<16x16x128xf32>
      %187 = vector.broadcast %185 : f32 to vector<16x16x128xf32>
      %188 = arith.mulf %187, %186 : vector<16x16x128xf32>
      %189 = arith.addf %179, %188 : vector<16x16x128xf32>
      %c1_103 = arith.constant 1 : index
      %c0_104 = arith.constant 0 : index
      %c2_105 = arith.constant 2 : index
      %c0_106 = arith.constant 0 : index
      %190 = vector.load %arg1[%c1_103, %c0_104, %c2_105, %c0_106] : memref<3x18x18x128xf32, #tpu.memory_space<vmem>>, vector<1x18x16x128xf32>
      %191 = vector.shape_cast %190 : vector<1x18x16x128xf32> to vector<18x16x128xf32>
      %c27_i32_107 = arith.constant 27 : i32
      %192 = arith.muli %arg15, %c27_i32_107 : i32
      %c9_i32_108 = arith.constant 9 : i32
      %193 = arith.addi %192, %c9_i32_108 : i32
      %c0_i32_109 = arith.constant 0 : i32
      %194 = arith.addi %193, %c0_i32_109 : i32
      %c2_i32_110 = arith.constant 2 : i32
      %195 = arith.addi %194, %c2_i32_110 : i32
      %196 = arith.index_cast %195 : i32 to index
      %197 = memref.load %arg2[%196] : memref<162xf32, #tpu.memory_space<smem>>
      %198 = vector.extract_strided_slice %191 {offsets = [0, 0, 0], sizes = [16, 16, 128], strides = [1, 1, 1]} : vector<18x16x128xf32> to vector<16x16x128xf32>
      %199 = vector.broadcast %197 : f32 to vector<16x16x128xf32>
      %200 = arith.mulf %199, %198 : vector<16x16x128xf32>
      %201 = arith.addf %189, %200 : vector<16x16x128xf32>
      %c27_i32_111 = arith.constant 27 : i32
      %202 = arith.muli %arg15, %c27_i32_111 : i32
      %c9_i32_112 = arith.constant 9 : i32
      %203 = arith.addi %202, %c9_i32_112 : i32
      %c3_i32_113 = arith.constant 3 : i32
      %204 = arith.addi %203, %c3_i32_113 : i32
      %c2_i32_114 = arith.constant 2 : i32
      %205 = arith.addi %204, %c2_i32_114 : i32
      %206 = arith.index_cast %205 : i32 to index
      %207 = memref.load %arg2[%206] : memref<162xf32, #tpu.memory_space<smem>>
      %208 = vector.extract_strided_slice %191 {offsets = [1, 0, 0], sizes = [16, 16, 128], strides = [1, 1, 1]} : vector<18x16x128xf32> to vector<16x16x128xf32>
      %209 = vector.broadcast %207 : f32 to vector<16x16x128xf32>
      %210 = arith.mulf %209, %208 : vector<16x16x128xf32>
      %211 = arith.addf %201, %210 : vector<16x16x128xf32>
      %c27_i32_115 = arith.constant 27 : i32
      %212 = arith.muli %arg15, %c27_i32_115 : i32
      %c9_i32_116 = arith.constant 9 : i32
      %213 = arith.addi %212, %c9_i32_116 : i32
      %c6_i32_117 = arith.constant 6 : i32
      %214 = arith.addi %213, %c6_i32_117 : i32
      %c2_i32_118 = arith.constant 2 : i32
      %215 = arith.addi %214, %c2_i32_118 : i32
      %216 = arith.index_cast %215 : i32 to index
      %217 = memref.load %arg2[%216] : memref<162xf32, #tpu.memory_space<smem>>
      %218 = vector.extract_strided_slice %191 {offsets = [2, 0, 0], sizes = [16, 16, 128], strides = [1, 1, 1]} : vector<18x16x128xf32> to vector<16x16x128xf32>
      %219 = vector.broadcast %217 : f32 to vector<16x16x128xf32>
      %220 = arith.mulf %219, %218 : vector<16x16x128xf32>
      %221 = arith.addf %211, %220 : vector<16x16x128xf32>
      %c2_119 = arith.constant 2 : index
      %c0_120 = arith.constant 0 : index
      %c0_121 = arith.constant 0 : index
      %c0_122 = arith.constant 0 : index
      %222 = vector.load %arg1[%c2_119, %c0_120, %c0_121, %c0_122] : memref<3x18x18x128xf32, #tpu.memory_space<vmem>>, vector<1x18x16x128xf32>
      %223 = vector.shape_cast %222 : vector<1x18x16x128xf32> to vector<18x16x128xf32>
      %c27_i32_123 = arith.constant 27 : i32
      %224 = arith.muli %arg15, %c27_i32_123 : i32
      %c18_i32 = arith.constant 18 : i32
      %225 = arith.addi %224, %c18_i32 : i32
      %c0_i32_124 = arith.constant 0 : i32
      %226 = arith.addi %225, %c0_i32_124 : i32
      %c0_i32_125 = arith.constant 0 : i32
      %227 = arith.addi %226, %c0_i32_125 : i32
      %228 = arith.index_cast %227 : i32 to index
      %229 = memref.load %arg2[%228] : memref<162xf32, #tpu.memory_space<smem>>
      %230 = vector.extract_strided_slice %223 {offsets = [0, 0, 0], sizes = [16, 16, 128], strides = [1, 1, 1]} : vector<18x16x128xf32> to vector<16x16x128xf32>
      %231 = vector.broadcast %229 : f32 to vector<16x16x128xf32>
      %232 = arith.mulf %231, %230 : vector<16x16x128xf32>
      %233 = arith.addf %221, %232 : vector<16x16x128xf32>
      %c27_i32_126 = arith.constant 27 : i32
      %234 = arith.muli %arg15, %c27_i32_126 : i32
      %c18_i32_127 = arith.constant 18 : i32
      %235 = arith.addi %234, %c18_i32_127 : i32
      %c3_i32_128 = arith.constant 3 : i32
      %236 = arith.addi %235, %c3_i32_128 : i32
      %c0_i32_129 = arith.constant 0 : i32
      %237 = arith.addi %236, %c0_i32_129 : i32
      %238 = arith.index_cast %237 : i32 to index
      %239 = memref.load %arg2[%238] : memref<162xf32, #tpu.memory_space<smem>>
      %240 = vector.extract_strided_slice %223 {offsets = [1, 0, 0], sizes = [16, 16, 128], strides = [1, 1, 1]} : vector<18x16x128xf32> to vector<16x16x128xf32>
      %241 = vector.broadcast %239 : f32 to vector<16x16x128xf32>
      %242 = arith.mulf %241, %240 : vector<16x16x128xf32>
      %243 = arith.addf %233, %242 : vector<16x16x128xf32>
      %c27_i32_130 = arith.constant 27 : i32
      %244 = arith.muli %arg15, %c27_i32_130 : i32
      %c18_i32_131 = arith.constant 18 : i32
      %245 = arith.addi %244, %c18_i32_131 : i32
      %c6_i32_132 = arith.constant 6 : i32
      %246 = arith.addi %245, %c6_i32_132 : i32
      %c0_i32_133 = arith.constant 0 : i32
      %247 = arith.addi %246, %c0_i32_133 : i32
      %248 = arith.index_cast %247 : i32 to index
      %249 = memref.load %arg2[%248] : memref<162xf32, #tpu.memory_space<smem>>
      %250 = vector.extract_strided_slice %223 {offsets = [2, 0, 0], sizes = [16, 16, 128], strides = [1, 1, 1]} : vector<18x16x128xf32> to vector<16x16x128xf32>
      %251 = vector.broadcast %249 : f32 to vector<16x16x128xf32>
      %252 = arith.mulf %251, %250 : vector<16x16x128xf32>
      %253 = arith.addf %243, %252 : vector<16x16x128xf32>
      %c2_134 = arith.constant 2 : index
      %c0_135 = arith.constant 0 : index
      %c1_136 = arith.constant 1 : index
      %c0_137 = arith.constant 0 : index
      %254 = vector.load %arg1[%c2_134, %c0_135, %c1_136, %c0_137] : memref<3x18x18x128xf32, #tpu.memory_space<vmem>>, vector<1x18x16x128xf32>
      %255 = vector.shape_cast %254 : vector<1x18x16x128xf32> to vector<18x16x128xf32>
      %c27_i32_138 = arith.constant 27 : i32
      %256 = arith.muli %arg15, %c27_i32_138 : i32
      %c18_i32_139 = arith.constant 18 : i32
      %257 = arith.addi %256, %c18_i32_139 : i32
      %c0_i32_140 = arith.constant 0 : i32
      %258 = arith.addi %257, %c0_i32_140 : i32
      %c1_i32_141 = arith.constant 1 : i32
      %259 = arith.addi %258, %c1_i32_141 : i32
      %260 = arith.index_cast %259 : i32 to index
      %261 = memref.load %arg2[%260] : memref<162xf32, #tpu.memory_space<smem>>
      %262 = vector.extract_strided_slice %255 {offsets = [0, 0, 0], sizes = [16, 16, 128], strides = [1, 1, 1]} : vector<18x16x128xf32> to vector<16x16x128xf32>
      %263 = vector.broadcast %261 : f32 to vector<16x16x128xf32>
      %264 = arith.mulf %263, %262 : vector<16x16x128xf32>
      %265 = arith.addf %253, %264 : vector<16x16x128xf32>
      %c27_i32_142 = arith.constant 27 : i32
      %266 = arith.muli %arg15, %c27_i32_142 : i32
      %c18_i32_143 = arith.constant 18 : i32
      %267 = arith.addi %266, %c18_i32_143 : i32
      %c3_i32_144 = arith.constant 3 : i32
      %268 = arith.addi %267, %c3_i32_144 : i32
      %c1_i32_145 = arith.constant 1 : i32
      %269 = arith.addi %268, %c1_i32_145 : i32
      %270 = arith.index_cast %269 : i32 to index
      %271 = memref.load %arg2[%270] : memref<162xf32, #tpu.memory_space<smem>>
      %272 = vector.extract_strided_slice %255 {offsets = [1, 0, 0], sizes = [16, 16, 128], strides = [1, 1, 1]} : vector<18x16x128xf32> to vector<16x16x128xf32>
      %273 = vector.broadcast %271 : f32 to vector<16x16x128xf32>
      %274 = arith.mulf %273, %272 : vector<16x16x128xf32>
      %275 = arith.addf %265, %274 : vector<16x16x128xf32>
      %c27_i32_146 = arith.constant 27 : i32
      %276 = arith.muli %arg15, %c27_i32_146 : i32
      %c18_i32_147 = arith.constant 18 : i32
      %277 = arith.addi %276, %c18_i32_147 : i32
      %c6_i32_148 = arith.constant 6 : i32
      %278 = arith.addi %277, %c6_i32_148 : i32
      %c1_i32_149 = arith.constant 1 : i32
      %279 = arith.addi %278, %c1_i32_149 : i32
      %280 = arith.index_cast %279 : i32 to index
      %281 = memref.load %arg2[%280] : memref<162xf32, #tpu.memory_space<smem>>
      %282 = vector.extract_strided_slice %255 {offsets = [2, 0, 0], sizes = [16, 16, 128], strides = [1, 1, 1]} : vector<18x16x128xf32> to vector<16x16x128xf32>
      %283 = vector.broadcast %281 : f32 to vector<16x16x128xf32>
      %284 = arith.mulf %283, %282 : vector<16x16x128xf32>
      %285 = arith.addf %275, %284 : vector<16x16x128xf32>
      %c2_150 = arith.constant 2 : index
      %c0_151 = arith.constant 0 : index
      %c2_152 = arith.constant 2 : index
      %c0_153 = arith.constant 0 : index
      %286 = vector.load %arg1[%c2_150, %c0_151, %c2_152, %c0_153] : memref<3x18x18x128xf32, #tpu.memory_space<vmem>>, vector<1x18x16x128xf32>
      %287 = vector.shape_cast %286 : vector<1x18x16x128xf32> to vector<18x16x128xf32>
      %c27_i32_154 = arith.constant 27 : i32
      %288 = arith.muli %arg15, %c27_i32_154 : i32
      %c18_i32_155 = arith.constant 18 : i32
      %289 = arith.addi %288, %c18_i32_155 : i32
      %c0_i32_156 = arith.constant 0 : i32
      %290 = arith.addi %289, %c0_i32_156 : i32
      %c2_i32_157 = arith.constant 2 : i32
      %291 = arith.addi %290, %c2_i32_157 : i32
      %292 = arith.index_cast %291 : i32 to index
      %293 = memref.load %arg2[%292] : memref<162xf32, #tpu.memory_space<smem>>
      %294 = vector.extract_strided_slice %287 {offsets = [0, 0, 0], sizes = [16, 16, 128], strides = [1, 1, 1]} : vector<18x16x128xf32> to vector<16x16x128xf32>
      %295 = vector.broadcast %293 : f32 to vector<16x16x128xf32>
      %296 = arith.mulf %295, %294 : vector<16x16x128xf32>
      %297 = arith.addf %285, %296 : vector<16x16x128xf32>
      %c27_i32_158 = arith.constant 27 : i32
      %298 = arith.muli %arg15, %c27_i32_158 : i32
      %c18_i32_159 = arith.constant 18 : i32
      %299 = arith.addi %298, %c18_i32_159 : i32
      %c3_i32_160 = arith.constant 3 : i32
      %300 = arith.addi %299, %c3_i32_160 : i32
      %c2_i32_161 = arith.constant 2 : i32
      %301 = arith.addi %300, %c2_i32_161 : i32
      %302 = arith.index_cast %301 : i32 to index
      %303 = memref.load %arg2[%302] : memref<162xf32, #tpu.memory_space<smem>>
      %304 = vector.extract_strided_slice %287 {offsets = [1, 0, 0], sizes = [16, 16, 128], strides = [1, 1, 1]} : vector<18x16x128xf32> to vector<16x16x128xf32>
      %305 = vector.broadcast %303 : f32 to vector<16x16x128xf32>
      %306 = arith.mulf %305, %304 : vector<16x16x128xf32>
      %307 = arith.addf %297, %306 : vector<16x16x128xf32>
      %c27_i32_162 = arith.constant 27 : i32
      %308 = arith.muli %arg15, %c27_i32_162 : i32
      %c18_i32_163 = arith.constant 18 : i32
      %309 = arith.addi %308, %c18_i32_163 : i32
      %c6_i32_164 = arith.constant 6 : i32
      %310 = arith.addi %309, %c6_i32_164 : i32
      %c2_i32_165 = arith.constant 2 : i32
      %311 = arith.addi %310, %c2_i32_165 : i32
      %312 = arith.index_cast %311 : i32 to index
      %313 = memref.load %arg2[%312] : memref<162xf32, #tpu.memory_space<smem>>
      %314 = vector.extract_strided_slice %287 {offsets = [2, 0, 0], sizes = [16, 16, 128], strides = [1, 1, 1]} : vector<18x16x128xf32> to vector<16x16x128xf32>
      %315 = vector.broadcast %313 : f32 to vector<16x16x128xf32>
      %316 = arith.mulf %315, %314 : vector<16x16x128xf32>
      %317 = arith.addf %307, %316 : vector<16x16x128xf32>
      %318 = vector.extract_strided_slice %317 {offsets = [0, 0, 0], sizes = [1, 16, 128], strides = [1, 1, 1]} : vector<16x16x128xf32> to vector<1x16x128xf32>
      %319 = vector.shape_cast %318 : vector<1x16x128xf32> to vector<16x128xf32>
      %320 = vector.extract_strided_slice %317 {offsets = [1, 0, 0], sizes = [1, 16, 128], strides = [1, 1, 1]} : vector<16x16x128xf32> to vector<1x16x128xf32>
      %321 = vector.shape_cast %320 : vector<1x16x128xf32> to vector<16x128xf32>
      %322 = arith.maximumf %319, %321 : vector<16x128xf32>
      %323 = vector.extract_strided_slice %317 {offsets = [2, 0, 0], sizes = [1, 16, 128], strides = [1, 1, 1]} : vector<16x16x128xf32> to vector<1x16x128xf32>
      %324 = vector.shape_cast %323 : vector<1x16x128xf32> to vector<16x128xf32>
      %325 = vector.extract_strided_slice %317 {offsets = [3, 0, 0], sizes = [1, 16, 128], strides = [1, 1, 1]} : vector<16x16x128xf32> to vector<1x16x128xf32>
      %326 = vector.shape_cast %325 : vector<1x16x128xf32> to vector<16x128xf32>
      %327 = arith.maximumf %324, %326 : vector<16x128xf32>
      %328 = vector.extract_strided_slice %317 {offsets = [4, 0, 0], sizes = [1, 16, 128], strides = [1, 1, 1]} : vector<16x16x128xf32> to vector<1x16x128xf32>
      %329 = vector.shape_cast %328 : vector<1x16x128xf32> to vector<16x128xf32>
      %330 = vector.extract_strided_slice %317 {offsets = [5, 0, 0], sizes = [1, 16, 128], strides = [1, 1, 1]} : vector<16x16x128xf32> to vector<1x16x128xf32>
      %331 = vector.shape_cast %330 : vector<1x16x128xf32> to vector<16x128xf32>
      %332 = arith.maximumf %329, %331 : vector<16x128xf32>
      %333 = vector.extract_strided_slice %317 {offsets = [6, 0, 0], sizes = [1, 16, 128], strides = [1, 1, 1]} : vector<16x16x128xf32> to vector<1x16x128xf32>
      %334 = vector.shape_cast %333 : vector<1x16x128xf32> to vector<16x128xf32>
      %335 = vector.extract_strided_slice %317 {offsets = [7, 0, 0], sizes = [1, 16, 128], strides = [1, 1, 1]} : vector<16x16x128xf32> to vector<1x16x128xf32>
      %336 = vector.shape_cast %335 : vector<1x16x128xf32> to vector<16x128xf32>
      %337 = arith.maximumf %334, %336 : vector<16x128xf32>
      %338 = vector.extract_strided_slice %317 {offsets = [8, 0, 0], sizes = [1, 16, 128], strides = [1, 1, 1]} : vector<16x16x128xf32> to vector<1x16x128xf32>
      %339 = vector.shape_cast %338 : vector<1x16x128xf32> to vector<16x128xf32>
      %340 = vector.extract_strided_slice %317 {offsets = [9, 0, 0], sizes = [1, 16, 128], strides = [1, 1, 1]} : vector<16x16x128xf32> to vector<1x16x128xf32>
      %341 = vector.shape_cast %340 : vector<1x16x128xf32> to vector<16x128xf32>
      %342 = arith.maximumf %339, %341 : vector<16x128xf32>
      %343 = vector.extract_strided_slice %317 {offsets = [10, 0, 0], sizes = [1, 16, 128], strides = [1, 1, 1]} : vector<16x16x128xf32> to vector<1x16x128xf32>
      %344 = vector.shape_cast %343 : vector<1x16x128xf32> to vector<16x128xf32>
      %345 = vector.extract_strided_slice %317 {offsets = [11, 0, 0], sizes = [1, 16, 128], strides = [1, 1, 1]} : vector<16x16x128xf32> to vector<1x16x128xf32>
      %346 = vector.shape_cast %345 : vector<1x16x128xf32> to vector<16x128xf32>
      %347 = arith.maximumf %344, %346 : vector<16x128xf32>
      %348 = vector.extract_strided_slice %317 {offsets = [12, 0, 0], sizes = [1, 16, 128], strides = [1, 1, 1]} : vector<16x16x128xf32> to vector<1x16x128xf32>
      %349 = vector.shape_cast %348 : vector<1x16x128xf32> to vector<16x128xf32>
      %350 = vector.extract_strided_slice %317 {offsets = [13, 0, 0], sizes = [1, 16, 128], strides = [1, 1, 1]} : vector<16x16x128xf32> to vector<1x16x128xf32>
      %351 = vector.shape_cast %350 : vector<1x16x128xf32> to vector<16x128xf32>
      %352 = arith.maximumf %349, %351 : vector<16x128xf32>
      %353 = vector.extract_strided_slice %317 {offsets = [14, 0, 0], sizes = [1, 16, 128], strides = [1, 1, 1]} : vector<16x16x128xf32> to vector<1x16x128xf32>
      %354 = vector.shape_cast %353 : vector<1x16x128xf32> to vector<16x128xf32>
      %355 = vector.extract_strided_slice %317 {offsets = [15, 0, 0], sizes = [1, 16, 128], strides = [1, 1, 1]} : vector<16x16x128xf32> to vector<1x16x128xf32>
      %356 = vector.shape_cast %355 : vector<1x16x128xf32> to vector<16x128xf32>
      %357 = arith.maximumf %354, %356 : vector<16x128xf32>
      %358 = vector.shape_cast %322 : vector<16x128xf32> to vector<1x16x128xf32>
      %359 = vector.shape_cast %327 : vector<16x128xf32> to vector<1x16x128xf32>
      %360 = vector.shape_cast %332 : vector<16x128xf32> to vector<1x16x128xf32>
      %361 = vector.shape_cast %337 : vector<16x128xf32> to vector<1x16x128xf32>
      %362 = vector.shape_cast %342 : vector<16x128xf32> to vector<1x16x128xf32>
      %363 = vector.shape_cast %347 : vector<16x128xf32> to vector<1x16x128xf32>
      %364 = vector.shape_cast %352 : vector<16x128xf32> to vector<1x16x128xf32>
      %365 = vector.shape_cast %357 : vector<16x128xf32> to vector<1x16x128xf32>
      %366 = tpu.concatenate %358, %359, %360, %361, %362, %363, %364, %365 in 0 : vector<1x16x128xf32>, vector<1x16x128xf32>, vector<1x16x128xf32>, vector<1x16x128xf32>, vector<1x16x128xf32>, vector<1x16x128xf32>, vector<1x16x128xf32>, vector<1x16x128xf32> -> vector<8x16x128xf32>
      %367 = vector.extract_strided_slice %366 {offsets = [0, 0, 0], sizes = [8, 1, 128], strides = [1, 1, 1]} : vector<8x16x128xf32> to vector<8x1x128xf32>
      %368 = vector.extract_strided_slice %366 {offsets = [0, 1, 0], sizes = [8, 1, 128], strides = [1, 1, 1]} : vector<8x16x128xf32> to vector<8x1x128xf32>
      %369 = arith.maximumf %367, %368 : vector<8x1x128xf32>
      %370 = vector.extract_strided_slice %366 {offsets = [0, 2, 0], sizes = [8, 1, 128], strides = [1, 1, 1]} : vector<8x16x128xf32> to vector<8x1x128xf32>
      %371 = vector.extract_strided_slice %366 {offsets = [0, 3, 0], sizes = [8, 1, 128], strides = [1, 1, 1]} : vector<8x16x128xf32> to vector<8x1x128xf32>
      %372 = arith.maximumf %370, %371 : vector<8x1x128xf32>
      %373 = vector.extract_strided_slice %366 {offsets = [0, 4, 0], sizes = [8, 1, 128], strides = [1, 1, 1]} : vector<8x16x128xf32> to vector<8x1x128xf32>
      %374 = vector.extract_strided_slice %366 {offsets = [0, 5, 0], sizes = [8, 1, 128], strides = [1, 1, 1]} : vector<8x16x128xf32> to vector<8x1x128xf32>
      %375 = arith.maximumf %373, %374 : vector<8x1x128xf32>
      %376 = vector.extract_strided_slice %366 {offsets = [0, 6, 0], sizes = [8, 1, 128], strides = [1, 1, 1]} : vector<8x16x128xf32> to vector<8x1x128xf32>
      %377 = vector.extract_strided_slice %366 {offsets = [0, 7, 0], sizes = [8, 1, 128], strides = [1, 1, 1]} : vector<8x16x128xf32> to vector<8x1x128xf32>
      %378 = arith.maximumf %376, %377 : vector<8x1x128xf32>
      %379 = vector.extract_strided_slice %366 {offsets = [0, 8, 0], sizes = [8, 1, 128], strides = [1, 1, 1]} : vector<8x16x128xf32> to vector<8x1x128xf32>
      %380 = vector.extract_strided_slice %366 {offsets = [0, 9, 0], sizes = [8, 1, 128], strides = [1, 1, 1]} : vector<8x16x128xf32> to vector<8x1x128xf32>
      %381 = arith.maximumf %379, %380 : vector<8x1x128xf32>
      %382 = vector.extract_strided_slice %366 {offsets = [0, 10, 0], sizes = [8, 1, 128], strides = [1, 1, 1]} : vector<8x16x128xf32> to vector<8x1x128xf32>
      %383 = vector.extract_strided_slice %366 {offsets = [0, 11, 0], sizes = [8, 1, 128], strides = [1, 1, 1]} : vector<8x16x128xf32> to vector<8x1x128xf32>
      %384 = arith.maximumf %382, %383 : vector<8x1x128xf32>
      %385 = vector.extract_strided_slice %366 {offsets = [0, 12, 0], sizes = [8, 1, 128], strides = [1, 1, 1]} : vector<8x16x128xf32> to vector<8x1x128xf32>
      %386 = vector.extract_strided_slice %366 {offsets = [0, 13, 0], sizes = [8, 1, 128], strides = [1, 1, 1]} : vector<8x16x128xf32> to vector<8x1x128xf32>
      %387 = arith.maximumf %385, %386 : vector<8x1x128xf32>
      %388 = vector.extract_strided_slice %366 {offsets = [0, 14, 0], sizes = [8, 1, 128], strides = [1, 1, 1]} : vector<8x16x128xf32> to vector<8x1x128xf32>
      %389 = vector.extract_strided_slice %366 {offsets = [0, 15, 0], sizes = [8, 1, 128], strides = [1, 1, 1]} : vector<8x16x128xf32> to vector<8x1x128xf32>
      %390 = arith.maximumf %388, %389 : vector<8x1x128xf32>
      %391 = vector.shape_cast %369 : vector<8x1x128xf32> to vector<8x1x1x128xf32>
      %392 = vector.shape_cast %372 : vector<8x1x128xf32> to vector<8x1x1x128xf32>
      %393 = vector.shape_cast %375 : vector<8x1x128xf32> to vector<8x1x1x128xf32>
      %394 = vector.shape_cast %378 : vector<8x1x128xf32> to vector<8x1x1x128xf32>
      %395 = vector.shape_cast %381 : vector<8x1x128xf32> to vector<8x1x1x128xf32>
      %396 = vector.shape_cast %384 : vector<8x1x128xf32> to vector<8x1x1x128xf32>
      %397 = vector.shape_cast %387 : vector<8x1x128xf32> to vector<8x1x1x128xf32>
      %398 = vector.shape_cast %390 : vector<8x1x128xf32> to vector<8x1x1x128xf32>
      %399 = tpu.concatenate %391, %392, %393, %394, %395, %396, %397, %398 in 1 : vector<8x1x1x128xf32>, vector<8x1x1x128xf32>, vector<8x1x1x128xf32>, vector<8x1x1x128xf32>, vector<8x1x1x128xf32>, vector<8x1x1x128xf32>, vector<8x1x1x128xf32>, vector<8x1x1x128xf32> -> vector<8x8x1x128xf32>
      %400 = vector.shape_cast %399 : vector<8x8x1x128xf32> to vector<8x8x128xf32>
      %401 = arith.index_cast %arg15 : i32 to index
      %402 = memref.load %arg3[%401] : memref<6xf32, #tpu.memory_space<smem>>
      %403 = vector.broadcast %402 : f32 to vector<8x8x128xf32>
      %404 = arith.addf %400, %403 : vector<8x8x128xf32>
      %cst_166 = arith.constant 0.000000e+00 : f32
      %405 = vector.broadcast %cst_166 : f32 to vector<8x8x128xf32>
      %406 = arith.maximumf %404, %405 : vector<8x8x128xf32>
      %407 = arith.index_cast %arg15 : i32 to index
      %c0_167 = arith.constant 0 : index
      %c0_168 = arith.constant 0 : index
      %c0_169 = arith.constant 0 : index
      %408 = vector.load %arg13[%407, %c0_167, %c0_168, %c0_169] : memref<6x8x8x128xf32, #tpu.memory_space<vmem>>, vector<1x8x8x128xf32>
      %409 = vector.shape_cast %408 : vector<1x8x8x128xf32> to vector<8x8x128xf32>
      %410 = vector.shape_cast %406 : vector<8x8x128xf32> to vector<1x8x8x128xf32>
      tpu.vector_store %arg13[%407, %c0_167, %c0_168, %c0_169], %410 {strides = array<i32>} : memref<6x8x8x128xf32, #tpu.memory_space<vmem>>, vector<1x8x8x128xf32>,
    }
    %c6_i32_2 = arith.constant 6 : i32
    %c0_i32_3 = arith.constant 0 : i32
    %c16_i32 = arith.constant 16 : i32
    %3 = arith.addi %c0_i32_3, %c16_i32 : i32
    %c1_i32_4 = arith.constant 1 : i32
    scf.for %arg15 = %c0_i32_3 to %3 step %c1_i32_4  : i32 {
      %cst_28 = arith.constant 0.000000e+00 : f32
      %29 = vector.broadcast %cst_28 : f32 to vector<6x6x128xf32>
      %c0_29 = arith.constant 0 : index
      %c0_30 = arith.constant 0 : index
      %c0_31 = arith.constant 0 : index
      %c0_32 = arith.constant 0 : index
      %30 = vector.load %arg13[%c0_29, %c0_30, %c0_31, %c0_32] : memref<6x8x8x128xf32, #tpu.memory_space<vmem>>, vector<1x8x6x128xf32>
      %31 = vector.shape_cast %30 : vector<1x8x6x128xf32> to vector<8x6x128xf32>
      %c54_i32 = arith.constant 54 : i32
      %32 = arith.muli %arg15, %c54_i32 : i32
      %c0_i32_33 = arith.constant 0 : i32
      %33 = arith.addi %32, %c0_i32_33 : i32
      %c0_i32_34 = arith.constant 0 : i32
      %34 = arith.addi %33, %c0_i32_34 : i32
      %c0_i32_35 = arith.constant 0 : i32
      %35 = arith.addi %34, %c0_i32_35 : i32
      %36 = arith.index_cast %35 : i32 to index
      %37 = memref.load %arg4[%36] : memref<864xf32, #tpu.memory_space<smem>>
      %38 = vector.extract_strided_slice %31 {offsets = [0, 0, 0], sizes = [6, 6, 128], strides = [1, 1, 1]} : vector<8x6x128xf32> to vector<6x6x128xf32>
      %39 = vector.broadcast %37 : f32 to vector<6x6x128xf32>
      %40 = arith.mulf %39, %38 : vector<6x6x128xf32>
      %41 = arith.addf %29, %40 : vector<6x6x128xf32>
      %c54_i32_36 = arith.constant 54 : i32
      %42 = arith.muli %arg15, %c54_i32_36 : i32
      %c0_i32_37 = arith.constant 0 : i32
      %43 = arith.addi %42, %c0_i32_37 : i32
      %c3_i32 = arith.constant 3 : i32
      %44 = arith.addi %43, %c3_i32 : i32
      %c0_i32_38 = arith.constant 0 : i32
      %45 = arith.addi %44, %c0_i32_38 : i32
      %46 = arith.index_cast %45 : i32 to index
      %47 = memref.load %arg4[%46] : memref<864xf32, #tpu.memory_space<smem>>
      %48 = vector.extract_strided_slice %31 {offsets = [1, 0, 0], sizes = [6, 6, 128], strides = [1, 1, 1]} : vector<8x6x128xf32> to vector<6x6x128xf32>
      %49 = vector.broadcast %47 : f32 to vector<6x6x128xf32>
      %50 = arith.mulf %49, %48 : vector<6x6x128xf32>
      %51 = arith.addf %41, %50 : vector<6x6x128xf32>
      %c54_i32_39 = arith.constant 54 : i32
      %52 = arith.muli %arg15, %c54_i32_39 : i32
      %c0_i32_40 = arith.constant 0 : i32
      %53 = arith.addi %52, %c0_i32_40 : i32
      %c6_i32_41 = arith.constant 6 : i32
      %54 = arith.addi %53, %c6_i32_41 : i32
      %c0_i32_42 = arith.constant 0 : i32
      %55 = arith.addi %54, %c0_i32_42 : i32
      %56 = arith.index_cast %55 : i32 to index
      %57 = memref.load %arg4[%56] : memref<864xf32, #tpu.memory_space<smem>>
      %58 = vector.extract_strided_slice %31 {offsets = [2, 0, 0], sizes = [6, 6, 128], strides = [1, 1, 1]} : vector<8x6x128xf32> to vector<6x6x128xf32>
      %59 = vector.broadcast %57 : f32 to vector<6x6x128xf32>
      %60 = arith.mulf %59, %58 : vector<6x6x128xf32>
      %61 = arith.addf %51, %60 : vector<6x6x128xf32>
      %c0_43 = arith.constant 0 : index
      %c0_44 = arith.constant 0 : index
      %c1 = arith.constant 1 : index
      %c0_45 = arith.constant 0 : index
      %62 = vector.load %arg13[%c0_43, %c0_44, %c1, %c0_45] : memref<6x8x8x128xf32, #tpu.memory_space<vmem>>, vector<1x8x6x128xf32>
      %63 = vector.shape_cast %62 : vector<1x8x6x128xf32> to vector<8x6x128xf32>
      %c54_i32_46 = arith.constant 54 : i32
      %64 = arith.muli %arg15, %c54_i32_46 : i32
      %c0_i32_47 = arith.constant 0 : i32
      %65 = arith.addi %64, %c0_i32_47 : i32
      %c0_i32_48 = arith.constant 0 : i32
      %66 = arith.addi %65, %c0_i32_48 : i32
      %c1_i32_49 = arith.constant 1 : i32
      %67 = arith.addi %66, %c1_i32_49 : i32
      %68 = arith.index_cast %67 : i32 to index
      %69 = memref.load %arg4[%68] : memref<864xf32, #tpu.memory_space<smem>>
      %70 = vector.extract_strided_slice %63 {offsets = [0, 0, 0], sizes = [6, 6, 128], strides = [1, 1, 1]} : vector<8x6x128xf32> to vector<6x6x128xf32>
      %71 = vector.broadcast %69 : f32 to vector<6x6x128xf32>
      %72 = arith.mulf %71, %70 : vector<6x6x128xf32>
      %73 = arith.addf %61, %72 : vector<6x6x128xf32>
      %c54_i32_50 = arith.constant 54 : i32
      %74 = arith.muli %arg15, %c54_i32_50 : i32
      %c0_i32_51 = arith.constant 0 : i32
      %75 = arith.addi %74, %c0_i32_51 : i32
      %c3_i32_52 = arith.constant 3 : i32
      %76 = arith.addi %75, %c3_i32_52 : i32
      %c1_i32_53 = arith.constant 1 : i32
      %77 = arith.addi %76, %c1_i32_53 : i32
      %78 = arith.index_cast %77 : i32 to index
      %79 = memref.load %arg4[%78] : memref<864xf32, #tpu.memory_space<smem>>
      %80 = vector.extract_strided_slice %63 {offsets = [1, 0, 0], sizes = [6, 6, 128], strides = [1, 1, 1]} : vector<8x6x128xf32> to vector<6x6x128xf32>
      %81 = vector.broadcast %79 : f32 to vector<6x6x128xf32>
      %82 = arith.mulf %81, %80 : vector<6x6x128xf32>
      %83 = arith.addf %73, %82 : vector<6x6x128xf32>
      %c54_i32_54 = arith.constant 54 : i32
      %84 = arith.muli %arg15, %c54_i32_54 : i32
      %c0_i32_55 = arith.constant 0 : i32
      %85 = arith.addi %84, %c0_i32_55 : i32
      %c6_i32_56 = arith.constant 6 : i32
      %86 = arith.addi %85, %c6_i32_56 : i32
      %c1_i32_57 = arith.constant 1 : i32
      %87 = arith.addi %86, %c1_i32_57 : i32
      %88 = arith.index_cast %87 : i32 to index
      %89 = memref.load %arg4[%88] : memref<864xf32, #tpu.memory_space<smem>>
      %90 = vector.extract_strided_slice %63 {offsets = [2, 0, 0], sizes = [6, 6, 128], strides = [1, 1, 1]} : vector<8x6x128xf32> to vector<6x6x128xf32>
      %91 = vector.broadcast %89 : f32 to vector<6x6x128xf32>
      %92 = arith.mulf %91, %90 : vector<6x6x128xf32>
      %93 = arith.addf %83, %92 : vector<6x6x128xf32>
      %c0_58 = arith.constant 0 : index
      %c0_59 = arith.constant 0 : index
      %c2 = arith.constant 2 : index
      %c0_60 = arith.constant 0 : index
      %94 = vector.load %arg13[%c0_58, %c0_59, %c2, %c0_60] : memref<6x8x8x128xf32, #tpu.memory_space<vmem>>, vector<1x8x6x128xf32>
      %95 = vector.shape_cast %94 : vector<1x8x6x128xf32> to vector<8x6x128xf32>
      %c54_i32_61 = arith.constant 54 : i32
      %96 = arith.muli %arg15, %c54_i32_61 : i32
      %c0_i32_62 = arith.constant 0 : i32
      %97 = arith.addi %96, %c0_i32_62 : i32
      %c0_i32_63 = arith.constant 0 : i32
      %98 = arith.addi %97, %c0_i32_63 : i32
      %c2_i32 = arith.constant 2 : i32
      %99 = arith.addi %98, %c2_i32 : i32
      %100 = arith.index_cast %99 : i32 to index
      %101 = memref.load %arg4[%100] : memref<864xf32, #tpu.memory_space<smem>>
      %102 = vector.extract_strided_slice %95 {offsets = [0, 0, 0], sizes = [6, 6, 128], strides = [1, 1, 1]} : vector<8x6x128xf32> to vector<6x6x128xf32>
      %103 = vector.broadcast %101 : f32 to vector<6x6x128xf32>
      %104 = arith.mulf %103, %102 : vector<6x6x128xf32>
      %105 = arith.addf %93, %104 : vector<6x6x128xf32>
      %c54_i32_64 = arith.constant 54 : i32
      %106 = arith.muli %arg15, %c54_i32_64 : i32
      %c0_i32_65 = arith.constant 0 : i32
      %107 = arith.addi %106, %c0_i32_65 : i32
      %c3_i32_66 = arith.constant 3 : i32
      %108 = arith.addi %107, %c3_i32_66 : i32
      %c2_i32_67 = arith.constant 2 : i32
      %109 = arith.addi %108, %c2_i32_67 : i32
      %110 = arith.index_cast %109 : i32 to index
      %111 = memref.load %arg4[%110] : memref<864xf32, #tpu.memory_space<smem>>
      %112 = vector.extract_strided_slice %95 {offsets = [1, 0, 0], sizes = [6, 6, 128], strides = [1, 1, 1]} : vector<8x6x128xf32> to vector<6x6x128xf32>
      %113 = vector.broadcast %111 : f32 to vector<6x6x128xf32>
      %114 = arith.mulf %113, %112 : vector<6x6x128xf32>
      %115 = arith.addf %105, %114 : vector<6x6x128xf32>
      %c54_i32_68 = arith.constant 54 : i32
      %116 = arith.muli %arg15, %c54_i32_68 : i32
      %c0_i32_69 = arith.constant 0 : i32
      %117 = arith.addi %116, %c0_i32_69 : i32
      %c6_i32_70 = arith.constant 6 : i32
      %118 = arith.addi %117, %c6_i32_70 : i32
      %c2_i32_71 = arith.constant 2 : i32
      %119 = arith.addi %118, %c2_i32_71 : i32
      %120 = arith.index_cast %119 : i32 to index
      %121 = memref.load %arg4[%120] : memref<864xf32, #tpu.memory_space<smem>>
      %122 = vector.extract_strided_slice %95 {offsets = [2, 0, 0], sizes = [6, 6, 128], strides = [1, 1, 1]} : vector<8x6x128xf32> to vector<6x6x128xf32>
      %123 = vector.broadcast %121 : f32 to vector<6x6x128xf32>
      %124 = arith.mulf %123, %122 : vector<6x6x128xf32>
      %125 = arith.addf %115, %124 : vector<6x6x128xf32>
      %c1_72 = arith.constant 1 : index
      %c0_73 = arith.constant 0 : index
      %c0_74 = arith.constant 0 : index
      %c0_75 = arith.constant 0 : index
      %126 = vector.load %arg13[%c1_72, %c0_73, %c0_74, %c0_75] : memref<6x8x8x128xf32, #tpu.memory_space<vmem>>, vector<1x8x6x128xf32>
      %127 = vector.shape_cast %126 : vector<1x8x6x128xf32> to vector<8x6x128xf32>
      %c54_i32_76 = arith.constant 54 : i32
      %128 = arith.muli %arg15, %c54_i32_76 : i32
      %c9_i32 = arith.constant 9 : i32
      %129 = arith.addi %128, %c9_i32 : i32
      %c0_i32_77 = arith.constant 0 : i32
      %130 = arith.addi %129, %c0_i32_77 : i32
      %c0_i32_78 = arith.constant 0 : i32
      %131 = arith.addi %130, %c0_i32_78 : i32
      %132 = arith.index_cast %131 : i32 to index
      %133 = memref.load %arg4[%132] : memref<864xf32, #tpu.memory_space<smem>>
      %134 = vector.extract_strided_slice %127 {offsets = [0, 0, 0], sizes = [6, 6, 128], strides = [1, 1, 1]} : vector<8x6x128xf32> to vector<6x6x128xf32>
      %135 = vector.broadcast %133 : f32 to vector<6x6x128xf32>
      %136 = arith.mulf %135, %134 : vector<6x6x128xf32>
      %137 = arith.addf %125, %136 : vector<6x6x128xf32>
      %c54_i32_79 = arith.constant 54 : i32
      %138 = arith.muli %arg15, %c54_i32_79 : i32
      %c9_i32_80 = arith.constant 9 : i32
      %139 = arith.addi %138, %c9_i32_80 : i32
      %c3_i32_81 = arith.constant 3 : i32
      %140 = arith.addi %139, %c3_i32_81 : i32
      %c0_i32_82 = arith.constant 0 : i32
      %141 = arith.addi %140, %c0_i32_82 : i32
      %142 = arith.index_cast %141 : i32 to index
      %143 = memref.load %arg4[%142] : memref<864xf32, #tpu.memory_space<smem>>
      %144 = vector.extract_strided_slice %127 {offsets = [1, 0, 0], sizes = [6, 6, 128], strides = [1, 1, 1]} : vector<8x6x128xf32> to vector<6x6x128xf32>
      %145 = vector.broadcast %143 : f32 to vector<6x6x128xf32>
      %146 = arith.mulf %145, %144 : vector<6x6x128xf32>
      %147 = arith.addf %137, %146 : vector<6x6x128xf32>
      %c54_i32_83 = arith.constant 54 : i32
      %148 = arith.muli %arg15, %c54_i32_83 : i32
      %c9_i32_84 = arith.constant 9 : i32
      %149 = arith.addi %148, %c9_i32_84 : i32
      %c6_i32_85 = arith.constant 6 : i32
      %150 = arith.addi %149, %c6_i32_85 : i32
      %c0_i32_86 = arith.constant 0 : i32
      %151 = arith.addi %150, %c0_i32_86 : i32
      %152 = arith.index_cast %151 : i32 to index
      %153 = memref.load %arg4[%152] : memref<864xf32, #tpu.memory_space<smem>>
      %154 = vector.extract_strided_slice %127 {offsets = [2, 0, 0], sizes = [6, 6, 128], strides = [1, 1, 1]} : vector<8x6x128xf32> to vector<6x6x128xf32>
      %155 = vector.broadcast %153 : f32 to vector<6x6x128xf32>
      %156 = arith.mulf %155, %154 : vector<6x6x128xf32>
      %157 = arith.addf %147, %156 : vector<6x6x128xf32>
      %c1_87 = arith.constant 1 : index
      %c0_88 = arith.constant 0 : index
      %c1_89 = arith.constant 1 : index
      %c0_90 = arith.constant 0 : index
      %158 = vector.load %arg13[%c1_87, %c0_88, %c1_89, %c0_90] : memref<6x8x8x128xf32, #tpu.memory_space<vmem>>, vector<1x8x6x128xf32>
      %159 = vector.shape_cast %158 : vector<1x8x6x128xf32> to vector<8x6x128xf32>
      %c54_i32_91 = arith.constant 54 : i32
      %160 = arith.muli %arg15, %c54_i32_91 : i32
      %c9_i32_92 = arith.constant 9 : i32
      %161 = arith.addi %160, %c9_i32_92 : i32
      %c0_i32_93 = arith.constant 0 : i32
      %162 = arith.addi %161, %c0_i32_93 : i32
      %c1_i32_94 = arith.constant 1 : i32
      %163 = arith.addi %162, %c1_i32_94 : i32
      %164 = arith.index_cast %163 : i32 to index
      %165 = memref.load %arg4[%164] : memref<864xf32, #tpu.memory_space<smem>>
      %166 = vector.extract_strided_slice %159 {offsets = [0, 0, 0], sizes = [6, 6, 128], strides = [1, 1, 1]} : vector<8x6x128xf32> to vector<6x6x128xf32>
      %167 = vector.broadcast %165 : f32 to vector<6x6x128xf32>
      %168 = arith.mulf %167, %166 : vector<6x6x128xf32>
      %169 = arith.addf %157, %168 : vector<6x6x128xf32>
      %c54_i32_95 = arith.constant 54 : i32
      %170 = arith.muli %arg15, %c54_i32_95 : i32
      %c9_i32_96 = arith.constant 9 : i32
      %171 = arith.addi %170, %c9_i32_96 : i32
      %c3_i32_97 = arith.constant 3 : i32
      %172 = arith.addi %171, %c3_i32_97 : i32
      %c1_i32_98 = arith.constant 1 : i32
      %173 = arith.addi %172, %c1_i32_98 : i32
      %174 = arith.index_cast %173 : i32 to index
      %175 = memref.load %arg4[%174] : memref<864xf32, #tpu.memory_space<smem>>
      %176 = vector.extract_strided_slice %159 {offsets = [1, 0, 0], sizes = [6, 6, 128], strides = [1, 1, 1]} : vector<8x6x128xf32> to vector<6x6x128xf32>
      %177 = vector.broadcast %175 : f32 to vector<6x6x128xf32>
      %178 = arith.mulf %177, %176 : vector<6x6x128xf32>
      %179 = arith.addf %169, %178 : vector<6x6x128xf32>
      %c54_i32_99 = arith.constant 54 : i32
      %180 = arith.muli %arg15, %c54_i32_99 : i32
      %c9_i32_100 = arith.constant 9 : i32
      %181 = arith.addi %180, %c9_i32_100 : i32
      %c6_i32_101 = arith.constant 6 : i32
      %182 = arith.addi %181, %c6_i32_101 : i32
      %c1_i32_102 = arith.constant 1 : i32
      %183 = arith.addi %182, %c1_i32_102 : i32
      %184 = arith.index_cast %183 : i32 to index
      %185 = memref.load %arg4[%184] : memref<864xf32, #tpu.memory_space<smem>>
      %186 = vector.extract_strided_slice %159 {offsets = [2, 0, 0], sizes = [6, 6, 128], strides = [1, 1, 1]} : vector<8x6x128xf32> to vector<6x6x128xf32>
      %187 = vector.broadcast %185 : f32 to vector<6x6x128xf32>
      %188 = arith.mulf %187, %186 : vector<6x6x128xf32>
      %189 = arith.addf %179, %188 : vector<6x6x128xf32>
      %c1_103 = arith.constant 1 : index
      %c0_104 = arith.constant 0 : index
      %c2_105 = arith.constant 2 : index
      %c0_106 = arith.constant 0 : index
      %190 = vector.load %arg13[%c1_103, %c0_104, %c2_105, %c0_106] : memref<6x8x8x128xf32, #tpu.memory_space<vmem>>, vector<1x8x6x128xf32>
      %191 = vector.shape_cast %190 : vector<1x8x6x128xf32> to vector<8x6x128xf32>
      %c54_i32_107 = arith.constant 54 : i32
      %192 = arith.muli %arg15, %c54_i32_107 : i32
      %c9_i32_108 = arith.constant 9 : i32
      %193 = arith.addi %192, %c9_i32_108 : i32
      %c0_i32_109 = arith.constant 0 : i32
      %194 = arith.addi %193, %c0_i32_109 : i32
      %c2_i32_110 = arith.constant 2 : i32
      %195 = arith.addi %194, %c2_i32_110 : i32
      %196 = arith.index_cast %195 : i32 to index
      %197 = memref.load %arg4[%196] : memref<864xf32, #tpu.memory_space<smem>>
      %198 = vector.extract_strided_slice %191 {offsets = [0, 0, 0], sizes = [6, 6, 128], strides = [1, 1, 1]} : vector<8x6x128xf32> to vector<6x6x128xf32>
      %199 = vector.broadcast %197 : f32 to vector<6x6x128xf32>
      %200 = arith.mulf %199, %198 : vector<6x6x128xf32>
      %201 = arith.addf %189, %200 : vector<6x6x128xf32>
      %c54_i32_111 = arith.constant 54 : i32
      %202 = arith.muli %arg15, %c54_i32_111 : i32
      %c9_i32_112 = arith.constant 9 : i32
      %203 = arith.addi %202, %c9_i32_112 : i32
      %c3_i32_113 = arith.constant 3 : i32
      %204 = arith.addi %203, %c3_i32_113 : i32
      %c2_i32_114 = arith.constant 2 : i32
      %205 = arith.addi %204, %c2_i32_114 : i32
      %206 = arith.index_cast %205 : i32 to index
      %207 = memref.load %arg4[%206] : memref<864xf32, #tpu.memory_space<smem>>
      %208 = vector.extract_strided_slice %191 {offsets = [1, 0, 0], sizes = [6, 6, 128], strides = [1, 1, 1]} : vector<8x6x128xf32> to vector<6x6x128xf32>
      %209 = vector.broadcast %207 : f32 to vector<6x6x128xf32>
      %210 = arith.mulf %209, %208 : vector<6x6x128xf32>
      %211 = arith.addf %201, %210 : vector<6x6x128xf32>
      %c54_i32_115 = arith.constant 54 : i32
      %212 = arith.muli %arg15, %c54_i32_115 : i32
      %c9_i32_116 = arith.constant 9 : i32
      %213 = arith.addi %212, %c9_i32_116 : i32
      %c6_i32_117 = arith.constant 6 : i32
      %214 = arith.addi %213, %c6_i32_117 : i32
      %c2_i32_118 = arith.constant 2 : i32
      %215 = arith.addi %214, %c2_i32_118 : i32
      %216 = arith.index_cast %215 : i32 to index
      %217 = memref.load %arg4[%216] : memref<864xf32, #tpu.memory_space<smem>>
      %218 = vector.extract_strided_slice %191 {offsets = [2, 0, 0], sizes = [6, 6, 128], strides = [1, 1, 1]} : vector<8x6x128xf32> to vector<6x6x128xf32>
      %219 = vector.broadcast %217 : f32 to vector<6x6x128xf32>
      %220 = arith.mulf %219, %218 : vector<6x6x128xf32>
      %221 = arith.addf %211, %220 : vector<6x6x128xf32>
      %c2_119 = arith.constant 2 : index
      %c0_120 = arith.constant 0 : index
      %c0_121 = arith.constant 0 : index
      %c0_122 = arith.constant 0 : index
      %222 = vector.load %arg13[%c2_119, %c0_120, %c0_121, %c0_122] : memref<6x8x8x128xf32, #tpu.memory_space<vmem>>, vector<1x8x6x128xf32>
      %223 = vector.shape_cast %222 : vector<1x8x6x128xf32> to vector<8x6x128xf32>
      %c54_i32_123 = arith.constant 54 : i32
      %224 = arith.muli %arg15, %c54_i32_123 : i32
      %c18_i32 = arith.constant 18 : i32
      %225 = arith.addi %224, %c18_i32 : i32
      %c0_i32_124 = arith.constant 0 : i32
      %226 = arith.addi %225, %c0_i32_124 : i32
      %c0_i32_125 = arith.constant 0 : i32
      %227 = arith.addi %226, %c0_i32_125 : i32
      %228 = arith.index_cast %227 : i32 to index
      %229 = memref.load %arg4[%228] : memref<864xf32, #tpu.memory_space<smem>>
      %230 = vector.extract_strided_slice %223 {offsets = [0, 0, 0], sizes = [6, 6, 128], strides = [1, 1, 1]} : vector<8x6x128xf32> to vector<6x6x128xf32>
      %231 = vector.broadcast %229 : f32 to vector<6x6x128xf32>
      %232 = arith.mulf %231, %230 : vector<6x6x128xf32>
      %233 = arith.addf %221, %232 : vector<6x6x128xf32>
      %c54_i32_126 = arith.constant 54 : i32
      %234 = arith.muli %arg15, %c54_i32_126 : i32
      %c18_i32_127 = arith.constant 18 : i32
      %235 = arith.addi %234, %c18_i32_127 : i32
      %c3_i32_128 = arith.constant 3 : i32
      %236 = arith.addi %235, %c3_i32_128 : i32
      %c0_i32_129 = arith.constant 0 : i32
      %237 = arith.addi %236, %c0_i32_129 : i32
      %238 = arith.index_cast %237 : i32 to index
      %239 = memref.load %arg4[%238] : memref<864xf32, #tpu.memory_space<smem>>
      %240 = vector.extract_strided_slice %223 {offsets = [1, 0, 0], sizes = [6, 6, 128], strides = [1, 1, 1]} : vector<8x6x128xf32> to vector<6x6x128xf32>
      %241 = vector.broadcast %239 : f32 to vector<6x6x128xf32>
      %242 = arith.mulf %241, %240 : vector<6x6x128xf32>
      %243 = arith.addf %233, %242 : vector<6x6x128xf32>
      %c54_i32_130 = arith.constant 54 : i32
      %244 = arith.muli %arg15, %c54_i32_130 : i32
      %c18_i32_131 = arith.constant 18 : i32
      %245 = arith.addi %244, %c18_i32_131 : i32
      %c6_i32_132 = arith.constant 6 : i32
      %246 = arith.addi %245, %c6_i32_132 : i32
      %c0_i32_133 = arith.constant 0 : i32
      %247 = arith.addi %246, %c0_i32_133 : i32
      %248 = arith.index_cast %247 : i32 to index
      %249 = memref.load %arg4[%248] : memref<864xf32, #tpu.memory_space<smem>>
      %250 = vector.extract_strided_slice %223 {offsets = [2, 0, 0], sizes = [6, 6, 128], strides = [1, 1, 1]} : vector<8x6x128xf32> to vector<6x6x128xf32>
      %251 = vector.broadcast %249 : f32 to vector<6x6x128xf32>
      %252 = arith.mulf %251, %250 : vector<6x6x128xf32>
      %253 = arith.addf %243, %252 : vector<6x6x128xf32>
      %c2_134 = arith.constant 2 : index
      %c0_135 = arith.constant 0 : index
      %c1_136 = arith.constant 1 : index
      %c0_137 = arith.constant 0 : index
      %254 = vector.load %arg13[%c2_134, %c0_135, %c1_136, %c0_137] : memref<6x8x8x128xf32, #tpu.memory_space<vmem>>, vector<1x8x6x128xf32>
      %255 = vector.shape_cast %254 : vector<1x8x6x128xf32> to vector<8x6x128xf32>
      %c54_i32_138 = arith.constant 54 : i32
      %256 = arith.muli %arg15, %c54_i32_138 : i32
      %c18_i32_139 = arith.constant 18 : i32
      %257 = arith.addi %256, %c18_i32_139 : i32
      %c0_i32_140 = arith.constant 0 : i32
      %258 = arith.addi %257, %c0_i32_140 : i32
      %c1_i32_141 = arith.constant 1 : i32
      %259 = arith.addi %258, %c1_i32_141 : i32
      %260 = arith.index_cast %259 : i32 to index
      %261 = memref.load %arg4[%260] : memref<864xf32, #tpu.memory_space<smem>>
      %262 = vector.extract_strided_slice %255 {offsets = [0, 0, 0], sizes = [6, 6, 128], strides = [1, 1, 1]} : vector<8x6x128xf32> to vector<6x6x128xf32>
      %263 = vector.broadcast %261 : f32 to vector<6x6x128xf32>
      %264 = arith.mulf %263, %262 : vector<6x6x128xf32>
      %265 = arith.addf %253, %264 : vector<6x6x128xf32>
      %c54_i32_142 = arith.constant 54 : i32
      %266 = arith.muli %arg15, %c54_i32_142 : i32
      %c18_i32_143 = arith.constant 18 : i32
      %267 = arith.addi %266, %c18_i32_143 : i32
      %c3_i32_144 = arith.constant 3 : i32
      %268 = arith.addi %267, %c3_i32_144 : i32
      %c1_i32_145 = arith.constant 1 : i32
      %269 = arith.addi %268, %c1_i32_145 : i32
      %270 = arith.index_cast %269 : i32 to index
      %271 = memref.load %arg4[%270] : memref<864xf32, #tpu.memory_space<smem>>
      %272 = vector.extract_strided_slice %255 {offsets = [1, 0, 0], sizes = [6, 6, 128], strides = [1, 1, 1]} : vector<8x6x128xf32> to vector<6x6x128xf32>
      %273 = vector.broadcast %271 : f32 to vector<6x6x128xf32>
      %274 = arith.mulf %273, %272 : vector<6x6x128xf32>
      %275 = arith.addf %265, %274 : vector<6x6x128xf32>
      %c54_i32_146 = arith.constant 54 : i32
      %276 = arith.muli %arg15, %c54_i32_146 : i32
      %c18_i32_147 = arith.constant 18 : i32
      %277 = arith.addi %276, %c18_i32_147 : i32
      %c6_i32_148 = arith.constant 6 : i32
      %278 = arith.addi %277, %c6_i32_148 : i32
      %c1_i32_149 = arith.constant 1 : i32
      %279 = arith.addi %278, %c1_i32_149 : i32
      %280 = arith.index_cast %279 : i32 to index
      %281 = memref.load %arg4[%280] : memref<864xf32, #tpu.memory_space<smem>>
      %282 = vector.extract_strided_slice %255 {offsets = [2, 0, 0], sizes = [6, 6, 128], strides = [1, 1, 1]} : vector<8x6x128xf32> to vector<6x6x128xf32>
      %283 = vector.broadcast %281 : f32 to vector<6x6x128xf32>
      %284 = arith.mulf %283, %282 : vector<6x6x128xf32>
      %285 = arith.addf %275, %284 : vector<6x6x128xf32>
      %c2_150 = arith.constant 2 : index
      %c0_151 = arith.constant 0 : index
      %c2_152 = arith.constant 2 : index
      %c0_153 = arith.constant 0 : index
      %286 = vector.load %arg13[%c2_150, %c0_151, %c2_152, %c0_153] : memref<6x8x8x128xf32, #tpu.memory_space<vmem>>, vector<1x8x6x128xf32>
      %287 = vector.shape_cast %286 : vector<1x8x6x128xf32> to vector<8x6x128xf32>
      %c54_i32_154 = arith.constant 54 : i32
      %288 = arith.muli %arg15, %c54_i32_154 : i32
      %c18_i32_155 = arith.constant 18 : i32
      %289 = arith.addi %288, %c18_i32_155 : i32
      %c0_i32_156 = arith.constant 0 : i32
      %290 = arith.addi %289, %c0_i32_156 : i32
      %c2_i32_157 = arith.constant 2 : i32
      %291 = arith.addi %290, %c2_i32_157 : i32
      %292 = arith.index_cast %291 : i32 to index
      %293 = memref.load %arg4[%292] : memref<864xf32, #tpu.memory_space<smem>>
      %294 = vector.extract_strided_slice %287 {offsets = [0, 0, 0], sizes = [6, 6, 128], strides = [1, 1, 1]} : vector<8x6x128xf32> to vector<6x6x128xf32>
      %295 = vector.broadcast %293 : f32 to vector<6x6x128xf32>
      %296 = arith.mulf %295, %294 : vector<6x6x128xf32>
      %297 = arith.addf %285, %296 : vector<6x6x128xf32>
      %c54_i32_158 = arith.constant 54 : i32
      %298 = arith.muli %arg15, %c54_i32_158 : i32
      %c18_i32_159 = arith.constant 18 : i32
      %299 = arith.addi %298, %c18_i32_159 : i32
      %c3_i32_160 = arith.constant 3 : i32
      %300 = arith.addi %299, %c3_i32_160 : i32
      %c2_i32_161 = arith.constant 2 : i32
      %301 = arith.addi %300, %c2_i32_161 : i32
      %302 = arith.index_cast %301 : i32 to index
      %303 = memref.load %arg4[%302] : memref<864xf32, #tpu.memory_space<smem>>
      %304 = vector.extract_strided_slice %287 {offsets = [1, 0, 0], sizes = [6, 6, 128], strides = [1, 1, 1]} : vector<8x6x128xf32> to vector<6x6x128xf32>
      %305 = vector.broadcast %303 : f32 to vector<6x6x128xf32>
      %306 = arith.mulf %305, %304 : vector<6x6x128xf32>
      %307 = arith.addf %297, %306 : vector<6x6x128xf32>
      %c54_i32_162 = arith.constant 54 : i32
      %308 = arith.muli %arg15, %c54_i32_162 : i32
      %c18_i32_163 = arith.constant 18 : i32
      %309 = arith.addi %308, %c18_i32_163 : i32
      %c6_i32_164 = arith.constant 6 : i32
      %310 = arith.addi %309, %c6_i32_164 : i32
      %c2_i32_165 = arith.constant 2 : i32
      %311 = arith.addi %310, %c2_i32_165 : i32
      %312 = arith.index_cast %311 : i32 to index
      %313 = memref.load %arg4[%312] : memref<864xf32, #tpu.memory_space<smem>>
      %314 = vector.extract_strided_slice %287 {offsets = [2, 0, 0], sizes = [6, 6, 128], strides = [1, 1, 1]} : vector<8x6x128xf32> to vector<6x6x128xf32>
      %315 = vector.broadcast %313 : f32 to vector<6x6x128xf32>
      %316 = arith.mulf %315, %314 : vector<6x6x128xf32>
      %317 = arith.addf %307, %316 : vector<6x6x128xf32>
      %c3 = arith.constant 3 : index
      %c0_166 = arith.constant 0 : index
      %c0_167 = arith.constant 0 : index
      %c0_168 = arith.constant 0 : index
      %318 = vector.load %arg13[%c3, %c0_166, %c0_167, %c0_168] : memref<6x8x8x128xf32, #tpu.memory_space<vmem>>, vector<1x8x6x128xf32>
      %319 = vector.shape_cast %318 : vector<1x8x6x128xf32> to vector<8x6x128xf32>
      %c54_i32_169 = arith.constant 54 : i32
      %320 = arith.muli %arg15, %c54_i32_169 : i32
      %c27_i32 = arith.constant 27 : i32
      %321 = arith.addi %320, %c27_i32 : i32
      %c0_i32_170 = arith.constant 0 : i32
      %322 = arith.addi %321, %c0_i32_170 : i32
      %c0_i32_171 = arith.constant 0 : i32
      %323 = arith.addi %322, %c0_i32_171 : i32
      %324 = arith.index_cast %323 : i32 to index
      %325 = memref.load %arg4[%324] : memref<864xf32, #tpu.memory_space<smem>>
      %326 = vector.extract_strided_slice %319 {offsets = [0, 0, 0], sizes = [6, 6, 128], strides = [1, 1, 1]} : vector<8x6x128xf32> to vector<6x6x128xf32>
      %327 = vector.broadcast %325 : f32 to vector<6x6x128xf32>
      %328 = arith.mulf %327, %326 : vector<6x6x128xf32>
      %329 = arith.addf %317, %328 : vector<6x6x128xf32>
      %c54_i32_172 = arith.constant 54 : i32
      %330 = arith.muli %arg15, %c54_i32_172 : i32
      %c27_i32_173 = arith.constant 27 : i32
      %331 = arith.addi %330, %c27_i32_173 : i32
      %c3_i32_174 = arith.constant 3 : i32
      %332 = arith.addi %331, %c3_i32_174 : i32
      %c0_i32_175 = arith.constant 0 : i32
      %333 = arith.addi %332, %c0_i32_175 : i32
      %334 = arith.index_cast %333 : i32 to index
      %335 = memref.load %arg4[%334] : memref<864xf32, #tpu.memory_space<smem>>
      %336 = vector.extract_strided_slice %319 {offsets = [1, 0, 0], sizes = [6, 6, 128], strides = [1, 1, 1]} : vector<8x6x128xf32> to vector<6x6x128xf32>
      %337 = vector.broadcast %335 : f32 to vector<6x6x128xf32>
      %338 = arith.mulf %337, %336 : vector<6x6x128xf32>
      %339 = arith.addf %329, %338 : vector<6x6x128xf32>
      %c54_i32_176 = arith.constant 54 : i32
      %340 = arith.muli %arg15, %c54_i32_176 : i32
      %c27_i32_177 = arith.constant 27 : i32
      %341 = arith.addi %340, %c27_i32_177 : i32
      %c6_i32_178 = arith.constant 6 : i32
      %342 = arith.addi %341, %c6_i32_178 : i32
      %c0_i32_179 = arith.constant 0 : i32
      %343 = arith.addi %342, %c0_i32_179 : i32
      %344 = arith.index_cast %343 : i32 to index
      %345 = memref.load %arg4[%344] : memref<864xf32, #tpu.memory_space<smem>>
      %346 = vector.extract_strided_slice %319 {offsets = [2, 0, 0], sizes = [6, 6, 128], strides = [1, 1, 1]} : vector<8x6x128xf32> to vector<6x6x128xf32>
      %347 = vector.broadcast %345 : f32 to vector<6x6x128xf32>
      %348 = arith.mulf %347, %346 : vector<6x6x128xf32>
      %349 = arith.addf %339, %348 : vector<6x6x128xf32>
      %c3_180 = arith.constant 3 : index
      %c0_181 = arith.constant 0 : index
      %c1_182 = arith.constant 1 : index
      %c0_183 = arith.constant 0 : index
      %350 = vector.load %arg13[%c3_180, %c0_181, %c1_182, %c0_183] : memref<6x8x8x128xf32, #tpu.memory_space<vmem>>, vector<1x8x6x128xf32>
      %351 = vector.shape_cast %350 : vector<1x8x6x128xf32> to vector<8x6x128xf32>
      %c54_i32_184 = arith.constant 54 : i32
      %352 = arith.muli %arg15, %c54_i32_184 : i32
      %c27_i32_185 = arith.constant 27 : i32
      %353 = arith.addi %352, %c27_i32_185 : i32
      %c0_i32_186 = arith.constant 0 : i32
      %354 = arith.addi %353, %c0_i32_186 : i32
      %c1_i32_187 = arith.constant 1 : i32
      %355 = arith.addi %354, %c1_i32_187 : i32
      %356 = arith.index_cast %355 : i32 to index
      %357 = memref.load %arg4[%356] : memref<864xf32, #tpu.memory_space<smem>>
      %358 = vector.extract_strided_slice %351 {offsets = [0, 0, 0], sizes = [6, 6, 128], strides = [1, 1, 1]} : vector<8x6x128xf32> to vector<6x6x128xf32>
      %359 = vector.broadcast %357 : f32 to vector<6x6x128xf32>
      %360 = arith.mulf %359, %358 : vector<6x6x128xf32>
      %361 = arith.addf %349, %360 : vector<6x6x128xf32>
      %c54_i32_188 = arith.constant 54 : i32
      %362 = arith.muli %arg15, %c54_i32_188 : i32
      %c27_i32_189 = arith.constant 27 : i32
      %363 = arith.addi %362, %c27_i32_189 : i32
      %c3_i32_190 = arith.constant 3 : i32
      %364 = arith.addi %363, %c3_i32_190 : i32
      %c1_i32_191 = arith.constant 1 : i32
      %365 = arith.addi %364, %c1_i32_191 : i32
      %366 = arith.index_cast %365 : i32 to index
      %367 = memref.load %arg4[%366] : memref<864xf32, #tpu.memory_space<smem>>
      %368 = vector.extract_strided_slice %351 {offsets = [1, 0, 0], sizes = [6, 6, 128], strides = [1, 1, 1]} : vector<8x6x128xf32> to vector<6x6x128xf32>
      %369 = vector.broadcast %367 : f32 to vector<6x6x128xf32>
      %370 = arith.mulf %369, %368 : vector<6x6x128xf32>
      %371 = arith.addf %361, %370 : vector<6x6x128xf32>
      %c54_i32_192 = arith.constant 54 : i32
      %372 = arith.muli %arg15, %c54_i32_192 : i32
      %c27_i32_193 = arith.constant 27 : i32
      %373 = arith.addi %372, %c27_i32_193 : i32
      %c6_i32_194 = arith.constant 6 : i32
      %374 = arith.addi %373, %c6_i32_194 : i32
      %c1_i32_195 = arith.constant 1 : i32
      %375 = arith.addi %374, %c1_i32_195 : i32
      %376 = arith.index_cast %375 : i32 to index
      %377 = memref.load %arg4[%376] : memref<864xf32, #tpu.memory_space<smem>>
      %378 = vector.extract_strided_slice %351 {offsets = [2, 0, 0], sizes = [6, 6, 128], strides = [1, 1, 1]} : vector<8x6x128xf32> to vector<6x6x128xf32>
      %379 = vector.broadcast %377 : f32 to vector<6x6x128xf32>
      %380 = arith.mulf %379, %378 : vector<6x6x128xf32>
      %381 = arith.addf %371, %380 : vector<6x6x128xf32>
      %c3_196 = arith.constant 3 : index
      %c0_197 = arith.constant 0 : index
      %c2_198 = arith.constant 2 : index
      %c0_199 = arith.constant 0 : index
      %382 = vector.load %arg13[%c3_196, %c0_197, %c2_198, %c0_199] : memref<6x8x8x128xf32, #tpu.memory_space<vmem>>, vector<1x8x6x128xf32>
      %383 = vector.shape_cast %382 : vector<1x8x6x128xf32> to vector<8x6x128xf32>
      %c54_i32_200 = arith.constant 54 : i32
      %384 = arith.muli %arg15, %c54_i32_200 : i32
      %c27_i32_201 = arith.constant 27 : i32
      %385 = arith.addi %384, %c27_i32_201 : i32
      %c0_i32_202 = arith.constant 0 : i32
      %386 = arith.addi %385, %c0_i32_202 : i32
      %c2_i32_203 = arith.constant 2 : i32
      %387 = arith.addi %386, %c2_i32_203 : i32
      %388 = arith.index_cast %387 : i32 to index
      %389 = memref.load %arg4[%388] : memref<864xf32, #tpu.memory_space<smem>>
      %390 = vector.extract_strided_slice %383 {offsets = [0, 0, 0], sizes = [6, 6, 128], strides = [1, 1, 1]} : vector<8x6x128xf32> to vector<6x6x128xf32>
      %391 = vector.broadcast %389 : f32 to vector<6x6x128xf32>
      %392 = arith.mulf %391, %390 : vector<6x6x128xf32>
      %393 = arith.addf %381, %392 : vector<6x6x128xf32>
      %c54_i32_204 = arith.constant 54 : i32
      %394 = arith.muli %arg15, %c54_i32_204 : i32
      %c27_i32_205 = arith.constant 27 : i32
      %395 = arith.addi %394, %c27_i32_205 : i32
      %c3_i32_206 = arith.constant 3 : i32
      %396 = arith.addi %395, %c3_i32_206 : i32
      %c2_i32_207 = arith.constant 2 : i32
      %397 = arith.addi %396, %c2_i32_207 : i32
      %398 = arith.index_cast %397 : i32 to index
      %399 = memref.load %arg4[%398] : memref<864xf32, #tpu.memory_space<smem>>
      %400 = vector.extract_strided_slice %383 {offsets = [1, 0, 0], sizes = [6, 6, 128], strides = [1, 1, 1]} : vector<8x6x128xf32> to vector<6x6x128xf32>
      %401 = vector.broadcast %399 : f32 to vector<6x6x128xf32>
      %402 = arith.mulf %401, %400 : vector<6x6x128xf32>
      %403 = arith.addf %393, %402 : vector<6x6x128xf32>
      %c54_i32_208 = arith.constant 54 : i32
      %404 = arith.muli %arg15, %c54_i32_208 : i32
      %c27_i32_209 = arith.constant 27 : i32
      %405 = arith.addi %404, %c27_i32_209 : i32
      %c6_i32_210 = arith.constant 6 : i32
      %406 = arith.addi %405, %c6_i32_210 : i32
      %c2_i32_211 = arith.constant 2 : i32
      %407 = arith.addi %406, %c2_i32_211 : i32
      %408 = arith.index_cast %407 : i32 to index
      %409 = memref.load %arg4[%408] : memref<864xf32, #tpu.memory_space<smem>>
      %410 = vector.extract_strided_slice %383 {offsets = [2, 0, 0], sizes = [6, 6, 128], strides = [1, 1, 1]} : vector<8x6x128xf32> to vector<6x6x128xf32>
      %411 = vector.broadcast %409 : f32 to vector<6x6x128xf32>
      %412 = arith.mulf %411, %410 : vector<6x6x128xf32>
      %413 = arith.addf %403, %412 : vector<6x6x128xf32>
      %c4 = arith.constant 4 : index
      %c0_212 = arith.constant 0 : index
      %c0_213 = arith.constant 0 : index
      %c0_214 = arith.constant 0 : index
      %414 = vector.load %arg13[%c4, %c0_212, %c0_213, %c0_214] : memref<6x8x8x128xf32, #tpu.memory_space<vmem>>, vector<1x8x6x128xf32>
      %415 = vector.shape_cast %414 : vector<1x8x6x128xf32> to vector<8x6x128xf32>
      %c54_i32_215 = arith.constant 54 : i32
      %416 = arith.muli %arg15, %c54_i32_215 : i32
      %c36_i32 = arith.constant 36 : i32
      %417 = arith.addi %416, %c36_i32 : i32
      %c0_i32_216 = arith.constant 0 : i32
      %418 = arith.addi %417, %c0_i32_216 : i32
      %c0_i32_217 = arith.constant 0 : i32
      %419 = arith.addi %418, %c0_i32_217 : i32
      %420 = arith.index_cast %419 : i32 to index
      %421 = memref.load %arg4[%420] : memref<864xf32, #tpu.memory_space<smem>>
      %422 = vector.extract_strided_slice %415 {offsets = [0, 0, 0], sizes = [6, 6, 128], strides = [1, 1, 1]} : vector<8x6x128xf32> to vector<6x6x128xf32>
      %423 = vector.broadcast %421 : f32 to vector<6x6x128xf32>
      %424 = arith.mulf %423, %422 : vector<6x6x128xf32>
      %425 = arith.addf %413, %424 : vector<6x6x128xf32>
      %c54_i32_218 = arith.constant 54 : i32
      %426 = arith.muli %arg15, %c54_i32_218 : i32
      %c36_i32_219 = arith.constant 36 : i32
      %427 = arith.addi %426, %c36_i32_219 : i32
      %c3_i32_220 = arith.constant 3 : i32
      %428 = arith.addi %427, %c3_i32_220 : i32
      %c0_i32_221 = arith.constant 0 : i32
      %429 = arith.addi %428, %c0_i32_221 : i32
      %430 = arith.index_cast %429 : i32 to index
      %431 = memref.load %arg4[%430] : memref<864xf32, #tpu.memory_space<smem>>
      %432 = vector.extract_strided_slice %415 {offsets = [1, 0, 0], sizes = [6, 6, 128], strides = [1, 1, 1]} : vector<8x6x128xf32> to vector<6x6x128xf32>
      %433 = vector.broadcast %431 : f32 to vector<6x6x128xf32>
      %434 = arith.mulf %433, %432 : vector<6x6x128xf32>
      %435 = arith.addf %425, %434 : vector<6x6x128xf32>
      %c54_i32_222 = arith.constant 54 : i32
      %436 = arith.muli %arg15, %c54_i32_222 : i32
      %c36_i32_223 = arith.constant 36 : i32
      %437 = arith.addi %436, %c36_i32_223 : i32
      %c6_i32_224 = arith.constant 6 : i32
      %438 = arith.addi %437, %c6_i32_224 : i32
      %c0_i32_225 = arith.constant 0 : i32
      %439 = arith.addi %438, %c0_i32_225 : i32
      %440 = arith.index_cast %439 : i32 to index
      %441 = memref.load %arg4[%440] : memref<864xf32, #tpu.memory_space<smem>>
      %442 = vector.extract_strided_slice %415 {offsets = [2, 0, 0], sizes = [6, 6, 128], strides = [1, 1, 1]} : vector<8x6x128xf32> to vector<6x6x128xf32>
      %443 = vector.broadcast %441 : f32 to vector<6x6x128xf32>
      %444 = arith.mulf %443, %442 : vector<6x6x128xf32>
      %445 = arith.addf %435, %444 : vector<6x6x128xf32>
      %c4_226 = arith.constant 4 : index
      %c0_227 = arith.constant 0 : index
      %c1_228 = arith.constant 1 : index
      %c0_229 = arith.constant 0 : index
      %446 = vector.load %arg13[%c4_226, %c0_227, %c1_228, %c0_229] : memref<6x8x8x128xf32, #tpu.memory_space<vmem>>, vector<1x8x6x128xf32>
      %447 = vector.shape_cast %446 : vector<1x8x6x128xf32> to vector<8x6x128xf32>
      %c54_i32_230 = arith.constant 54 : i32
      %448 = arith.muli %arg15, %c54_i32_230 : i32
      %c36_i32_231 = arith.constant 36 : i32
      %449 = arith.addi %448, %c36_i32_231 : i32
      %c0_i32_232 = arith.constant 0 : i32
      %450 = arith.addi %449, %c0_i32_232 : i32
      %c1_i32_233 = arith.constant 1 : i32
      %451 = arith.addi %450, %c1_i32_233 : i32
      %452 = arith.index_cast %451 : i32 to index
      %453 = memref.load %arg4[%452] : memref<864xf32, #tpu.memory_space<smem>>
      %454 = vector.extract_strided_slice %447 {offsets = [0, 0, 0], sizes = [6, 6, 128], strides = [1, 1, 1]} : vector<8x6x128xf32> to vector<6x6x128xf32>
      %455 = vector.broadcast %453 : f32 to vector<6x6x128xf32>
      %456 = arith.mulf %455, %454 : vector<6x6x128xf32>
      %457 = arith.addf %445, %456 : vector<6x6x128xf32>
      %c54_i32_234 = arith.constant 54 : i32
      %458 = arith.muli %arg15, %c54_i32_234 : i32
      %c36_i32_235 = arith.constant 36 : i32
      %459 = arith.addi %458, %c36_i32_235 : i32
      %c3_i32_236 = arith.constant 3 : i32
      %460 = arith.addi %459, %c3_i32_236 : i32
      %c1_i32_237 = arith.constant 1 : i32
      %461 = arith.addi %460, %c1_i32_237 : i32
      %462 = arith.index_cast %461 : i32 to index
      %463 = memref.load %arg4[%462] : memref<864xf32, #tpu.memory_space<smem>>
      %464 = vector.extract_strided_slice %447 {offsets = [1, 0, 0], sizes = [6, 6, 128], strides = [1, 1, 1]} : vector<8x6x128xf32> to vector<6x6x128xf32>
      %465 = vector.broadcast %463 : f32 to vector<6x6x128xf32>
      %466 = arith.mulf %465, %464 : vector<6x6x128xf32>
      %467 = arith.addf %457, %466 : vector<6x6x128xf32>
      %c54_i32_238 = arith.constant 54 : i32
      %468 = arith.muli %arg15, %c54_i32_238 : i32
      %c36_i32_239 = arith.constant 36 : i32
      %469 = arith.addi %468, %c36_i32_239 : i32
      %c6_i32_240 = arith.constant 6 : i32
      %470 = arith.addi %469, %c6_i32_240 : i32
      %c1_i32_241 = arith.constant 1 : i32
      %471 = arith.addi %470, %c1_i32_241 : i32
      %472 = arith.index_cast %471 : i32 to index
      %473 = memref.load %arg4[%472] : memref<864xf32, #tpu.memory_space<smem>>
      %474 = vector.extract_strided_slice %447 {offsets = [2, 0, 0], sizes = [6, 6, 128], strides = [1, 1, 1]} : vector<8x6x128xf32> to vector<6x6x128xf32>
      %475 = vector.broadcast %473 : f32 to vector<6x6x128xf32>
      %476 = arith.mulf %475, %474 : vector<6x6x128xf32>
      %477 = arith.addf %467, %476 : vector<6x6x128xf32>
      %c4_242 = arith.constant 4 : index
      %c0_243 = arith.constant 0 : index
      %c2_244 = arith.constant 2 : index
      %c0_245 = arith.constant 0 : index
      %478 = vector.load %arg13[%c4_242, %c0_243, %c2_244, %c0_245] : memref<6x8x8x128xf32, #tpu.memory_space<vmem>>, vector<1x8x6x128xf32>
      %479 = vector.shape_cast %478 : vector<1x8x6x128xf32> to vector<8x6x128xf32>
      %c54_i32_246 = arith.constant 54 : i32
      %480 = arith.muli %arg15, %c54_i32_246 : i32
      %c36_i32_247 = arith.constant 36 : i32
      %481 = arith.addi %480, %c36_i32_247 : i32
      %c0_i32_248 = arith.constant 0 : i32
      %482 = arith.addi %481, %c0_i32_248 : i32
      %c2_i32_249 = arith.constant 2 : i32
      %483 = arith.addi %482, %c2_i32_249 : i32
      %484 = arith.index_cast %483 : i32 to index
      %485 = memref.load %arg4[%484] : memref<864xf32, #tpu.memory_space<smem>>
      %486 = vector.extract_strided_slice %479 {offsets = [0, 0, 0], sizes = [6, 6, 128], strides = [1, 1, 1]} : vector<8x6x128xf32> to vector<6x6x128xf32>
      %487 = vector.broadcast %485 : f32 to vector<6x6x128xf32>
      %488 = arith.mulf %487, %486 : vector<6x6x128xf32>
      %489 = arith.addf %477, %488 : vector<6x6x128xf32>
      %c54_i32_250 = arith.constant 54 : i32
      %490 = arith.muli %arg15, %c54_i32_250 : i32
      %c36_i32_251 = arith.constant 36 : i32
      %491 = arith.addi %490, %c36_i32_251 : i32
      %c3_i32_252 = arith.constant 3 : i32
      %492 = arith.addi %491, %c3_i32_252 : i32
      %c2_i32_253 = arith.constant 2 : i32
      %493 = arith.addi %492, %c2_i32_253 : i32
      %494 = arith.index_cast %493 : i32 to index
      %495 = memref.load %arg4[%494] : memref<864xf32, #tpu.memory_space<smem>>
      %496 = vector.extract_strided_slice %479 {offsets = [1, 0, 0], sizes = [6, 6, 128], strides = [1, 1, 1]} : vector<8x6x128xf32> to vector<6x6x128xf32>
      %497 = vector.broadcast %495 : f32 to vector<6x6x128xf32>
      %498 = arith.mulf %497, %496 : vector<6x6x128xf32>
      %499 = arith.addf %489, %498 : vector<6x6x128xf32>
      %c54_i32_254 = arith.constant 54 : i32
      %500 = arith.muli %arg15, %c54_i32_254 : i32
      %c36_i32_255 = arith.constant 36 : i32
      %501 = arith.addi %500, %c36_i32_255 : i32
      %c6_i32_256 = arith.constant 6 : i32
      %502 = arith.addi %501, %c6_i32_256 : i32
      %c2_i32_257 = arith.constant 2 : i32
      %503 = arith.addi %502, %c2_i32_257 : i32
      %504 = arith.index_cast %503 : i32 to index
      %505 = memref.load %arg4[%504] : memref<864xf32, #tpu.memory_space<smem>>
      %506 = vector.extract_strided_slice %479 {offsets = [2, 0, 0], sizes = [6, 6, 128], strides = [1, 1, 1]} : vector<8x6x128xf32> to vector<6x6x128xf32>
      %507 = vector.broadcast %505 : f32 to vector<6x6x128xf32>
      %508 = arith.mulf %507, %506 : vector<6x6x128xf32>
      %509 = arith.addf %499, %508 : vector<6x6x128xf32>
      %c5 = arith.constant 5 : index
      %c0_258 = arith.constant 0 : index
      %c0_259 = arith.constant 0 : index
      %c0_260 = arith.constant 0 : index
      %510 = vector.load %arg13[%c5, %c0_258, %c0_259, %c0_260] : memref<6x8x8x128xf32, #tpu.memory_space<vmem>>, vector<1x8x6x128xf32>
      %511 = vector.shape_cast %510 : vector<1x8x6x128xf32> to vector<8x6x128xf32>
      %c54_i32_261 = arith.constant 54 : i32
      %512 = arith.muli %arg15, %c54_i32_261 : i32
      %c45_i32 = arith.constant 45 : i32
      %513 = arith.addi %512, %c45_i32 : i32
      %c0_i32_262 = arith.constant 0 : i32
      %514 = arith.addi %513, %c0_i32_262 : i32
      %c0_i32_263 = arith.constant 0 : i32
      %515 = arith.addi %514, %c0_i32_263 : i32
      %516 = arith.index_cast %515 : i32 to index
      %517 = memref.load %arg4[%516] : memref<864xf32, #tpu.memory_space<smem>>
      %518 = vector.extract_strided_slice %511 {offsets = [0, 0, 0], sizes = [6, 6, 128], strides = [1, 1, 1]} : vector<8x6x128xf32> to vector<6x6x128xf32>
      %519 = vector.broadcast %517 : f32 to vector<6x6x128xf32>
      %520 = arith.mulf %519, %518 : vector<6x6x128xf32>
      %521 = arith.addf %509, %520 : vector<6x6x128xf32>
      %c54_i32_264 = arith.constant 54 : i32
      %522 = arith.muli %arg15, %c54_i32_264 : i32
      %c45_i32_265 = arith.constant 45 : i32
      %523 = arith.addi %522, %c45_i32_265 : i32
      %c3_i32_266 = arith.constant 3 : i32
      %524 = arith.addi %523, %c3_i32_266 : i32
      %c0_i32_267 = arith.constant 0 : i32
      %525 = arith.addi %524, %c0_i32_267 : i32
      %526 = arith.index_cast %525 : i32 to index
      %527 = memref.load %arg4[%526] : memref<864xf32, #tpu.memory_space<smem>>
      %528 = vector.extract_strided_slice %511 {offsets = [1, 0, 0], sizes = [6, 6, 128], strides = [1, 1, 1]} : vector<8x6x128xf32> to vector<6x6x128xf32>
      %529 = vector.broadcast %527 : f32 to vector<6x6x128xf32>
      %530 = arith.mulf %529, %528 : vector<6x6x128xf32>
      %531 = arith.addf %521, %530 : vector<6x6x128xf32>
      %c54_i32_268 = arith.constant 54 : i32
      %532 = arith.muli %arg15, %c54_i32_268 : i32
      %c45_i32_269 = arith.constant 45 : i32
      %533 = arith.addi %532, %c45_i32_269 : i32
      %c6_i32_270 = arith.constant 6 : i32
      %534 = arith.addi %533, %c6_i32_270 : i32
      %c0_i32_271 = arith.constant 0 : i32
      %535 = arith.addi %534, %c0_i32_271 : i32
      %536 = arith.index_cast %535 : i32 to index
      %537 = memref.load %arg4[%536] : memref<864xf32, #tpu.memory_space<smem>>
      %538 = vector.extract_strided_slice %511 {offsets = [2, 0, 0], sizes = [6, 6, 128], strides = [1, 1, 1]} : vector<8x6x128xf32> to vector<6x6x128xf32>
      %539 = vector.broadcast %537 : f32 to vector<6x6x128xf32>
      %540 = arith.mulf %539, %538 : vector<6x6x128xf32>
      %541 = arith.addf %531, %540 : vector<6x6x128xf32>
      %c5_272 = arith.constant 5 : index
      %c0_273 = arith.constant 0 : index
      %c1_274 = arith.constant 1 : index
      %c0_275 = arith.constant 0 : index
      %542 = vector.load %arg13[%c5_272, %c0_273, %c1_274, %c0_275] : memref<6x8x8x128xf32, #tpu.memory_space<vmem>>, vector<1x8x6x128xf32>
      %543 = vector.shape_cast %542 : vector<1x8x6x128xf32> to vector<8x6x128xf32>
      %c54_i32_276 = arith.constant 54 : i32
      %544 = arith.muli %arg15, %c54_i32_276 : i32
      %c45_i32_277 = arith.constant 45 : i32
      %545 = arith.addi %544, %c45_i32_277 : i32
      %c0_i32_278 = arith.constant 0 : i32
      %546 = arith.addi %545, %c0_i32_278 : i32
      %c1_i32_279 = arith.constant 1 : i32
      %547 = arith.addi %546, %c1_i32_279 : i32
      %548 = arith.index_cast %547 : i32 to index
      %549 = memref.load %arg4[%548] : memref<864xf32, #tpu.memory_space<smem>>
      %550 = vector.extract_strided_slice %543 {offsets = [0, 0, 0], sizes = [6, 6, 128], strides = [1, 1, 1]} : vector<8x6x128xf32> to vector<6x6x128xf32>
      %551 = vector.broadcast %549 : f32 to vector<6x6x128xf32>
      %552 = arith.mulf %551, %550 : vector<6x6x128xf32>
      %553 = arith.addf %541, %552 : vector<6x6x128xf32>
      %c54_i32_280 = arith.constant 54 : i32
      %554 = arith.muli %arg15, %c54_i32_280 : i32
      %c45_i32_281 = arith.constant 45 : i32
      %555 = arith.addi %554, %c45_i32_281 : i32
      %c3_i32_282 = arith.constant 3 : i32
      %556 = arith.addi %555, %c3_i32_282 : i32
      %c1_i32_283 = arith.constant 1 : i32
      %557 = arith.addi %556, %c1_i32_283 : i32
      %558 = arith.index_cast %557 : i32 to index
      %559 = memref.load %arg4[%558] : memref<864xf32, #tpu.memory_space<smem>>
      %560 = vector.extract_strided_slice %543 {offsets = [1, 0, 0], sizes = [6, 6, 128], strides = [1, 1, 1]} : vector<8x6x128xf32> to vector<6x6x128xf32>
      %561 = vector.broadcast %559 : f32 to vector<6x6x128xf32>
      %562 = arith.mulf %561, %560 : vector<6x6x128xf32>
      %563 = arith.addf %553, %562 : vector<6x6x128xf32>
      %c54_i32_284 = arith.constant 54 : i32
      %564 = arith.muli %arg15, %c54_i32_284 : i32
      %c45_i32_285 = arith.constant 45 : i32
      %565 = arith.addi %564, %c45_i32_285 : i32
      %c6_i32_286 = arith.constant 6 : i32
      %566 = arith.addi %565, %c6_i32_286 : i32
      %c1_i32_287 = arith.constant 1 : i32
      %567 = arith.addi %566, %c1_i32_287 : i32
      %568 = arith.index_cast %567 : i32 to index
      %569 = memref.load %arg4[%568] : memref<864xf32, #tpu.memory_space<smem>>
      %570 = vector.extract_strided_slice %543 {offsets = [2, 0, 0], sizes = [6, 6, 128], strides = [1, 1, 1]} : vector<8x6x128xf32> to vector<6x6x128xf32>
      %571 = vector.broadcast %569 : f32 to vector<6x6x128xf32>
      %572 = arith.mulf %571, %570 : vector<6x6x128xf32>
      %573 = arith.addf %563, %572 : vector<6x6x128xf32>
      %c5_288 = arith.constant 5 : index
      %c0_289 = arith.constant 0 : index
      %c2_290 = arith.constant 2 : index
      %c0_291 = arith.constant 0 : index
      %574 = vector.load %arg13[%c5_288, %c0_289, %c2_290, %c0_291] : memref<6x8x8x128xf32, #tpu.memory_space<vmem>>, vector<1x8x6x128xf32>
      %575 = vector.shape_cast %574 : vector<1x8x6x128xf32> to vector<8x6x128xf32>
      %c54_i32_292 = arith.constant 54 : i32
      %576 = arith.muli %arg15, %c54_i32_292 : i32
      %c45_i32_293 = arith.constant 45 : i32
      %577 = arith.addi %576, %c45_i32_293 : i32
      %c0_i32_294 = arith.constant 0 : i32
      %578 = arith.addi %577, %c0_i32_294 : i32
      %c2_i32_295 = arith.constant 2 : i32
      %579 = arith.addi %578, %c2_i32_295 : i32
      %580 = arith.index_cast %579 : i32 to index
      %581 = memref.load %arg4[%580] : memref<864xf32, #tpu.memory_space<smem>>
      %582 = vector.extract_strided_slice %575 {offsets = [0, 0, 0], sizes = [6, 6, 128], strides = [1, 1, 1]} : vector<8x6x128xf32> to vector<6x6x128xf32>
      %583 = vector.broadcast %581 : f32 to vector<6x6x128xf32>
      %584 = arith.mulf %583, %582 : vector<6x6x128xf32>
      %585 = arith.addf %573, %584 : vector<6x6x128xf32>
      %c54_i32_296 = arith.constant 54 : i32
      %586 = arith.muli %arg15, %c54_i32_296 : i32
      %c45_i32_297 = arith.constant 45 : i32
      %587 = arith.addi %586, %c45_i32_297 : i32
      %c3_i32_298 = arith.constant 3 : i32
      %588 = arith.addi %587, %c3_i32_298 : i32
      %c2_i32_299 = arith.constant 2 : i32
      %589 = arith.addi %588, %c2_i32_299 : i32
      %590 = arith.index_cast %589 : i32 to index
      %591 = memref.load %arg4[%590] : memref<864xf32, #tpu.memory_space<smem>>
      %592 = vector.extract_strided_slice %575 {offsets = [1, 0, 0], sizes = [6, 6, 128], strides = [1, 1, 1]} : vector<8x6x128xf32> to vector<6x6x128xf32>
      %593 = vector.broadcast %591 : f32 to vector<6x6x128xf32>
      %594 = arith.mulf %593, %592 : vector<6x6x128xf32>
      %595 = arith.addf %585, %594 : vector<6x6x128xf32>
      %c54_i32_300 = arith.constant 54 : i32
      %596 = arith.muli %arg15, %c54_i32_300 : i32
      %c45_i32_301 = arith.constant 45 : i32
      %597 = arith.addi %596, %c45_i32_301 : i32
      %c6_i32_302 = arith.constant 6 : i32
      %598 = arith.addi %597, %c6_i32_302 : i32
      %c2_i32_303 = arith.constant 2 : i32
      %599 = arith.addi %598, %c2_i32_303 : i32
      %600 = arith.index_cast %599 : i32 to index
      %601 = memref.load %arg4[%600] : memref<864xf32, #tpu.memory_space<smem>>
      %602 = vector.extract_strided_slice %575 {offsets = [2, 0, 0], sizes = [6, 6, 128], strides = [1, 1, 1]} : vector<8x6x128xf32> to vector<6x6x128xf32>
      %603 = vector.broadcast %601 : f32 to vector<6x6x128xf32>
      %604 = arith.mulf %603, %602 : vector<6x6x128xf32>
      %605 = arith.addf %595, %604 : vector<6x6x128xf32>
      %606 = arith.index_cast %arg15 : i32 to index
      %607 = memref.load %arg5[%606] : memref<16xf32, #tpu.memory_space<smem>>
      %608 = vector.extract_strided_slice %605 {offsets = [0, 0, 0], sizes = [1, 1, 128], strides = [1, 1, 1]} : vector<6x6x128xf32> to vector<1x1x128xf32>
      %609 = vector.shape_cast %608 : vector<1x1x128xf32> to vector<1x128xf32>
      %610 = vector.extract_strided_slice %605 {offsets = [0, 1, 0], sizes = [1, 1, 128], strides = [1, 1, 1]} : vector<6x6x128xf32> to vector<1x1x128xf32>
      %611 = vector.shape_cast %610 : vector<1x1x128xf32> to vector<1x128xf32>
      %612 = arith.maximumf %609, %611 : vector<1x128xf32>
      %613 = vector.extract_strided_slice %605 {offsets = [1, 0, 0], sizes = [1, 1, 128], strides = [1, 1, 1]} : vector<6x6x128xf32> to vector<1x1x128xf32>
      %614 = vector.shape_cast %613 : vector<1x1x128xf32> to vector<1x128xf32>
      %615 = vector.extract_strided_slice %605 {offsets = [1, 1, 0], sizes = [1, 1, 128], strides = [1, 1, 1]} : vector<6x6x128xf32> to vector<1x1x128xf32>
      %616 = vector.shape_cast %615 : vector<1x1x128xf32> to vector<1x128xf32>
      %617 = arith.maximumf %614, %616 : vector<1x128xf32>
      %618 = arith.maximumf %612, %617 : vector<1x128xf32>
      %619 = vector.broadcast %607 : f32 to vector<1x128xf32>
      %620 = arith.addf %618, %619 : vector<1x128xf32>
      %cst_304 = arith.constant 0.000000e+00 : f32
      %621 = vector.broadcast %cst_304 : f32 to vector<1x128xf32>
      %622 = arith.maximumf %620, %621 : vector<1x128xf32>
      %623 = arith.index_cast %arg15 : i32 to index
      %c0_305 = arith.constant 0 : index
      %c0_306 = arith.constant 0 : index
      %624 = vector.load %arg14[%623, %c0_305, %c0_306] : memref<16x16x128xf32, #tpu.memory_space<vmem>>, vector<1x1x128xf32>
      %625 = vector.shape_cast %624 : vector<1x1x128xf32> to vector<1x128xf32>
      %626 = vector.shape_cast %622 : vector<1x128xf32> to vector<1x1x128xf32>
      tpu.vector_store %arg14[%623, %c0_305, %c0_306], %626 {strides = array<i32>} : memref<16x16x128xf32, #tpu.memory_space<vmem>>, vector<1x1x128xf32>,
      %627 = vector.extract_strided_slice %605 {offsets = [0, 2, 0], sizes = [1, 1, 128], strides = [1, 1, 1]} : vector<6x6x128xf32> to vector<1x1x128xf32>
      %628 = vector.shape_cast %627 : vector<1x1x128xf32> to vector<1x128xf32>
      %629 = vector.extract_strided_slice %605 {offsets = [0, 3, 0], sizes = [1, 1, 128], strides = [1, 1, 1]} : vector<6x6x128xf32> to vector<1x1x128xf32>
      %630 = vector.shape_cast %629 : vector<1x1x128xf32> to vector<1x128xf32>
      %631 = arith.maximumf %628, %630 : vector<1x128xf32>
      %632 = vector.extract_strided_slice %605 {offsets = [1, 2, 0], sizes = [1, 1, 128], strides = [1, 1, 1]} : vector<6x6x128xf32> to vector<1x1x128xf32>
      %633 = vector.shape_cast %632 : vector<1x1x128xf32> to vector<1x128xf32>
      %634 = vector.extract_strided_slice %605 {offsets = [1, 3, 0], sizes = [1, 1, 128], strides = [1, 1, 1]} : vector<6x6x128xf32> to vector<1x1x128xf32>
      %635 = vector.shape_cast %634 : vector<1x1x128xf32> to vector<1x128xf32>
      %636 = arith.maximumf %633, %635 : vector<1x128xf32>
      %637 = arith.maximumf %631, %636 : vector<1x128xf32>
      %638 = vector.broadcast %607 : f32 to vector<1x128xf32>
      %639 = arith.addf %637, %638 : vector<1x128xf32>
      %cst_307 = arith.constant 0.000000e+00 : f32
      %640 = vector.broadcast %cst_307 : f32 to vector<1x128xf32>
      %641 = arith.maximumf %639, %640 : vector<1x128xf32>
      %642 = arith.index_cast %arg15 : i32 to index
      %c1_308 = arith.constant 1 : index
      %c0_309 = arith.constant 0 : index
      %643 = vector.load %arg14[%642, %c1_308, %c0_309] : memref<16x16x128xf32, #tpu.memory_space<vmem>>, vector<1x1x128xf32>
      %644 = vector.shape_cast %643 : vector<1x1x128xf32> to vector<1x128xf32>
      %645 = vector.shape_cast %641 : vector<1x128xf32> to vector<1x1x128xf32>
      tpu.vector_store %arg14[%642, %c1_308, %c0_309], %645 {strides = array<i32>} : memref<16x16x128xf32, #tpu.memory_space<vmem>>, vector<1x1x128xf32>,
      %646 = vector.extract_strided_slice %605 {offsets = [0, 4, 0], sizes = [1, 1, 128], strides = [1, 1, 1]} : vector<6x6x128xf32> to vector<1x1x128xf32>
      %647 = vector.shape_cast %646 : vector<1x1x128xf32> to vector<1x128xf32>
      %648 = vector.extract_strided_slice %605 {offsets = [0, 5, 0], sizes = [1, 1, 128], strides = [1, 1, 1]} : vector<6x6x128xf32> to vector<1x1x128xf32>
      %649 = vector.shape_cast %648 : vector<1x1x128xf32> to vector<1x128xf32>
      %650 = arith.maximumf %647, %649 : vector<1x128xf32>
      %651 = vector.extract_strided_slice %605 {offsets = [1, 4, 0], sizes = [1, 1, 128], strides = [1, 1, 1]} : vector<6x6x128xf32> to vector<1x1x128xf32>
      %652 = vector.shape_cast %651 : vector<1x1x128xf32> to vector<1x128xf32>
      %653 = vector.extract_strided_slice %605 {offsets = [1, 5, 0], sizes = [1, 1, 128], strides = [1, 1, 1]} : vector<6x6x128xf32> to vector<1x1x128xf32>
      %654 = vector.shape_cast %653 : vector<1x1x128xf32> to vector<1x128xf32>
      %655 = arith.maximumf %652, %654 : vector<1x128xf32>
      %656 = arith.maximumf %650, %655 : vector<1x128xf32>
      %657 = vector.broadcast %607 : f32 to vector<1x128xf32>
      %658 = arith.addf %656, %657 : vector<1x128xf32>
      %cst_310 = arith.constant 0.000000e+00 : f32
      %659 = vector.broadcast %cst_310 : f32 to vector<1x128xf32>
      %660 = arith.maximumf %658, %659 : vector<1x128xf32>
      %661 = arith.index_cast %arg15 : i32 to index
      %c2_311 = arith.constant 2 : index
      %c0_312 = arith.constant 0 : index
      %662 = vector.load %arg14[%661, %c2_311, %c0_312] : memref<16x16x128xf32, #tpu.memory_space<vmem>>, vector<1x1x128xf32>
      %663 = vector.shape_cast %662 : vector<1x1x128xf32> to vector<1x128xf32>
      %664 = vector.shape_cast %660 : vector<1x128xf32> to vector<1x1x128xf32>
      tpu.vector_store %arg14[%661, %c2_311, %c0_312], %664 {strides = array<i32>} : memref<16x16x128xf32, #tpu.memory_space<vmem>>, vector<1x1x128xf32>,
      %665 = vector.extract_strided_slice %605 {offsets = [2, 0, 0], sizes = [1, 1, 128], strides = [1, 1, 1]} : vector<6x6x128xf32> to vector<1x1x128xf32>
      %666 = vector.shape_cast %665 : vector<1x1x128xf32> to vector<1x128xf32>
      %667 = vector.extract_strided_slice %605 {offsets = [2, 1, 0], sizes = [1, 1, 128], strides = [1, 1, 1]} : vector<6x6x128xf32> to vector<1x1x128xf32>
      %668 = vector.shape_cast %667 : vector<1x1x128xf32> to vector<1x128xf32>
      %669 = arith.maximumf %666, %668 : vector<1x128xf32>
      %670 = vector.extract_strided_slice %605 {offsets = [3, 0, 0], sizes = [1, 1, 128], strides = [1, 1, 1]} : vector<6x6x128xf32> to vector<1x1x128xf32>
      %671 = vector.shape_cast %670 : vector<1x1x128xf32> to vector<1x128xf32>
      %672 = vector.extract_strided_slice %605 {offsets = [3, 1, 0], sizes = [1, 1, 128], strides = [1, 1, 1]} : vector<6x6x128xf32> to vector<1x1x128xf32>
      %673 = vector.shape_cast %672 : vector<1x1x128xf32> to vector<1x128xf32>
      %674 = arith.maximumf %671, %673 : vector<1x128xf32>
      %675 = arith.maximumf %669, %674 : vector<1x128xf32>
      %676 = vector.broadcast %607 : f32 to vector<1x128xf32>
      %677 = arith.addf %675, %676 : vector<1x128xf32>
      %cst_313 = arith.constant 0.000000e+00 : f32
      %678 = vector.broadcast %cst_313 : f32 to vector<1x128xf32>
      %679 = arith.maximumf %677, %678 : vector<1x128xf32>
      %680 = arith.index_cast %arg15 : i32 to index
      %c3_314 = arith.constant 3 : index
      %c0_315 = arith.constant 0 : index
      %681 = vector.load %arg14[%680, %c3_314, %c0_315] : memref<16x16x128xf32, #tpu.memory_space<vmem>>, vector<1x1x128xf32>
      %682 = vector.shape_cast %681 : vector<1x1x128xf32> to vector<1x128xf32>
      %683 = vector.shape_cast %679 : vector<1x128xf32> to vector<1x1x128xf32>
      tpu.vector_store %arg14[%680, %c3_314, %c0_315], %683 {strides = array<i32>} : memref<16x16x128xf32, #tpu.memory_space<vmem>>, vector<1x1x128xf32>,
      %684 = vector.extract_strided_slice %605 {offsets = [2, 2, 0], sizes = [1, 1, 128], strides = [1, 1, 1]} : vector<6x6x128xf32> to vector<1x1x128xf32>
      %685 = vector.shape_cast %684 : vector<1x1x128xf32> to vector<1x128xf32>
      %686 = vector.extract_strided_slice %605 {offsets = [2, 3, 0], sizes = [1, 1, 128], strides = [1, 1, 1]} : vector<6x6x128xf32> to vector<1x1x128xf32>
      %687 = vector.shape_cast %686 : vector<1x1x128xf32> to vector<1x128xf32>
      %688 = arith.maximumf %685, %687 : vector<1x128xf32>
      %689 = vector.extract_strided_slice %605 {offsets = [3, 2, 0], sizes = [1, 1, 128], strides = [1, 1, 1]} : vector<6x6x128xf32> to vector<1x1x128xf32>
      %690 = vector.shape_cast %689 : vector<1x1x128xf32> to vector<1x128xf32>
      %691 = vector.extract_strided_slice %605 {offsets = [3, 3, 0], sizes = [1, 1, 128], strides = [1, 1, 1]} : vector<6x6x128xf32> to vector<1x1x128xf32>
      %692 = vector.shape_cast %691 : vector<1x1x128xf32> to vector<1x128xf32>
      %693 = arith.maximumf %690, %692 : vector<1x128xf32>
      %694 = arith.maximumf %688, %693 : vector<1x128xf32>
      %695 = vector.broadcast %607 : f32 to vector<1x128xf32>
      %696 = arith.addf %694, %695 : vector<1x128xf32>
      %cst_316 = arith.constant 0.000000e+00 : f32
      %697 = vector.broadcast %cst_316 : f32 to vector<1x128xf32>
      %698 = arith.maximumf %696, %697 : vector<1x128xf32>
      %699 = arith.index_cast %arg15 : i32 to index
      %c4_317 = arith.constant 4 : index
      %c0_318 = arith.constant 0 : index
      %700 = vector.load %arg14[%699, %c4_317, %c0_318] : memref<16x16x128xf32, #tpu.memory_space<vmem>>, vector<1x1x128xf32>
      %701 = vector.shape_cast %700 : vector<1x1x128xf32> to vector<1x128xf32>
      %702 = vector.shape_cast %698 : vector<1x128xf32> to vector<1x1x128xf32>
      tpu.vector_store %arg14[%699, %c4_317, %c0_318], %702 {strides = array<i32>} : memref<16x16x128xf32, #tpu.memory_space<vmem>>, vector<1x1x128xf32>,
      %703 = vector.extract_strided_slice %605 {offsets = [2, 4, 0], sizes = [1, 1, 128], strides = [1, 1, 1]} : vector<6x6x128xf32> to vector<1x1x128xf32>
      %704 = vector.shape_cast %703 : vector<1x1x128xf32> to vector<1x128xf32>
      %705 = vector.extract_strided_slice %605 {offsets = [2, 5, 0], sizes = [1, 1, 128], strides = [1, 1, 1]} : vector<6x6x128xf32> to vector<1x1x128xf32>
      %706 = vector.shape_cast %705 : vector<1x1x128xf32> to vector<1x128xf32>
      %707 = arith.maximumf %704, %706 : vector<1x128xf32>
      %708 = vector.extract_strided_slice %605 {offsets = [3, 4, 0], sizes = [1, 1, 128], strides = [1, 1, 1]} : vector<6x6x128xf32> to vector<1x1x128xf32>
      %709 = vector.shape_cast %708 : vector<1x1x128xf32> to vector<1x128xf32>
      %710 = vector.extract_strided_slice %605 {offsets = [3, 5, 0], sizes = [1, 1, 128], strides = [1, 1, 1]} : vector<6x6x128xf32> to vector<1x1x128xf32>
      %711 = vector.shape_cast %710 : vector<1x1x128xf32> to vector<1x128xf32>
      %712 = arith.maximumf %709, %711 : vector<1x128xf32>
      %713 = arith.maximumf %707, %712 : vector<1x128xf32>
      %714 = vector.broadcast %607 : f32 to vector<1x128xf32>
      %715 = arith.addf %713, %714 : vector<1x128xf32>
      %cst_319 = arith.constant 0.000000e+00 : f32
      %716 = vector.broadcast %cst_319 : f32 to vector<1x128xf32>
      %717 = arith.maximumf %715, %716 : vector<1x128xf32>
      %718 = arith.index_cast %arg15 : i32 to index
      %c5_320 = arith.constant 5 : index
      %c0_321 = arith.constant 0 : index
      %719 = vector.load %arg14[%718, %c5_320, %c0_321] : memref<16x16x128xf32, #tpu.memory_space<vmem>>, vector<1x1x128xf32>
      %720 = vector.shape_cast %719 : vector<1x1x128xf32> to vector<1x128xf32>
      %721 = vector.shape_cast %717 : vector<1x128xf32> to vector<1x1x128xf32>
      tpu.vector_store %arg14[%718, %c5_320, %c0_321], %721 {strides = array<i32>} : memref<16x16x128xf32, #tpu.memory_space<vmem>>, vector<1x1x128xf32>,
      %722 = vector.extract_strided_slice %605 {offsets = [4, 0, 0], sizes = [1, 1, 128], strides = [1, 1, 1]} : vector<6x6x128xf32> to vector<1x1x128xf32>
      %723 = vector.shape_cast %722 : vector<1x1x128xf32> to vector<1x128xf32>
      %724 = vector.extract_strided_slice %605 {offsets = [4, 1, 0], sizes = [1, 1, 128], strides = [1, 1, 1]} : vector<6x6x128xf32> to vector<1x1x128xf32>
      %725 = vector.shape_cast %724 : vector<1x1x128xf32> to vector<1x128xf32>
      %726 = arith.maximumf %723, %725 : vector<1x128xf32>
      %727 = vector.extract_strided_slice %605 {offsets = [5, 0, 0], sizes = [1, 1, 128], strides = [1, 1, 1]} : vector<6x6x128xf32> to vector<1x1x128xf32>
      %728 = vector.shape_cast %727 : vector<1x1x128xf32> to vector<1x128xf32>
      %729 = vector.extract_strided_slice %605 {offsets = [5, 1, 0], sizes = [1, 1, 128], strides = [1, 1, 1]} : vector<6x6x128xf32> to vector<1x1x128xf32>
      %730 = vector.shape_cast %729 : vector<1x1x128xf32> to vector<1x128xf32>
      %731 = arith.maximumf %728, %730 : vector<1x128xf32>
      %732 = arith.maximumf %726, %731 : vector<1x128xf32>
      %733 = vector.broadcast %607 : f32 to vector<1x128xf32>
      %734 = arith.addf %732, %733 : vector<1x128xf32>
      %cst_322 = arith.constant 0.000000e+00 : f32
      %735 = vector.broadcast %cst_322 : f32 to vector<1x128xf32>
      %736 = arith.maximumf %734, %735 : vector<1x128xf32>
      %737 = arith.index_cast %arg15 : i32 to index
      %c6 = arith.constant 6 : index
      %c0_323 = arith.constant 0 : index
      %738 = vector.load %arg14[%737, %c6, %c0_323] : memref<16x16x128xf32, #tpu.memory_space<vmem>>, vector<1x1x128xf32>
      %739 = vector.shape_cast %738 : vector<1x1x128xf32> to vector<1x128xf32>
      %740 = vector.shape_cast %736 : vector<1x128xf32> to vector<1x1x128xf32>
      tpu.vector_store %arg14[%737, %c6, %c0_323], %740 {strides = array<i32>} : memref<16x16x128xf32, #tpu.memory_space<vmem>>, vector<1x1x128xf32>,
      %741 = vector.extract_strided_slice %605 {offsets = [4, 2, 0], sizes = [1, 1, 128], strides = [1, 1, 1]} : vector<6x6x128xf32> to vector<1x1x128xf32>
      %742 = vector.shape_cast %741 : vector<1x1x128xf32> to vector<1x128xf32>
      %743 = vector.extract_strided_slice %605 {offsets = [4, 3, 0], sizes = [1, 1, 128], strides = [1, 1, 1]} : vector<6x6x128xf32> to vector<1x1x128xf32>
      %744 = vector.shape_cast %743 : vector<1x1x128xf32> to vector<1x128xf32>
      %745 = arith.maximumf %742, %744 : vector<1x128xf32>
      %746 = vector.extract_strided_slice %605 {offsets = [5, 2, 0], sizes = [1, 1, 128], strides = [1, 1, 1]} : vector<6x6x128xf32> to vector<1x1x128xf32>
      %747 = vector.shape_cast %746 : vector<1x1x128xf32> to vector<1x128xf32>
      %748 = vector.extract_strided_slice %605 {offsets = [5, 3, 0], sizes = [1, 1, 128], strides = [1, 1, 1]} : vector<6x6x128xf32> to vector<1x1x128xf32>
      %749 = vector.shape_cast %748 : vector<1x1x128xf32> to vector<1x128xf32>
      %750 = arith.maximumf %747, %749 : vector<1x128xf32>
      %751 = arith.maximumf %745, %750 : vector<1x128xf32>
      %752 = vector.broadcast %607 : f32 to vector<1x128xf32>
      %753 = arith.addf %751, %752 : vector<1x128xf32>
      %cst_324 = arith.constant 0.000000e+00 : f32
      %754 = vector.broadcast %cst_324 : f32 to vector<1x128xf32>
      %755 = arith.maximumf %753, %754 : vector<1x128xf32>
      %756 = arith.index_cast %arg15 : i32 to index
      %c7 = arith.constant 7 : index
      %c0_325 = arith.constant 0 : index
      %757 = vector.load %arg14[%756, %c7, %c0_325] : memref<16x16x128xf32, #tpu.memory_space<vmem>>, vector<1x1x128xf32>
      %758 = vector.shape_cast %757 : vector<1x1x128xf32> to vector<1x128xf32>
      %759 = vector.shape_cast %755 : vector<1x128xf32> to vector<1x1x128xf32>
      tpu.vector_store %arg14[%756, %c7, %c0_325], %759 {strides = array<i32>} : memref<16x16x128xf32, #tpu.memory_space<vmem>>, vector<1x1x128xf32>,
      %760 = vector.extract_strided_slice %605 {offsets = [4, 4, 0], sizes = [1, 1, 128], strides = [1, 1, 1]} : vector<6x6x128xf32> to vector<1x1x128xf32>
      %761 = vector.shape_cast %760 : vector<1x1x128xf32> to vector<1x128xf32>
      %762 = vector.extract_strided_slice %605 {offsets = [4, 5, 0], sizes = [1, 1, 128], strides = [1, 1, 1]} : vector<6x6x128xf32> to vector<1x1x128xf32>
      %763 = vector.shape_cast %762 : vector<1x1x128xf32> to vector<1x128xf32>
      %764 = arith.maximumf %761, %763 : vector<1x128xf32>
      %765 = vector.extract_strided_slice %605 {offsets = [5, 4, 0], sizes = [1, 1, 128], strides = [1, 1, 1]} : vector<6x6x128xf32> to vector<1x1x128xf32>
      %766 = vector.shape_cast %765 : vector<1x1x128xf32> to vector<1x128xf32>
      %767 = vector.extract_strided_slice %605 {offsets = [5, 5, 0], sizes = [1, 1, 128], strides = [1, 1, 1]} : vector<6x6x128xf32> to vector<1x1x128xf32>
      %768 = vector.shape_cast %767 : vector<1x1x128xf32> to vector<1x128xf32>
      %769 = arith.maximumf %766, %768 : vector<1x128xf32>
      %770 = arith.maximumf %764, %769 : vector<1x128xf32>
      %771 = vector.broadcast %607 : f32 to vector<1x128xf32>
      %772 = arith.addf %770, %771 : vector<1x128xf32>
      %cst_326 = arith.constant 0.000000e+00 : f32
      %773 = vector.broadcast %cst_326 : f32 to vector<1x128xf32>
      %774 = arith.maximumf %772, %773 : vector<1x128xf32>
      %775 = arith.index_cast %arg15 : i32 to index
      %c8 = arith.constant 8 : index
      %c0_327 = arith.constant 0 : index
      %776 = vector.load %arg14[%775, %c8, %c0_327] : memref<16x16x128xf32, #tpu.memory_space<vmem>>, vector<1x1x128xf32>
      %777 = vector.shape_cast %776 : vector<1x1x128xf32> to vector<1x128xf32>
      %778 = vector.shape_cast %774 : vector<1x128xf32> to vector<1x1x128xf32>
      tpu.vector_store %arg14[%775, %c8, %c0_327], %778 {strides = array<i32>} : memref<16x16x128xf32, #tpu.memory_space<vmem>>, vector<1x1x128xf32>,
    }
    %c16_i32_5 = arith.constant 16 : i32
    %c0_6 = arith.constant 0 : index
    %c0_7 = arith.constant 0 : index
    %c0_8 = arith.constant 0 : index
    %4 = vector.load %arg14[%c0_6, %c0_7, %c0_8] : memref<16x16x128xf32, #tpu.memory_space<vmem>>, vector<16x16x128xf32>
    %5 = vector.shape_cast %4 : vector<16x16x128xf32> to vector<256x128xf32>
    %6 = arith.truncf %5 : vector<256x128xf32> to vector<256x128xbf16>
    %c0_9 = arith.constant 0 : index
    %c0_10 = arith.constant 0 : index
    %7 = vector.load %arg6[%c0_9, %c0_10] : memref<128x256xbf16, #tpu.memory_space<vmem>>, vector<128x256xbf16>
    %cst_11 = arith.constant dense<0.000000e+00> : vector<128x128xf32>
    %8 = tpu.matmul %7, %6, %cst_11 {dimension_numbers = #tpu.dot_dimension_numbers<[1], [0], [0], [1], [0, 0, 1, 1], [], []>} : vector<128x256xbf16>, vector<256x128xbf16>, vector<128x128xf32> -> vector<128x128xf32>
    %c0_12 = arith.constant 0 : index
    %c0_13 = arith.constant 0 : index
    %9 = vector.load %arg7[%c0_12, %c0_13] : memref<128x1xf32, #tpu.memory_space<vmem>>, vector<128x1xf32>
    %10 = vector.broadcast %9 : vector<128x1xf32> to vector<128x128xf32>
    %11 = arith.addf %8, %10 : vector<128x128xf32>
    %cst_14 = arith.constant 0.000000e+00 : f32
    %12 = vector.broadcast %cst_14 : f32 to vector<128x128xf32>
    %13 = arith.maximumf %11, %12 : vector<128x128xf32>
    %c0_15 = arith.constant 0 : index
    %c0_16 = arith.constant 0 : index
    %14 = vector.load %arg8[%c0_15, %c0_16] : memref<128x128xbf16, #tpu.memory_space<vmem>>, vector<128x128xbf16>
    %15 = arith.truncf %13 : vector<128x128xf32> to vector<128x128xbf16>
    %cst_17 = arith.constant dense<0.000000e+00> : vector<128x128xf32>
    %16 = tpu.matmul %14, %15, %cst_17 {dimension_numbers = #tpu.dot_dimension_numbers<[1], [0], [0], [1], [0, 0, 1, 1], [], []>} : vector<128x128xbf16>, vector<128x128xbf16>, vector<128x128xf32> -> vector<128x128xf32>
    %c0_18 = arith.constant 0 : index
    %c0_19 = arith.constant 0 : index
    %17 = vector.load %arg9[%c0_18, %c0_19] : memref<128x1xf32, #tpu.memory_space<vmem>>, vector<128x1xf32>
    %18 = vector.broadcast %17 : vector<128x1xf32> to vector<128x128xf32>
    %19 = arith.addf %16, %18 : vector<128x128xf32>
    %cst_20 = arith.constant 0.000000e+00 : f32
    %20 = vector.broadcast %cst_20 : f32 to vector<128x128xf32>
    %21 = arith.maximumf %19, %20 : vector<128x128xf32>
    %c0_21 = arith.constant 0 : index
    %c0_22 = arith.constant 0 : index
    %22 = vector.load %arg10[%c0_21, %c0_22] : memref<128x128xbf16, #tpu.memory_space<vmem>>, vector<128x128xbf16>
    %23 = arith.truncf %21 : vector<128x128xf32> to vector<128x128xbf16>
    %cst_23 = arith.constant dense<0.000000e+00> : vector<128x128xf32>
    %24 = tpu.matmul %22, %23, %cst_23 {dimension_numbers = #tpu.dot_dimension_numbers<[1], [0], [0], [1], [0, 0, 1, 1], [], []>} : vector<128x128xbf16>, vector<128x128xbf16>, vector<128x128xf32> -> vector<128x128xf32>
    %c0_24 = arith.constant 0 : index
    %c0_25 = arith.constant 0 : index
    %25 = vector.load %arg11[%c0_24, %c0_25] : memref<128x1xf32, #tpu.memory_space<vmem>>, vector<128x1xf32>
    %26 = vector.broadcast %25 : vector<128x1xf32> to vector<128x128xf32>
    %27 = arith.addf %24, %26 : vector<128x128xf32>
    %c0_26 = arith.constant 0 : index
    %c0_27 = arith.constant 0 : index
    %28 = vector.load %arg12[%c0_26, %c0_27] : memref<128x128xf32, #tpu.memory_space<vmem>>, vector<128x128xf32>
    tpu.vector_store %arg12[%c0_26, %c0_27], %27 {strides = array<i32>} : memref<128x128xf32, #tpu.memory_space<vmem>>, vector<128x128xf32>,
    return
  }
  func.func @transform_0(%arg0: i32) -> (i32, i32, i32, i32) {
    %c0_i32 = arith.constant 0 : i32
    %c0_i32_0 = arith.constant 0 : i32
    %c0_i32_1 = arith.constant 0 : i32
    %c0_i32_2 = arith.constant 0 : i32
    return %c0_i32, %c0_i32_0, %c0_i32_1, %arg0 : i32, i32, i32, i32
  }
  func.func @transform_1(%arg0: i32) -> i32 {
    %c0_i32 = arith.constant 0 : i32
    %c0_i32_0 = arith.constant 0 : i32
    return %c0_i32 : i32
  }
  func.func @transform_2(%arg0: i32) -> i32 {
    %c0_i32 = arith.constant 0 : i32
    %c0_i32_0 = arith.constant 0 : i32
    return %c0_i32 : i32
  }
  func.func @transform_3(%arg0: i32) -> i32 {
    %c0_i32 = arith.constant 0 : i32
    %c0_i32_0 = arith.constant 0 : i32
    return %c0_i32 : i32
  }
  func.func @transform_4(%arg0: i32) -> i32 {
    %c0_i32 = arith.constant 0 : i32
    %c0_i32_0 = arith.constant 0 : i32
    return %c0_i32 : i32
  }
  func.func @transform_5(%arg0: i32) -> (i32, i32) {
    %c0_i32 = arith.constant 0 : i32
    %c0_i32_0 = arith.constant 0 : i32
    %c0_i32_1 = arith.constant 0 : i32
    return %c0_i32, %c0_i32_0 : i32, i32
  }
  func.func @transform_6(%arg0: i32) -> (i32, i32) {
    %c0_i32 = arith.constant 0 : i32
    %c0_i32_0 = arith.constant 0 : i32
    %c0_i32_1 = arith.constant 0 : i32
    return %c0_i32, %c0_i32_0 : i32, i32
  }
  func.func @transform_7(%arg0: i32) -> (i32, i32) {
    %c0_i32 = arith.constant 0 : i32
    %c0_i32_0 = arith.constant 0 : i32
    %c0_i32_1 = arith.constant 0 : i32
    return %c0_i32, %c0_i32_0 : i32, i32
  }
  func.func @transform_8(%arg0: i32) -> (i32, i32) {
    %c0_i32 = arith.constant 0 : i32
    %c0_i32_0 = arith.constant 0 : i32
    %c0_i32_1 = arith.constant 0 : i32
    return %c0_i32, %c0_i32_0 : i32, i32
  }
  func.func @transform_9(%arg0: i32) -> (i32, i32) {
    %c0_i32 = arith.constant 0 : i32
    %c0_i32_0 = arith.constant 0 : i32
    %c0_i32_1 = arith.constant 0 : i32
    return %c0_i32, %c0_i32_0 : i32, i32
  }
  func.func @transform_10(%arg0: i32) -> (i32, i32) {
    %c0_i32 = arith.constant 0 : i32
    %c0_i32_0 = arith.constant 0 : i32
    %c0_i32_1 = arith.constant 0 : i32
    return %c0_i32, %c0_i32_0 : i32, i32
  }
  func.func @transform_11(%arg0: i32) -> (i32, i32) {
    %c0_i32 = arith.constant 0 : i32
    %c0_i32_0 = arith.constant 0 : i32
    return %c0_i32, %arg0 : i32, i32
  }
}

</mosaic_0001>

<bundles_post_ra>
// kernel: net_forward.1
= control target key start
LH: loop header
LB: loop body
LE: loop exit
PB: predicated region body
PF: predicated region fallthrough
CT: control target
= control target key end

     0   :  { %16 = vsyncpa [#allocation5], 0  ;;  %s12089_s0 = inlined_call_operand.vmem [shape: f32[3,18,18,128], index: 0, kind: input, shape index: {}]   ;;  %s12090_s1 = inlined_call_operand.vmem [shape: f32[162], index: 1, kind: input, shape index: {}]   ;;  %s12091_s2 = inlined_call_operand.vmem [shape: f32[6], index: 2, kind: input, shape index: {}]   ;;  %s12092_s3 = inlined_call_operand.vmem [shape: f32[864], index: 3, kind: input, shape index: {}]   ;;  %s12093_s4 = inlined_call_operand.vmem [shape: f32[16], index: 4, kind: input, shape index: {}]   ;;  %s12094_s5 = inlined_call_operand.vmem [shape: bf16[128,256], index: 5, kind: input, shape index: {}]   ;;  %s12095_s6 = inlined_call_operand.vmem [shape: f32[128,1], index: 6, kind: input, shape index: {}]   ;;  %s12096_s7 = inlined_call_operand.vmem [shape: bf16[128,128], index: 7, kind: input, shape index: {}]   ;;  %s12097_s8 = inlined_call_operand.vmem [shape: f32[128,1], index: 8, kind: input, shape index: {}]   ;;  %s12098_s9 = inlined_call_operand.vmem [shape: bf16[128,128], index: 9, kind: input, shape index: {}]   ;;  %s12099_s10 = inlined_call_operand.vmem [shape: f32[128,1], index: 10, kind: input, shape index: {}]   ;;  %s12100_s11 = inlined_call_operand.vmem [shape: f32[128,128], index: 11, kind: output, shape index: {}]  }
   0x1   :  { %17 = vsyncpa [#allocation7], 0  ;;  %s37_s19 = sshll.u32 %s12091_s2, 4  ;;  %s38_s19 = int_to_ptr.vmem [resolvable:$true] %s37_s19 }
   0x2   :  { %18 = vsyncpa [#allocation10], 0  ;;  %s27_s22 = sshll.u32 %s12090_s1, 4  ;;  %s5204_s23 = scalar_lea.vmem %s38_s19, 16  ;;  %s28_s22 = int_to_ptr.vmem [resolvable:$true] %s27_s22 }
   0x3   :  { %p5205_p0 = scmp.ne.s32.totalorder %s38_s19, %s5204_s23  ;;  %p5209_p1 = scmp.lt.s32.totalorder %s38_s19, %s38_s19 }
   0x4   :  { %p5210_p2 = scmp.lt.s32.totalorder %s5204_s23, %s5204_s23 }
   0x6   :  { %p5211_p3 = por %p5210_p2, %p5209_p1 }
   0x8   :  { %p5212_p4 = pnand %p5211_p3, %p5205_p0 }
   0xa   :  { %5215 = shalt.err (!%p5212_p4)
}
   0xb   :  { %s5274_s24 = smov [#allocation6]   ;;  %s5216_s25 = scalar_lea.vmem %s28_s22, 32 }
   0xc   :  { %40 = dma.vmem_to_smem %s38_s19, 16, %s5274_s24, [#allocation7]  }
   0xd   :  { %p5217_p5 = scmp.ne.s32.totalorder %s28_s22, %s5216_s25  ;;  %p5221_p6 = scmp.lt.s32.totalorder %s28_s22, %s28_s22 }
   0xe   :  { %p5222_p7 = scmp.lt.s32.totalorder %s5216_s25, %s5216_s25 }
  0x10   :  { %p5223_p8 = por %p5222_p7, %p5221_p6 }
  0x12   :  { %p5224_p9 = pnand %p5223_p8, %p5217_p5 }
  0x14   :  { %5227 = shalt.err (!%p5224_p9)
}
  0x15   :  { %s5275_s2 = smov [#allocation4]   ;;  %s47_s27 = sshll.u32 %s12092_s3, 4  ;;  %s48_s27 = int_to_ptr.vmem [resolvable:$true] %s47_s27 }
  0x16   :  { %30 = dma.vmem_to_smem %s28_s22, 32, %s5275_s2, [#allocation5]  }
  0x17   :  { %s57_s30 = sshll.u32 %s12093_s4, 4  ;;  %s5228_s12 = scalar_lea.vmem %s48_s27, 112  ;;  %s58_s30 = int_to_ptr.vmem [resolvable:$true] %s57_s30 }
  0x18   :  { %p5229_p10 = scmp.ne.s32.totalorder %s48_s27, %s5228_s12  ;;  %s5232_s13 = scalar_lea.vmem %s48_s27, 128 }
  0x19   :  { %p5233_p11 = scmp.lt.s32.totalorder %s48_s27, %s48_s27  ;;  %p5234_p12 = scmp.lt.s32.totalorder %s5232_s13, %s5228_s12 }
  0x1b   :  { %p5235_p13 = por %p5234_p12, %p5233_p11 }
  0x1d   :  { %p5236_p0 = pnand %p5235_p13, %p5229_p10 }
  0x1f   :  { %5239 = shalt.err (!%p5236_p0)
}
  0x20   :  { %s5276_s14 = smov [#allocation8]   ;;  %s5240_s15 = scalar_lea.vmem %s58_s30, 16 }
  0x21   :  { %50 = dma.vmem_to_smem %s48_s27, 112, %s5276_s14, [#allocation7]  }
  0x22   :  { %p5241_p1 = scmp.ne.s32.totalorder %s58_s30, %s5240_s15  ;;  %p5245_p2 = scmp.lt.s32.totalorder %s58_s30, %s58_s30 }
  0x23   :  { %p5246_p3 = scmp.lt.s32.totalorder %s5240_s15, %s5240_s15 }
  0x25   :  { %p5247_p4 = por %p5246_p3, %p5245_p2 }
  0x27   :  { %p5248_p5 = pnand %p5247_p4, %p5241_p1 }
  0x29   :  { %5251 = shalt.err (!%p5248_p5)
}
  0x2a   :  { %s5277_s3 = smov [#allocation9]  }
  0x2b   :  { %60 = dma.vmem_to_smem %s58_s30, 16, %s5277_s3, [#allocation10]  }
  0x2c   :  { %5260 = dma.done.wait [#allocation5], 32  }
  0x2d   :  { %5261 = vsyncadd [#allocation5], 4294967264 }
  0x2e   :  { %5262 = dma.done.wait [#allocation7], 128  }
  0x2f   :  { %5263 = vsyncadd [#allocation7], 4294967168 }
  0x30   :  { %5264 = dma.done.wait [#allocation10], 16  }
  0x31   :  { %5265 = vsyncadd [#allocation10], 4294967280 }
  0x32   :  { %85 = sfence }
  0x33   :  { %v5278_v0 = vmov 0.0   ;;  %s5352_s4 = smov 0  }
  0x34   :  { %87 = vst [vmem:[#allocation3] sm:$0xff] %v5278_v0  ;;  %88 = vst [vmem:[#allocation3 + $0x8] sm:$0xff] %v5278_v0 }
  0x35   :  { %89 = vst [vmem:[#allocation3 + $0x10] sm:$0xff] %v5278_v0  ;;  %90 = vst [vmem:[#allocation3 + $0x18] sm:$0xff] %v5278_v0 }
  0x36   :  { %91 = vst [vmem:[#allocation3 + $0x20] sm:$0xff] %v5278_v0  ;;  %92 = vst [vmem:[#allocation3 + $0x28] sm:$0xff] %v5278_v0 }
  0x37   :  { %93 = vst [vmem:[#allocation3 + $0x30] sm:$0xff] %v5278_v0  ;;  %94 = vst [vmem:[#allocation3 + $0x38] sm:$0xff] %v5278_v0 }
  0x38   :  { %95 = vst [vmem:[#allocation3 + $0x40] sm:$0xff] %v5278_v0  ;;  %96 = vst [vmem:[#allocation3 + $0x48] sm:$0xff] %v5278_v0 }
  0x39   :  { %97 = vst [vmem:[#allocation3 + $0x50] sm:$0xff] %v5278_v0  ;;  %98 = vst [vmem:[#allocation3 + $0x58] sm:$0xff] %v5278_v0 }
  0x3a   :  { %99 = vst [vmem:[#allocation3 + $0x60] sm:$0xff] %v5278_v0  ;;  %100 = vst [vmem:[#allocation3 + $0x68] sm:$0xff] %v5278_v0 }
  0x3b   :  { %101 = vst [vmem:[#allocation3 + $0x70] sm:$0xff] %v5278_v0  ;;  %102 = vst [vmem:[#allocation3 + $0x78] sm:$0xff] %v5278_v0 }
  0x3c   :  { %103 = vst [vmem:[#allocation3 + $0x80] sm:$0xff] %v5278_v0  ;;  %104 = vst [vmem:[#allocation3 + $0x88] sm:$0xff] %v5278_v0 }
  0x3d   :  { %105 = vst [vmem:[#allocation3 + $0x90] sm:$0xff] %v5278_v0  ;;  %106 = vst [vmem:[#allocation3 + $0x98] sm:$0xff] %v5278_v0 }
  0x3e   :  { %107 = vst [vmem:[#allocation3 + $0xa0] sm:$0xff] %v5278_v0  ;;  %108 = vst [vmem:[#allocation3 + $0xa8] sm:$0xff] %v5278_v0 }
  0x3f   :  { %109 = vst [vmem:[#allocation3 + $0xb0] sm:$0xff] %v5278_v0  ;;  %110 = vst [vmem:[#allocation3 + $0xb8] sm:$0xff] %v5278_v0 }
  0x40   :  { %111 = vst [vmem:[#allocation3 + $0xc0] sm:$0xff] %v5278_v0  ;;  %112 = vst [vmem:[#allocation3 + $0xc8] sm:$0xff] %v5278_v0 }
  0x41   :  { %113 = vst [vmem:[#allocation3 + $0xd0] sm:$0xff] %v5278_v0  ;;  %114 = vst [vmem:[#allocation3 + $0xd8] sm:$0xff] %v5278_v0 }
  0x42   :  { %115 = vst [vmem:[#allocation3 + $0xe0] sm:$0xff] %v5278_v0  ;;  %116 = vst [vmem:[#allocation3 + $0xe8] sm:$0xff] %v5278_v0 }
  0x43   :  { %117 = vst [vmem:[#allocation3 + $0xf0] sm:$0xff] %v5278_v0  ;;  %118 = vst [vmem:[#allocation3 + $0xf8] sm:$0xff] %v5278_v0 }
  0x44 LB: > { %s5358_s16 = smul.u32 27, %s5268_s4  ;;  %v125_v1 = vld [vmem:[%s12089_s0] sm:$0xff]  ;;  %v126_v2 = vld [vmem:[%s12089_s0 + $0x8] sm:$0xff]  ;;  %v5370_v3 = vld [vmem:[%s12089_s0 + $0x18] sm:$0xff]  ;;  %s11033_s30 = sld [smem:[#allocation6 + %s5268_s4]]  ;;  %vm2647_vm0 = vcmask 1041409   ;;  %s5268_s4 = sphi %s5352_s4, %s124_s4  }
  0x45   : > { %v5375_v4 = vld [vmem:[%s12089_s0 + $0x20] sm:$0xff]  ;;  %v5380_v5 = vld [vmem:[%s12089_s0 + $0x30] sm:$0xff]  ;;  %v5385_v6 = vld [vmem:[%s12089_s0 + $0x38] sm:$0xff]  ;;  %vm2650_vm1 = vcmask 1042434   ;;  %vm2653_vm2 = vcmask 1043459   ;;  %vm2656_vm3 = vcmask 1044484  }
  0x46   : > { %s162_s17 = sld [smem:[#allocation4 + %s5358_s16]]  ;;  %12619 = vst [vmem:[#allocation14_spill] sm:$0xff] %v5380_v5  ;;  %12620 = vst [vmem:[#allocation15_spill] sm:$0xff] %v5385_v6  ;;  %s228_s28 = sadd.s32 3, %s5358_s16  ;;  %v5391_v7 = vld [vmem:[%s12089_s0 + $0x48] sm:$0xff]  ;;  %v5396_v8 = vld [vmem:[%s12089_s0 + $0x50] sm:$0xff] }
  0x47   : > { %12621 = vst [vmem:[#allocation16_spill] sm:$0xff] %v5391_v7  ;;  %12622 = vst [vmem:[#allocation17_spill] sm:$0xff] %v5396_v8  ;;  %v5401_v9 = vld [vmem:[%s12089_s0 + $0x60] sm:$0xff]  ;;  %s295_s3 = sadd.s32 6, %s5358_s16  ;;  %v5407_v10 = vld [vmem:[%s12089_s0 + $0x68] sm:$0xff]  ;;  %s5434_s29 = sld [smem:[#allocation4 + %s228_s28]] }
  0x48   : > { %12623 = vst [vmem:[#allocation18_spill] sm:$0xff] %v5401_v9  ;;  %12624 = vst [vmem:[#allocation19_spill] sm:$0xff] %v5407_v10  ;;  %v5412_v11 = vld [vmem:[%s12089_s0 + $0x78] sm:$0xff]  ;;  %v5417_v12 = vld [vmem:[%s12089_s0 + $0x80] sm:$0xff]  ;;  %s5458_s28 = sld [smem:[#allocation4 + %s295_s3]]  ;;  %s465_s13 = sadd.s32 4, %s5358_s16 }
  0x49   : > { %12625 = vst [vmem:[#allocation20_spill] sm:$0xff] %v5412_v11  ;;  %12626 = vst [vmem:[#allocation21_spill] sm:$0xff] %v5417_v12  ;;  %v5422_v14 = vld [vmem:[%s12089_s0 + $0x90] sm:$0xff]  ;;  %v5427_v15 = vld [vmem:[%s12089_s0 + $0x98] sm:$0xff]  ;;  %s532_s14 = sadd.s32 7, %s5358_s16  ;;  %s635_s15 = sadd.s32 2, %s5358_s16 }
  0x4a   : > { %12627 = vst [vmem:[#allocation22_spill] sm:$0xff] %v5422_v14  ;;  %12628 = vst [vmem:[#allocation23_spill] sm:$0xff] %v5427_v15  ;;  %v5432_v16 = vld [vmem:[%s12089_s0 + $0xa8] sm:$0xff]  ;;  %v5439_v17 = vld [vmem:[%s12089_s0 + $0xb0] sm:$0xff]  ;;  %s5836_s19 = sld [smem:[#allocation4 + %s465_s13]]  ;;  %s702_s13 = sadd.s32 5, %s5358_s16 }
  0x4b   : > { %12629 = vst [vmem:[#allocation24_spill] sm:$0xff] %v5432_v16  ;;  %12630 = vst [vmem:[#allocation25_spill] sm:$0xff] %v5439_v17  ;;  %v5444_v18 = vld [vmem:[%s12089_s0 + $0xc0] sm:$0xff]  ;;  %v5449_v19 = vld [vmem:[%s12089_s0 + $0xc8] sm:$0xff]  ;;  %s5850_s20 = sld [smem:[#allocation4 + %s532_s14]]  ;;  %s769_s14 = sadd.s32 8, %s5358_s16 }
  0x4c   : > { %v163_v13 = vstv %s162_s17  ;;  %12631 = vst [vmem:[#allocation26_spill] sm:$0xff] %v5444_v18  ;;  %12632 = vst [vmem:[#allocation27_spill] sm:$0xff] %v5449_v19  ;;  %v5463_v23 = vld [vmem:[%s12089_s0 + $0xd8] sm:$0xff]  ;;  %v5468_v24 = vld [vmem:[%s12089_s0 + $0xe0] sm:$0xff]  ;;  %s398_s17 = sadd.s32 1, %s5358_s16  ;;  %s5852_s21 = sld [smem:[#allocation4 + %s635_s15]] }
  0x4d   : > { %v5451_v20 = vmul.f32 %v163_v13, %v125_v1  ;;  %v5453_v21 = vmul.f32 %v163_v13, %v126_v2  ;;  %v5456_v22 = vmul.f32 %v163_v13, %v5370_v3  ;;  %12633 = vst [vmem:[#allocation28_spill] sm:$0xff] %v5463_v23  ;;  %12634 = vst [vmem:[#allocation29_spill] sm:$0xff] %v5468_v24  ;;  %v5473_v25 = vld [vmem:[%s12089_s0 + $0xf0] sm:$0xff]  ;;  %v5490_v30 = vld [vmem:[%s12089_s0 + $0xf8] sm:$0xff]  ;;  %v230_v0 = vstv %s5434_s29  ;;  %s5834_s18 = sld [smem:[#allocation4 + %s398_s17]]  ;;  %s873_s15 = sadd.s32 9, %s5358_s16 }
  0x4e   : > { %12635 = vst [vmem:[#allocation30_spill] sm:$0xff] %v5473_v25  ;;  %v5476_v26 = vmul.f32 %v163_v13, %v5375_v4  ;;  %v5479_v27 = vmul.f32 %v163_v13, %v5380_v5  ;;  %v5482_v28 = vmul.f32 %v163_v13, %v5385_v6  ;;  %v5485_v29 = vmul.f32 %v163_v13, %v5391_v7  ;;  %v5495_v31 = vld [vmem:[%s12089_s0 + $0x108] sm:$0xff]  ;;  %v5500_v32 = vld [vmem:[%s12089_s0 + $0x110] sm:$0xff]  ;;  %v5517_v37 = vld [vmem:[%s12089_s0 + $0x120] sm:$0xff]  ;;  %s940_s22 = sadd.s32 12, %s5358_s16  ;;  %s6786_s23 = sld [smem:[#allocation4 + %s702_s13]] }
  0x4f   : > { %12636 = vst [vmem:[#allocation31_spill] sm:$0xff] %v5490_v30  ;;  %12637 = vst [vmem:[#allocation32_spill] sm:$0xff] %v5495_v31  ;;  %v5503_v33 = vmul.f32 %v163_v13, %v5396_v8  ;;  %v5506_v34 = vmul.f32 %v163_v13, %v5401_v9  ;;  %v5509_v35 = vmul.f32 %v163_v13, %v5407_v10  ;;  %v5522_v38 = vld [vmem:[%s12089_s0 + $0x128] sm:$0xff]  ;;  %v5527_v39 = vld [vmem:[%s12089_s0 + $0x138] sm:$0xff]  ;;  %s6788_s3 = sld [smem:[#allocation4 + %s769_s14]]  ;;  %s1007_s13 = sadd.s32 15, %s5358_s16 }
  0x50   : > { %12638 = vst [vmem:[#allocation33_spill] sm:$0xff] %v5500_v32  ;;  %v5512_v36 = vmul.f32 %v163_v13, %v5412_v11  ;;  %12639 = vst [vmem:[#allocation34_spill] sm:$0xff] %v5517_v37  ;;  %v5530_v40 = vmul.f32 %v163_v13, %v5417_v12  ;;  %v5533_v41 = vmul.f32 %v163_v13, %v5422_v14  ;;  %v5544_v44 = vld [vmem:[%s12089_s0 + $0x140] sm:$0xff]  ;;  %v5549_v45 = vld [vmem:[%s12089_s0 + $0x150] sm:$0xff]  ;;  %s6802_s24 = sld [smem:[#allocation4 + %s873_s15]]  ;;  %s1110_s14 = sadd.s32 10, %s5358_s16 }
  0x51   : > { %12640 = vst [vmem:[#allocation35_spill] sm:$0xff] %v5522_v38  ;;  %v5536_v42 = vmul.f32 %v163_v13, %v5427_v15  ;;  %v5539_v43 = vmul.f32 %v163_v13, %v5432_v16  ;;  %12641 = vst [vmem:[#allocation36_spill] sm:$0xff] %v5544_v44  ;;  %v5554_v46 = vld [vmem:[%s12089_s0 + $0x158] sm:$0xff]  ;;  %v5557_v47 = vmul.f32 %v163_v13, %v5439_v17  ;;  %v5571_v51 = vld [vmem:[%s12089_s0 + $0x168] sm:$0xff]  ;;  %s1177_s15 = sadd.s32 13, %s5358_s16  ;;  %s1889_s25 = sadd.s32 22, %s5358_s16 }
  0x52   : > { %12642 = vst [vmem:[#allocation37_spill] sm:$0xff] %v5549_v45  ;;  %v5560_v48 = vmul.f32 %v163_v13, %v5444_v18  ;;  %v5563_v49 = vmul.f32 %v163_v13, %v5449_v19  ;;  %v5566_v50 = vmul.f32 %v163_v13, %v5463_v23  ;;  %12643 = vst [vmem:[#allocation38_spill] sm:$0xff] %v5571_v51  ;;  %v5576_v52 = vld [vmem:[%s12089_s0 + $0x170] sm:$0xff]  ;;  %vm2659_vm4 = vcmask 1045509   ;;  %s4946_s12 = sshll.u32 %s5268_s4, 6  ;;  %s124_s4 = sadd.s32 1, %s5268_s4  }
  0x53   : > { %12644 = vst [vmem:[#allocation39_spill] sm:$0xff] %v5576_v52  ;;  %v5579_v53 = vmul.f32 %v163_v13, %v5468_v24  ;;  %v5582_v54 = vmul.f32 %v163_v13, %v5473_v25  ;;  %v5585_v55 = vmul.f32 %v163_v13, %v5490_v30  ;;  %v5588_v56 = vmul.f32 %v163_v13, %v5495_v31  ;;  %s11447_s17 = scalar_lea.vmem [#allocation2], %s4946_s12  ;;  %p121_p6 = scmp.ge.s32.totalorder %s124_s4, 6  }
  0x54   : > { %v5591_v57 = vmul.f32 %v163_v13, %v5500_v32  ;;  %v5594_v58 = vmul.f32 %v163_v13, %v5517_v37  ;;  %v5597_v59 = vmul.f32 %v163_v13, %v5522_v38  ;;  %v5600_v60 = vmul.f32 %v163_v13, %v5527_v39 }
  0x55   : > { %12645 = vst [vmem:[#allocation40_spill] sm:$0xff] %v5585_v55  ;;  %12646 = vst [vmem:[#allocation41_spill] sm:$0xff] %v5588_v56  ;;  %v5603_v61 = vmul.f32 %v163_v13, %v5544_v44  ;;  %v5606_v62 = vmul.f32 %v163_v13, %v5549_v45  ;;  %v5609_v63 = vmul.f32 %v163_v13, %v5554_v46  ;;  %vm2662_vm5 = vcmask 1046534  }
  0x56   : > { %12647 = vst [vmem:[#allocation42_spill] sm:$0xff] %v5591_v57  ;;  %12648 = vst [vmem:[#allocation43_spill] sm:$0xff] %v5594_v58  ;;  %v5613_v1 = vmul.f32 %v163_v13, %v5571_v51  ;;  %v5616_v2 = vmul.f32 %v163_v13, %v5576_v52  ;;  %v5620_v58 = vstv %s5458_s28  ;;  %v235_v57 = vmul.f32 %v230_v0, %v5391_v7 }
  0x57   : > { %12649 = vst [vmem:[#allocation44_spill] sm:$0xff] %v5597_v59  ;;  %12650 = vst [vmem:[#allocation45_spill] sm:$0xff] %v5600_v60  ;;  %v231_v59 = vmul.f32 %v230_v0, %v5370_v3  ;;  %v232_v60 = vmul.f32 %v230_v0, %v5375_v4  ;;  %v237_v56 = vmul.f32 %v230_v0, %v5401_v9  ;;  %vm2665_vm6 = vcmask 1047559  }
  0x58   : > { %12651 = vst [vmem:[#allocation46_spill] sm:$0xff] %v5603_v61  ;;  %12652 = vst [vmem:[#allocation47_spill] sm:$0xff] %v5606_v62  ;;  %v233_v61 = vmul.f32 %v230_v0, %v5380_v5  ;;  %v234_v62 = vmul.f32 %v230_v0, %v5385_v6  ;;  %v239_v13 = vmul.f32 %v230_v0, %v5412_v11  ;;  %v5641_v11 = vld [vmem:[%s12089_s0 + $0x180] sm:$0xff] }
  0x59   : > { %12653 = vst [vmem:[#allocation48_spill] sm:$0xff] %v5609_v63  ;;  %12654 = vst [vmem:[#allocation49_spill] sm:$0xff] %v5613_v1  ;;  %v236_v63 = vmul.f32 %v230_v0, %v5396_v8  ;;  %v238_v1 = vmul.f32 %v230_v0, %v5407_v10  ;;  %v240_v3 = vmul.f32 %v230_v0, %v5417_v12 }
  0x5a   : > { %12655 = vst [vmem:[#allocation50_spill] sm:$0xff] %v5616_v2  ;;  %12656 = vst [vmem:[#allocation51_spill] sm:$0xff] %v5620_v58  ;;  %v241_v58 = vmul.f32 %v230_v0, %v5422_v14  ;;  %v242_v4 = vmul.f32 %v230_v0, %v5427_v15  ;;  %v243_v5 = vmul.f32 %v230_v0, %v5432_v16  ;;  %v5646_v14 = vld [vmem:[%s12089_s0 + $0x188] sm:$0xff] }
  0x5b   : > { %v244_v6 = vmul.f32 %v230_v0, %v5439_v17  ;;  %v245_v7 = vmul.f32 %v230_v0, %v5444_v18  ;;  %v246_v8 = vmul.f32 %v230_v0, %v5449_v19  ;;  %v247_v9 = vmul.f32 %v230_v0, %v5463_v23 }
  0x5c   : > { %v248_v16 = vmul.f32 %v230_v0, %v5468_v24  ;;  %v249_v17 = vmul.f32 %v230_v0, %v5473_v25  ;;  %v250_v18 = vmul.f32 %v230_v0, %v5490_v30  ;;  %v251_v19 = vmul.f32 %v230_v0, %v5495_v31 }
  0x5d   : > { %v252_v23 = vmul.f32 %v230_v0, %v5500_v32  ;;  %v253_v15 = vmul.f32 %v230_v0, %v5517_v37  ;;  %v254_v12 = vmul.f32 %v230_v0, %v5522_v38  ;;  %v255_v10 = vmul.f32 %v230_v0, %v5527_v39 }
  0x5e   : > { %v256_v2 = vmul.f32 %v230_v0, %v5544_v44  ;;  %v257_v55 = vmul.f32 %v230_v0, %v5549_v45  ;;  %v258_v24 = vmul.f32 %v230_v0, %v5554_v46  ;;  %v259_v25 = vmul.f32 %v230_v0, %v5571_v51 }
  0x5f   : > { %v260_v30 = vmul.f32 %v230_v0, %v5576_v52  ;;  %v261_v31 = vmul.f32 %v230_v0, %v5641_v11  ;;  %v262_v32 = vmul.f32 %v230_v0, %v5646_v14  ;;  %v5664_v37 = vadd.f32 %v231_v59, %v5451_v20 }
  0x60   : > { %v5667_v38 = vadd.f32 %v232_v60, %v5453_v21  ;;  %v5670_v44 = vadd.f32 %v233_v61, %v5456_v22  ;;  %v5673_v45 = vadd.f32 %v234_v62, %v5476_v26  ;;  %v5676_v51 = vadd.f32 %v235_v57, %v5479_v27 }
  0x61   : > { %v5679_v52 = vadd.f32 %v236_v63, %v5482_v28  ;;  %v5682_v0 = vadd.f32 %v237_v56, %v5485_v29  ;;  %v5685_v20 = vadd.f32 %v238_v1, %v5503_v33  ;;  %v5688_v21 = vadd.f32 %v239_v13, %v5506_v34  ;;  %v12678_v59 = vld [vmem:[#allocation51_spill] sm:$0xff] }
  0x62   : > { %v5691_v22 = vadd.f32 %v240_v3, %v5509_v35  ;;  %v5694_v26 = vadd.f32 %v241_v58, %v5512_v36  ;;  %v5697_v27 = vadd.f32 %v242_v4, %v5530_v40  ;;  %v5700_v28 = vadd.f32 %v243_v5, %v5533_v41  ;;  %v12677_v58 = vld [vmem:[#allocation14_spill] sm:$0xff]  ;;  %v12685_v3 = vld [vmem:[#allocation21_spill] sm:$0xff] }
  0x63   : > { %v5703_v29 = vadd.f32 %v244_v6, %v5536_v42  ;;  %v5706_v33 = vadd.f32 %v245_v7, %v5539_v43  ;;  %v5709_v34 = vadd.f32 %v246_v8, %v5557_v47  ;;  %v5712_v35 = vadd.f32 %v247_v9, %v5560_v48  ;;  %v12657_v7 = vld [vmem:[#allocation40_spill] sm:$0xff]  ;;  %v12658_v8 = vld [vmem:[#allocation41_spill] sm:$0xff]  ;;  %v12659_v9 = vld [vmem:[#allocation42_spill] sm:$0xff] }
  0x64   : > { %v5715_v36 = vadd.f32 %v248_v16, %v5563_v49  ;;  %v5718_v40 = vadd.f32 %v249_v17, %v5566_v50  ;;  %v5721_v5 = vadd.f32 %v250_v18, %v5579_v53  ;;  %v5724_v6 = vadd.f32 %v251_v19, %v5582_v54  ;;  %v12661_v16 = vld [vmem:[#allocation43_spill] sm:$0xff]  ;;  %v12663_v17 = vld [vmem:[#allocation44_spill] sm:$0xff]  ;;  %v12665_v18 = vld [vmem:[#allocation45_spill] sm:$0xff] }
  0x65   : > { %v5727_v41 = vadd.f32 %v252_v23, %v12657_v7  ;;  %v5730_v42 = vadd.f32 %v253_v15, %v12658_v8  ;;  %v5733_v43 = vadd.f32 %v254_v12, %v12659_v9  ;;  %v5736_v47 = vadd.f32 %v255_v10, %v12661_v16  ;;  %v12667_v19 = vld [vmem:[#allocation46_spill] sm:$0xff]  ;;  %v12669_v23 = vld [vmem:[#allocation47_spill] sm:$0xff]  ;;  %v12671_v15 = vld [vmem:[#allocation48_spill] sm:$0xff] }
  0x66   : > { %v5739_v48 = vadd.f32 %v256_v2, %v12663_v17  ;;  %v5742_v49 = vadd.f32 %v257_v55, %v12665_v18  ;;  %v5745_v50 = vadd.f32 %v258_v24, %v12667_v19  ;;  %v5748_v53 = vadd.f32 %v259_v25, %v12669_v23  ;;  %v12673_v12 = vld [vmem:[#allocation49_spill] sm:$0xff]  ;;  %v12675_v10 = vld [vmem:[#allocation50_spill] sm:$0xff]  ;;  %v12679_v55 = vld [vmem:[#allocation15_spill] sm:$0xff] }
  0x67   : > { %12660 = vst [vmem:[#allocation40_spill] sm:$0xff] %v5733_v43  ;;  %12662 = vst [vmem:[#allocation41_spill] sm:$0xff] %v5736_v47  ;;  %v5751_v54 = vadd.f32 %v260_v30, %v12671_v15  ;;  %v5754_v56 = vadd.f32 %v261_v31, %v12673_v12  ;;  %v5757_v57 = vadd.f32 %v262_v32, %v12675_v10  ;;  %v12680_v24 = vld [vmem:[#allocation16_spill] sm:$0xff]  ;;  %v12681_v25 = vld [vmem:[#allocation17_spill] sm:$0xff] }
  0x68   : > { %12664 = vst [vmem:[#allocation42_spill] sm:$0xff] %v5739_v48  ;;  %12666 = vst [vmem:[#allocation43_spill] sm:$0xff] %v5742_v49  ;;  %v298_v60 = vmul.f32 %v12678_v59, %v12677_v58  ;;  %v299_v61 = vmul.f32 %v12678_v59, %v12679_v55  ;;  %v300_v62 = vmul.f32 %v12678_v59, %v12680_v24  ;;  %v12682_v30 = vld [vmem:[#allocation18_spill] sm:$0xff]  ;;  %v12683_v31 = vld [vmem:[#allocation19_spill] sm:$0xff] }
  0x69   : > { %12668 = vst [vmem:[#allocation44_spill] sm:$0xff] %v5745_v50  ;;  %12670 = vst [vmem:[#allocation45_spill] sm:$0xff] %v5748_v53  ;;  %v301_v63 = vmul.f32 %v12678_v59, %v12681_v25  ;;  %v302_v1 = vmul.f32 %v12678_v59, %v12682_v30  ;;  %v303_v2 = vmul.f32 %v12678_v59, %v12683_v31  ;;  %v12684_v32 = vld [vmem:[#allocation20_spill] sm:$0xff]  ;;  %v12686_v7 = vld [vmem:[#allocation22_spill] sm:$0xff] }
  0x6a   : > { %12672 = vst [vmem:[#allocation46_spill] sm:$0xff] %v5751_v54  ;;  %12674 = vst [vmem:[#allocation47_spill] sm:$0xff] %v5754_v56  ;;  %v304_v13 = vmul.f32 %v12678_v59, %v12684_v32  ;;  %v305_v4 = vmul.f32 %v12678_v59, %v12685_v3  ;;  %v306_v8 = vmul.f32 %v12678_v59, %v12686_v7  ;;  %v12687_v9 = vld [vmem:[#allocation23_spill] sm:$0xff]  ;;  %v12688_v17 = vld [vmem:[#allocation24_spill] sm:$0xff] }
  0x6b   : > { %12676 = vst [vmem:[#allocation48_spill] sm:$0xff] %v5757_v57  ;;  %v307_v16 = vmul.f32 %v12678_v59, %v12687_v9  ;;  %v308_v18 = vmul.f32 %v12678_v59, %v12688_v17  ;;  %v12689_v19 = vld [vmem:[#allocation25_spill] sm:$0xff]  ;;  %v12690_v15 = vld [vmem:[#allocation26_spill] sm:$0xff]  ;;  %v12691_v10 = vld [vmem:[#allocation27_spill] sm:$0xff]  ;;  %v320_v54 = vmul.f32 %v12678_v59, %v5527_v39  ;;  %v326_v39 = vmul.f32 %v12678_v59, %v5641_v11 }
  0x6c   : > { %v309_v23 = vmul.f32 %v12678_v59, %v12689_v19  ;;  %v310_v12 = vmul.f32 %v12678_v59, %v12690_v15  ;;  %v311_v58 = vmul.f32 %v12678_v59, %v12691_v10  ;;  %v12692_v55 = vld [vmem:[#allocation28_spill] sm:$0xff]  ;;  %v12693_v25 = vld [vmem:[#allocation29_spill] sm:$0xff]  ;;  %v12694_v31 = vld [vmem:[#allocation30_spill] sm:$0xff]  ;;  %v5832_v43 = vadd.f32 %v298_v60, %v5664_v37 }
  0x6d   : > { %v312_v24 = vmul.f32 %v12678_v59, %v12692_v55  ;;  %v313_v30 = vmul.f32 %v12678_v59, %v12693_v25  ;;  %v314_v32 = vmul.f32 %v12678_v59, %v12694_v31  ;;  %v159_v3 = vld [vmem:[%s12089_s0 + $0x198] sm:$0xff]  ;;  %v160_v7 = vld [vmem:[%s12089_s0 + $0x1a0] sm:$0xff]  ;;  %v12695_v9 = vld [vmem:[#allocation31_spill] sm:$0xff]  ;;  %v5845_v11 = vadd.f32 %v301_v63, %v5673_v45 }
  0x6e   : > { %v315_v17 = vmul.f32 %v12678_v59, %v12695_v9  ;;  %v12696_v19 = vld [vmem:[#allocation32_spill] sm:$0xff]  ;;  %v12697_v10 = vld [vmem:[#allocation33_spill] sm:$0xff]  ;;  %v12698_v25 = vld [vmem:[#allocation34_spill] sm:$0xff]  ;;  %v328_v47 = vmul.f32 %v12678_v59, %v159_v3  ;;  %v5855_v37 = vadd.f32 %v303_v2, %v5679_v52  ;;  %v5867_v45 = vadd.f32 %v307_v16, %v5691_v22 }
  0x6f   : > { %v316_v15 = vmul.f32 %v12678_v59, %v12696_v19  ;;  %v317_v55 = vmul.f32 %v12678_v59, %v12697_v10  ;;  %v318_v31 = vmul.f32 %v12678_v59, %v12698_v25  ;;  %v12699_v57 = vld [vmem:[#allocation35_spill] sm:$0xff]  ;;  %v12700_v53 = vld [vmem:[#allocation36_spill] sm:$0xff]  ;;  %v12701_v50 = vld [vmem:[#allocation37_spill] sm:$0xff]  ;;  %v323_v10 = vmul.f32 %v12678_v59, %v5554_v46 }
  0x70   : > { %v319_v56 = vmul.f32 %v12678_v59, %v12699_v57  ;;  %v321_v9 = vmul.f32 %v12678_v59, %v12700_v53  ;;  %v322_v19 = vmul.f32 %v12678_v59, %v12701_v50  ;;  %v12702_v25 = vld [vmem:[#allocation38_spill] sm:$0xff]  ;;  %v12703_v48 = vld [vmem:[#allocation39_spill] sm:$0xff]  ;;  %v327_v53 = vmul.f32 %v12678_v59, %v5646_v14  ;;  %v12711_v63 = vld [vmem:[#allocation41_spill] sm:$0xff] }
  0x71   : > { %v324_v49 = vmul.f32 %v12678_v59, %v12702_v25  ;;  %v325_v57 = vmul.f32 %v12678_v59, %v12703_v48  ;;  %v329_v50 = vmul.f32 %v12678_v59, %v160_v7  ;;  %v5839_v46 = vadd.f32 %v299_v61, %v5667_v38  ;;  %v12709_v61 = vld [vmem:[#allocation40_spill] sm:$0xff]  ;;  %v5938_v2 = vld [vmem:[%s12089_s0 + $0x39] sm:$0xff]  ;;  %v12731_v7 = vld [vmem:[#allocation47_spill] sm:$0xff] }
  0x72   : > { %v5842_v48 = vadd.f32 %v300_v62, %v5670_v44  ;;  %v5848_v14 = vadd.f32 %v302_v1, %v5676_v51  ;;  %v5858_v59 = vadd.f32 %v304_v13, %v5682_v0  ;;  %v5861_v38 = vadd.f32 %v305_v4, %v5685_v20  ;;  %12713 = vst [vmem:[#allocation18_spill] sm:$0xff] %v5938_v2  ;;  %v5943_v13 = vld [vmem:[%s12089_s0 + $0x49] sm:$0xff] }
  0x73   : > { %v5864_v44 = vadd.f32 %v306_v8, %v5688_v21  ;;  %v5870_v51 = vadd.f32 %v308_v18, %v5694_v26  ;;  %v5873_v60 = vadd.f32 %v309_v23, %v5697_v27  ;;  %v5876_v52 = vadd.f32 %v310_v12, %v5700_v28  ;;  %v362_v26 = vld [vmem:[%s12089_s0 + $0x1] sm:$0xff]  ;;  %12714 = vst [vmem:[#allocation19_spill] sm:$0xff] %v5943_v13  ;;  %v12721_v16 = vld [vmem:[#allocation44_spill] sm:$0xff]  ;;  %v12723_v23 = vld [vmem:[#allocation45_spill] sm:$0xff] }
  0x74   : > { %v5879_v0 = vadd.f32 %v311_v58, %v5703_v29  ;;  %v5882_v20 = vadd.f32 %v312_v24, %v5706_v33  ;;  %v5885_v21 = vadd.f32 %v313_v30, %v5709_v34  ;;  %v5888_v22 = vadd.f32 %v314_v32, %v5712_v35  ;;  %v363_v34 = vld [vmem:[%s12089_s0 + $0x9] sm:$0xff]  ;;  %v5911_v35 = vld [vmem:[%s12089_s0 + $0x19] sm:$0xff]  ;;  %v5985_v30 = vld [vmem:[%s12089_s0 + $0x91] sm:$0xff] }
  0x75   : > { %v5894_v27 = vadd.f32 %v315_v17, %v5715_v36  ;;  %v5897_v28 = vadd.f32 %v316_v15, %v5718_v40  ;;  %v5900_v29 = vadd.f32 %v317_v55, %v5721_v5  ;;  %v5903_v33 = vadd.f32 %v318_v31, %v5724_v6  ;;  %12704 = vst [vmem:[#allocation49_spill] sm:$0xff] %v5911_v35  ;;  %v5916_v36 = vld [vmem:[%s12089_s0 + $0x21] sm:$0xff]  ;;  %v5921_v40 = vld [vmem:[%s12089_s0 + $0x31] sm:$0xff]  ;;  %v5970_v58 = vld [vmem:[%s12089_s0 + $0x69] sm:$0xff] }
  0x76   : > { %12705 = vst [vmem:[#allocation50_spill] sm:$0xff] %v5916_v36  ;;  %12706 = vst [vmem:[#allocation14_spill] sm:$0xff] %v5921_v40  ;;  %v5924_v5 = vadd.f32 %v319_v56, %v5727_v41  ;;  %v5927_v6 = vadd.f32 %v320_v54, %v5730_v42  ;;  %v5930_v62 = vadd.f32 %v321_v9, %v12709_v61  ;;  %v5948_v41 = vld [vmem:[%s12089_s0 + $0x51] sm:$0xff]  ;;  %v5953_v42 = vld [vmem:[%s12089_s0 + $0x61] sm:$0xff] }
  0x77   : > { %v5933_v1 = vadd.f32 %v322_v19, %v12711_v63  ;;  %12715 = vst [vmem:[#allocation20_spill] sm:$0xff] %v5948_v41  ;;  %12716 = vst [vmem:[#allocation21_spill] sm:$0xff] %v5953_v42  ;;  %v12717_v54 = vld [vmem:[#allocation42_spill] sm:$0xff]  ;;  %v12719_v4 = vld [vmem:[#allocation43_spill] sm:$0xff]  ;;  %v5962_v18 = vadd.f32 %v325_v57, %v12721_v16  ;;  %v5965_v12 = vadd.f32 %v326_v39, %v12723_v23  ;;  %v6018_v57 = vstv %s5836_s19 }
  0x78   : > { %12707 = vst [vmem:[#allocation51_spill] sm:$0xff] %v5924_v5  ;;  %12708 = vst [vmem:[#allocation15_spill] sm:$0xff] %v5927_v6  ;;  %v5956_v56 = vadd.f32 %v323_v10, %v12717_v54  ;;  %v5959_v8 = vadd.f32 %v324_v49, %v12719_v4  ;;  %v5975_v24 = vld [vmem:[%s12089_s0 + $0x79] sm:$0xff]  ;;  %v5980_v49 = vld [vmem:[%s12089_s0 + $0x81] sm:$0xff]  ;;  %v5991_v17 = vadd.f32 %v328_v47, %v12731_v7  ;;  %v400_v47 = vstv %s5834_s18  ;;  %s6804_s18 = sld [smem:[#allocation4 + %s940_s22]]  ;;  %s1244_s22 = sadd.s32 16, %s5358_s16 }
  0x79   : > { %12710 = vst [vmem:[#allocation16_spill] sm:$0xff] %v5930_v62  ;;  %12712 = vst [vmem:[#allocation17_spill] sm:$0xff] %v5933_v1  ;;  %v12729_v32 = vld [vmem:[#allocation46_spill] sm:$0xff]  ;;  %v12733_v15 = vld [vmem:[#allocation48_spill] sm:$0xff]  ;;  %v401_v25 = vmul.f32 %v400_v47, %v362_v26  ;;  %v6021_v39 = vstv %s5850_s20  ;;  %v402_v63 = vmul.f32 %v400_v47, %v363_v34  ;;  %v403_v54 = vmul.f32 %v400_v47, %v5911_v35 }
  0x7a   : > { %12718 = vst [vmem:[#allocation22_spill] sm:$0xff] %v5956_v56  ;;  %12720 = vst [vmem:[#allocation23_spill] sm:$0xff] %v5959_v8  ;;  %v5988_v3 = vadd.f32 %v327_v53, %v12729_v32  ;;  %v5994_v55 = vadd.f32 %v329_v50, %v12733_v15  ;;  %v5999_v31 = vld [vmem:[%s12089_s0 + $0x99] sm:$0xff]  ;;  %v6004_v9 = vld [vmem:[%s12089_s0 + $0xa9] sm:$0xff]  ;;  %v6024_v53 = vstv %s5852_s21  ;;  %v404_v4 = vmul.f32 %v400_v47, %v5916_v36 }
  0x7b   : > { %12722 = vst [vmem:[#allocation24_spill] sm:$0xff] %v5962_v18  ;;  %12724 = vst [vmem:[#allocation25_spill] sm:$0xff] %v5965_v12  ;;  %v6009_v19 = vld [vmem:[%s12089_s0 + $0xb1] sm:$0xff]  ;;  %v6015_v10 = vld [vmem:[%s12089_s0 + $0xc1] sm:$0xff]  ;;  %v405_v16 = vmul.f32 %v400_v47, %v5921_v40  ;;  %v406_v7 = vmul.f32 %v400_v47, %v5938_v2  ;;  %v407_v15 = vmul.f32 %v400_v47, %v5943_v13 }
  0x7c   : > { %12725 = vst [vmem:[#allocation26_spill] sm:$0xff] %v5970_v58  ;;  %12726 = vst [vmem:[#allocation27_spill] sm:$0xff] %v5975_v24  ;;  %v6029_v50 = vld [vmem:[%s12089_s0 + $0xc9] sm:$0xff]  ;;  %v6034_v61 = vld [vmem:[%s12089_s0 + $0xd9] sm:$0xff]  ;;  %v410_v13 = vmul.f32 %v400_v47, %v5970_v58 }
  0x7d   : > { %12727 = vst [vmem:[#allocation28_spill] sm:$0xff] %v5980_v49  ;;  %12728 = vst [vmem:[#allocation29_spill] sm:$0xff] %v5985_v30  ;;  %v6039_v26 = vld [vmem:[%s12089_s0 + $0xe1] sm:$0xff]  ;;  %v6047_v23 = vld [vmem:[%s12089_s0 + $0xf1] sm:$0xff] }
  0x7e   : > { %12730 = vst [vmem:[#allocation30_spill] sm:$0xff] %v5988_v3  ;;  %12732 = vst [vmem:[#allocation31_spill] sm:$0xff] %v5991_v17  ;;  %v6052_v32 = vld [vmem:[%s12089_s0 + $0xf9] sm:$0xff]  ;;  %v6057_v34 = vld [vmem:[%s12089_s0 + $0x109] sm:$0xff]  ;;  %v417_v17 = vmul.f32 %v400_v47, %v6015_v10  ;;  %v421_v18 = vmul.f32 %v400_v47, %v6047_v23 }
  0x7f   : > { %12734 = vst [vmem:[#allocation32_spill] sm:$0xff] %v5994_v55  ;;  %12735 = vst [vmem:[#allocation33_spill] sm:$0xff] %v5999_v31  ;;  %v6066_v40 = vld [vmem:[%s12089_s0 + $0x111] sm:$0xff]  ;;  %v6071_v36 = vld [vmem:[%s12089_s0 + $0x121] sm:$0xff]  ;;  %v422_v8 = vmul.f32 %v400_v47, %v6052_v32  ;;  %v423_v56 = vmul.f32 %v400_v47, %v6057_v34 }
  0x80   : > { %12736 = vst [vmem:[#allocation34_spill] sm:$0xff] %v6004_v9  ;;  %12737 = vst [vmem:[#allocation35_spill] sm:$0xff] %v6009_v19  ;;  %v6076_v2 = vld [vmem:[%s12089_s0 + $0x129] sm:$0xff]  ;;  %v6085_v35 = vld [vmem:[%s12089_s0 + $0x139] sm:$0xff]  ;;  %v424_v1 = vmul.f32 %v400_v47, %v6066_v40  ;;  %v425_v62 = vmul.f32 %v400_v47, %v6071_v36 }
  0x81   : > { %12738 = vst [vmem:[#allocation36_spill] sm:$0xff] %v6015_v10  ;;  %12739 = vst [vmem:[#allocation37_spill] sm:$0xff] %v6018_v57  ;;  %v413_v57 = vmul.f32 %v400_v47, %v5985_v30  ;;  %v6090_v55 = vld [vmem:[%s12089_s0 + $0x141] sm:$0xff]  ;;  %v6095_v58 = vld [vmem:[%s12089_s0 + $0x151] sm:$0xff]  ;;  %v416_v30 = vmul.f32 %v400_v47, %v6009_v19  ;;  %v419_v19 = vmul.f32 %v400_v47, %v6034_v61 }
  0x82   : > { %12740 = vst [vmem:[#allocation38_spill] sm:$0xff] %v6021_v39  ;;  %12741 = vst [vmem:[#allocation39_spill] sm:$0xff] %v6024_v53  ;;  %v408_v53 = vmul.f32 %v400_v47, %v5948_v41  ;;  %v409_v39 = vmul.f32 %v400_v47, %v5953_v42  ;;  %v411_v41 = vmul.f32 %v400_v47, %v5975_v24  ;;  %v6104_v3 = vld [vmem:[%s12089_s0 + $0x159] sm:$0xff]  ;;  %v6109_v12 = vld [vmem:[%s12089_s0 + $0x169] sm:$0xff] }
  0x83   : > { %12742 = vst [vmem:[#allocation40_spill] sm:$0xff] %v6029_v50  ;;  %12743 = vst [vmem:[#allocation41_spill] sm:$0xff] %v6034_v61  ;;  %v412_v42 = vmul.f32 %v400_v47, %v5980_v49  ;;  %v414_v24 = vmul.f32 %v400_v47, %v5999_v31  ;;  %v415_v49 = vmul.f32 %v400_v47, %v6004_v9  ;;  %v6114_v31 = vld [vmem:[%s12089_s0 + $0x171] sm:$0xff] }
  0x84   : > { %12744 = vst [vmem:[#allocation42_spill] sm:$0xff] %v6039_v26  ;;  %12745 = vst [vmem:[#allocation43_spill] sm:$0xff] %v6047_v23  ;;  %v418_v9 = vmul.f32 %v400_v47, %v6029_v50  ;;  %v420_v10 = vmul.f32 %v400_v47, %v6039_v26  ;;  %v426_v6 = vmul.f32 %v400_v47, %v6076_v2 }
  0x85   : > { %12746 = vst [vmem:[#allocation44_spill] sm:$0xff] %v6052_v32  ;;  %12747 = vst [vmem:[#allocation45_spill] sm:$0xff] %v6057_v34  ;;  %v427_v5 = vmul.f32 %v400_v47, %v6085_v35  ;;  %v428_v50 = vmul.f32 %v400_v47, %v6090_v55  ;;  %v429_v61 = vmul.f32 %v400_v47, %v6095_v58 }
  0x86   : > { %12748 = vst [vmem:[#allocation46_spill] sm:$0xff] %v6066_v40  ;;  %12749 = vst [vmem:[#allocation47_spill] sm:$0xff] %v6071_v36  ;;  %v430_v26 = vmul.f32 %v400_v47, %v6104_v3  ;;  %v431_v23 = vmul.f32 %v400_v47, %v6109_v12  ;;  %v432_v32 = vmul.f32 %v400_v47, %v6114_v31 }
  0x87   : > { %12750 = vst [vmem:[#allocation48_spill] sm:$0xff] %v6076_v2  ;;  %12751 = vst [vmem:[#allocation52_spill] sm:$0xff] %v6085_v35  ;;  %v6132_v34 = vadd.f32 %v401_v25, %v5832_v43  ;;  %v6135_v40 = vadd.f32 %v402_v63, %v5839_v46  ;;  %v6138_v2 = vadd.f32 %v403_v54, %v5842_v48 }
  0x88   : > { %12752 = vst [vmem:[#allocation53_spill] sm:$0xff] %v6090_v55  ;;  %12753 = vst [vmem:[#allocation54_spill] sm:$0xff] %v6095_v58  ;;  %v6141_v35 = vadd.f32 %v404_v4, %v5845_v11  ;;  %v6144_v58 = vadd.f32 %v405_v16, %v5848_v14  ;;  %v6150_v47 = vadd.f32 %v407_v15, %v5858_v59  ;;  %v12777_v25 = vld [vmem:[#allocation37_spill] sm:$0xff]  ;;  %v12782_v4 = vld [vmem:[#allocation20_spill] sm:$0xff] }
  0x89   : > { %12754 = vst [vmem:[#allocation55_spill] sm:$0xff] %v6104_v3  ;;  %12755 = vst [vmem:[#allocation56_spill] sm:$0xff] %v6109_v12  ;;  %v6147_v3 = vadd.f32 %v406_v7, %v5855_v37  ;;  %v6153_v43 = vadd.f32 %v408_v53, %v5861_v38  ;;  %v6156_v46 = vadd.f32 %v409_v39, %v5864_v44  ;;  %v12779_v53 = vld [vmem:[#allocation14_spill] sm:$0xff] }
  0x8a   : > { %12756 = vst [vmem:[#allocation57_spill] sm:$0xff] %v6114_v31  ;;  %v6159_v48 = vadd.f32 %v410_v13, %v5867_v45  ;;  %v6162_v11 = vadd.f32 %v411_v41, %v5870_v51  ;;  %v6165_v14 = vadd.f32 %v412_v42, %v5873_v60  ;;  %v6168_v37 = vadd.f32 %v413_v57, %v5876_v52  ;;  %v12784_v7 = vld [vmem:[#allocation26_spill] sm:$0xff] }
  0x8b   : > { %v6171_v59 = vadd.f32 %v414_v24, %v5879_v0  ;;  %v6174_v38 = vadd.f32 %v415_v49, %v5882_v20  ;;  %v6177_v44 = vadd.f32 %v416_v30, %v5885_v21  ;;  %v6180_v45 = vadd.f32 %v417_v17, %v5888_v22  ;;  %v12757_v20 = vld [vmem:[#allocation51_spill] sm:$0xff]  ;;  %v12759_v22 = vld [vmem:[#allocation16_spill] sm:$0xff] }
  0x8c   : > { %v6183_v51 = vadd.f32 %v418_v9, %v5894_v27  ;;  %v6186_v60 = vadd.f32 %v419_v19, %v5897_v28  ;;  %v6189_v52 = vadd.f32 %v420_v10, %v5900_v29  ;;  %v6192_v0 = vadd.f32 %v421_v18, %v5903_v33  ;;  %v12758_v21 = vld [vmem:[#allocation15_spill] sm:$0xff]  ;;  %v12760_v27 = vld [vmem:[#allocation17_spill] sm:$0xff]  ;;  %v12762_v28 = vld [vmem:[#allocation22_spill] sm:$0xff] }
  0x8d   : > { %v6195_v13 = vadd.f32 %v422_v8, %v12757_v20  ;;  %v6198_v41 = vadd.f32 %v423_v56, %v12758_v21  ;;  %v6201_v42 = vadd.f32 %v424_v1, %v12759_v22  ;;  %v6204_v24 = vadd.f32 %v425_v62, %v12760_v27  ;;  %v12764_v29 = vld [vmem:[#allocation23_spill] sm:$0xff]  ;;  %v12766_v33 = vld [vmem:[#allocation24_spill] sm:$0xff]  ;;  %v12768_v8 = vld [vmem:[#allocation25_spill] sm:$0xff] }
  0x8e   : > { %v6207_v49 = vadd.f32 %v426_v6, %v12762_v28  ;;  %v6210_v30 = vadd.f32 %v427_v5, %v12764_v29  ;;  %v6213_v18 = vadd.f32 %v428_v50, %v12766_v33  ;;  %v6216_v17 = vadd.f32 %v429_v61, %v12768_v8  ;;  %v12770_v56 = vld [vmem:[#allocation30_spill] sm:$0xff]  ;;  %v12772_v1 = vld [vmem:[#allocation31_spill] sm:$0xff]  ;;  %v12774_v62 = vld [vmem:[#allocation32_spill] sm:$0xff] }
  0x8f   : > { %12761 = vst [vmem:[#allocation51_spill] sm:$0xff] %v6204_v24  ;;  %v6219_v9 = vadd.f32 %v430_v26, %v12770_v56  ;;  %v6222_v19 = vadd.f32 %v431_v23, %v12772_v1  ;;  %v6225_v10 = vadd.f32 %v432_v32, %v12774_v62  ;;  %v12776_v6 = vld [vmem:[#allocation49_spill] sm:$0xff]  ;;  %v12778_v5 = vld [vmem:[#allocation50_spill] sm:$0xff]  ;;  %v470_v50 = vmul.f32 %v12777_v25, %v12779_v53  ;;  %v12781_v26 = vld [vmem:[#allocation19_spill] sm:$0xff] }
  0x90   : > { %12763 = vst [vmem:[#allocation15_spill] sm:$0xff] %v6207_v49  ;;  %12765 = vst [vmem:[#allocation16_spill] sm:$0xff] %v6210_v30  ;;  %v468_v57 = vmul.f32 %v12777_v25, %v12776_v6  ;;  %v469_v39 = vmul.f32 %v12777_v25, %v12778_v5  ;;  %v12780_v61 = vld [vmem:[#allocation18_spill] sm:$0xff]  ;;  %v472_v54 = vmul.f32 %v12777_v25, %v12781_v26  ;;  %v12783_v23 = vld [vmem:[#allocation21_spill] sm:$0xff] }
  0x91   : > { %12767 = vst [vmem:[#allocation17_spill] sm:$0xff] %v6213_v18  ;;  %12769 = vst [vmem:[#allocation22_spill] sm:$0xff] %v6216_v17  ;;  %v471_v63 = vmul.f32 %v12777_v25, %v12780_v61  ;;  %v473_v16 = vmul.f32 %v12777_v25, %v12782_v4  ;;  %v474_v32 = vmul.f32 %v12777_v25, %v12783_v23  ;;  %v12785_v20 = vld [vmem:[#allocation27_spill] sm:$0xff]  ;;  %v12786_v22 = vld [vmem:[#allocation28_spill] sm:$0xff] }
  0x92   : > { %12771 = vst [vmem:[#allocation23_spill] sm:$0xff] %v6219_v9  ;;  %12773 = vst [vmem:[#allocation24_spill] sm:$0xff] %v6222_v19  ;;  %v475_v15 = vmul.f32 %v12777_v25, %v12784_v7  ;;  %v476_v21 = vmul.f32 %v12777_v25, %v12785_v20  ;;  %v477_v27 = vmul.f32 %v12777_v25, %v12786_v22  ;;  %v12787_v28 = vld [vmem:[#allocation29_spill] sm:$0xff]  ;;  %v12789_v56 = vld [vmem:[#allocation34_spill] sm:$0xff] }
  0x93   : > { %12775 = vst [vmem:[#allocation25_spill] sm:$0xff] %v6225_v10  ;;  %v478_v29 = vmul.f32 %v12777_v25, %v12787_v28  ;;  %v12788_v33 = vld [vmem:[#allocation33_spill] sm:$0xff]  ;;  %v480_v1 = vmul.f32 %v12777_v25, %v12789_v56  ;;  %v12790_v62 = vld [vmem:[#allocation35_spill] sm:$0xff]  ;;  %v12791_v5 = vld [vmem:[#allocation36_spill] sm:$0xff]  ;;  %v490_v9 = vmul.f32 %v12777_v25, %v6071_v36  ;;  %v497_v36 = vmul.f32 %v12777_v25, %v6114_v31 }
  0x94   : > { %v479_v8 = vmul.f32 %v12777_v25, %v12788_v33  ;;  %v481_v6 = vmul.f32 %v12777_v25, %v12790_v62  ;;  %v482_v7 = vmul.f32 %v12777_v25, %v12791_v5  ;;  %v12792_v23 = vld [vmem:[#allocation40_spill] sm:$0xff]  ;;  %v12793_v4 = vld [vmem:[#allocation41_spill] sm:$0xff]  ;;  %v6264_v28 = vld [vmem:[%s12089_s0 + $0x181] sm:$0xff]  ;;  %v6314_v31 = vadd.f32 %v472_v54, %v6144_v58 }
  0x95   : > { %v483_v20 = vmul.f32 %v12777_v25, %v12792_v23  ;;  %v484_v22 = vmul.f32 %v12777_v25, %v12793_v4  ;;  %12794 = vst [vmem:[#allocation30_spill] sm:$0xff] %v6264_v28  ;;  %v6269_v56 = vld [vmem:[%s12089_s0 + $0x189] sm:$0xff]  ;;  %v12795_v62 = vld [vmem:[#allocation42_spill] sm:$0xff]  ;;  %v12798_v4 = vld [vmem:[#allocation45_spill] sm:$0xff] }
  0x96   : > { %v485_v33 = vmul.f32 %v12777_v25, %v12795_v62  ;;  %v12796_v5 = vld [vmem:[#allocation43_spill] sm:$0xff]  ;;  %v12797_v23 = vld [vmem:[#allocation44_spill] sm:$0xff]  ;;  %v488_v53 = vmul.f32 %v12777_v25, %v12798_v4  ;;  %v12799_v10 = vld [vmem:[#allocation46_spill] sm:$0xff]  ;;  %v6335_v58 = vadd.f32 %v479_v8, %v6165_v14 }
  0x97   : > { %v486_v26 = vmul.f32 %v12777_v25, %v12796_v5  ;;  %v487_v61 = vmul.f32 %v12777_v25, %v12797_v23  ;;  %v489_v19 = vmul.f32 %v12777_v25, %v12799_v10  ;;  %v12800_v17 = vld [vmem:[#allocation48_spill] sm:$0xff]  ;;  %v493_v5 = vmul.f32 %v12777_v25, %v6090_v55  ;;  %v12802_v49 = vld [vmem:[#allocation54_spill] sm:$0xff]  ;;  %v12803_v24 = vld [vmem:[#allocation55_spill] sm:$0xff] }
  0x98   : > { %v491_v18 = vmul.f32 %v12777_v25, %v12800_v17  ;;  %v12801_v30 = vld [vmem:[#allocation52_spill] sm:$0xff]  ;;  %v494_v23 = vmul.f32 %v12777_v25, %v12802_v49  ;;  %v495_v4 = vmul.f32 %v12777_v25, %v12803_v24  ;;  %v496_v10 = vmul.f32 %v12777_v25, %v6109_v12  ;;  %v12822_v54 = vld [vmem:[#allocation38_spill] sm:$0xff] }
  0x99   : > { %v492_v62 = vmul.f32 %v12777_v25, %v12801_v30  ;;  %v498_v17 = vmul.f32 %v12777_v25, %v6264_v28  ;;  %v499_v30 = vmul.f32 %v12777_v25, %v6269_v56  ;;  %v6302_v55 = vadd.f32 %v468_v57, %v6132_v34 }
  0x9a   : > { %v6305_v49 = vadd.f32 %v469_v39, %v6135_v40  ;;  %v6308_v24 = vadd.f32 %v470_v50, %v6138_v2  ;;  %v6311_v12 = vadd.f32 %v471_v63, %v6141_v35  ;;  %v6317_v28 = vadd.f32 %v473_v16, %v6147_v3 }
  0x9b   : > { %v6320_v25 = vadd.f32 %v474_v32, %v6150_v47  ;;  %v6323_v34 = vadd.f32 %v475_v15, %v6153_v43  ;;  %v6326_v40 = vadd.f32 %v476_v21, %v6156_v46  ;;  %v6329_v2 = vadd.f32 %v477_v27, %v6159_v48  ;;  %v12829_v27 = vld [vmem:[#allocation28_spill] sm:$0xff] }
  0x9c   : > { %v6332_v35 = vadd.f32 %v478_v29, %v6162_v11  ;;  %v6338_v3 = vadd.f32 %v480_v1, %v6168_v37  ;;  %v6341_v47 = vadd.f32 %v481_v6, %v6171_v59  ;;  %v6344_v43 = vadd.f32 %v482_v7, %v6174_v38  ;;  %v12831_v1 = vld [vmem:[#allocation33_spill] sm:$0xff]  ;;  %v12832_v6 = vld [vmem:[#allocation34_spill] sm:$0xff] }
  0x9d   : > { %v6347_v46 = vadd.f32 %v483_v20, %v6177_v44  ;;  %v6350_v48 = vadd.f32 %v484_v22, %v6180_v45  ;;  %v6353_v11 = vadd.f32 %v485_v33, %v6183_v51  ;;  %v6356_v14 = vadd.f32 %v486_v26, %v6186_v60  ;;  %v12805_v51 = vld [vmem:[#allocation51_spill] sm:$0xff]  ;;  %v12821_v26 = vld [vmem:[#allocation14_spill] sm:$0xff]  ;;  %v12830_v33 = vld [vmem:[#allocation29_spill] sm:$0xff] }
  0x9e   : > { %v6359_v37 = vadd.f32 %v487_v61, %v6189_v52  ;;  %v6362_v59 = vadd.f32 %v488_v53, %v6192_v0  ;;  %v6365_v38 = vadd.f32 %v489_v19, %v6195_v13  ;;  %v6368_v44 = vadd.f32 %v490_v9, %v6198_v41  ;;  %v12807_v60 = vld [vmem:[#allocation15_spill] sm:$0xff]  ;;  %v12809_v52 = vld [vmem:[#allocation16_spill] sm:$0xff]  ;;  %v12811_v0 = vld [vmem:[#allocation17_spill] sm:$0xff] }
  0x9f   : > { %v6371_v45 = vadd.f32 %v491_v18, %v6201_v42  ;;  %v6374_v57 = vadd.f32 %v492_v62, %v12805_v51  ;;  %v6377_v39 = vadd.f32 %v493_v5, %v12807_v60  ;;  %v6380_v50 = vadd.f32 %v494_v23, %v12809_v52  ;;  %v12813_v13 = vld [vmem:[#allocation22_spill] sm:$0xff]  ;;  %v12815_v41 = vld [vmem:[#allocation23_spill] sm:$0xff]  ;;  %v12817_v42 = vld [vmem:[#allocation24_spill] sm:$0xff] }
  0xa0   : > { %v6383_v53 = vadd.f32 %v495_v4, %v12811_v0  ;;  %v6386_v19 = vadd.f32 %v496_v10, %v12813_v13  ;;  %v6389_v9 = vadd.f32 %v497_v36, %v12815_v41  ;;  %v6392_v18 = vadd.f32 %v498_v17, %v12817_v42  ;;  %v12819_v61 = vld [vmem:[#allocation25_spill] sm:$0xff]  ;;  %v12823_v23 = vld [vmem:[#allocation18_spill] sm:$0xff]  ;;  %v12824_v4 = vld [vmem:[#allocation19_spill] sm:$0xff] }
  0xa1   : > { %12804 = vst [vmem:[#allocation31_spill] sm:$0xff] %v6371_v45  ;;  %12806 = vst [vmem:[#allocation32_spill] sm:$0xff] %v6374_v57  ;;  %v6395_v63 = vadd.f32 %v499_v30, %v12819_v61  ;;  %v535_v16 = vmul.f32 %v12822_v54, %v12821_v26  ;;  %v536_v32 = vmul.f32 %v12822_v54, %v12823_v23  ;;  %v12825_v10 = vld [vmem:[#allocation20_spill] sm:$0xff]  ;;  %v12826_v36 = vld [vmem:[#allocation21_spill] sm:$0xff] }
  0xa2   : > { %12808 = vst [vmem:[#allocation49_spill] sm:$0xff] %v6377_v39  ;;  %12810 = vst [vmem:[#allocation37_spill] sm:$0xff] %v6380_v50  ;;  %v537_v7 = vmul.f32 %v12822_v54, %v12824_v4  ;;  %v538_v15 = vmul.f32 %v12822_v54, %v12825_v10  ;;  %v539_v20 = vmul.f32 %v12822_v54, %v12826_v36  ;;  %v12827_v17 = vld [vmem:[#allocation26_spill] sm:$0xff]  ;;  %v12828_v30 = vld [vmem:[#allocation27_spill] sm:$0xff] }
  0xa3   : > { %12812 = vst [vmem:[#allocation50_spill] sm:$0xff] %v6383_v53  ;;  %12814 = vst [vmem:[#allocation51_spill] sm:$0xff] %v6386_v19  ;;  %v540_v21 = vmul.f32 %v12822_v54, %v12827_v17  ;;  %v541_v22 = vmul.f32 %v12822_v54, %v12828_v30  ;;  %v542_v29 = vmul.f32 %v12822_v54, %v12829_v27  ;;  %v12833_v51 = vld [vmem:[#allocation35_spill] sm:$0xff]  ;;  %v12834_v52 = vld [vmem:[#allocation36_spill] sm:$0xff] }
  0xa4   : > { %12816 = vst [vmem:[#allocation15_spill] sm:$0xff] %v6389_v9  ;;  %12818 = vst [vmem:[#allocation16_spill] sm:$0xff] %v6392_v18  ;;  %v543_v8 = vmul.f32 %v12822_v54, %v12830_v33  ;;  %v544_v62 = vmul.f32 %v12822_v54, %v12831_v1  ;;  %v545_v5 = vmul.f32 %v12822_v54, %v12832_v6  ;;  %v12835_v13 = vld [vmem:[#allocation40_spill] sm:$0xff]  ;;  %v12836_v42 = vld [vmem:[#allocation41_spill] sm:$0xff] }
  0xa5   : > { %12820 = vst [vmem:[#allocation17_spill] sm:$0xff] %v6395_v63  ;;  %v546_v60 = vmul.f32 %v12822_v54, %v12833_v51  ;;  %v547_v0 = vmul.f32 %v12822_v54, %v12834_v52  ;;  %v548_v41 = vmul.f32 %v12822_v54, %v12835_v13  ;;  %v549_v61 = vmul.f32 %v12822_v54, %v12836_v42  ;;  %v12837_v26 = vld [vmem:[#allocation42_spill] sm:$0xff]  ;;  %v12838_v4 = vld [vmem:[#allocation43_spill] sm:$0xff]  ;;  %v12839_v30 = vld [vmem:[#allocation44_spill] sm:$0xff] }
  0xa6   : > { %v550_v23 = vmul.f32 %v12822_v54, %v12837_v26  ;;  %v551_v10 = vmul.f32 %v12822_v54, %v12838_v4  ;;  %v396_v36 = vld [vmem:[%s12089_s0 + $0x199] sm:$0xff]  ;;  %v397_v17 = vld [vmem:[%s12089_s0 + $0x1a1] sm:$0xff]  ;;  %v552_v27 = vmul.f32 %v12822_v54, %v12839_v30  ;;  %v12843_v42 = vld [vmem:[#allocation48_spill] sm:$0xff] }
  0xa7   : > { %v12840_v33 = vld [vmem:[#allocation45_spill] sm:$0xff]  ;;  %v12841_v6 = vld [vmem:[#allocation46_spill] sm:$0xff]  ;;  %v12842_v52 = vld [vmem:[#allocation47_spill] sm:$0xff]  ;;  %v556_v26 = vmul.f32 %v12822_v54, %v12843_v42  ;;  %v566_v45 = vmul.f32 %v12822_v54, %v397_v17 }
  0xa8   : > { %v553_v1 = vmul.f32 %v12822_v54, %v12840_v33  ;;  %v554_v51 = vmul.f32 %v12822_v54, %v12841_v6  ;;  %v555_v13 = vmul.f32 %v12822_v54, %v12842_v52  ;;  %v12844_v4 = vld [vmem:[#allocation52_spill] sm:$0xff]  ;;  %v12845_v18 = vld [vmem:[#allocation53_spill] sm:$0xff]  ;;  %v12846_v19 = vld [vmem:[#allocation54_spill] sm:$0xff] }
  0xa9   : > { %v557_v63 = vmul.f32 %v12822_v54, %v12844_v4  ;;  %v558_v9 = vmul.f32 %v12822_v54, %v12845_v18  ;;  %v559_v30 = vmul.f32 %v12822_v54, %v12846_v19  ;;  %v12847_v53 = vld [vmem:[#allocation55_spill] sm:$0xff]  ;;  %v12848_v50 = vld [vmem:[#allocation56_spill] sm:$0xff]  ;;  %v12849_v39 = vld [vmem:[#allocation57_spill] sm:$0xff]  ;;  %v564_v4 = vmul.f32 %v12822_v54, %v6269_v56 }
  0xaa   : > { %v560_v33 = vmul.f32 %v12822_v54, %v12847_v53  ;;  %v561_v6 = vmul.f32 %v12822_v54, %v12848_v50  ;;  %v562_v52 = vmul.f32 %v12822_v54, %v12849_v39  ;;  %v12850_v57 = vld [vmem:[#allocation30_spill] sm:$0xff]  ;;  %v565_v18 = vmul.f32 %v12822_v54, %v396_v36 }
  0xab   : > { %v563_v42 = vmul.f32 %v12822_v54, %v12850_v57  ;;  %v6466_v19 = vadd.f32 %v535_v16, %v6302_v55  ;;  %v6469_v53 = vadd.f32 %v536_v32, %v6305_v49  ;;  %v6472_v50 = vadd.f32 %v537_v7, %v6308_v24  ;;  %v6552_v7 = vld [vmem:[%s12089_s0 + $0x3a] sm:$0xff]  ;;  %v12874_v36 = vld [vmem:[#allocation15_spill] sm:$0xff] }
  0xac   : > { %v6475_v39 = vadd.f32 %v538_v15, %v6311_v12  ;;  %v6478_v57 = vadd.f32 %v539_v20, %v6314_v31  ;;  %v6481_v56 = vadd.f32 %v540_v21, %v6317_v28  ;;  %v6484_v54 = vadd.f32 %v541_v22, %v6320_v25  ;;  %v599_v25 = vld [vmem:[%s12089_s0 + $0x2] sm:$0xff]  ;;  %12854 = vst [vmem:[#allocation25_spill] sm:$0xff] %v6552_v7  ;;  %v6557_v15 = vld [vmem:[%s12089_s0 + $0x4a] sm:$0xff] }
  0xad   : > { %v6487_v55 = vadd.f32 %v542_v29, %v6323_v34  ;;  %v6490_v49 = vadd.f32 %v543_v8, %v6326_v40  ;;  %v6493_v24 = vadd.f32 %v544_v62, %v6329_v2  ;;  %v6496_v12 = vadd.f32 %v545_v5, %v6332_v35  ;;  %12855 = vst [vmem:[#allocation14_spill] sm:$0xff] %v6557_v15  ;;  %v12858_v21 = vld [vmem:[#allocation32_spill] sm:$0xff]  ;;  %v6579_v29 = vld [vmem:[%s12089_s0 + $0x62] sm:$0xff] }
  0xae   : > { %v6499_v31 = vadd.f32 %v546_v60, %v6335_v58  ;;  %v6502_v28 = vadd.f32 %v547_v0, %v6338_v3  ;;  %v6508_v34 = vadd.f32 %v548_v41, %v6341_v47  ;;  %v6511_v40 = vadd.f32 %v549_v61, %v6344_v43  ;;  %v600_v58 = vld [vmem:[%s12089_s0 + $0xa] sm:$0xff]  ;;  %v6525_v3 = vld [vmem:[%s12089_s0 + $0x1a] sm:$0xff]  ;;  %v6530_v47 = vld [vmem:[%s12089_s0 + $0x22] sm:$0xff]  ;;  %12860 = vst [vmem:[#allocation19_spill] sm:$0xff] %v6579_v29 }
  0xaf   : > { %v6514_v2 = vadd.f32 %v550_v23, %v6347_v46  ;;  %v6517_v35 = vadd.f32 %v551_v10, %v6350_v48  ;;  %12851 = vst [vmem:[#allocation22_spill] sm:$0xff] %v6525_v3  ;;  %12852 = vst [vmem:[#allocation23_spill] sm:$0xff] %v6530_v47  ;;  %v6535_v43 = vld [vmem:[%s12089_s0 + $0x32] sm:$0xff]  ;;  %v6538_v46 = vadd.f32 %v552_v27, %v6353_v11  ;;  %v6584_v8 = vld [vmem:[%s12089_s0 + $0x6a] sm:$0xff] }
  0xb0   : > { %12853 = vst [vmem:[#allocation24_spill] sm:$0xff] %v6535_v43  ;;  %v6541_v48 = vadd.f32 %v553_v1, %v6356_v14  ;;  %v6544_v16 = vadd.f32 %v554_v51, %v6359_v37  ;;  %v6547_v32 = vadd.f32 %v555_v13, %v6362_v59  ;;  %v6562_v11 = vld [vmem:[%s12089_s0 + $0x52] sm:$0xff]  ;;  %v6565_v14 = vadd.f32 %v556_v26, %v6365_v38  ;;  %v12857_v59 = vld [vmem:[#allocation31_spill] sm:$0xff]  ;;  %v6589_v38 = vld [vmem:[%s12089_s0 + $0x7a] sm:$0xff] }
  0xb1   : > { %12856 = vst [vmem:[#allocation38_spill] sm:$0xff] %v6562_v11  ;;  %v6568_v37 = vadd.f32 %v557_v63, %v6368_v44  ;;  %v6571_v20 = vadd.f32 %v558_v9, %v12857_v59  ;;  %v6574_v22 = vadd.f32 %v559_v30, %v12858_v21  ;;  %12861 = vst [vmem:[#allocation20_spill] sm:$0xff] %v6584_v8  ;;  %v12863_v44 = vld [vmem:[#allocation49_spill] sm:$0xff]  ;;  %v12867_v5 = vld [vmem:[#allocation50_spill] sm:$0xff] }
  0xb2   : > { %12862 = vst [vmem:[#allocation21_spill] sm:$0xff] %v6589_v38  ;;  %v6592_v9 = vadd.f32 %v560_v33, %v12863_v44  ;;  %v12865_v63 = vld [vmem:[#allocation37_spill] sm:$0xff]  ;;  %v6598_v60 = vadd.f32 %v562_v52, %v12867_v5  ;;  %v12869_v0 = vld [vmem:[#allocation51_spill] sm:$0xff]  ;;  %v6619_v17 = vadd.f32 %v564_v4, %v12874_v36  ;;  %v12876_v27 = vld [vmem:[#allocation16_spill] sm:$0xff] }
  0xb3   : > { %12859 = vst [vmem:[#allocation18_spill] sm:$0xff] %v6574_v22  ;;  %v6595_v62 = vadd.f32 %v561_v6, %v12865_v63  ;;  %v6601_v41 = vadd.f32 %v563_v42, %v12869_v0  ;;  %v6606_v61 = vld [vmem:[%s12089_s0 + $0x82] sm:$0xff]  ;;  %v6611_v23 = vld [vmem:[%s12089_s0 + $0x92] sm:$0xff]  ;;  %v6616_v10 = vld [vmem:[%s12089_s0 + $0x9a] sm:$0xff]  ;;  %v6622_v1 = vadd.f32 %v565_v18, %v12876_v27 }
  0xb4   : > { %12864 = vst [vmem:[#allocation26_spill] sm:$0xff] %v6592_v9  ;;  %12868 = vst [vmem:[#allocation28_spill] sm:$0xff] %v6598_v60  ;;  %v12878_v51 = vld [vmem:[#allocation17_spill] sm:$0xff]  ;;  %v6630_v26 = vld [vmem:[%s12089_s0 + $0xaa] sm:$0xff] }
  0xb5   : > { %12866 = vst [vmem:[#allocation27_spill] sm:$0xff] %v6595_v62  ;;  %12870 = vst [vmem:[#allocation29_spill] sm:$0xff] %v6601_v41  ;;  %v6625_v13 = vadd.f32 %v566_v45, %v12878_v51  ;;  %v6635_v30 = vld [vmem:[%s12089_s0 + $0xb2] sm:$0xff]  ;;  %v6640_v33 = vld [vmem:[%s12089_s0 + $0xc2] sm:$0xff] }
  0xb6   : > { %12871 = vst [vmem:[#allocation33_spill] sm:$0xff] %v6606_v61  ;;  %12872 = vst [vmem:[#allocation34_spill] sm:$0xff] %v6611_v23  ;;  %v12883_v6 = vld [vmem:[#allocation39_spill] sm:$0xff]  ;;  %v6651_v42 = vld [vmem:[%s12089_s0 + $0xda] sm:$0xff] }
  0xb7   : > { %12873 = vst [vmem:[#allocation35_spill] sm:$0xff] %v6616_v10  ;;  %12875 = vst [vmem:[#allocation36_spill] sm:$0xff] %v6619_v17  ;;  %v638_v52 = vmul.f32 %v12883_v6, %v599_v25  ;;  %v6646_v45 = vld [vmem:[%s12089_s0 + $0xca] sm:$0xff]  ;;  %v6656_v4 = vld [vmem:[%s12089_s0 + $0xe2] sm:$0xff]  ;;  %v639_v18 = vmul.f32 %v12883_v6, %v600_v58  ;;  %v640_v25 = vmul.f32 %v12883_v6, %v6525_v3 }
  0xb8   : > { %12877 = vst [vmem:[#allocation40_spill] sm:$0xff] %v6622_v1  ;;  %12879 = vst [vmem:[#allocation41_spill] sm:$0xff] %v6625_v13  ;;  %v641_v59 = vmul.f32 %v12883_v6, %v6530_v47  ;;  %v642_v21 = vmul.f32 %v12883_v6, %v6535_v43  ;;  %v6668_v44 = vld [vmem:[%s12089_s0 + $0xf2] sm:$0xff]  ;;  %v6673_v63 = vld [vmem:[%s12089_s0 + $0xfa] sm:$0xff]  ;;  %v643_v5 = vmul.f32 %v12883_v6, %v6552_v7 }
  0xb9   : > { %12880 = vst [vmem:[#allocation42_spill] sm:$0xff] %v6630_v26  ;;  %12881 = vst [vmem:[#allocation43_spill] sm:$0xff] %v6635_v30  ;;  %v6678_v58 = vld [vmem:[%s12089_s0 + $0x10a] sm:$0xff]  ;;  %v644_v0 = vmul.f32 %v12883_v6, %v6557_v15  ;;  %v645_v36 = vmul.f32 %v12883_v6, %v6562_v11  ;;  %v646_v27 = vmul.f32 %v12883_v6, %v6579_v29  ;;  %v6691_v51 = vld [vmem:[%s12089_s0 + $0x112] sm:$0xff] }
  0xba   : > { %12882 = vst [vmem:[#allocation44_spill] sm:$0xff] %v6640_v33  ;;  %12884 = vst [vmem:[#allocation45_spill] sm:$0xff] %v6646_v45  ;;  %v6696_v43 = vld [vmem:[%s12089_s0 + $0x122] sm:$0xff]  ;;  %v6701_v15 = vld [vmem:[%s12089_s0 + $0x12a] sm:$0xff]  ;;  %v647_v11 = vmul.f32 %v12883_v6, %v6584_v8  ;;  %v648_v29 = vmul.f32 %v12883_v6, %v6589_v38  ;;  %v649_v7 = vmul.f32 %v12883_v6, %v6606_v61 }
  0xbb   : > { %12885 = vst [vmem:[#allocation46_spill] sm:$0xff] %v6651_v42  ;;  %12886 = vst [vmem:[#allocation47_spill] sm:$0xff] %v6656_v4  ;;  %v650_v47 = vmul.f32 %v12883_v6, %v6611_v23  ;;  %v6714_v3 = vld [vmem:[%s12089_s0 + $0x13a] sm:$0xff]  ;;  %v6719_v8 = vld [vmem:[%s12089_s0 + $0x142] sm:$0xff]  ;;  %v651_v61 = vmul.f32 %v12883_v6, %v6616_v10  ;;  %v652_v23 = vmul.f32 %v12883_v6, %v6630_v26 }
  0xbc   : > { %12887 = vst [vmem:[#allocation48_spill] sm:$0xff] %v6668_v44  ;;  %12888 = vst [vmem:[#allocation52_spill] sm:$0xff] %v6673_v63  ;;  %v6724_v38 = vld [vmem:[%s12089_s0 + $0x152] sm:$0xff]  ;;  %v653_v13 = vmul.f32 %v12883_v6, %v6635_v30  ;;  %v654_v1 = vmul.f32 %v12883_v6, %v6640_v33  ;;  %v6737_v17 = vld [vmem:[%s12089_s0 + $0x15a] sm:$0xff]  ;;  %v655_v30 = vmul.f32 %v12883_v6, %v6646_v45 }
  0xbd   : > { %12889 = vst [vmem:[#allocation53_spill] sm:$0xff] %v6678_v58  ;;  %12890 = vst [vmem:[#allocation54_spill] sm:$0xff] %v6691_v51  ;;  %v6742_v10 = vld [vmem:[%s12089_s0 + $0x16a] sm:$0xff]  ;;  %v6747_v26 = vld [vmem:[%s12089_s0 + $0x172] sm:$0xff]  ;;  %v656_v33 = vmul.f32 %v12883_v6, %v6651_v42  ;;  %v657_v41 = vmul.f32 %v12883_v6, %v6656_v4  ;;  %v658_v60 = vmul.f32 %v12883_v6, %v6668_v44 }
  0xbe   : > { %12891 = vst [vmem:[#allocation55_spill] sm:$0xff] %v6696_v43  ;;  %12892 = vst [vmem:[#allocation56_spill] sm:$0xff] %v6701_v15  ;;  %v659_v62 = vmul.f32 %v12883_v6, %v6673_v63  ;;  %v660_v9 = vmul.f32 %v12883_v6, %v6678_v58  ;;  %v661_v45 = vmul.f32 %v12883_v6, %v6691_v51 }
  0xbf   : > { %12893 = vst [vmem:[#allocation57_spill] sm:$0xff] %v6719_v8  ;;  %12894 = vst [vmem:[#allocation30_spill] sm:$0xff] %v6724_v38  ;;  %v662_v42 = vmul.f32 %v12883_v6, %v6696_v43  ;;  %v663_v4 = vmul.f32 %v12883_v6, %v6701_v15  ;;  %v664_v44 = vmul.f32 %v12883_v6, %v6714_v3 }
  0xc0   : > { %12895 = vst [vmem:[#allocation31_spill] sm:$0xff] %v6737_v17  ;;  %12896 = vst [vmem:[#allocation32_spill] sm:$0xff] %v6742_v10  ;;  %v665_v63 = vmul.f32 %v12883_v6, %v6719_v8  ;;  %v666_v58 = vmul.f32 %v12883_v6, %v6724_v38  ;;  %v667_v51 = vmul.f32 %v12883_v6, %v6737_v17 }
  0xc1   : > { %12897 = vst [vmem:[#allocation49_spill] sm:$0xff] %v6747_v26  ;;  %v668_v43 = vmul.f32 %v12883_v6, %v6742_v10  ;;  %v669_v22 = vmul.f32 %v12883_v6, %v6747_v26  ;;  %v6784_v15 = vadd.f32 %v638_v52, %v6466_v19  ;;  %v6791_v8 = vadd.f32 %v639_v18, %v6469_v53  ;;  %v12922_v18 = vld [vmem:[#allocation24_spill] sm:$0xff] }
  0xc2   : > { %v6794_v38 = vadd.f32 %v640_v25, %v6472_v50  ;;  %v6797_v17 = vadd.f32 %v641_v59, %v6475_v39  ;;  %v6800_v10 = vadd.f32 %v642_v21, %v6478_v57  ;;  %v6807_v19 = vadd.f32 %v643_v5, %v6481_v56  ;;  %v12923_v59 = vld [vmem:[#allocation25_spill] sm:$0xff] }
  0xc3   : > { %v6810_v6 = vadd.f32 %v644_v0, %v6484_v54  ;;  %v6813_v53 = vadd.f32 %v645_v36, %v6487_v55  ;;  %v6816_v50 = vadd.f32 %v646_v27, %v6490_v49  ;;  %v6819_v39 = vadd.f32 %v647_v11, %v6493_v24  ;;  %v12927_v0 = vld [vmem:[#allocation20_spill] sm:$0xff]  ;;  %v12928_v27 = vld [vmem:[#allocation21_spill] sm:$0xff] }
  0xc4   : > { %v6822_v57 = vadd.f32 %v648_v29, %v6496_v12  ;;  %v6825_v52 = vadd.f32 %v649_v7, %v6499_v31  ;;  %v6828_v56 = vadd.f32 %v650_v47, %v6502_v28  ;;  %v6831_v54 = vadd.f32 %v651_v61, %v6508_v34  ;;  %v12901_v47 = vld [vmem:[#allocation18_spill] sm:$0xff]  ;;  %v12905_v7 = vld [vmem:[#allocation27_spill] sm:$0xff] }
  0xc5   : > { %v6834_v55 = vadd.f32 %v652_v23, %v6511_v40  ;;  %v6837_v49 = vadd.f32 %v653_v13, %v6514_v2  ;;  %v6840_v24 = vadd.f32 %v654_v1, %v6517_v35  ;;  %v6843_v12 = vadd.f32 %v655_v30, %v6538_v46  ;;  %v12917_v1 = vld [vmem:[#allocation22_spill] sm:$0xff] }
  0xc6   : > { %v6846_v31 = vadd.f32 %v656_v33, %v6541_v48  ;;  %v6849_v28 = vadd.f32 %v657_v41, %v6544_v16  ;;  %v6852_v34 = vadd.f32 %v658_v60, %v6547_v32  ;;  %v6855_v40 = vadd.f32 %v659_v62, %v6565_v14  ;;  %v12903_v48 = vld [vmem:[#allocation26_spill] sm:$0xff]  ;;  %v12907_v32 = vld [vmem:[#allocation28_spill] sm:$0xff]  ;;  %v12909_v14 = vld [vmem:[#allocation29_spill] sm:$0xff] }
  0xc7   : > { %v6858_v2 = vadd.f32 %v660_v9, %v6568_v37  ;;  %v6861_v35 = vadd.f32 %v661_v45, %v6571_v20  ;;  %v6864_v46 = vadd.f32 %v662_v42, %v12901_v47  ;;  %v6867_v16 = vadd.f32 %v663_v4, %v12903_v48  ;;  %v12911_v37 = vld [vmem:[#allocation36_spill] sm:$0xff]  ;;  %v12915_v41 = vld [vmem:[#allocation41_spill] sm:$0xff]  ;;  %v12921_v42 = vld [vmem:[#allocation23_spill] sm:$0xff] }
  0xc8   : > { %12898 = vst [vmem:[#allocation37_spill] sm:$0xff] %v6855_v40  ;;  %v6870_v11 = vadd.f32 %v664_v44, %v12905_v7  ;;  %v6873_v29 = vadd.f32 %v665_v63, %v12907_v32  ;;  %v6876_v62 = vadd.f32 %v666_v58, %v12909_v14  ;;  %v6879_v9 = vadd.f32 %v667_v51, %v12911_v37  ;;  %v12913_v20 = vld [vmem:[#allocation40_spill] sm:$0xff]  ;;  %v12925_v63 = vld [vmem:[#allocation38_spill] sm:$0xff]  ;;  %v12926_v58 = vld [vmem:[#allocation19_spill] sm:$0xff] }
  0xc9   : > { %12899 = vst [vmem:[#allocation50_spill] sm:$0xff] %v6858_v2  ;;  %12900 = vst [vmem:[#allocation51_spill] sm:$0xff] %v6861_v35  ;;  %v6882_v60 = vadd.f32 %v668_v43, %v12913_v20  ;;  %v6885_v61 = vadd.f32 %v669_v22, %v12915_v41  ;;  %v704_v23 = vstv %s6786_s23  ;;  %v6890_v30 = vstv %s6788_s3  ;;  %v12924_v43 = vld [vmem:[#allocation14_spill] sm:$0xff]  ;;  %v12929_v47 = vld [vmem:[#allocation33_spill] sm:$0xff]  ;;  %s7594_s23 = sld [smem:[#allocation4 + %s1007_s13]]  ;;  %s1347_s13 = sadd.s32 11, %s5358_s16 }
  0xca   : > { %12902 = vst [vmem:[#allocation15_spill] sm:$0xff] %v6864_v46  ;;  %12904 = vst [vmem:[#allocation16_spill] sm:$0xff] %v6867_v16  ;;  %v705_v13 = vmul.f32 %v704_v23, %v12917_v1  ;;  %v6893_v33 = vstv %s6802_s24  ;;  %v6896_v45 = vstv %s6804_s18  ;;  %v706_v4 = vmul.f32 %v704_v23, %v12921_v42  ;;  %v12930_v7 = vld [vmem:[#allocation34_spill] sm:$0xff]  ;;  %v12931_v14 = vld [vmem:[#allocation35_spill] sm:$0xff]  ;;  %s7596_s3 = sld [smem:[#allocation4 + %s1110_s14]]  ;;  %s1414_s14 = sadd.s32 14, %s5358_s16 }
  0xcb   : > { %12906 = vst [vmem:[#allocation17_spill] sm:$0xff] %v6870_v11  ;;  %12908 = vst [vmem:[#allocation39_spill] sm:$0xff] %v6873_v29  ;;  %v707_v25 = vmul.f32 %v704_v23, %v12922_v18  ;;  %v708_v21 = vmul.f32 %v704_v23, %v12923_v59  ;;  %v709_v44 = vmul.f32 %v704_v23, %v12924_v43  ;;  %v12932_v20 = vld [vmem:[#allocation42_spill] sm:$0xff]  ;;  %v12933_v1 = vld [vmem:[#allocation43_spill] sm:$0xff]  ;;  %s7610_s24 = sld [smem:[#allocation4 + %s1177_s15]]  ;;  %s1481_s15 = sadd.s32 17, %s5358_s16 }
  0xcc   : > { %12910 = vst [vmem:[#allocation18_spill] sm:$0xff] %v6876_v62  ;;  %12912 = vst [vmem:[#allocation26_spill] sm:$0xff] %v6879_v9  ;;  %v710_v22 = vmul.f32 %v704_v23, %v12925_v63  ;;  %v711_v5 = vmul.f32 %v704_v23, %v12926_v58  ;;  %v712_v36 = vmul.f32 %v704_v23, %v12927_v0  ;;  %v12935_v43 = vld [vmem:[#allocation45_spill] sm:$0xff]  ;;  %v12936_v59 = vld [vmem:[#allocation46_spill] sm:$0xff]  ;;  %s7612_s18 = sld [smem:[#allocation4 + %s1244_s22]]  ;;  %s1585_s22 = sadd.s32 18, %s5358_s16 }
  0xcd   : > { %12914 = vst [vmem:[#allocation27_spill] sm:$0xff] %v6882_v60  ;;  %12916 = vst [vmem:[#allocation28_spill] sm:$0xff] %v6885_v61  ;;  %v713_v51 = vmul.f32 %v704_v23, %v12928_v27  ;;  %v714_v48 = vmul.f32 %v704_v23, %v12929_v47  ;;  %v715_v32 = vmul.f32 %v704_v23, %v12930_v7  ;;  %v6917_v27 = vld [vmem:[%s12089_s0 + $0x182] sm:$0xff]  ;;  %v6922_v7 = vld [vmem:[%s12089_s0 + $0x18a] sm:$0xff] }
  0xce   : > { %12918 = vst [vmem:[#allocation29_spill] sm:$0xff] %v6890_v30  ;;  %12919 = vst [vmem:[#allocation36_spill] sm:$0xff] %v6893_v33  ;;  %v716_v37 = vmul.f32 %v704_v23, %v12931_v14  ;;  %v717_v41 = vmul.f32 %v704_v23, %v12932_v20  ;;  %v718_v42 = vmul.f32 %v704_v23, %v12933_v1  ;;  %v12937_v14 = vld [vmem:[#allocation47_spill] sm:$0xff]  ;;  %v12938_v47 = vld [vmem:[#allocation48_spill] sm:$0xff] }
  0xcf   : > { %12920 = vst [vmem:[#allocation40_spill] sm:$0xff] %v6896_v45  ;;  %v12934_v45 = vld [vmem:[#allocation44_spill] sm:$0xff]  ;;  %v720_v63 = vmul.f32 %v704_v23, %v12935_v43  ;;  %v721_v58 = vmul.f32 %v704_v23, %v12936_v59  ;;  %v722_v20 = vmul.f32 %v704_v23, %v12937_v14  ;;  %v723_v1 = vmul.f32 %v704_v23, %v12938_v47  ;;  %v12940_v30 = vld [vmem:[#allocation53_spill] sm:$0xff]  ;;  %v12941_v18 = vld [vmem:[#allocation54_spill] sm:$0xff] }
  0xd0   : > { %v719_v33 = vmul.f32 %v704_v23, %v12934_v45  ;;  %v12939_v0 = vld [vmem:[#allocation52_spill] sm:$0xff]  ;;  %v725_v43 = vmul.f32 %v704_v23, %v12940_v30  ;;  %v726_v59 = vmul.f32 %v704_v23, %v12941_v18  ;;  %v12942_v61 = vld [vmem:[#allocation55_spill] sm:$0xff]  ;;  %v729_v29 = vmul.f32 %v704_v23, %v6714_v3  ;;  %v12944_v11 = vld [vmem:[#allocation57_spill] sm:$0xff] }
  0xd1   : > { %v724_v45 = vmul.f32 %v704_v23, %v12939_v0  ;;  %v727_v60 = vmul.f32 %v704_v23, %v12942_v61  ;;  %v12943_v9 = vld [vmem:[#allocation56_spill] sm:$0xff]  ;;  %v730_v16 = vmul.f32 %v704_v23, %v12944_v11  ;;  %v12945_v46 = vld [vmem:[#allocation30_spill] sm:$0xff]  ;;  %v12946_v2 = vld [vmem:[#allocation31_spill] sm:$0xff]  ;;  %v734_v0 = vmul.f32 %v704_v23, %v6747_v26 }
  0xd2   : > { %v728_v62 = vmul.f32 %v704_v23, %v12943_v9  ;;  %v731_v35 = vmul.f32 %v704_v23, %v12945_v46  ;;  %v732_v14 = vmul.f32 %v704_v23, %v12946_v2  ;;  %v12947_v40 = vld [vmem:[#allocation32_spill] sm:$0xff]  ;;  %v735_v30 = vmul.f32 %v704_v23, %v6917_v27 }
  0xd3   : > { %v733_v47 = vmul.f32 %v704_v23, %v12947_v40  ;;  %v736_v18 = vmul.f32 %v704_v23, %v6922_v7  ;;  %v6940_v61 = vadd.f32 %v705_v13, %v6784_v15  ;;  %v6943_v9 = vadd.f32 %v706_v4, %v6791_v8 }
  0xd4   : > { %v6946_v11 = vadd.f32 %v707_v25, %v6794_v38  ;;  %v6949_v46 = vadd.f32 %v708_v21, %v6797_v17  ;;  %v6952_v40 = vadd.f32 %v709_v44, %v6800_v10  ;;  %v6955_v26 = vadd.f32 %v710_v22, %v6807_v19 }
  0xd5   : > { %v6958_v23 = vadd.f32 %v711_v5, %v6810_v6  ;;  %v6961_v15 = vadd.f32 %v712_v36, %v6813_v53  ;;  %v6964_v8 = vadd.f32 %v713_v51, %v6816_v50  ;;  %v6967_v38 = vadd.f32 %v714_v48, %v6819_v39  ;;  %v12969_v5 = vld [vmem:[#allocation29_spill] sm:$0xff]  ;;  %v12971_v48 = vld [vmem:[#allocation14_spill] sm:$0xff] }
  0xd6   : > { %v6970_v17 = vadd.f32 %v715_v32, %v6822_v57  ;;  %v6973_v10 = vadd.f32 %v716_v37, %v6825_v52  ;;  %v6976_v19 = vadd.f32 %v717_v41, %v6828_v56  ;;  %v6979_v6 = vadd.f32 %v718_v42, %v6831_v54 }
  0xd7   : > { %v6982_v53 = vadd.f32 %v719_v33, %v6834_v55  ;;  %v6985_v50 = vadd.f32 %v720_v63, %v6837_v49  ;;  %v6988_v39 = vadd.f32 %v721_v58, %v6840_v24  ;;  %v6991_v57 = vadd.f32 %v722_v20, %v6843_v12  ;;  %v12948_v55 = vld [vmem:[#allocation37_spill] sm:$0xff]  ;;  %v12949_v49 = vld [vmem:[#allocation50_spill] sm:$0xff]  ;;  %v12950_v24 = vld [vmem:[#allocation51_spill] sm:$0xff] }
  0xd8   : > { %v6994_v52 = vadd.f32 %v723_v1, %v6846_v31  ;;  %v6997_v56 = vadd.f32 %v724_v45, %v6849_v28  ;;  %v7000_v54 = vadd.f32 %v725_v43, %v6852_v34  ;;  %v7003_v13 = vadd.f32 %v726_v59, %v12948_v55  ;;  %v12952_v12 = vld [vmem:[#allocation15_spill] sm:$0xff]  ;;  %v12954_v31 = vld [vmem:[#allocation16_spill] sm:$0xff]  ;;  %v12956_v28 = vld [vmem:[#allocation17_spill] sm:$0xff] }
  0xd9   : > { %v7006_v33 = vadd.f32 %v727_v60, %v12949_v49  ;;  %v7009_v4 = vadd.f32 %v728_v62, %v12950_v24  ;;  %v7012_v25 = vadd.f32 %v729_v29, %v12952_v12  ;;  %v7015_v21 = vadd.f32 %v730_v16, %v12954_v31  ;;  %v12958_v34 = vld [vmem:[#allocation39_spill] sm:$0xff]  ;;  %v12960_v59 = vld [vmem:[#allocation18_spill] sm:$0xff]  ;;  %v12966_v29 = vld [vmem:[#allocation28_spill] sm:$0xff] }
  0xda   : > { %v7018_v45 = vadd.f32 %v731_v35, %v12956_v28  ;;  %v7021_v43 = vadd.f32 %v732_v14, %v12958_v34  ;;  %v7024_v44 = vadd.f32 %v733_v47, %v12960_v59  ;;  %v12962_v60 = vld [vmem:[#allocation26_spill] sm:$0xff]  ;;  %v12964_v62 = vld [vmem:[#allocation27_spill] sm:$0xff]  ;;  %v7033_v58 = vadd.f32 %v736_v18, %v12966_v29  ;;  %v12968_v16 = vld [vmem:[#allocation24_spill] sm:$0xff] }
  0xdb   : > { %12951 = vst [vmem:[#allocation41_spill] sm:$0xff] %v7009_v4  ;;  %12953 = vst [vmem:[#allocation22_spill] sm:$0xff] %v7012_v25  ;;  %v7027_v63 = vadd.f32 %v734_v0, %v12962_v60  ;;  %v7030_v22 = vadd.f32 %v735_v30, %v12964_v62  ;;  %v772_v36 = vmul.f32 %v12969_v5, %v12968_v16  ;;  %v12970_v35 = vld [vmem:[#allocation25_spill] sm:$0xff]  ;;  %v12972_v47 = vld [vmem:[#allocation38_spill] sm:$0xff] }
  0xdc   : > { %12955 = vst [vmem:[#allocation23_spill] sm:$0xff] %v7015_v21  ;;  %12957 = vst [vmem:[#allocation31_spill] sm:$0xff] %v7018_v45  ;;  %v773_v51 = vmul.f32 %v12969_v5, %v12970_v35  ;;  %v774_v32 = vmul.f32 %v12969_v5, %v12971_v48  ;;  %v775_v14 = vmul.f32 %v12969_v5, %v12972_v47  ;;  %v12973_v0 = vld [vmem:[#allocation19_spill] sm:$0xff]  ;;  %v12974_v30 = vld [vmem:[#allocation20_spill] sm:$0xff] }
  0xdd   : > { %12959 = vst [vmem:[#allocation37_spill] sm:$0xff] %v7021_v43  ;;  %12961 = vst [vmem:[#allocation50_spill] sm:$0xff] %v7024_v44  ;;  %v776_v37 = vmul.f32 %v12969_v5, %v12973_v0  ;;  %v777_v20 = vmul.f32 %v12969_v5, %v12974_v30  ;;  %v12975_v18 = vld [vmem:[#allocation21_spill] sm:$0xff]  ;;  %v12977_v55 = vld [vmem:[#allocation34_spill] sm:$0xff] }
  0xde   : > { %12963 = vst [vmem:[#allocation51_spill] sm:$0xff] %v7027_v63  ;;  %12965 = vst [vmem:[#allocation15_spill] sm:$0xff] %v7030_v22  ;;  %v778_v41 = vmul.f32 %v12969_v5, %v12975_v18  ;;  %v12976_v1 = vld [vmem:[#allocation33_spill] sm:$0xff]  ;;  %v780_v49 = vmul.f32 %v12969_v5, %v12977_v55  ;;  %v12978_v24 = vld [vmem:[#allocation35_spill] sm:$0xff]  ;;  %v794_v63 = vmul.f32 %v12969_v5, %v6714_v3 }
  0xdf   : > { %12967 = vst [vmem:[#allocation16_spill] sm:$0xff] %v7033_v58  ;;  %v779_v42 = vmul.f32 %v12969_v5, %v12976_v1  ;;  %v781_v12 = vmul.f32 %v12969_v5, %v12978_v24  ;;  %v12979_v31 = vld [vmem:[#allocation42_spill] sm:$0xff]  ;;  %v12980_v34 = vld [vmem:[#allocation43_spill] sm:$0xff]  ;;  %v12981_v60 = vld [vmem:[#allocation44_spill] sm:$0xff]  ;;  %v801_v3 = vmul.f32 %v12969_v5, %v6922_v7  ;;  %v7119_v7 = vadd.f32 %v777_v20, %v6955_v26 }
  0xe0   : > { %v782_v28 = vmul.f32 %v12969_v5, %v12979_v31  ;;  %v783_v59 = vmul.f32 %v12969_v5, %v12980_v34  ;;  %v784_v62 = vmul.f32 %v12969_v5, %v12981_v60  ;;  %v12982_v29 = vld [vmem:[#allocation45_spill] sm:$0xff]  ;;  %v12983_v35 = vld [vmem:[#allocation46_spill] sm:$0xff]  ;;  %v12984_v47 = vld [vmem:[#allocation47_spill] sm:$0xff] }
  0xe1   : > { %v785_v16 = vmul.f32 %v12969_v5, %v12982_v29  ;;  %v786_v48 = vmul.f32 %v12969_v5, %v12983_v35  ;;  %v787_v0 = vmul.f32 %v12969_v5, %v12984_v47  ;;  %v12985_v30 = vld [vmem:[#allocation48_spill] sm:$0xff]  ;;  %v633_v1 = vld [vmem:[%s12089_s0 + $0x19a] sm:$0xff]  ;;  %v634_v55 = vld [vmem:[%s12089_s0 + $0x1a2] sm:$0xff] }
  0xe2   : > { %v788_v18 = vmul.f32 %v12969_v5, %v12985_v30  ;;  %v12986_v24 = vld [vmem:[#allocation52_spill] sm:$0xff]  ;;  %v12987_v34 = vld [vmem:[#allocation53_spill] sm:$0xff]  ;;  %v12988_v29 = vld [vmem:[#allocation54_spill] sm:$0xff]  ;;  %v803_v4 = vmul.f32 %v12969_v5, %v634_v55  ;;  %v7140_v26 = vadd.f32 %v784_v62, %v6976_v19 }
  0xe3   : > { %v789_v31 = vmul.f32 %v12969_v5, %v12986_v24  ;;  %v790_v60 = vmul.f32 %v12969_v5, %v12987_v34  ;;  %v791_v35 = vmul.f32 %v12969_v5, %v12988_v29  ;;  %v12989_v47 = vld [vmem:[#allocation55_spill] sm:$0xff]  ;;  %v12990_v58 = vld [vmem:[#allocation56_spill] sm:$0xff]  ;;  %v12991_v44 = vld [vmem:[#allocation57_spill] sm:$0xff]  ;;  %v797_v34 = vmul.f32 %v12969_v5, %v12946_v2 }
  0xe4   : > { %v792_v30 = vmul.f32 %v12969_v5, %v12989_v47  ;;  %v793_v22 = vmul.f32 %v12969_v5, %v12990_v58  ;;  %v795_v43 = vmul.f32 %v12969_v5, %v12991_v44  ;;  %v12992_v45 = vld [vmem:[#allocation30_spill] sm:$0xff]  ;;  %v12993_v21 = vld [vmem:[#allocation32_spill] sm:$0xff]  ;;  %v12994_v25 = vld [vmem:[#allocation49_spill] sm:$0xff]  ;;  %v800_v58 = vmul.f32 %v12969_v5, %v6917_v27 }
  0xe5   : > { %v796_v24 = vmul.f32 %v12969_v5, %v12992_v45  ;;  %v798_v29 = vmul.f32 %v12969_v5, %v12993_v21  ;;  %v799_v47 = vmul.f32 %v12969_v5, %v12994_v25  ;;  %v802_v44 = vmul.f32 %v12969_v5, %v633_v1  ;;  %v7163_v19 = vld [vmem:[%s12089_s0 + $0x1c8] sm:$0xff]  ;;  %v13002_v20 = vld [vmem:[#allocation22_spill] sm:$0xff] }
  0xe6   : > { %v7104_v45 = vadd.f32 %v772_v36, %v6940_v61  ;;  %v7107_v2 = vadd.f32 %v773_v51, %v6943_v9  ;;  %v7110_v21 = vadd.f32 %v774_v32, %v6946_v11  ;;  %v7113_v25 = vadd.f32 %v775_v14, %v6949_v46  ;;  %12995 = vst [vmem:[#allocation17_spill] sm:$0xff] %v7163_v19  ;;  %v7190_v32 = vld [vmem:[%s12089_s0 + $0x1e8] sm:$0xff]  ;;  %v7195_v14 = vld [vmem:[%s12089_s0 + $0x1f8] sm:$0xff] }
  0xe7   : > { %v7116_v27 = vadd.f32 %v776_v37, %v6952_v40  ;;  %v7122_v5 = vadd.f32 %v778_v41, %v6958_v23  ;;  %v7125_v61 = vadd.f32 %v779_v42, %v6961_v15  ;;  %v7128_v9 = vadd.f32 %v780_v49, %v6964_v8  ;;  %v4730_v23 = vld [vmem:[%s12089_s0 + $0x1b0] sm:$0xff]  ;;  %12998 = vst [vmem:[#allocation26_spill] sm:$0xff] %v7190_v32  ;;  %v7222_v49 = vld [vmem:[%s12089_s0 + $0x218] sm:$0xff]  ;;  %v13020_v55 = vld [vmem:[#allocation15_spill] sm:$0xff] }
  0xe8   : > { %v7131_v11 = vadd.f32 %v781_v12, %v6967_v38  ;;  %v7134_v46 = vadd.f32 %v782_v28, %v6970_v17  ;;  %v7137_v40 = vadd.f32 %v783_v59, %v6973_v10  ;;  %v7146_v15 = vadd.f32 %v785_v16, %v6979_v6  ;;  %v4731_v10 = vld [vmem:[%s12089_s0 + $0x1b8] sm:$0xff]  ;;  %v7168_v6 = vld [vmem:[%s12089_s0 + $0x1d0] sm:$0xff]  ;;  %12999 = vst [vmem:[#allocation27_spill] sm:$0xff] %v7195_v14  ;;  %v13013_v59 = vld [vmem:[#allocation50_spill] sm:$0xff] }
  0xe9   : > { %v7149_v8 = vadd.f32 %v786_v48, %v6982_v53  ;;  %v7152_v38 = vadd.f32 %v787_v0, %v6985_v50  ;;  %v7155_v17 = vadd.f32 %v788_v18, %v6988_v39  ;;  %12996 = vst [vmem:[#allocation39_spill] sm:$0xff] %v7168_v6  ;;  %v7173_v53 = vld [vmem:[%s12089_s0 + $0x1e0] sm:$0xff]  ;;  %v7176_v50 = vadd.f32 %v789_v31, %v6991_v57  ;;  %v7217_v42 = vld [vmem:[%s12089_s0 + $0x210] sm:$0xff]  ;;  %v13011_v12 = vld [vmem:[#allocation37_spill] sm:$0xff] }
  0xea   : > { %12997 = vst [vmem:[#allocation18_spill] sm:$0xff] %v7173_v53  ;;  %v7179_v39 = vadd.f32 %v790_v60, %v6994_v52  ;;  %v7182_v36 = vadd.f32 %v791_v35, %v6997_v56  ;;  %v7185_v51 = vadd.f32 %v792_v30, %v7000_v54  ;;  %v7200_v57 = vld [vmem:[%s12089_s0 + $0x200] sm:$0xff]  ;;  %v7203_v52 = vadd.f32 %v793_v22, %v7003_v13  ;;  %v13001_v54 = vld [vmem:[#allocation41_spill] sm:$0xff]  ;;  %v7227_v13 = vld [vmem:[%s12089_s0 + $0x228] sm:$0xff] }
  0xeb   : > { %13000 = vst [vmem:[#allocation28_spill] sm:$0xff] %v7200_v57  ;;  %v7206_v56 = vadd.f32 %v794_v63, %v7006_v33  ;;  %v7209_v37 = vadd.f32 %v795_v43, %v13001_v54  ;;  %v7212_v41 = vadd.f32 %v796_v24, %v13002_v20  ;;  %13004 = vst [vmem:[#allocation29_spill] sm:$0xff] %v7217_v42  ;;  %v13007_v33 = vld [vmem:[#allocation23_spill] sm:$0xff]  ;;  %v7244_v16 = vld [vmem:[%s12089_s0 + $0x230] sm:$0xff] }
  0xec   : > { %13005 = vst [vmem:[#allocation25_spill] sm:$0xff] %v7222_v49  ;;  %13006 = vst [vmem:[#allocation14_spill] sm:$0xff] %v7227_v13  ;;  %v7230_v43 = vadd.f32 %v797_v34, %v13007_v33  ;;  %v13009_v63 = vld [vmem:[#allocation31_spill] sm:$0xff]  ;;  %v7236_v28 = vadd.f32 %v799_v47, %v13011_v12  ;;  %v7239_v62 = vadd.f32 %v800_v58, %v13013_v59  ;;  %v7249_v48 = vld [vmem:[%s12089_s0 + $0x240] sm:$0xff] }
  0xed   : > { %13003 = vst [vmem:[#allocation24_spill] sm:$0xff] %v7212_v41  ;;  %v7233_v22 = vadd.f32 %v798_v29, %v13009_v63  ;;  %13015 = vst [vmem:[#allocation33_spill] sm:$0xff] %v7244_v16  ;;  %v7254_v0 = vld [vmem:[%s12089_s0 + $0x248] sm:$0xff]  ;;  %v7260_v31 = vadd.f32 %v802_v44, %v13020_v55  ;;  %v13022_v60 = vld [vmem:[#allocation16_spill] sm:$0xff] }
  0xee   : > { %13008 = vst [vmem:[#allocation38_spill] sm:$0xff] %v7230_v43  ;;  %13012 = vst [vmem:[#allocation20_spill] sm:$0xff] %v7236_v28  ;;  %v13018_v18 = vld [vmem:[#allocation51_spill] sm:$0xff]  ;;  %v7263_v35 = vadd.f32 %v803_v4, %v13022_v60  ;;  %v7268_v30 = vld [vmem:[%s12089_s0 + $0x258] sm:$0xff] }
  0xef   : > { %13010 = vst [vmem:[#allocation19_spill] sm:$0xff] %v7233_v22  ;;  %13014 = vst [vmem:[#allocation21_spill] sm:$0xff] %v7239_v62  ;;  %v7257_v1 = vadd.f32 %v801_v3, %v13018_v18  ;;  %v7273_v24 = vld [vmem:[%s12089_s0 + $0x260] sm:$0xff]  ;;  %v7278_v34 = vld [vmem:[%s12089_s0 + $0x270] sm:$0xff] }
  0xf0   : > { %13016 = vst [vmem:[#allocation34_spill] sm:$0xff] %v7249_v48  ;;  %13017 = vst [vmem:[#allocation35_spill] sm:$0xff] %v7254_v0  ;;  %v13027_v29 = vld [vmem:[#allocation36_spill] sm:$0xff]  ;;  %v7284_v4 = vld [vmem:[%s12089_s0 + $0x278] sm:$0xff] }
  0xf1   : > { %13019 = vst [vmem:[#allocation42_spill] sm:$0xff] %v7257_v1  ;;  %13021 = vst [vmem:[#allocation43_spill] sm:$0xff] %v7260_v31  ;;  %v876_v47 = vmul.f32 %v4730_v23, %v13027_v29  ;;  %v7289_v58 = vld [vmem:[%s12089_s0 + $0x288] sm:$0xff]  ;;  %v7294_v3 = vld [vmem:[%s12089_s0 + $0x290] sm:$0xff]  ;;  %v877_v44 = vmul.f32 %v4731_v10, %v13027_v29  ;;  %v878_v23 = vmul.f32 %v7163_v19, %v13027_v29 }
  0xf2   : > { %13023 = vst [vmem:[#allocation44_spill] sm:$0xff] %v7263_v35  ;;  %13024 = vst [vmem:[#allocation45_spill] sm:$0xff] %v7268_v30  ;;  %v879_v54 = vmul.f32 %v7168_v6, %v13027_v29  ;;  %v880_v20 = vmul.f32 %v7173_v53, %v13027_v29  ;;  %v7306_v33 = vld [vmem:[%s12089_s0 + $0x2a0] sm:$0xff]  ;;  %v7311_v63 = vld [vmem:[%s12089_s0 + $0x2a8] sm:$0xff]  ;;  %v881_v12 = vmul.f32 %v7190_v32, %v13027_v29 }
  0xf3   : > { %13025 = vst [vmem:[#allocation46_spill] sm:$0xff] %v7273_v24  ;;  %13026 = vst [vmem:[#allocation47_spill] sm:$0xff] %v7278_v34  ;;  %v7316_v10 = vld [vmem:[%s12089_s0 + $0x2b8] sm:$0xff]  ;;  %v882_v59 = vmul.f32 %v7195_v14, %v13027_v29  ;;  %v883_v18 = vmul.f32 %v7200_v57, %v13027_v29  ;;  %v884_v55 = vmul.f32 %v7217_v42, %v13027_v29  ;;  %v7329_v60 = vld [vmem:[%s12089_s0 + $0x2c0] sm:$0xff] }
  0xf4   : > { %13028 = vst [vmem:[#allocation48_spill] sm:$0xff] %v7284_v4  ;;  %13029 = vst [vmem:[#allocation52_spill] sm:$0xff] %v7289_v58  ;;  %v7334_v53 = vld [vmem:[%s12089_s0 + $0x2d0] sm:$0xff]  ;;  %v7339_v14 = vld [vmem:[%s12089_s0 + $0x2d8] sm:$0xff]  ;;  %v885_v57 = vmul.f32 %v7222_v49, %v13027_v29  ;;  %v886_v42 = vmul.f32 %v7227_v13, %v13027_v29  ;;  %v887_v32 = vmul.f32 %v7244_v16, %v13027_v29 }
  0xf5   : > { %13030 = vst [vmem:[#allocation53_spill] sm:$0xff] %v7294_v3  ;;  %13031 = vst [vmem:[#allocation54_spill] sm:$0xff] %v7306_v33  ;;  %v888_v6 = vmul.f32 %v7249_v48, %v13027_v29  ;;  %v7352_v19 = vld [vmem:[%s12089_s0 + $0x2e8] sm:$0xff]  ;;  %v7357_v35 = vld [vmem:[%s12089_s0 + $0x2f0] sm:$0xff]  ;;  %v889_v16 = vmul.f32 %v7254_v0, %v13027_v29  ;;  %v890_v48 = vmul.f32 %v7268_v30, %v13027_v29 }
  0xf6   : > { %13032 = vst [vmem:[#allocation55_spill] sm:$0xff] %v7311_v63  ;;  %13033 = vst [vmem:[#allocation56_spill] sm:$0xff] %v7316_v10  ;;  %v7362_v13 = vld [vmem:[%s12089_s0 + $0x300] sm:$0xff]  ;;  %v891_v49 = vmul.f32 %v7273_v24, %v13027_v29  ;;  %v892_v31 = vmul.f32 %v7278_v34, %v13027_v29  ;;  %v7375_v1 = vld [vmem:[%s12089_s0 + $0x308] sm:$0xff]  ;;  %v893_v24 = vmul.f32 %v7284_v4, %v13027_v29 }
  0xf7   : > { %13034 = vst [vmem:[#allocation57_spill] sm:$0xff] %v7329_v60  ;;  %13035 = vst [vmem:[#allocation30_spill] sm:$0xff] %v7334_v53  ;;  %v7380_v62 = vld [vmem:[%s12089_s0 + $0x318] sm:$0xff]  ;;  %v7385_v30 = vld [vmem:[%s12089_s0 + $0x320] sm:$0xff]  ;;  %v894_v34 = vmul.f32 %v7289_v58, %v13027_v29  ;;  %v895_v0 = vmul.f32 %v7294_v3, %v13027_v29  ;;  %v896_v28 = vmul.f32 %v7306_v33, %v13027_v29 }
  0xf8   : > { %13036 = vst [vmem:[#allocation32_spill] sm:$0xff] %v7339_v14  ;;  %13037 = vst [vmem:[#allocation49_spill] sm:$0xff] %v7352_v19  ;;  %v897_v22 = vmul.f32 %v7311_v63, %v13027_v29  ;;  %v898_v43 = vmul.f32 %v7316_v10, %v13027_v29  ;;  %v899_v41 = vmul.f32 %v7329_v60, %v13027_v29 }
  0xf9   : > { %13038 = vst [vmem:[#allocation41_spill] sm:$0xff] %v7357_v35  ;;  %13039 = vst [vmem:[#allocation22_spill] sm:$0xff] %v7362_v13  ;;  %v900_v4 = vmul.f32 %v7334_v53, %v13027_v29  ;;  %v901_v58 = vmul.f32 %v7339_v14, %v13027_v29  ;;  %v902_v3 = vmul.f32 %v7352_v19, %v13027_v29 }
  0xfa   : > { %13040 = vst [vmem:[#allocation23_spill] sm:$0xff] %v7375_v1  ;;  %13041 = vst [vmem:[#allocation31_spill] sm:$0xff] %v7380_v62  ;;  %v903_v33 = vmul.f32 %v7357_v35, %v13027_v29  ;;  %v904_v63 = vmul.f32 %v7362_v13, %v13027_v29  ;;  %v905_v10 = vmul.f32 %v7375_v1, %v13027_v29 }
  0xfb   : > { %13042 = vst [vmem:[#allocation37_spill] sm:$0xff] %v7385_v30  ;;  %v906_v60 = vmul.f32 %v7380_v62, %v13027_v29  ;;  %v907_v53 = vmul.f32 %v7385_v30, %v13027_v29  ;;  %v7418_v14 = vadd.f32 %v876_v47, %v7104_v45  ;;  %v7421_v19 = vadd.f32 %v877_v44, %v7107_v2 }
  0xfc   : > { %v7424_v35 = vadd.f32 %v878_v23, %v7110_v21  ;;  %v7427_v13 = vadd.f32 %v879_v54, %v7113_v25  ;;  %v7430_v1 = vadd.f32 %v880_v20, %v7116_v27  ;;  %v7433_v62 = vadd.f32 %v881_v12, %v7119_v7  ;;  %v13065_v23 = vld [vmem:[#allocation28_spill] sm:$0xff] }
  0xfd   : > { %v7436_v29 = vadd.f32 %v882_v59, %v7122_v5  ;;  %v7439_v45 = vadd.f32 %v883_v18, %v7125_v61  ;;  %v7442_v2 = vadd.f32 %v884_v55, %v7128_v9  ;;  %v7445_v21 = vadd.f32 %v885_v57, %v7131_v11  ;;  %v13069_v59 = vld [vmem:[#allocation33_spill] sm:$0xff]  ;;  %v13070_v55 = vld [vmem:[#allocation34_spill] sm:$0xff] }
  0xfe   : > { %v7448_v25 = vadd.f32 %v886_v42, %v7134_v46  ;;  %v7451_v27 = vadd.f32 %v887_v32, %v7137_v40  ;;  %v7454_v7 = vadd.f32 %v888_v6, %v7140_v26  ;;  %v7457_v5 = vadd.f32 %v889_v16, %v7146_v15  ;;  %v13043_v6 = vld [vmem:[#allocation24_spill] sm:$0xff] }
  0xff   : > { %v7460_v61 = vadd.f32 %v890_v48, %v7149_v8  ;;  %v7463_v9 = vadd.f32 %v891_v49, %v7152_v38  ;;  %v7466_v11 = vadd.f32 %v892_v31, %v7155_v17  ;;  %v7469_v46 = vadd.f32 %v893_v24, %v7176_v50  ;;  %v13059_v16 = vld [vmem:[#allocation40_spill] sm:$0xff]  ;;  %v13060_v48 = vld [vmem:[#allocation17_spill] sm:$0xff]  ;;  %v13061_v31 = vld [vmem:[#allocation39_spill] sm:$0xff] }
 0x100   : > { %v7472_v40 = vadd.f32 %v894_v34, %v7179_v39  ;;  %v7475_v26 = vadd.f32 %v895_v0, %v7182_v36  ;;  %v7478_v15 = vadd.f32 %v896_v28, %v7185_v51  ;;  %v7481_v8 = vadd.f32 %v897_v22, %v7203_v52  ;;  %v13045_v39 = vld [vmem:[#allocation38_spill] sm:$0xff]  ;;  %v13047_v36 = vld [vmem:[#allocation19_spill] sm:$0xff]  ;;  %v13049_v51 = vld [vmem:[#allocation20_spill] sm:$0xff] }
 0x101   : > { %v7484_v38 = vadd.f32 %v898_v43, %v7206_v56  ;;  %v7487_v17 = vadd.f32 %v899_v41, %v7209_v37  ;;  %v7490_v50 = vadd.f32 %v900_v4, %v13043_v6  ;;  %v7493_v32 = vadd.f32 %v901_v58, %v13045_v39  ;;  %v13051_v52 = vld [vmem:[#allocation21_spill] sm:$0xff]  ;;  %v13053_v56 = vld [vmem:[#allocation42_spill] sm:$0xff]  ;;  %v13055_v37 = vld [vmem:[#allocation43_spill] sm:$0xff] }
 0x102   : > { %v7496_v57 = vadd.f32 %v902_v3, %v13047_v36  ;;  %v7499_v42 = vadd.f32 %v903_v33, %v13049_v51  ;;  %v7502_v49 = vadd.f32 %v904_v63, %v13051_v52  ;;  %v7505_v43 = vadd.f32 %v905_v10, %v13053_v56  ;;  %v13057_v22 = vld [vmem:[#allocation44_spill] sm:$0xff]  ;;  %v13062_v34 = vld [vmem:[#allocation18_spill] sm:$0xff]  ;;  %v13064_v3 = vld [vmem:[#allocation27_spill] sm:$0xff] }
 0x103   : > { %13044 = vst [vmem:[#allocation50_spill] sm:$0xff] %v7490_v50  ;;  %13046 = vst [vmem:[#allocation51_spill] sm:$0xff] %v7493_v32  ;;  %v7508_v41 = vadd.f32 %v906_v60, %v13055_v37  ;;  %v7511_v28 = vadd.f32 %v907_v53, %v13057_v22  ;;  %v943_v0 = vmul.f32 %v13060_v48, %v13059_v16  ;;  %v13063_v4 = vld [vmem:[#allocation26_spill] sm:$0xff]  ;;  %v13066_v53 = vld [vmem:[#allocation29_spill] sm:$0xff] }
 0x104   : > { %13048 = vst [vmem:[#allocation15_spill] sm:$0xff] %v7496_v57  ;;  %13050 = vst [vmem:[#allocation16_spill] sm:$0xff] %v7499_v42  ;;  %v944_v24 = vmul.f32 %v13061_v31, %v13059_v16  ;;  %v945_v47 = vmul.f32 %v13062_v34, %v13059_v16  ;;  %v946_v58 = vmul.f32 %v13063_v4, %v13059_v16  ;;  %v13067_v33 = vld [vmem:[#allocation25_spill] sm:$0xff]  ;;  %v13068_v10 = vld [vmem:[#allocation14_spill] sm:$0xff] }
 0x105   : > { %13052 = vst [vmem:[#allocation36_spill] sm:$0xff] %v7502_v49  ;;  %13054 = vst [vmem:[#allocation24_spill] sm:$0xff] %v7505_v43  ;;  %v947_v44 = vmul.f32 %v13064_v3, %v13059_v16  ;;  %v948_v54 = vmul.f32 %v13065_v23, %v13059_v16  ;;  %v949_v20 = vmul.f32 %v13066_v53, %v13059_v16  ;;  %v13071_v6 = vld [vmem:[#allocation35_spill] sm:$0xff]  ;;  %v13072_v36 = vld [vmem:[#allocation45_spill] sm:$0xff] }
 0x106   : > { %13056 = vst [vmem:[#allocation38_spill] sm:$0xff] %v7508_v41  ;;  %13058 = vst [vmem:[#allocation19_spill] sm:$0xff] %v7511_v28  ;;  %v950_v63 = vmul.f32 %v13067_v33, %v13059_v16  ;;  %v951_v12 = vmul.f32 %v13068_v10, %v13059_v16  ;;  %v952_v18 = vmul.f32 %v13069_v59, %v13059_v16  ;;  %v13073_v52 = vld [vmem:[#allocation46_spill] sm:$0xff]  ;;  %v13074_v37 = vld [vmem:[#allocation47_spill] sm:$0xff] }
 0x107   : > { %v953_v60 = vmul.f32 %v13070_v55, %v13059_v16  ;;  %v954_v39 = vmul.f32 %v13071_v6, %v13059_v16  ;;  %v955_v51 = vmul.f32 %v13072_v36, %v13059_v16  ;;  %v956_v56 = vmul.f32 %v13073_v52, %v13059_v16  ;;  %v13075_v48 = vld [vmem:[#allocation48_spill] sm:$0xff]  ;;  %v7555_v52 = vld [vmem:[%s12089_s0 + $0x338] sm:$0xff]  ;;  %v13079_v10 = vld [vmem:[#allocation54_spill] sm:$0xff] }
 0x108   : > { %v957_v22 = vmul.f32 %v13074_v37, %v13059_v16  ;;  %v958_v31 = vmul.f32 %v13075_v48, %v13059_v16  ;;  %v13076_v59 = vld [vmem:[#allocation52_spill] sm:$0xff]  ;;  %v13078_v36 = vld [vmem:[#allocation53_spill] sm:$0xff]  ;;  %v961_v33 = vmul.f32 %v13079_v10, %v13059_v16  ;;  %v13080_v48 = vld [vmem:[#allocation55_spill] sm:$0xff]  ;;  %v974_v50 = vmul.f32 %v7555_v52, %v13059_v16 }
 0x109   : > { %v959_v55 = vmul.f32 %v13076_v59, %v13059_v16  ;;  %v7550_v6 = vld [vmem:[%s12089_s0 + $0x330] sm:$0xff]  ;;  %v960_v37 = vmul.f32 %v13078_v36, %v13059_v16  ;;  %v962_v53 = vmul.f32 %v13080_v48, %v13059_v16  ;;  %v13082_v3 = vld [vmem:[#allocation57_spill] sm:$0xff]  ;;  %v13083_v34 = vld [vmem:[#allocation30_spill] sm:$0xff] }
 0x10a   : > { %13077 = vst [vmem:[#allocation20_spill] sm:$0xff] %v7550_v6  ;;  %v13081_v59 = vld [vmem:[#allocation56_spill] sm:$0xff]  ;;  %v964_v4 = vmul.f32 %v13082_v3, %v13059_v16  ;;  %v965_v28 = vmul.f32 %v13083_v34, %v13059_v16  ;;  %v13085_v43 = vld [vmem:[#allocation49_spill] sm:$0xff]  ;;  %v13088_v57 = vld [vmem:[#allocation23_spill] sm:$0xff] }
 0x10b   : > { %v963_v23 = vmul.f32 %v13081_v59, %v13059_v16  ;;  %v13084_v41 = vld [vmem:[#allocation32_spill] sm:$0xff]  ;;  %v967_v10 = vmul.f32 %v13085_v43, %v13059_v16  ;;  %v13086_v48 = vld [vmem:[#allocation41_spill] sm:$0xff]  ;;  %v13087_v59 = vld [vmem:[#allocation22_spill] sm:$0xff]  ;;  %v970_v3 = vmul.f32 %v13088_v57, %v13059_v16  ;;  %v973_v43 = vmul.f32 %v7550_v6, %v13059_v16 }
 0x10c   : > { %v966_v36 = vmul.f32 %v13084_v41, %v13059_v16  ;;  %v968_v49 = vmul.f32 %v13086_v48, %v13059_v16  ;;  %v969_v42 = vmul.f32 %v13087_v59, %v13059_v16  ;;  %v13089_v32 = vld [vmem:[#allocation31_spill] sm:$0xff]  ;;  %v972_v41 = vmul.f32 %v7385_v30, %v13059_v16 }
 0x10d   : > { %v971_v34 = vmul.f32 %v13089_v32, %v13059_v16  ;;  %v7592_v48 = vadd.f32 %v943_v0, %v7418_v14  ;;  %v7599_v57 = vadd.f32 %v944_v24, %v7421_v19  ;;  %v7602_v32 = vadd.f32 %v945_v47, %v7424_v35  ;;  %v13096_v24 = vld [vmem:[#allocation51_spill] sm:$0xff] }
 0x10e   : > { %v7605_v30 = vadd.f32 %v946_v58, %v7427_v13  ;;  %v7608_v6 = vadd.f32 %v947_v44, %v7430_v1  ;;  %v7615_v14 = vadd.f32 %v948_v54, %v7433_v62  ;;  %v7618_v16 = vadd.f32 %v949_v20, %v7436_v29  ;;  %v13098_v47 = vld [vmem:[#allocation15_spill] sm:$0xff]  ;;  %v13110_v20 = vld [vmem:[#allocation18_spill] sm:$0xff] }
 0x10f   : > { %v7621_v19 = vadd.f32 %v950_v63, %v7439_v45  ;;  %v7624_v35 = vadd.f32 %v951_v12, %v7442_v2  ;;  %v7627_v13 = vadd.f32 %v952_v18, %v7445_v21  ;;  %v7630_v1 = vadd.f32 %v953_v60, %v7448_v25  ;;  %v13108_v54 = vld [vmem:[#allocation19_spill] sm:$0xff]  ;;  %v13116_v18 = vld [vmem:[#allocation28_spill] sm:$0xff] }
 0x110   : > { %v7633_v0 = vadd.f32 %v954_v39, %v7451_v27  ;;  %v7636_v62 = vadd.f32 %v955_v51, %v7454_v7  ;;  %v7639_v29 = vadd.f32 %v956_v56, %v7457_v5  ;;  %v7642_v45 = vadd.f32 %v957_v22, %v7460_v61  ;;  %v13115_v12 = vld [vmem:[#allocation27_spill] sm:$0xff]  ;;  %v13118_v39 = vld [vmem:[#allocation25_spill] sm:$0xff]  ;;  %v13121_v22 = vld [vmem:[#allocation34_spill] sm:$0xff] }
 0x111   : > { %v7645_v2 = vadd.f32 %v958_v31, %v7463_v9  ;;  %v7648_v21 = vadd.f32 %v959_v55, %v7466_v11  ;;  %v7651_v25 = vadd.f32 %v960_v37, %v7469_v46  ;;  %v7654_v27 = vadd.f32 %v961_v33, %v7472_v40  ;;  %v13094_v46 = vld [vmem:[#allocation50_spill] sm:$0xff]  ;;  %v13120_v56 = vld [vmem:[#allocation33_spill] sm:$0xff] }
 0x112   : > { %v7657_v7 = vadd.f32 %v962_v53, %v7475_v26  ;;  %v7660_v5 = vadd.f32 %v963_v23, %v7478_v15  ;;  %v7663_v61 = vadd.f32 %v964_v4, %v7481_v8  ;;  %v7666_v9 = vadd.f32 %v965_v28, %v7484_v38  ;;  %v13100_v15 = vld [vmem:[#allocation16_spill] sm:$0xff] }
 0x113   : > { %v7669_v11 = vadd.f32 %v966_v36, %v7487_v17  ;;  %v7672_v40 = vadd.f32 %v967_v10, %v13094_v46  ;;  %v7675_v26 = vadd.f32 %v968_v49, %v13096_v24  ;;  %v7678_v58 = vadd.f32 %v969_v42, %v13098_v47  ;;  %v13102_v8 = vld [vmem:[#allocation36_spill] sm:$0xff]  ;;  %v13106_v17 = vld [vmem:[#allocation38_spill] sm:$0xff]  ;;  %v13122_v46 = vld [vmem:[#allocation35_spill] sm:$0xff] }
 0x114   : > { %13090 = vst [vmem:[#allocation21_spill] sm:$0xff] %v7660_v5  ;;  %13091 = vst [vmem:[#allocation42_spill] sm:$0xff] %v7663_v61  ;;  %v7681_v44 = vadd.f32 %v970_v3, %v13100_v15  ;;  %v7684_v4 = vadd.f32 %v971_v34, %v13102_v8  ;;  %v13104_v38 = vld [vmem:[#allocation24_spill] sm:$0xff]  ;;  %v7690_v23 = vadd.f32 %v973_v43, %v13106_v17  ;;  %v1009_v49 = vstv %s7594_s23  ;;  %v13114_v34 = vld [vmem:[#allocation26_spill] sm:$0xff]  ;;  %s8396_s23 = sld [smem:[#allocation4 + %s1347_s13]]  ;;  %s11581_s13 = smov (%p121_p6), 0  }
 0x115   : > { %13092 = vst [vmem:[#allocation43_spill] sm:$0xff] %v7666_v9  ;;  %13093 = vst [vmem:[#allocation44_spill] sm:$0xff] %v7669_v11  ;;  %v7687_v28 = vadd.f32 %v972_v41, %v13104_v38  ;;  %v7693_v53 = vadd.f32 %v974_v50, %v13108_v54  ;;  %v1010_v33 = vmul.f32 %v13110_v20, %v1009_v49  ;;  %v7698_v42 = vstv %s7596_s3  ;;  %v13117_v43 = vld [vmem:[#allocation29_spill] sm:$0xff]  ;;  %v13119_v36 = vld [vmem:[#allocation14_spill] sm:$0xff]  ;;  %s8398_s3 = sld [smem:[#allocation4 + %s1414_s14]]  ;;  %s1652_s14 = sadd.s32 21, %s5358_s16 }
 0x116   : > { %13095 = vst [vmem:[#allocation40_spill] sm:$0xff] %v7672_v40  ;;  %13097 = vst [vmem:[#allocation17_spill] sm:$0xff] %v7675_v26  ;;  %v7701_v63 = vstv %s7610_s24  ;;  %v7704_v3 = vstv %s7612_s18  ;;  %v1011_v10 = vmul.f32 %v13114_v34, %v1009_v49  ;;  %v1012_v41 = vmul.f32 %v13115_v12, %v1009_v49  ;;  %v13123_v47 = vld [vmem:[#allocation45_spill] sm:$0xff]  ;;  %v13124_v8 = vld [vmem:[#allocation46_spill] sm:$0xff]  ;;  %s8412_s24 = sld [smem:[#allocation4 + %s1481_s15]]  ;;  %s1719_s15 = sadd.s32 24, %s5358_s16 }
 0x117   : > { %13099 = vst [vmem:[#allocation39_spill] sm:$0xff] %v7678_v58  ;;  %13101 = vst [vmem:[#allocation22_spill] sm:$0xff] %v7681_v44  ;;  %v1013_v55 = vmul.f32 %v13116_v18, %v1009_v49  ;;  %v1014_v60 = vmul.f32 %v13117_v43, %v1009_v49  ;;  %v1015_v50 = vmul.f32 %v13118_v39, %v1009_v49  ;;  %v13125_v17 = vld [vmem:[#allocation47_spill] sm:$0xff]  ;;  %v13126_v20 = vld [vmem:[#allocation48_spill] sm:$0xff]  ;;  %s8414_s18 = sld [smem:[#allocation4 + %s1585_s22]]  ;;  %s1822_s22 = sadd.s32 19, %s5358_s16 }
 0x118   : > { %13103 = vst [vmem:[#allocation50_spill] sm:$0xff] %v7684_v4  ;;  %13105 = vst [vmem:[#allocation51_spill] sm:$0xff] %v7687_v28  ;;  %v1016_v51 = vmul.f32 %v13119_v36, %v1009_v49  ;;  %v1017_v37 = vmul.f32 %v13120_v56, %v1009_v49  ;;  %v1018_v31 = vmul.f32 %v13121_v22, %v1009_v49  ;;  %v13127_v12 = vld [vmem:[#allocation52_spill] sm:$0xff]  ;;  %v13128_v43 = vld [vmem:[#allocation53_spill] sm:$0xff]  ;;  %s9348_s19 = sld [smem:[#allocation4 + %s1652_s14]]  ;;  %s1956_s14 = sadd.s32 25, %s5358_s16 }
 0x119   : > { %13107 = vst [vmem:[#allocation15_spill] sm:$0xff] %v7690_v23  ;;  %13109 = vst [vmem:[#allocation16_spill] sm:$0xff] %v7693_v53  ;;  %v1019_v24 = vmul.f32 %v13122_v46, %v1009_v49  ;;  %v1020_v15 = vmul.f32 %v13123_v47, %v1009_v49  ;;  %v1021_v38 = vmul.f32 %v13124_v8, %v1009_v49  ;;  %v4764_v56 = vld [vmem:[%s12089_s0 + $0x348] sm:$0xff]  ;;  %v4765_v22 = vld [vmem:[%s12089_s0 + $0x350] sm:$0xff]  ;;  %s9350_s20 = sld [smem:[#allocation4 + %s1719_s15]]  ;;  %s2059_s15 = sadd.s32 20, %s5358_s16 }
 0x11a   : > { %13111 = vst [vmem:[#allocation36_spill] sm:$0xff] %v7698_v42  ;;  %13112 = vst [vmem:[#allocation24_spill] sm:$0xff] %v7701_v63  ;;  %v1022_v54 = vmul.f32 %v13125_v17, %v1009_v49  ;;  %v1023_v34 = vmul.f32 %v13126_v20, %v1009_v49  ;;  %v1024_v18 = vmul.f32 %v13127_v12, %v1009_v49  ;;  %v13130_v46 = vld [vmem:[#allocation55_spill] sm:$0xff]  ;;  %v13131_v8 = vld [vmem:[#allocation56_spill] sm:$0xff]  ;;  %s9364_s21 = sld [smem:[#allocation4 + %s1822_s22]]  ;;  %s2126_s22 = sadd.s32 23, %s5358_s16 }
 0x11b   : > { %13113 = vst [vmem:[#allocation38_spill] sm:$0xff] %v7704_v3  ;;  %v1025_v39 = vmul.f32 %v13128_v43, %v1009_v49  ;;  %v13129_v3 = vld [vmem:[#allocation54_spill] sm:$0xff]  ;;  %v1027_v47 = vmul.f32 %v13130_v46, %v1009_v49  ;;  %v1028_v17 = vmul.f32 %v13131_v8, %v1009_v49  ;;  %v13132_v63 = vld [vmem:[#allocation57_spill] sm:$0xff]  ;;  %v13134_v53 = vld [vmem:[#allocation32_spill] sm:$0xff]  ;;  %v1034_v44 = vmul.f32 %v13087_v59, %v1009_v49 }
 0x11c   : > { %v1026_v36 = vmul.f32 %v13129_v3, %v1009_v49  ;;  %v1029_v20 = vmul.f32 %v13132_v63, %v1009_v49  ;;  %v13133_v42 = vld [vmem:[#allocation30_spill] sm:$0xff]  ;;  %v1031_v43 = vmul.f32 %v13134_v53, %v1009_v49  ;;  %v13135_v23 = vld [vmem:[#allocation49_spill] sm:$0xff]  ;;  %v13137_v58 = vld [vmem:[#allocation23_spill] sm:$0xff]  ;;  %v1039_v63 = vmul.f32 %v7555_v52, %v1009_v49 }
 0x11d   : > { %v1030_v12 = vmul.f32 %v13133_v42, %v1009_v49  ;;  %v1032_v3 = vmul.f32 %v13135_v23, %v1009_v49  ;;  %v13136_v28 = vld [vmem:[#allocation41_spill] sm:$0xff]  ;;  %v1035_v26 = vmul.f32 %v13137_v58, %v1009_v49  ;;  %v13138_v40 = vld [vmem:[#allocation31_spill] sm:$0xff]  ;;  %v13140_v61 = vld [vmem:[#allocation20_spill] sm:$0xff]  ;;  %v1040_v5 = vmul.f32 %v4764_v56, %v1009_v49 }
 0x11e   : > { %v1033_v4 = vmul.f32 %v13136_v28, %v1009_v49  ;;  %v1036_v11 = vmul.f32 %v13138_v40, %v1009_v49  ;;  %v13139_v9 = vld [vmem:[#allocation37_spill] sm:$0xff]  ;;  %v1038_v8 = vmul.f32 %v13140_v61, %v1009_v49  ;;  %v1041_v42 = vmul.f32 %v4765_v22, %v1009_v49  ;;  %v7887_v22 = vld [vmem:[%s12089_s0 + $0x241] sm:$0xff] }
 0x11f   : > { %v1037_v46 = vmul.f32 %v13139_v9, %v1009_v49  ;;  %v7742_v53 = vadd.f32 %v1010_v33, %v7592_v48  ;;  %v7745_v23 = vadd.f32 %v1011_v10, %v7599_v57  ;;  %v7748_v59 = vadd.f32 %v1012_v41, %v7602_v32  ;;  %v13144_v28 = vld [vmem:[#allocation21_spill] sm:$0xff]  ;;  %v7828_v33 = vld [vmem:[%s12089_s0 + $0x1e9] sm:$0xff]  ;;  %13165 = vst [vmem:[#allocation52_spill] sm:$0xff] %v7887_v22 }
 0x120   : > { %v7751_v58 = vadd.f32 %v1013_v55, %v7605_v30  ;;  %v7754_v9 = vadd.f32 %v1014_v60, %v7608_v6  ;;  %v7757_v61 = vadd.f32 %v1015_v50, %v7615_v14  ;;  %v7760_v52 = vadd.f32 %v1016_v51, %v7618_v16  ;;  %v4766_v16 = vld [vmem:[%s12089_s0 + $0x1b1] sm:$0xff]  ;;  %13145 = vst [vmem:[#allocation27_spill] sm:$0xff] %v7828_v33  ;;  %v7833_v10 = vld [vmem:[%s12089_s0 + $0x1f9] sm:$0xff]  ;;  %v13149_v41 = vld [vmem:[#allocation43_spill] sm:$0xff] }
 0x121   : > { %v7763_v48 = vadd.f32 %v1017_v37, %v7621_v19  ;;  %v7766_v57 = vadd.f32 %v1018_v31, %v7624_v35  ;;  %v7769_v32 = vadd.f32 %v1019_v24, %v7627_v13  ;;  %v7772_v30 = vadd.f32 %v1020_v15, %v7630_v1  ;;  %13146 = vst [vmem:[#allocation28_spill] sm:$0xff] %v7833_v10  ;;  %v13150_v60 = vld [vmem:[#allocation44_spill] sm:$0xff]  ;;  %v7860_v24 = vld [vmem:[%s12089_s0 + $0x219] sm:$0xff] }
 0x122   : > { %v7775_v6 = vadd.f32 %v1021_v38, %v7633_v0  ;;  %v7778_v14 = vadd.f32 %v1022_v54, %v7636_v62  ;;  %v7784_v19 = vadd.f32 %v1023_v34, %v7639_v29  ;;  %v7787_v35 = vadd.f32 %v1024_v18, %v7642_v45  ;;  %v4767_v0 = vld [vmem:[%s12089_s0 + $0x1b9] sm:$0xff]  ;;  %v7801_v62 = vld [vmem:[%s12089_s0 + $0x1c9] sm:$0xff]  ;;  %v7806_v29 = vld [vmem:[%s12089_s0 + $0x1d1] sm:$0xff]  ;;  %13154 = vst [vmem:[#allocation33_spill] sm:$0xff] %v7860_v24 }
 0x123   : > { %v7790_v13 = vadd.f32 %v1025_v39, %v7645_v2  ;;  %v7793_v1 = vadd.f32 %v1026_v36, %v7648_v21  ;;  %13141 = vst [vmem:[#allocation19_spill] sm:$0xff] %v7801_v62  ;;  %13142 = vst [vmem:[#allocation18_spill] sm:$0xff] %v7806_v29  ;;  %v7811_v45 = vld [vmem:[%s12089_s0 + $0x1e1] sm:$0xff]  ;;  %v7814_v2 = vadd.f32 %v1027_v47, %v7651_v25  ;;  %v13151_v51 = vld [vmem:[#allocation40_spill] sm:$0xff] }
 0x124   : > { %13143 = vst [vmem:[#allocation26_spill] sm:$0xff] %v7811_v45  ;;  %v7817_v21 = vadd.f32 %v1028_v17, %v7654_v27  ;;  %v7820_v40 = vadd.f32 %v1029_v20, %v7657_v7  ;;  %v7823_v49 = vadd.f32 %v1030_v12, %v13144_v28  ;;  %v7838_v25 = vld [vmem:[%s12089_s0 + $0x201] sm:$0xff]  ;;  %v7844_v55 = vadd.f32 %v1032_v3, %v13149_v41  ;;  %v7855_v31 = vld [vmem:[%s12089_s0 + $0x211] sm:$0xff]  ;;  %v7865_v15 = vld [vmem:[%s12089_s0 + $0x229] sm:$0xff] }
 0x125   : > { %13147 = vst [vmem:[#allocation29_spill] sm:$0xff] %v7838_v25  ;;  %v13148_v27 = vld [vmem:[#allocation42_spill] sm:$0xff]  ;;  %v7847_v50 = vadd.f32 %v1033_v4, %v13150_v60  ;;  %v7850_v37 = vadd.f32 %v1034_v44, %v13151_v51  ;;  %13153 = vst [vmem:[#allocation14_spill] sm:$0xff] %v7855_v31  ;;  %v13156_v4 = vld [vmem:[#allocation17_spill] sm:$0xff] }
 0x126   : > { %v7841_v7 = vadd.f32 %v1031_v43, %v13148_v27  ;;  %13155 = vst [vmem:[#allocation34_spill] sm:$0xff] %v7865_v15  ;;  %v7868_v38 = vadd.f32 %v1035_v26, %v13156_v4  ;;  %v13158_v44 = vld [vmem:[#allocation39_spill] sm:$0xff]  ;;  %v13160_v34 = vld [vmem:[#allocation22_spill] sm:$0xff]  ;;  %v7882_v56 = vld [vmem:[%s12089_s0 + $0x231] sm:$0xff] }
 0x127   : > { %13152 = vst [vmem:[#allocation25_spill] sm:$0xff] %v7850_v37  ;;  %v7871_v54 = vadd.f32 %v1036_v11, %v13158_v44  ;;  %v7874_v18 = vadd.f32 %v1037_v46, %v13160_v34  ;;  %v13162_v39 = vld [vmem:[#allocation50_spill] sm:$0xff]  ;;  %13164 = vst [vmem:[#allocation48_spill] sm:$0xff] %v7882_v56  ;;  %v7892_v11 = vld [vmem:[%s12089_s0 + $0x249] sm:$0xff] }
 0x128   : > { %13157 = vst [vmem:[#allocation35_spill] sm:$0xff] %v7868_v38  ;;  %v7877_v36 = vadd.f32 %v1038_v8, %v13162_v39  ;;  %13166 = vst [vmem:[#allocation53_spill] sm:$0xff] %v7892_v11  ;;  %v13167_v26 = vld [vmem:[#allocation51_spill] sm:$0xff]  ;;  %v13171_v12 = vld [vmem:[#allocation16_spill] sm:$0xff] }
 0x129   : > { %13159 = vst [vmem:[#allocation45_spill] sm:$0xff] %v7871_v54  ;;  %13161 = vst [vmem:[#allocation46_spill] sm:$0xff] %v7874_v18  ;;  %v7895_v47 = vadd.f32 %v1039_v63, %v13167_v26  ;;  %v13169_v17 = vld [vmem:[#allocation15_spill] sm:$0xff]  ;;  %v7901_v43 = vadd.f32 %v1041_v42, %v13171_v12  ;;  %v7906_v3 = vld [vmem:[%s12089_s0 + $0x259] sm:$0xff] }
 0x12a   : > { %13163 = vst [vmem:[#allocation47_spill] sm:$0xff] %v7877_v36  ;;  %v7898_v20 = vadd.f32 %v1040_v5, %v13169_v17  ;;  %13173 = vst [vmem:[#allocation57_spill] sm:$0xff] %v7906_v3  ;;  %v7911_v46 = vld [vmem:[%s12089_s0 + $0x261] sm:$0xff]  ;;  %v7916_v8 = vld [vmem:[%s12089_s0 + $0x271] sm:$0xff] }
 0x12b   : > { %13168 = vst [vmem:[#allocation54_spill] sm:$0xff] %v7895_v47  ;;  %13172 = vst [vmem:[#allocation56_spill] sm:$0xff] %v7901_v43  ;;  %v13176_v5 = vld [vmem:[#allocation36_spill] sm:$0xff]  ;;  %v7922_v42 = vld [vmem:[%s12089_s0 + $0x279] sm:$0xff] }
 0x12c   : > { %13170 = vst [vmem:[#allocation55_spill] sm:$0xff] %v7898_v20  ;;  %13174 = vst [vmem:[#allocation30_spill] sm:$0xff] %v7911_v46  ;;  %v1113_v63 = vmul.f32 %v4766_v16, %v13176_v5  ;;  %v7927_v28 = vld [vmem:[%s12089_s0 + $0x289] sm:$0xff]  ;;  %v7932_v27 = vld [vmem:[%s12089_s0 + $0x291] sm:$0xff]  ;;  %v1114_v41 = vmul.f32 %v4767_v0, %v13176_v5  ;;  %v1115_v16 = vmul.f32 %v7801_v62, %v13176_v5 }
 0x12d   : > { %13175 = vst [vmem:[#allocation32_spill] sm:$0xff] %v7916_v8  ;;  %13177 = vst [vmem:[#allocation49_spill] sm:$0xff] %v7922_v42  ;;  %v1116_v60 = vmul.f32 %v7806_v29, %v13176_v5  ;;  %v1117_v51 = vmul.f32 %v7811_v45, %v13176_v5  ;;  %v7944_v4 = vld [vmem:[%s12089_s0 + $0x2a1] sm:$0xff]  ;;  %v7949_v44 = vld [vmem:[%s12089_s0 + $0x2a9] sm:$0xff]  ;;  %v1118_v34 = vmul.f32 %v7828_v33, %v13176_v5 }
 0x12e   : > { %13178 = vst [vmem:[#allocation41_spill] sm:$0xff] %v7927_v28  ;;  %13179 = vst [vmem:[#allocation23_spill] sm:$0xff] %v7932_v27  ;;  %v7954_v0 = vld [vmem:[%s12089_s0 + $0x2b9] sm:$0xff]  ;;  %v1119_v39 = vmul.f32 %v7833_v10, %v13176_v5  ;;  %v1120_v26 = vmul.f32 %v7838_v25, %v13176_v5  ;;  %v1121_v17 = vmul.f32 %v7855_v31, %v13176_v5  ;;  %v7967_v12 = vld [vmem:[%s12089_s0 + $0x2c1] sm:$0xff] }
 0x12f   : > { %13180 = vst [vmem:[#allocation31_spill] sm:$0xff] %v7944_v4  ;;  %13181 = vst [vmem:[#allocation37_spill] sm:$0xff] %v7949_v44  ;;  %v7972_v45 = vld [vmem:[%s12089_s0 + $0x2d1] sm:$0xff]  ;;  %v7977_v10 = vld [vmem:[%s12089_s0 + $0x2d9] sm:$0xff]  ;;  %v1122_v25 = vmul.f32 %v7860_v24, %v13176_v5  ;;  %v1123_v31 = vmul.f32 %v7865_v15, %v13176_v5  ;;  %v1124_v33 = vmul.f32 %v7882_v56, %v13176_v5 }
 0x130   : > { %13182 = vst [vmem:[#allocation20_spill] sm:$0xff] %v7954_v0  ;;  %13183 = vst [vmem:[#allocation21_spill] sm:$0xff] %v7967_v12  ;;  %v1125_v29 = vmul.f32 %v7887_v22, %v13176_v5  ;;  %v7990_v62 = vld [vmem:[%s12089_s0 + $0x2e9] sm:$0xff]  ;;  %v7995_v43 = vld [vmem:[%s12089_s0 + $0x2f1] sm:$0xff]  ;;  %v1126_v56 = vmul.f32 %v7892_v11, %v13176_v5  ;;  %v1127_v22 = vmul.f32 %v7906_v3, %v13176_v5 }
 0x131   : > { %13184 = vst [vmem:[#allocation42_spill] sm:$0xff] %v7972_v45  ;;  %13185 = vst [vmem:[#allocation43_spill] sm:$0xff] %v7977_v10  ;;  %v8000_v15 = vld [vmem:[%s12089_s0 + $0x301] sm:$0xff]  ;;  %v1128_v24 = vmul.f32 %v7911_v46, %v13176_v5  ;;  %v1129_v20 = vmul.f32 %v7916_v8, %v13176_v5  ;;  %v8013_v47 = vld [vmem:[%s12089_s0 + $0x309] sm:$0xff]  ;;  %v1130_v46 = vmul.f32 %v7922_v42, %v13176_v5 }
 0x132   : > { %13186 = vst [vmem:[#allocation44_spill] sm:$0xff] %v7990_v62  ;;  %13187 = vst [vmem:[#allocation40_spill] sm:$0xff] %v7995_v43  ;;  %v8018_v36 = vld [vmem:[%s12089_s0 + $0x319] sm:$0xff]  ;;  %v8023_v3 = vld [vmem:[%s12089_s0 + $0x321] sm:$0xff]  ;;  %v1131_v8 = vmul.f32 %v7927_v28, %v13176_v5  ;;  %v1132_v11 = vmul.f32 %v7932_v27, %v13176_v5  ;;  %v1133_v18 = vmul.f32 %v7944_v4, %v13176_v5 }
 0x133   : > { %13188 = vst [vmem:[#allocation17_spill] sm:$0xff] %v8000_v15  ;;  %13189 = vst [vmem:[#allocation39_spill] sm:$0xff] %v8013_v47  ;;  %v1134_v54 = vmul.f32 %v7949_v44, %v13176_v5  ;;  %v1135_v38 = vmul.f32 %v7954_v0, %v13176_v5  ;;  %v1136_v37 = vmul.f32 %v7967_v12, %v13176_v5 }
 0x134   : > { %13190 = vst [vmem:[#allocation22_spill] sm:$0xff] %v8018_v36  ;;  %13191 = vst [vmem:[#allocation50_spill] sm:$0xff] %v8023_v3  ;;  %v1137_v42 = vmul.f32 %v7972_v45, %v13176_v5  ;;  %v1138_v28 = vmul.f32 %v7977_v10, %v13176_v5  ;;  %v1139_v27 = vmul.f32 %v7990_v62, %v13176_v5 }
 0x135   : > { %v1140_v4 = vmul.f32 %v7995_v43, %v13176_v5  ;;  %v1141_v44 = vmul.f32 %v8000_v15, %v13176_v5  ;;  %v1142_v0 = vmul.f32 %v8013_v47, %v13176_v5  ;;  %v1143_v12 = vmul.f32 %v8018_v36, %v13176_v5 }
 0x136   : > { %v1144_v45 = vmul.f32 %v8023_v3, %v13176_v5  ;;  %v8056_v10 = vadd.f32 %v1113_v63, %v7742_v53  ;;  %v8059_v62 = vadd.f32 %v1114_v41, %v7745_v23  ;;  %v8062_v43 = vadd.f32 %v1115_v16, %v7748_v59  ;;  %v13214_v16 = vld [vmem:[#allocation29_spill] sm:$0xff] }
 0x137   : > { %v8065_v15 = vadd.f32 %v1116_v60, %v7751_v58  ;;  %v8068_v47 = vadd.f32 %v1117_v51, %v7754_v9  ;;  %v8071_v36 = vadd.f32 %v1118_v34, %v7757_v61  ;;  %v8074_v5 = vadd.f32 %v1119_v39, %v7760_v52  ;;  %v13218_v39 = vld [vmem:[#allocation48_spill] sm:$0xff] }
 0x138   : > { %v8077_v53 = vadd.f32 %v1120_v26, %v7763_v48  ;;  %v8080_v23 = vadd.f32 %v1121_v17, %v7766_v57  ;;  %v8083_v59 = vadd.f32 %v1122_v25, %v7769_v32  ;;  %v8086_v58 = vadd.f32 %v1123_v31, %v7772_v30  ;;  %v13219_v17 = vld [vmem:[#allocation52_spill] sm:$0xff] }
 0x139   : > { %v8089_v9 = vadd.f32 %v1124_v33, %v7775_v6  ;;  %v8092_v61 = vadd.f32 %v1125_v29, %v7778_v14  ;;  %v8095_v52 = vadd.f32 %v1126_v56, %v7784_v19  ;;  %v8098_v48 = vadd.f32 %v1127_v22, %v7787_v35  ;;  %v13192_v29 = vld [vmem:[#allocation25_spill] sm:$0xff]  ;;  %v13208_v56 = vld [vmem:[#allocation24_spill] sm:$0xff]  ;;  %v13209_v22 = vld [vmem:[#allocation19_spill] sm:$0xff] }
 0x13a   : > { %v8101_v57 = vadd.f32 %v1128_v24, %v7790_v13  ;;  %v8104_v32 = vadd.f32 %v1129_v20, %v7793_v1  ;;  %v8107_v30 = vadd.f32 %v1130_v46, %v7814_v2  ;;  %v8110_v6 = vadd.f32 %v1131_v8, %v7817_v21  ;;  %v13194_v21 = vld [vmem:[#allocation35_spill] sm:$0xff]  ;;  %v13210_v20 = vld [vmem:[#allocation18_spill] sm:$0xff] }
 0x13b   : > { %v8113_v14 = vadd.f32 %v1132_v11, %v7820_v40  ;;  %v8116_v19 = vadd.f32 %v1133_v18, %v7823_v49  ;;  %v8119_v35 = vadd.f32 %v1134_v54, %v7841_v7  ;;  %v8122_v13 = vadd.f32 %v1135_v38, %v7844_v55  ;;  %v13196_v40 = vld [vmem:[#allocation45_spill] sm:$0xff]  ;;  %v13198_v49 = vld [vmem:[#allocation46_spill] sm:$0xff]  ;;  %v13200_v7 = vld [vmem:[#allocation47_spill] sm:$0xff] }
 0x13c   : > { %v8125_v1 = vadd.f32 %v1136_v37, %v7847_v50  ;;  %v8128_v2 = vadd.f32 %v1137_v42, %v13192_v29  ;;  %v8131_v33 = vadd.f32 %v1138_v28, %v13194_v21  ;;  %v8134_v25 = vadd.f32 %v1139_v27, %v13196_v40  ;;  %v13202_v55 = vld [vmem:[#allocation54_spill] sm:$0xff]  ;;  %v13204_v50 = vld [vmem:[#allocation55_spill] sm:$0xff]  ;;  %v13206_v54 = vld [vmem:[#allocation56_spill] sm:$0xff] }
 0x13d   : > { %v8137_v31 = vadd.f32 %v1140_v4, %v13198_v49  ;;  %v8140_v24 = vadd.f32 %v1141_v44, %v13200_v7  ;;  %v8143_v38 = vadd.f32 %v1142_v0, %v13202_v55  ;;  %v8146_v37 = vadd.f32 %v1143_v12, %v13204_v50  ;;  %v13211_v8 = vld [vmem:[#allocation26_spill] sm:$0xff]  ;;  %v13212_v42 = vld [vmem:[#allocation27_spill] sm:$0xff]  ;;  %v13213_v27 = vld [vmem:[#allocation28_spill] sm:$0xff] }
 0x13e   : > { %13193 = vst [vmem:[#allocation51_spill] sm:$0xff] %v8128_v2  ;;  %13195 = vst [vmem:[#allocation15_spill] sm:$0xff] %v8131_v33  ;;  %v8149_v18 = vadd.f32 %v1144_v45, %v13206_v54  ;;  %v1180_v11 = vmul.f32 %v13209_v22, %v13208_v56  ;;  %v1181_v46 = vmul.f32 %v13210_v20, %v13208_v56  ;;  %v13215_v45 = vld [vmem:[#allocation14_spill] sm:$0xff]  ;;  %v13216_v4 = vld [vmem:[#allocation33_spill] sm:$0xff] }
 0x13f   : > { %13197 = vst [vmem:[#allocation16_spill] sm:$0xff] %v8134_v25  ;;  %13199 = vst [vmem:[#allocation36_spill] sm:$0xff] %v8137_v31  ;;  %v1182_v63 = vmul.f32 %v13211_v8, %v13208_v56  ;;  %v1183_v28 = vmul.f32 %v13212_v42, %v13208_v56  ;;  %v1184_v41 = vmul.f32 %v13213_v27, %v13208_v56  ;;  %v13217_v0 = vld [vmem:[#allocation34_spill] sm:$0xff]  ;;  %v13220_v29 = vld [vmem:[#allocation53_spill] sm:$0xff] }
 0x140   : > { %13201 = vst [vmem:[#allocation25_spill] sm:$0xff] %v8140_v24  ;;  %13203 = vst [vmem:[#allocation35_spill] sm:$0xff] %v8143_v38  ;;  %v1185_v60 = vmul.f32 %v13214_v16, %v13208_v56  ;;  %v1186_v51 = vmul.f32 %v13215_v45, %v13208_v56  ;;  %v1187_v44 = vmul.f32 %v13216_v4, %v13208_v56  ;;  %v13221_v40 = vld [vmem:[#allocation57_spill] sm:$0xff]  ;;  %v13222_v7 = vld [vmem:[#allocation30_spill] sm:$0xff] }
 0x141   : > { %13205 = vst [vmem:[#allocation45_spill] sm:$0xff] %v8146_v37  ;;  %13207 = vst [vmem:[#allocation46_spill] sm:$0xff] %v8149_v18  ;;  %v1188_v34 = vmul.f32 %v13217_v0, %v13208_v56  ;;  %v1189_v26 = vmul.f32 %v13218_v39, %v13208_v56  ;;  %v1190_v12 = vmul.f32 %v13219_v17, %v13208_v56  ;;  %v13223_v50 = vld [vmem:[#allocation32_spill] sm:$0xff]  ;;  %v13224_v22 = vld [vmem:[#allocation49_spill] sm:$0xff] }
 0x142   : > { %v1191_v21 = vmul.f32 %v13220_v29, %v13208_v56  ;;  %v1192_v49 = vmul.f32 %v13221_v40, %v13208_v56  ;;  %v1193_v55 = vmul.f32 %v13222_v7, %v13208_v56  ;;  %v1194_v54 = vmul.f32 %v13223_v50, %v13208_v56  ;;  %v13225_v39 = vld [vmem:[#allocation41_spill] sm:$0xff]  ;;  %v13227_v7 = vld [vmem:[#allocation23_spill] sm:$0xff]  ;;  %v13232_v8 = vld [vmem:[#allocation42_spill] sm:$0xff] }
 0x143   : > { %v1195_v20 = vmul.f32 %v13224_v22, %v13208_v56  ;;  %v1196_v0 = vmul.f32 %v13225_v39, %v13208_v56  ;;  %v8188_v17 = vld [vmem:[%s12089_s0 + $0x331] sm:$0xff]  ;;  %v8193_v40 = vld [vmem:[%s12089_s0 + $0x339] sm:$0xff]  ;;  %v1197_v29 = vmul.f32 %v13227_v7, %v13208_v56  ;;  %v13228_v50 = vld [vmem:[#allocation31_spill] sm:$0xff]  ;;  %v1202_v18 = vmul.f32 %v13232_v8, %v13208_v56 }
 0x144   : > { %13226 = vst [vmem:[#allocation47_spill] sm:$0xff] %v8188_v17  ;;  %v1198_v4 = vmul.f32 %v13228_v50, %v13208_v56  ;;  %v13229_v22 = vld [vmem:[#allocation37_spill] sm:$0xff]  ;;  %v13230_v39 = vld [vmem:[#allocation20_spill] sm:$0xff]  ;;  %v13233_v37 = vld [vmem:[#allocation43_spill] sm:$0xff]  ;;  %v1209_v8 = vmul.f32 %v8023_v3, %v13208_v56  ;;  %v8238_v3 = vadd.f32 %v1184_v41, %v8068_v47  ;;  %v8259_v47 = vadd.f32 %v1191_v21, %v8089_v9 }
 0x145   : > { %v1199_v45 = vmul.f32 %v13229_v22, %v13208_v56  ;;  %v1200_v16 = vmul.f32 %v13230_v39, %v13208_v56  ;;  %v13231_v27 = vld [vmem:[#allocation21_spill] sm:$0xff]  ;;  %v1203_v38 = vmul.f32 %v13233_v37, %v13208_v56  ;;  %v13234_v7 = vld [vmem:[#allocation44_spill] sm:$0xff]  ;;  %v13237_v39 = vld [vmem:[#allocation39_spill] sm:$0xff]  ;;  %v1210_v37 = vmul.f32 %v8188_v17, %v13208_v56 }
 0x146   : > { %v1201_v42 = vmul.f32 %v13231_v27, %v13208_v56  ;;  %v1204_v24 = vmul.f32 %v13234_v7, %v13208_v56  ;;  %v13235_v50 = vld [vmem:[#allocation40_spill] sm:$0xff]  ;;  %v13236_v22 = vld [vmem:[#allocation17_spill] sm:$0xff]  ;;  %v1207_v33 = vmul.f32 %v13237_v39, %v13208_v56  ;;  %v13238_v27 = vld [vmem:[#allocation22_spill] sm:$0xff]  ;;  %v1211_v7 = vmul.f32 %v8193_v40, %v13208_v56 }
 0x147   : > { %v1205_v31 = vmul.f32 %v13235_v50, %v13208_v56  ;;  %v1206_v25 = vmul.f32 %v13236_v22, %v13208_v56  ;;  %v1208_v2 = vmul.f32 %v13238_v27, %v13208_v56  ;;  %v8226_v50 = vadd.f32 %v1180_v11, %v8056_v10  ;;  %v13265_v21 = vld [vmem:[#allocation52_spill] sm:$0xff] }
 0x148   : > { %v8229_v22 = vadd.f32 %v1181_v46, %v8059_v62  ;;  %v8232_v39 = vadd.f32 %v1182_v63, %v8062_v43  ;;  %v8235_v27 = vadd.f32 %v1183_v28, %v8065_v15  ;;  %v8241_v17 = vadd.f32 %v1185_v60, %v8071_v36 }
 0x149   : > { %v8244_v56 = vadd.f32 %v1186_v51, %v8074_v5  ;;  %v8247_v10 = vadd.f32 %v1187_v44, %v8077_v53  ;;  %v8250_v62 = vadd.f32 %v1188_v34, %v8080_v23  ;;  %v8253_v43 = vadd.f32 %v1189_v26, %v8083_v59  ;;  %v13263_v34 = vld [vmem:[#allocation34_spill] sm:$0xff] }
 0x14a   : > { %v8256_v15 = vadd.f32 %v1190_v12, %v8086_v58  ;;  %v8262_v36 = vadd.f32 %v1192_v49, %v8092_v61  ;;  %v8265_v5 = vadd.f32 %v1193_v55, %v8095_v52  ;;  %v8268_v53 = vadd.f32 %v1194_v54, %v8098_v48  ;;  %v13264_v12 = vld [vmem:[#allocation48_spill] sm:$0xff]  ;;  %v13267_v54 = vld [vmem:[#allocation57_spill] sm:$0xff] }
 0x14b   : > { %v8271_v23 = vadd.f32 %v1195_v20, %v8101_v57  ;;  %v8274_v59 = vadd.f32 %v1196_v0, %v8104_v32  ;;  %v8277_v58 = vadd.f32 %v1197_v29, %v8107_v30  ;;  %v8280_v9 = vadd.f32 %v1198_v4, %v8110_v6  ;;  %v13240_v30 = vld [vmem:[#allocation51_spill] sm:$0xff] }
 0x14c   : > { %v8283_v61 = vadd.f32 %v1199_v45, %v8113_v14  ;;  %v8286_v52 = vadd.f32 %v1200_v16, %v8116_v19  ;;  %v8289_v48 = vadd.f32 %v1201_v42, %v8119_v35  ;;  %v8292_v57 = vadd.f32 %v1202_v18, %v8122_v13  ;;  %v13242_v6 = vld [vmem:[#allocation15_spill] sm:$0xff]  ;;  %v13244_v14 = vld [vmem:[#allocation16_spill] sm:$0xff]  ;;  %v13248_v35 = vld [vmem:[#allocation25_spill] sm:$0xff] }
 0x14d   : > { %v8295_v32 = vadd.f32 %v1203_v38, %v8125_v1  ;;  %v8298_v11 = vadd.f32 %v1204_v24, %v13240_v30  ;;  %v8301_v46 = vadd.f32 %v1205_v31, %v13242_v6  ;;  %v8304_v63 = vadd.f32 %v1206_v25, %v13244_v14  ;;  %v13246_v19 = vld [vmem:[#allocation36_spill] sm:$0xff]  ;;  %v13250_v13 = vld [vmem:[#allocation35_spill] sm:$0xff]  ;;  %v13252_v1 = vld [vmem:[#allocation45_spill] sm:$0xff] }
 0x14e   : > { %v8307_v28 = vadd.f32 %v1207_v33, %v13246_v19  ;;  %v8310_v42 = vadd.f32 %v1208_v2, %v13248_v35  ;;  %v8313_v18 = vadd.f32 %v1209_v8, %v13250_v13  ;;  %v8316_v38 = vadd.f32 %v1210_v37, %v13252_v1  ;;  %v13254_v24 = vld [vmem:[#allocation46_spill] sm:$0xff]  ;;  %v13258_v25 = vld [vmem:[#allocation27_spill] sm:$0xff]  ;;  %v13259_v33 = vld [vmem:[#allocation28_spill] sm:$0xff] }
 0x14f   : > { %13239 = vst [vmem:[#allocation54_spill] sm:$0xff] %v8295_v32  ;;  %13241 = vst [vmem:[#allocation55_spill] sm:$0xff] %v8298_v11  ;;  %v8319_v41 = vadd.f32 %v1211_v7, %v13254_v24  ;;  %v13256_v31 = vld [vmem:[#allocation38_spill] sm:$0xff]  ;;  %v13260_v2 = vld [vmem:[#allocation29_spill] sm:$0xff] }
 0x150   : > { %13243 = vst [vmem:[#allocation56_spill] sm:$0xff] %v8301_v46  ;;  %13245 = vst [vmem:[#allocation24_spill] sm:$0xff] %v8304_v63  ;;  %v13257_v16 = vld [vmem:[#allocation26_spill] sm:$0xff]  ;;  %v1248_v45 = vmul.f32 %v13258_v25, %v13256_v31  ;;  %v1249_v51 = vmul.f32 %v13259_v33, %v13256_v31  ;;  %v1250_v4 = vmul.f32 %v13260_v2, %v13256_v31  ;;  %v13262_v37 = vld [vmem:[#allocation33_spill] sm:$0xff] }
 0x151   : > { %13247 = vst [vmem:[#allocation19_spill] sm:$0xff] %v8307_v28  ;;  %13249 = vst [vmem:[#allocation18_spill] sm:$0xff] %v8310_v42  ;;  %v1247_v60 = vmul.f32 %v13257_v16, %v13256_v31  ;;  %v13261_v8 = vld [vmem:[#allocation14_spill] sm:$0xff]  ;;  %v1252_v0 = vmul.f32 %v13262_v37, %v13256_v31  ;;  %v1253_v26 = vmul.f32 %v13263_v34, %v13256_v31  ;;  %v13266_v7 = vld [vmem:[#allocation53_spill] sm:$0xff] }
 0x152   : > { %13251 = vst [vmem:[#allocation51_spill] sm:$0xff] %v8313_v18  ;;  %13253 = vst [vmem:[#allocation15_spill] sm:$0xff] %v8316_v38  ;;  %v1251_v44 = vmul.f32 %v13261_v8, %v13256_v31  ;;  %v1254_v29 = vmul.f32 %v13264_v12, %v13256_v31  ;;  %v1255_v49 = vmul.f32 %v13265_v21, %v13256_v31  ;;  %v13268_v30 = vld [vmem:[#allocation30_spill] sm:$0xff]  ;;  %v13269_v14 = vld [vmem:[#allocation32_spill] sm:$0xff] }
 0x153   : > { %13255 = vst [vmem:[#allocation16_spill] sm:$0xff] %v8319_v41  ;;  %v1256_v55 = vmul.f32 %v13266_v7, %v13256_v31  ;;  %v1257_v20 = vmul.f32 %v13267_v54, %v13256_v31  ;;  %v1258_v6 = vmul.f32 %v13268_v30, %v13256_v31  ;;  %v1259_v19 = vmul.f32 %v13269_v14, %v13256_v31  ;;  %v13270_v35 = vld [vmem:[#allocation49_spill] sm:$0xff]  ;;  %v13272_v16 = vld [vmem:[#allocation23_spill] sm:$0xff]  ;;  %v13275_v21 = vld [vmem:[#allocation20_spill] sm:$0xff] }
 0x154   : > { %v1260_v13 = vmul.f32 %v13270_v35, %v13256_v31  ;;  %v13271_v1 = vld [vmem:[#allocation41_spill] sm:$0xff]  ;;  %v1262_v25 = vmul.f32 %v13272_v16, %v13256_v31  ;;  %v13273_v33 = vld [vmem:[#allocation31_spill] sm:$0xff]  ;;  %v1265_v7 = vmul.f32 %v13275_v21, %v13256_v31  ;;  %v13277_v14 = vld [vmem:[#allocation42_spill] sm:$0xff]  ;;  %v8394_v32 = vadd.f32 %v1247_v60, %v8226_v50 }
 0x155   : > { %v1261_v24 = vmul.f32 %v13271_v1, %v13256_v31  ;;  %v1263_v2 = vmul.f32 %v13273_v33, %v13256_v31  ;;  %v4800_v8 = vld [vmem:[%s12089_s0 + $0x349] sm:$0xff]  ;;  %v4801_v37 = vld [vmem:[%s12089_s0 + $0x351] sm:$0xff]  ;;  %v1267_v35 = vmul.f32 %v13277_v14, %v13256_v31  ;;  %v13283_v14 = vld [vmem:[#allocation22_spill] sm:$0xff]  ;;  %v8417_v50 = vadd.f32 %v1252_v0, %v8241_v17 }
 0x156   : > { %v13274_v34 = vld [vmem:[#allocation37_spill] sm:$0xff]  ;;  %v13278_v1 = vld [vmem:[#allocation43_spill] sm:$0xff]  ;;  %v13279_v33 = vld [vmem:[#allocation44_spill] sm:$0xff]  ;;  %v1273_v28 = vmul.f32 %v13283_v14, %v13256_v31  ;;  %v1277_v11 = vmul.f32 %v4800_v8, %v13256_v31  ;;  %v8435_v60 = vadd.f32 %v1258_v6, %v8259_v47  ;;  %v8438_v17 = vadd.f32 %v1259_v19, %v8262_v36 }
 0x157   : > { %v1264_v12 = vmul.f32 %v13274_v34, %v13256_v31  ;;  %v13276_v54 = vld [vmem:[#allocation21_spill] sm:$0xff]  ;;  %v1268_v16 = vmul.f32 %v13278_v1, %v13256_v31  ;;  %v1269_v41 = vmul.f32 %v13279_v33, %v13256_v31  ;;  %v13280_v38 = vld [vmem:[#allocation40_spill] sm:$0xff]  ;;  %v13284_v63 = vld [vmem:[#allocation50_spill] sm:$0xff]  ;;  %v8459_v36 = vadd.f32 %v1265_v7, %v8280_v9 }
 0x158   : > { %v1266_v30 = vmul.f32 %v13276_v54, %v13256_v31  ;;  %v1270_v34 = vmul.f32 %v13280_v38, %v13256_v31  ;;  %v13281_v18 = vld [vmem:[#allocation17_spill] sm:$0xff]  ;;  %v13282_v54 = vld [vmem:[#allocation39_spill] sm:$0xff]  ;;  %v1274_v1 = vmul.f32 %v13284_v63, %v13256_v31  ;;  %v1276_v38 = vmul.f32 %v8193_v40, %v13256_v31  ;;  %v13305_v19 = vld [vmem:[#allocation18_spill] sm:$0xff] }
 0x159   : > { %v1271_v21 = vmul.f32 %v13281_v18, %v13256_v31  ;;  %v1272_v42 = vmul.f32 %v13282_v54, %v13256_v31  ;;  %v13285_v46 = vld [vmem:[#allocation47_spill] sm:$0xff]  ;;  %v1278_v18 = vmul.f32 %v4801_v37, %v13256_v31  ;;  %v8401_v54 = vadd.f32 %v1248_v45, %v8229_v22  ;;  %v13291_v45 = vld [vmem:[#allocation54_spill] sm:$0xff] }
 0x15a   : > { %v1275_v33 = vmul.f32 %v13285_v46, %v13256_v31  ;;  %v8404_v63 = vadd.f32 %v1249_v51, %v8232_v39  ;;  %v8407_v46 = vadd.f32 %v1250_v4, %v8235_v27  ;;  %v8410_v40 = vadd.f32 %v1251_v44, %v8238_v3  ;;  %v8483_v9 = vld [vmem:[%s12089_s0 + $0x1e2] sm:$0xff]  ;;  %v8500_v0 = vld [vmem:[%s12089_s0 + $0x1ea] sm:$0xff] }
 0x15b   : > { %v8420_v31 = vadd.f32 %v1253_v26, %v8244_v56  ;;  %v8423_v22 = vadd.f32 %v1254_v29, %v8247_v10  ;;  %v8426_v39 = vadd.f32 %v1255_v49, %v8250_v62  ;;  %v8429_v27 = vadd.f32 %v1256_v55, %v8253_v43  ;;  %13288 = vst [vmem:[#allocation35_spill] sm:$0xff] %v8483_v9  ;;  %v13293_v4 = vld [vmem:[#allocation55_spill] sm:$0xff]  ;;  %v8505_v26 = vld [vmem:[%s12089_s0 + $0x1fa] sm:$0xff]  ;;  %v13301_v49 = vld [vmem:[#allocation24_spill] sm:$0xff] }
 0x15c   : > { %v8432_v3 = vadd.f32 %v1257_v20, %v8256_v15  ;;  %v8441_v56 = vadd.f32 %v1260_v13, %v8265_v5  ;;  %v8444_v10 = vadd.f32 %v1261_v24, %v8268_v53  ;;  %v8447_v62 = vadd.f32 %v1262_v25, %v8271_v23  ;;  %v4802_v15 = vld [vmem:[%s12089_s0 + $0x1b2] sm:$0xff]  ;;  %v4803_v23 = vld [vmem:[%s12089_s0 + $0x1ba] sm:$0xff]  ;;  %13295 = vst [vmem:[#allocation27_spill] sm:$0xff] %v8500_v0  ;;  %v13303_v20 = vld [vmem:[#allocation19_spill] sm:$0xff] }
 0x15d   : > { %v8450_v43 = vadd.f32 %v1263_v2, %v8274_v59  ;;  %v8456_v47 = vadd.f32 %v1264_v12, %v8277_v58  ;;  %v8462_v5 = vadd.f32 %v1266_v30, %v8283_v61  ;;  %v8465_v53 = vadd.f32 %v1267_v35, %v8286_v52  ;;  %v8473_v59 = vld [vmem:[%s12089_s0 + $0x1ca] sm:$0xff]  ;;  %v8478_v58 = vld [vmem:[%s12089_s0 + $0x1d2] sm:$0xff]  ;;  %13296 = vst [vmem:[#allocation28_spill] sm:$0xff] %v8505_v26  ;;  %v8532_v24 = vld [vmem:[%s12089_s0 + $0x21a] sm:$0xff] }
 0x15e   : > { %13286 = vst [vmem:[#allocation36_spill] sm:$0xff] %v8473_v59  ;;  %13287 = vst [vmem:[#allocation25_spill] sm:$0xff] %v8478_v58  ;;  %v8486_v61 = vadd.f32 %v1268_v16, %v8289_v48  ;;  %v8489_v52 = vadd.f32 %v1269_v41, %v8292_v57  ;;  %v8492_v51 = vadd.f32 %v1270_v34, %v13291_v45  ;;  %v8510_v48 = vld [vmem:[%s12089_s0 + $0x202] sm:$0xff]  ;;  %v8515_v57 = vld [vmem:[%s12089_s0 + $0x212] sm:$0xff] }
 0x15f   : > { %v8495_v44 = vadd.f32 %v1271_v21, %v13293_v4  ;;  %13297 = vst [vmem:[#allocation29_spill] sm:$0xff] %v8510_v48  ;;  %13298 = vst [vmem:[#allocation14_spill] sm:$0xff] %v8515_v57  ;;  %v13299_v41 = vld [vmem:[#allocation56_spill] sm:$0xff]  ;;  %v8521_v55 = vadd.f32 %v1273_v28, %v13301_v49  ;;  %v8524_v6 = vadd.f32 %v1274_v1, %v13303_v20  ;;  %v8547_v25 = vld [vmem:[%s12089_s0 + $0x242] sm:$0xff]  ;;  %v8580_v1 = vstv %s8398_s3 }
 0x160   : > { %13289 = vst [vmem:[#allocation45_spill] sm:$0xff] %v8486_v61  ;;  %13290 = vst [vmem:[#allocation46_spill] sm:$0xff] %v8489_v52  ;;  %v8518_v29 = vadd.f32 %v1272_v42, %v13299_v41  ;;  %v8527_v13 = vadd.f32 %v1275_v33, %v13305_v19  ;;  %v8537_v42 = vld [vmem:[%s12089_s0 + $0x22a] sm:$0xff]  ;;  %v8542_v28 = vld [vmem:[%s12089_s0 + $0x232] sm:$0xff]  ;;  %v8583_v33 = vstv %s8412_s24 }
 0x161   : > { %13292 = vst [vmem:[#allocation38_spill] sm:$0xff] %v8492_v51  ;;  %13294 = vst [vmem:[#allocation26_spill] sm:$0xff] %v8495_v44  ;;  %v13311_v2 = vld [vmem:[#allocation51_spill] sm:$0xff]  ;;  %v13315_v7 = vld [vmem:[#allocation16_spill] sm:$0xff] }
 0x162   : > { %13300 = vst [vmem:[#allocation33_spill] sm:$0xff] %v8518_v29  ;;  %13302 = vst [vmem:[#allocation34_spill] sm:$0xff] %v8521_v55  ;;  %v8550_v8 = vadd.f32 %v1276_v38, %v13311_v2  ;;  %v13313_v37 = vld [vmem:[#allocation15_spill] sm:$0xff]  ;;  %v8556_v30 = vadd.f32 %v1278_v18, %v13315_v7  ;;  %v8566_v16 = vld [vmem:[%s12089_s0 + $0x25a] sm:$0xff]  ;;  %v8586_v38 = vstv %s8414_s18 }
 0x163   : > { %13304 = vst [vmem:[#allocation48_spill] sm:$0xff] %v8524_v6  ;;  %13306 = vst [vmem:[#allocation52_spill] sm:$0xff] %v8527_v13  ;;  %v8553_v12 = vadd.f32 %v1277_v11, %v13313_v37  ;;  %v8561_v35 = vld [vmem:[%s12089_s0 + $0x24a] sm:$0xff]  ;;  %v8571_v34 = vld [vmem:[%s12089_s0 + $0x262] sm:$0xff]  ;;  %v1349_v11 = vstv %s8396_s23  ;;  %s9366_s23 = sld [smem:[#allocation4 + %s1889_s25]]  ;;  %s2193_s25 = sadd.s32 26, %s5358_s16 }
 0x164   : > { %13307 = vst [vmem:[#allocation53_spill] sm:$0xff] %v8532_v24  ;;  %13308 = vst [vmem:[#allocation57_spill] sm:$0xff] %v8537_v42  ;;  %v8577_v21 = vld [vmem:[%s12089_s0 + $0x272] sm:$0xff]  ;;  %v1350_v14 = vmul.f32 %v4802_v15, %v1349_v11  ;;  %v8591_v18 = vld [vmem:[%s12089_s0 + $0x27a] sm:$0xff]  ;;  %v1351_v4 = vmul.f32 %v4803_v23, %v1349_v11  ;;  %v1352_v41 = vmul.f32 %v8473_v59, %v1349_v11  ;;  %s10156_s16 = sld [smem:[#allocation4 + %s1956_s14]] }
 0x165   : > { %13309 = vst [vmem:[#allocation30_spill] sm:$0xff] %v8542_v28  ;;  %13310 = vst [vmem:[#allocation32_spill] sm:$0xff] %v8547_v25  ;;  %v8596_v45 = vld [vmem:[%s12089_s0 + $0x28a] sm:$0xff]  ;;  %v8601_v15 = vld [vmem:[%s12089_s0 + $0x292] sm:$0xff]  ;;  %v1353_v49 = vmul.f32 %v8478_v58, %v1349_v11  ;;  %v1354_v20 = vmul.f32 %v8483_v9, %v1349_v11  ;;  %v1355_v37 = vmul.f32 %v8500_v0, %v1349_v11 }
 0x166   : > { %13312 = vst [vmem:[#allocation49_spill] sm:$0xff] %v8550_v8  ;;  %13314 = vst [vmem:[#allocation41_spill] sm:$0xff] %v8553_v12  ;;  %v8609_v19 = vld [vmem:[%s12089_s0 + $0x2a2] sm:$0xff]  ;;  %v8614_v2 = vld [vmem:[%s12089_s0 + $0x2aa] sm:$0xff]  ;;  %v1356_v7 = vmul.f32 %v8505_v26, %v1349_v11  ;;  %v1359_v26 = vmul.f32 %v8532_v24, %v1349_v11  ;;  %v1362_v59 = vmul.f32 %v8547_v25, %v1349_v11 }
 0x167   : > { %13316 = vst [vmem:[#allocation23_spill] sm:$0xff] %v8556_v30  ;;  %13317 = vst [vmem:[#allocation31_spill] sm:$0xff] %v8561_v35  ;;  %v8619_v23 = vld [vmem:[%s12089_s0 + $0x2ba] sm:$0xff]  ;;  %v8628_v9 = vld [vmem:[%s12089_s0 + $0x2c2] sm:$0xff]  ;;  %v1365_v25 = vmul.f32 %v8571_v34, %v1349_v11  ;;  %v1366_v12 = vmul.f32 %v8577_v21, %v1349_v11  ;;  %v1370_v6 = vmul.f32 %v8609_v19, %v1349_v11 }
 0x168   : > { %13318 = vst [vmem:[#allocation37_spill] sm:$0xff] %v8566_v16  ;;  %13319 = vst [vmem:[#allocation20_spill] sm:$0xff] %v8571_v34  ;;  %v8633_v58 = vld [vmem:[%s12089_s0 + $0x2d2] sm:$0xff]  ;;  %v8638_v0 = vld [vmem:[%s12089_s0 + $0x2da] sm:$0xff]  ;;  %v1368_v34 = vmul.f32 %v8596_v45, %v1349_v11  ;;  %v1371_v55 = vmul.f32 %v8614_v2, %v1349_v11  ;;  %v1372_v29 = vmul.f32 %v8619_v23, %v1349_v11 }
 0x169   : > { %13320 = vst [vmem:[#allocation21_spill] sm:$0xff] %v8577_v21  ;;  %13321 = vst [vmem:[#allocation42_spill] sm:$0xff] %v8580_v1  ;;  %v8647_v1 = vld [vmem:[%s12089_s0 + $0x2ea] sm:$0xff]  ;;  %v8652_v30 = vld [vmem:[%s12089_s0 + $0x2f2] sm:$0xff]  ;;  %v1369_v21 = vmul.f32 %v8601_v15, %v1349_v11  ;;  %v1373_v44 = vmul.f32 %v8628_v9, %v1349_v11  ;;  %v1374_v51 = vmul.f32 %v8633_v58, %v1349_v11 }
 0x16a   : > { %13322 = vst [vmem:[#allocation43_spill] sm:$0xff] %v8583_v33  ;;  %13323 = vst [vmem:[#allocation44_spill] sm:$0xff] %v8586_v38  ;;  %v1357_v38 = vmul.f32 %v8510_v48, %v1349_v11  ;;  %v1358_v33 = vmul.f32 %v8515_v57, %v1349_v11  ;;  %v1360_v48 = vmul.f32 %v8537_v42, %v1349_v11  ;;  %v8657_v24 = vld [vmem:[%s12089_s0 + $0x302] sm:$0xff]  ;;  %v8666_v8 = vld [vmem:[%s12089_s0 + $0x30a] sm:$0xff] }
 0x16b   : > { %13324 = vst [vmem:[#allocation40_spill] sm:$0xff] %v8591_v18  ;;  %13325 = vst [vmem:[#allocation17_spill] sm:$0xff] %v8596_v45  ;;  %v1361_v57 = vmul.f32 %v8542_v28, %v1349_v11  ;;  %v1363_v42 = vmul.f32 %v8561_v35, %v1349_v11  ;;  %v1364_v28 = vmul.f32 %v8566_v16, %v1349_v11  ;;  %v8671_v13 = vld [vmem:[%s12089_s0 + $0x31a] sm:$0xff]  ;;  %v8676_v35 = vld [vmem:[%s12089_s0 + $0x322] sm:$0xff] }
 0x16c   : > { %13326 = vst [vmem:[#allocation39_spill] sm:$0xff] %v8601_v15  ;;  %13327 = vst [vmem:[#allocation22_spill] sm:$0xff] %v8609_v19  ;;  %v1367_v16 = vmul.f32 %v8591_v18, %v1349_v11  ;;  %v1375_v52 = vmul.f32 %v8638_v0, %v1349_v11  ;;  %v1376_v61 = vmul.f32 %v8647_v1, %v1349_v11 }
 0x16d   : > { %13328 = vst [vmem:[#allocation50_spill] sm:$0xff] %v8614_v2  ;;  %13329 = vst [vmem:[#allocation47_spill] sm:$0xff] %v8619_v23  ;;  %v1377_v18 = vmul.f32 %v8652_v30, %v1349_v11  ;;  %v1378_v45 = vmul.f32 %v8657_v24, %v1349_v11  ;;  %v1379_v15 = vmul.f32 %v8666_v8, %v1349_v11 }
 0x16e   : > { %13330 = vst [vmem:[#allocation54_spill] sm:$0xff] %v8628_v9  ;;  %13331 = vst [vmem:[#allocation55_spill] sm:$0xff] %v8633_v58  ;;  %v1380_v19 = vmul.f32 %v8671_v13, %v1349_v11  ;;  %v1381_v2 = vmul.f32 %v8676_v35, %v1349_v11  ;;  %v8694_v23 = vadd.f32 %v1350_v14, %v8394_v32 }
 0x16f   : > { %13332 = vst [vmem:[#allocation56_spill] sm:$0xff] %v8638_v0  ;;  %13333 = vst [vmem:[#allocation24_spill] sm:$0xff] %v8647_v1  ;;  %v8697_v9 = vadd.f32 %v1351_v4, %v8401_v54  ;;  %v8700_v0 = vadd.f32 %v1352_v41, %v8404_v63  ;;  %v8703_v1 = vadd.f32 %v1353_v49, %v8407_v46  ;;  %v13364_v49 = vld [vmem:[#allocation29_spill] sm:$0xff] }
 0x170   : > { %13334 = vst [vmem:[#allocation19_spill] sm:$0xff] %v8652_v30  ;;  %13335 = vst [vmem:[#allocation18_spill] sm:$0xff] %v8657_v24  ;;  %v8706_v24 = vadd.f32 %v1354_v20, %v8410_v40  ;;  %v8712_v11 = vadd.f32 %v1356_v7, %v8420_v31  ;;  %v8715_v32 = vadd.f32 %v1357_v38, %v8423_v22  ;;  %v13361_v38 = vld [vmem:[#allocation35_spill] sm:$0xff] }
 0x171   : > { %13336 = vst [vmem:[#allocation51_spill] sm:$0xff] %v8666_v8  ;;  %13337 = vst [vmem:[#allocation15_spill] sm:$0xff] %v8671_v13  ;;  %v8709_v8 = vadd.f32 %v1355_v37, %v8417_v50  ;;  %v8718_v54 = vadd.f32 %v1358_v33, %v8426_v39  ;;  %v8721_v63 = vadd.f32 %v1359_v26, %v8429_v27  ;;  %v13366_v37 = vld [vmem:[#allocation53_spill] sm:$0xff] }
 0x172   : > { %13338 = vst [vmem:[#allocation16_spill] sm:$0xff] %v8676_v35  ;;  %v8724_v46 = vadd.f32 %v1360_v48, %v8432_v3  ;;  %v8727_v40 = vadd.f32 %v1361_v57, %v8435_v60  ;;  %v8730_v50 = vadd.f32 %v1362_v59, %v8438_v17  ;;  %v8733_v31 = vadd.f32 %v1363_v42, %v8441_v56 }
 0x173   : > { %v8736_v22 = vadd.f32 %v1364_v28, %v8444_v10  ;;  %v8739_v39 = vadd.f32 %v1365_v25, %v8447_v62  ;;  %v8742_v27 = vadd.f32 %v1366_v12, %v8450_v43  ;;  %v8745_v3 = vadd.f32 %v1367_v16, %v8456_v47  ;;  %v13339_v10 = vld [vmem:[#allocation45_spill] sm:$0xff]  ;;  %v13340_v62 = vld [vmem:[#allocation46_spill] sm:$0xff] }
 0x174   : > { %v8748_v60 = vadd.f32 %v1368_v34, %v8459_v36  ;;  %v8751_v17 = vadd.f32 %v1369_v21, %v8462_v5  ;;  %v8754_v56 = vadd.f32 %v1370_v6, %v8465_v53  ;;  %v8757_v59 = vadd.f32 %v1371_v55, %v13339_v10  ;;  %v13341_v43 = vld [vmem:[#allocation38_spill] sm:$0xff]  ;;  %v13344_v36 = vld [vmem:[#allocation33_spill] sm:$0xff]  ;;  %v13348_v53 = vld [vmem:[#allocation48_spill] sm:$0xff] }
 0x175   : > { %v8760_v26 = vadd.f32 %v1372_v29, %v13340_v62  ;;  %v8763_v48 = vadd.f32 %v1373_v44, %v13341_v43  ;;  %v13342_v47 = vld [vmem:[#allocation26_spill] sm:$0xff]  ;;  %v8769_v42 = vadd.f32 %v1375_v52, %v13344_v36  ;;  %v8775_v6 = vadd.f32 %v1377_v18, %v13348_v53  ;;  %v13350_v55 = vld [vmem:[#allocation52_spill] sm:$0xff]  ;;  %v13352_v29 = vld [vmem:[#allocation49_spill] sm:$0xff] }
 0x176   : > { %v8766_v57 = vadd.f32 %v1374_v51, %v13342_v47  ;;  %v13346_v5 = vld [vmem:[#allocation34_spill] sm:$0xff]  ;;  %v8778_v25 = vadd.f32 %v1378_v45, %v13350_v55  ;;  %v8781_v12 = vadd.f32 %v1379_v15, %v13352_v29  ;;  %v13354_v44 = vld [vmem:[#allocation41_spill] sm:$0xff]  ;;  %v13356_v51 = vld [vmem:[#allocation23_spill] sm:$0xff] }
 0x177   : > { %13345 = vst [vmem:[#allocation46_spill] sm:$0xff] %v8769_v42  ;;  %v8772_v28 = vadd.f32 %v1376_v61, %v13346_v5  ;;  %13349 = vst [vmem:[#allocation26_spill] sm:$0xff] %v8775_v6  ;;  %v8784_v16 = vadd.f32 %v1380_v19, %v13354_v44  ;;  %v8787_v34 = vadd.f32 %v1381_v2, %v13356_v51  ;;  %v13358_v52 = vld [vmem:[#allocation42_spill] sm:$0xff]  ;;  %v13359_v21 = vld [vmem:[#allocation36_spill] sm:$0xff] }
 0x178   : > { %13343 = vst [vmem:[#allocation45_spill] sm:$0xff] %v8766_v57  ;;  %13351 = vst [vmem:[#allocation33_spill] sm:$0xff] %v8778_v25  ;;  %v1417_v14 = vmul.f32 %v13359_v21, %v13358_v52  ;;  %v13360_v61 = vld [vmem:[#allocation25_spill] sm:$0xff]  ;;  %v1419_v18 = vmul.f32 %v13361_v38, %v13358_v52  ;;  %v13362_v45 = vld [vmem:[#allocation27_spill] sm:$0xff]  ;;  %v1422_v20 = vmul.f32 %v13364_v49, %v13358_v52 }
 0x179   : > { %13347 = vst [vmem:[#allocation38_spill] sm:$0xff] %v8772_v28  ;;  %13353 = vst [vmem:[#allocation34_spill] sm:$0xff] %v8781_v12  ;;  %v1418_v33 = vmul.f32 %v13360_v61, %v13358_v52  ;;  %v1420_v4 = vmul.f32 %v13362_v45, %v13358_v52  ;;  %v13363_v15 = vld [vmem:[#allocation28_spill] sm:$0xff]  ;;  %v13365_v19 = vld [vmem:[#allocation14_spill] sm:$0xff]  ;;  %v1424_v7 = vmul.f32 %v13366_v37, %v13358_v52 }
 0x17a   : > { %13355 = vst [vmem:[#allocation48_spill] sm:$0xff] %v8784_v16  ;;  %13357 = vst [vmem:[#allocation52_spill] sm:$0xff] %v8787_v34  ;;  %v1421_v41 = vmul.f32 %v13363_v15, %v13358_v52  ;;  %v1423_v2 = vmul.f32 %v13365_v19, %v13358_v52  ;;  %v13367_v10 = vld [vmem:[#allocation57_spill] sm:$0xff]  ;;  %v13368_v43 = vld [vmem:[#allocation30_spill] sm:$0xff]  ;;  %v1439_v12 = vmul.f32 %v8633_v58, %v13358_v52 }
 0x17b   : > { %v1425_v62 = vmul.f32 %v13367_v10, %v13358_v52  ;;  %v1426_v47 = vmul.f32 %v13368_v43, %v13358_v52  ;;  %v13369_v36 = vld [vmem:[#allocation32_spill] sm:$0xff]  ;;  %v13370_v53 = vld [vmem:[#allocation31_spill] sm:$0xff]  ;;  %v13371_v29 = vld [vmem:[#allocation37_spill] sm:$0xff]  ;;  %v1446_v58 = vmul.f32 %v8676_v35, %v13358_v52 }
 0x17c   : > { %v1427_v5 = vmul.f32 %v13369_v36, %v13358_v52  ;;  %v1428_v55 = vmul.f32 %v13370_v53, %v13358_v52  ;;  %v1429_v44 = vmul.f32 %v13371_v29, %v13358_v52  ;;  %v13372_v51 = vld [vmem:[#allocation20_spill] sm:$0xff]  ;;  %v13373_v61 = vld [vmem:[#allocation21_spill] sm:$0xff]  ;;  %v13381_v34 = vld [vmem:[#allocation54_spill] sm:$0xff]  ;;  %v8876_v35 = vadd.f32 %v1421_v41, %v8706_v24 }
 0x17d   : > { %v1430_v21 = vmul.f32 %v13372_v51, %v13358_v52  ;;  %v1431_v37 = vmul.f32 %v13373_v61, %v13358_v52  ;;  %v13374_v10 = vld [vmem:[#allocation40_spill] sm:$0xff]  ;;  %v13375_v43 = vld [vmem:[#allocation17_spill] sm:$0xff]  ;;  %v13377_v51 = vld [vmem:[#allocation39_spill] sm:$0xff]  ;;  %v1438_v16 = vmul.f32 %v13381_v34, %v13358_v52  ;;  %v1445_v34 = vmul.f32 %v8671_v13, %v13358_v52 }
 0x17e   : > { %v1432_v19 = vmul.f32 %v13374_v10, %v13358_v52  ;;  %v1433_v49 = vmul.f32 %v13375_v43, %v13358_v52  ;;  %v8826_v36 = vld [vmem:[%s12089_s0 + $0x332] sm:$0xff]  ;;  %v8831_v29 = vld [vmem:[%s12089_s0 + $0x33a] sm:$0xff]  ;;  %v1434_v53 = vmul.f32 %v13377_v51, %v13358_v52  ;;  %v13380_v43 = vld [vmem:[#allocation47_spill] sm:$0xff]  ;;  %v8873_v13 = vadd.f32 %v1420_v4, %v8703_v1 }
 0x17f   : > { %13376 = vst [vmem:[#allocation49_spill] sm:$0xff] %v8826_v36  ;;  %v13378_v61 = vld [vmem:[#allocation22_spill] sm:$0xff]  ;;  %v1437_v38 = vmul.f32 %v13380_v43, %v13358_v52  ;;  %v13382_v25 = vld [vmem:[#allocation56_spill] sm:$0xff]  ;;  %v13385_v43 = vld [vmem:[#allocation51_spill] sm:$0xff]  ;;  %v8894_v1 = vadd.f32 %v1427_v5, %v8724_v46  ;;  %v8897_v24 = vadd.f32 %v1428_v55, %v8727_v40 }
 0x180   : > { %v1435_v15 = vmul.f32 %v13378_v61, %v13358_v52  ;;  %v13379_v10 = vld [vmem:[#allocation50_spill] sm:$0xff]  ;;  %v1440_v6 = vmul.f32 %v13382_v25, %v13358_v52  ;;  %v13383_v51 = vld [vmem:[#allocation24_spill] sm:$0xff]  ;;  %v1442_v61 = vmul.f32 %v8652_v30, %v13358_v52  ;;  %v1444_v57 = vmul.f32 %v13385_v43, %v13358_v52  ;;  %v13403_v4 = vld [vmem:[#allocation43_spill] sm:$0xff] }
 0x181   : > { %v1436_v45 = vmul.f32 %v13379_v10, %v13358_v52  ;;  %v1441_v28 = vmul.f32 %v13383_v51, %v13358_v52  ;;  %v13384_v10 = vld [vmem:[#allocation18_spill] sm:$0xff]  ;;  %v1447_v25 = vmul.f32 %v8826_v36, %v13358_v52  ;;  %v1448_v51 = vmul.f32 %v8831_v29, %v13358_v52 }
 0x182   : > { %v1443_v42 = vmul.f32 %v13384_v10, %v13358_v52  ;;  %v8864_v30 = vadd.f32 %v1417_v14, %v8694_v23  ;;  %v8867_v10 = vadd.f32 %v1418_v33, %v8697_v9  ;;  %v8870_v43 = vadd.f32 %v1419_v18, %v8700_v0 }
 0x183   : > { %v8879_v36 = vadd.f32 %v1422_v20, %v8709_v8  ;;  %v8882_v52 = vadd.f32 %v1423_v2, %v8712_v11  ;;  %v8885_v23 = vadd.f32 %v1424_v7, %v8715_v32  ;;  %v8888_v9 = vadd.f32 %v1425_v62, %v8718_v54  ;;  %v13410_v7 = vld [vmem:[#allocation57_spill] sm:$0xff] }
 0x184   : > { %v8891_v0 = vadd.f32 %v1426_v47, %v8721_v63  ;;  %v8900_v8 = vadd.f32 %v1429_v44, %v8730_v50  ;;  %v8903_v11 = vadd.f32 %v1430_v21, %v8733_v31  ;;  %v8906_v32 = vadd.f32 %v1431_v37, %v8736_v22  ;;  %v13411_v47 = vld [vmem:[#allocation30_spill] sm:$0xff]  ;;  %v13413_v44 = vld [vmem:[#allocation31_spill] sm:$0xff]  ;;  %v13414_v21 = vld [vmem:[#allocation37_spill] sm:$0xff] }
 0x185   : > { %v8909_v54 = vadd.f32 %v1432_v19, %v8739_v39  ;;  %v8912_v63 = vadd.f32 %v1433_v49, %v8742_v27  ;;  %v8915_v46 = vadd.f32 %v1434_v53, %v8745_v3  ;;  %v8918_v40 = vadd.f32 %v1435_v15, %v8748_v60  ;;  %v13387_v3 = vld [vmem:[#allocation45_spill] sm:$0xff]  ;;  %v13389_v60 = vld [vmem:[#allocation46_spill] sm:$0xff]  ;;  %v13404_v15 = vld [vmem:[#allocation35_spill] sm:$0xff] }
 0x186   : > { %v8921_v50 = vadd.f32 %v1436_v45, %v8751_v17  ;;  %v8924_v31 = vadd.f32 %v1437_v38, %v8754_v56  ;;  %v8927_v22 = vadd.f32 %v1438_v16, %v8757_v59  ;;  %v8930_v39 = vadd.f32 %v1439_v12, %v8760_v26  ;;  %v13391_v17 = vld [vmem:[#allocation38_spill] sm:$0xff]  ;;  %v13395_v59 = vld [vmem:[#allocation33_spill] sm:$0xff]  ;;  %v13412_v53 = vld [vmem:[#allocation32_spill] sm:$0xff] }
 0x187   : > { %v8933_v27 = vadd.f32 %v1440_v6, %v8763_v48  ;;  %v8936_v14 = vadd.f32 %v1441_v28, %v13387_v3  ;;  %v8939_v33 = vadd.f32 %v1442_v61, %v13389_v60  ;;  %v8942_v18 = vadd.f32 %v1443_v42, %v13391_v17  ;;  %v13393_v56 = vld [vmem:[#allocation26_spill] sm:$0xff]  ;;  %v13399_v48 = vld [vmem:[#allocation48_spill] sm:$0xff]  ;;  %v13405_v42 = vld [vmem:[#allocation27_spill] sm:$0xff] }
 0x188   : > { %v8945_v38 = vadd.f32 %v1444_v57, %v13393_v56  ;;  %v8948_v16 = vadd.f32 %v1445_v34, %v13395_v59  ;;  %v13397_v26 = vld [vmem:[#allocation34_spill] sm:$0xff]  ;;  %v8954_v6 = vadd.f32 %v1447_v25, %v13399_v48  ;;  %v13401_v28 = vld [vmem:[#allocation52_spill] sm:$0xff]  ;;  %v1484_v41 = vmul.f32 %v13404_v15, %v13403_v4  ;;  %v13407_v34 = vld [vmem:[#allocation29_spill] sm:$0xff] }
 0x189   : > { %13386 = vst [vmem:[#allocation41_spill] sm:$0xff] %v8933_v27  ;;  %13388 = vst [vmem:[#allocation23_spill] sm:$0xff] %v8936_v14  ;;  %v8951_v12 = vadd.f32 %v1446_v58, %v13397_v26  ;;  %v8957_v45 = vadd.f32 %v1448_v51, %v13401_v28  ;;  %v1485_v49 = vmul.f32 %v13405_v42, %v13403_v4  ;;  %v13406_v57 = vld [vmem:[#allocation28_spill] sm:$0xff]  ;;  %v13408_v58 = vld [vmem:[#allocation14_spill] sm:$0xff] }
 0x18a   : > { %13390 = vst [vmem:[#allocation42_spill] sm:$0xff] %v8939_v33  ;;  %13392 = vst [vmem:[#allocation36_spill] sm:$0xff] %v8942_v18  ;;  %v1486_v20 = vmul.f32 %v13406_v57, %v13403_v4  ;;  %v1487_v19 = vmul.f32 %v13407_v34, %v13403_v4  ;;  %v1488_v2 = vmul.f32 %v13408_v58, %v13403_v4  ;;  %v13409_v25 = vld [vmem:[#allocation53_spill] sm:$0xff]  ;;  %v13415_v3 = vld [vmem:[#allocation20_spill] sm:$0xff] }
 0x18b   : > { %13394 = vst [vmem:[#allocation25_spill] sm:$0xff] %v8945_v38  ;;  %13396 = vst [vmem:[#allocation45_spill] sm:$0xff] %v8948_v16  ;;  %v1489_v37 = vmul.f32 %v13409_v25, %v13403_v4  ;;  %v1490_v62 = vmul.f32 %v13410_v7, %v13403_v4  ;;  %v1491_v5 = vmul.f32 %v13411_v47, %v13403_v4  ;;  %v13416_v17 = vld [vmem:[#allocation21_spill] sm:$0xff]  ;;  %v13417_v59 = vld [vmem:[#allocation40_spill] sm:$0xff] }
 0x18c   : > { %13398 = vst [vmem:[#allocation46_spill] sm:$0xff] %v8951_v12  ;;  %13400 = vst [vmem:[#allocation38_spill] sm:$0xff] %v8954_v6  ;;  %v1492_v55 = vmul.f32 %v13412_v53, %v13403_v4  ;;  %v1493_v51 = vmul.f32 %v13413_v44, %v13403_v4  ;;  %v1494_v61 = vmul.f32 %v13414_v21, %v13403_v4  ;;  %v13418_v48 = vld [vmem:[#allocation17_spill] sm:$0xff]  ;;  %v13419_v15 = vld [vmem:[#allocation39_spill] sm:$0xff] }
 0x18d   : > { %13402 = vst [vmem:[#allocation26_spill] sm:$0xff] %v8957_v45  ;;  %v1495_v60 = vmul.f32 %v13415_v3, %v13403_v4  ;;  %v1496_v56 = vmul.f32 %v13416_v17, %v13403_v4  ;;  %v1497_v26 = vmul.f32 %v13417_v59, %v13403_v4  ;;  %v1498_v28 = vmul.f32 %v13418_v48, %v13403_v4  ;;  %v13420_v57 = vld [vmem:[#allocation22_spill] sm:$0xff]  ;;  %v4836_v58 = vld [vmem:[%s12089_s0 + $0x34a] sm:$0xff]  ;;  %v4837_v25 = vld [vmem:[%s12089_s0 + $0x352] sm:$0xff] }
 0x18e   : > { %v1499_v42 = vmul.f32 %v13419_v15, %v13403_v4  ;;  %v1500_v34 = vmul.f32 %v13420_v57, %v13403_v4  ;;  %v13421_v7 = vld [vmem:[#allocation50_spill] sm:$0xff]  ;;  %v13422_v53 = vld [vmem:[#allocation47_spill] sm:$0xff]  ;;  %v13425_v48 = vld [vmem:[#allocation56_spill] sm:$0xff]  ;;  %v1515_v27 = vmul.f32 %v4837_v25, %v13403_v4 }
 0x18f   : > { %v1501_v47 = vmul.f32 %v13421_v7, %v13403_v4  ;;  %v1502_v44 = vmul.f32 %v13422_v53, %v13403_v4  ;;  %v13423_v21 = vld [vmem:[#allocation54_spill] sm:$0xff]  ;;  %v13424_v17 = vld [vmem:[#allocation55_spill] sm:$0xff]  ;;  %v1505_v15 = vmul.f32 %v13425_v48, %v13403_v4  ;;  %v13426_v57 = vld [vmem:[#allocation24_spill] sm:$0xff] }
 0x190   : > { %v1503_v3 = vmul.f32 %v13423_v21, %v13403_v4  ;;  %v1504_v59 = vmul.f32 %v13424_v17, %v13403_v4  ;;  %v1506_v45 = vmul.f32 %v13426_v57, %v13403_v4  ;;  %v13427_v6 = vld [vmem:[#allocation19_spill] sm:$0xff]  ;;  %v13428_v7 = vld [vmem:[#allocation18_spill] sm:$0xff]  ;;  %v13431_v17 = vld [vmem:[#allocation16_spill] sm:$0xff]  ;;  %v1513_v57 = vmul.f32 %v8831_v29, %v13403_v4 }
 0x191   : > { %v1507_v12 = vmul.f32 %v13427_v6, %v13403_v4  ;;  %v1508_v16 = vmul.f32 %v13428_v7, %v13403_v4  ;;  %v13429_v53 = vld [vmem:[#allocation51_spill] sm:$0xff]  ;;  %v1511_v33 = vmul.f32 %v13431_v17, %v13403_v4  ;;  %v13432_v48 = vld [vmem:[#allocation49_spill] sm:$0xff]  ;;  %v1514_v6 = vmul.f32 %v4836_v58, %v13403_v4 }
 0x192   : > { %v1509_v38 = vmul.f32 %v13429_v53, %v13403_v4  ;;  %v13430_v21 = vld [vmem:[#allocation15_spill] sm:$0xff]  ;;  %v1512_v14 = vmul.f32 %v13432_v48, %v13403_v4  ;;  %v9028_v7 = vadd.f32 %v1484_v41, %v8864_v30  ;;  %v9031_v53 = vadd.f32 %v1485_v49, %v8867_v10 }
 0x193   : > { %v1510_v18 = vmul.f32 %v13430_v21, %v13403_v4  ;;  %v9034_v21 = vadd.f32 %v1486_v20, %v8870_v43  ;;  %v9037_v17 = vadd.f32 %v1487_v19, %v8873_v13  ;;  %v9040_v48 = vadd.f32 %v1488_v2, %v8876_v35  ;;  %v9114_v20 = vld [vmem:[%s12089_s0 + $0x398] sm:$0xff]  ;;  %v9119_v19 = vld [vmem:[%s12089_s0 + $0x3a8] sm:$0xff] }
 0x194   : > { %v9043_v29 = vadd.f32 %v1489_v37, %v8879_v36  ;;  %v9046_v4 = vadd.f32 %v1490_v62, %v8882_v52  ;;  %v9049_v30 = vadd.f32 %v1491_v5, %v8885_v23  ;;  %v9052_v10 = vadd.f32 %v1492_v55, %v8888_v9  ;;  %v4838_v52 = vld [vmem:[%s12089_s0 + $0x360] sm:$0xff]  ;;  %13436 = vst [vmem:[#allocation52_spill] sm:$0xff] %v9114_v20  ;;  %v13440_v37 = vld [vmem:[#allocation23_spill] sm:$0xff] }
 0x195   : > { %v9055_v43 = vadd.f32 %v1493_v51, %v8891_v0  ;;  %v9058_v13 = vadd.f32 %v1494_v61, %v8894_v1  ;;  %v9061_v35 = vadd.f32 %v1495_v60, %v8897_v24  ;;  %v9064_v36 = vadd.f32 %v1496_v56, %v8900_v8  ;;  %v4839_v24 = vld [vmem:[%s12089_s0 + $0x368] sm:$0xff]  ;;  %v9087_v8 = vld [vmem:[%s12089_s0 + $0x378] sm:$0xff]  ;;  %13437 = vst [vmem:[#allocation43_spill] sm:$0xff] %v9119_v19  ;;  %v9141_v5 = vld [vmem:[%s12089_s0 + $0x3c0] sm:$0xff] }
 0x196   : > { %v9070_v23 = vadd.f32 %v1497_v26, %v8903_v11  ;;  %v9073_v9 = vadd.f32 %v1498_v28, %v8906_v32  ;;  %v9076_v0 = vadd.f32 %v1499_v42, %v8909_v54  ;;  %v9079_v1 = vadd.f32 %v1500_v34, %v8912_v63  ;;  %13433 = vst [vmem:[#allocation33_spill] sm:$0xff] %v9087_v8  ;;  %v9092_v11 = vld [vmem:[%s12089_s0 + $0x380] sm:$0xff]  ;;  %v9097_v32 = vld [vmem:[%s12089_s0 + $0x390] sm:$0xff]  ;;  %v9146_v55 = vld [vmem:[%s12089_s0 + $0x3c8] sm:$0xff] }
 0x197   : > { %13434 = vst [vmem:[#allocation34_spill] sm:$0xff] %v9092_v11  ;;  %13435 = vst [vmem:[#allocation48_spill] sm:$0xff] %v9097_v32  ;;  %v9100_v54 = vadd.f32 %v1501_v47, %v8915_v46  ;;  %v9103_v63 = vadd.f32 %v1502_v44, %v8918_v40  ;;  %v9106_v41 = vadd.f32 %v1503_v3, %v8921_v50  ;;  %v9124_v46 = vld [vmem:[%s12089_s0 + $0x3b0] sm:$0xff]  ;;  %v13449_v51 = vld [vmem:[#allocation25_spill] sm:$0xff] }
 0x198   : > { %v9109_v49 = vadd.f32 %v1504_v59, %v8924_v31  ;;  %13438 = vst [vmem:[#allocation35_spill] sm:$0xff] %v9124_v46  ;;  %v9127_v40 = vadd.f32 %v1505_v15, %v8927_v22  ;;  %v9130_v50 = vadd.f32 %v1506_v45, %v8930_v39  ;;  %v13439_v31 = vld [vmem:[#allocation41_spill] sm:$0xff]  ;;  %v9136_v62 = vadd.f32 %v1508_v16, %v13440_v37  ;;  %v13445_v39 = vld [vmem:[#allocation42_spill] sm:$0xff]  ;;  %v13447_v16 = vld [vmem:[#allocation36_spill] sm:$0xff] }
 0x199   : > { %v9133_v2 = vadd.f32 %v1507_v12, %v13439_v31  ;;  %13442 = vst [vmem:[#allocation28_spill] sm:$0xff] %v9141_v5  ;;  %13443 = vst [vmem:[#allocation29_spill] sm:$0xff] %v9146_v55  ;;  %v9151_v22 = vld [vmem:[%s12089_s0 + $0x3d8] sm:$0xff]  ;;  %v9154_v12 = vadd.f32 %v1509_v38, %v13445_v39  ;;  %v9157_v45 = vadd.f32 %v1510_v18, %v13447_v16  ;;  %v9168_v26 = vld [vmem:[%s12089_s0 + $0x3e0] sm:$0xff] }
 0x19a   : > { %13441 = vst [vmem:[#allocation27_spill] sm:$0xff] %v9136_v62  ;;  %13444 = vst [vmem:[#allocation14_spill] sm:$0xff] %v9151_v22  ;;  %v9160_v61 = vadd.f32 %v1511_v33, %v13449_v51  ;;  %v13451_v60 = vld [vmem:[#allocation45_spill] sm:$0xff]  ;;  %v9173_v28 = vld [vmem:[%s12089_s0 + $0x3f0] sm:$0xff] }
 0x19b   : > { %13446 = vst [vmem:[#allocation53_spill] sm:$0xff] %v9154_v12  ;;  %13448 = vst [vmem:[#allocation57_spill] sm:$0xff] %v9157_v45  ;;  %v9163_v56 = vadd.f32 %v1512_v14, %v13451_v60  ;;  %v9178_v18 = vld [vmem:[%s12089_s0 + $0x3f8] sm:$0xff]  ;;  %v13456_v33 = vld [vmem:[#allocation46_spill] sm:$0xff] }
 0x19c   : > { %13450 = vst [vmem:[#allocation30_spill] sm:$0xff] %v9160_v61  ;;  %13453 = vst [vmem:[#allocation31_spill] sm:$0xff] %v9168_v26  ;;  %v9181_v38 = vadd.f32 %v1513_v57, %v13456_v33  ;;  %v13458_v14 = vld [vmem:[#allocation38_spill] sm:$0xff]  ;;  %v9192_v25 = vld [vmem:[%s12089_s0 + $0x408] sm:$0xff] }
 0x19d   : > { %13452 = vst [vmem:[#allocation32_spill] sm:$0xff] %v9163_v56  ;;  %13454 = vst [vmem:[#allocation37_spill] sm:$0xff] %v9173_v28  ;;  %v9184_v42 = vadd.f32 %v1514_v6, %v13458_v14  ;;  %v13460_v34 = vld [vmem:[#allocation26_spill] sm:$0xff]  ;;  %v9197_v47 = vld [vmem:[%s12089_s0 + $0x410] sm:$0xff] }
 0x19e   : > { %13455 = vst [vmem:[#allocation20_spill] sm:$0xff] %v9178_v18  ;;  %13457 = vst [vmem:[#allocation21_spill] sm:$0xff] %v9181_v38  ;;  %v9187_v58 = vadd.f32 %v1515_v27, %v13460_v34  ;;  %v9202_v44 = vld [vmem:[%s12089_s0 + $0x420] sm:$0xff]  ;;  %v13465_v3 = vld [vmem:[#allocation44_spill] sm:$0xff] }
 0x19f   : > { %13459 = vst [vmem:[#allocation40_spill] sm:$0xff] %v9184_v42  ;;  %13462 = vst [vmem:[#allocation39_spill] sm:$0xff] %v9192_v25  ;;  %v1588_v59 = vmul.f32 %v4838_v52, %v13465_v3  ;;  %v9208_v27 = vld [vmem:[%s12089_s0 + $0x428] sm:$0xff]  ;;  %v9213_v15 = vld [vmem:[%s12089_s0 + $0x438] sm:$0xff]  ;;  %v1589_v6 = vmul.f32 %v4839_v24, %v13465_v3  ;;  %v1590_v52 = vmul.f32 %v9087_v8, %v13465_v3 }
 0x1a0   : > { %13461 = vst [vmem:[#allocation17_spill] sm:$0xff] %v9187_v58  ;;  %13463 = vst [vmem:[#allocation22_spill] sm:$0xff] %v9197_v47  ;;  %v9218_v57 = vld [vmem:[%s12089_s0 + $0x440] sm:$0xff]  ;;  %v1591_v31 = vmul.f32 %v9092_v11, %v13465_v3  ;;  %v1592_v37 = vmul.f32 %v9097_v32, %v13465_v3  ;;  %v9230_v39 = vld [vmem:[%s12089_s0 + $0x450] sm:$0xff]  ;;  %v1593_v51 = vmul.f32 %v9114_v20, %v13465_v3 }
 0x1a1   : > { %13464 = vst [vmem:[#allocation50_spill] sm:$0xff] %v9202_v44  ;;  %13466 = vst [vmem:[#allocation47_spill] sm:$0xff] %v9208_v27  ;;  %v9235_v16 = vld [vmem:[%s12089_s0 + $0x458] sm:$0xff]  ;;  %v9240_v24 = vld [vmem:[%s12089_s0 + $0x468] sm:$0xff]  ;;  %v1594_v60 = vmul.f32 %v9119_v19, %v13465_v3  ;;  %v1595_v33 = vmul.f32 %v9124_v46, %v13465_v3  ;;  %v1596_v14 = vmul.f32 %v9141_v5, %v13465_v3 }
 0x1a2   : > { %13467 = vst [vmem:[#allocation54_spill] sm:$0xff] %v9213_v15  ;;  %13468 = vst [vmem:[#allocation55_spill] sm:$0xff] %v9218_v57  ;;  %v9253_v34 = vld [vmem:[%s12089_s0 + $0x470] sm:$0xff]  ;;  %v9258_v32 = vld [vmem:[%s12089_s0 + $0x480] sm:$0xff]  ;;  %v1597_v46 = vmul.f32 %v9146_v55, %v13465_v3  ;;  %v1598_v5 = vmul.f32 %v9151_v22, %v13465_v3  ;;  %v1599_v20 = vmul.f32 %v9168_v26, %v13465_v3 }
 0x1a3   : > { %13469 = vst [vmem:[#allocation56_spill] sm:$0xff] %v9230_v39  ;;  %13470 = vst [vmem:[#allocation24_spill] sm:$0xff] %v9235_v16  ;;  %v9263_v19 = vld [vmem:[%s12089_s0 + $0x488] sm:$0xff]  ;;  %v1600_v11 = vmul.f32 %v9173_v28, %v13465_v3  ;;  %v9276_v8 = vld [vmem:[%s12089_s0 + $0x498] sm:$0xff]  ;;  %v1601_v26 = vmul.f32 %v9178_v18, %v13465_v3  ;;  %v1602_v28 = vmul.f32 %v9192_v25, %v13465_v3 }
 0x1a4   : > { %13471 = vst [vmem:[#allocation19_spill] sm:$0xff] %v9240_v24  ;;  %13472 = vst [vmem:[#allocation18_spill] sm:$0xff] %v9253_v34  ;;  %v9281_v55 = vld [vmem:[%s12089_s0 + $0x4a0] sm:$0xff]  ;;  %v9286_v22 = vld [vmem:[%s12089_s0 + $0x4b0] sm:$0xff]  ;;  %v1603_v58 = vmul.f32 %v9197_v47, %v13465_v3  ;;  %v1604_v42 = vmul.f32 %v9202_v44, %v13465_v3  ;;  %v1605_v47 = vmul.f32 %v9208_v27, %v13465_v3 }
 0x1a5   : > { %13473 = vst [vmem:[#allocation51_spill] sm:$0xff] %v9258_v32  ;;  %13474 = vst [vmem:[#allocation15_spill] sm:$0xff] %v9263_v19  ;;  %v9299_v38 = vld [vmem:[%s12089_s0 + $0x4b8] sm:$0xff]  ;;  %v9304_v18 = vld [vmem:[%s12089_s0 + $0x4c8] sm:$0xff]  ;;  %v1606_v44 = vmul.f32 %v9213_v15, %v13465_v3  ;;  %v1607_v56 = vmul.f32 %v9218_v57, %v13465_v3  ;;  %v1608_v61 = vmul.f32 %v9230_v39, %v13465_v3 }
 0x1a6   : > { %13475 = vst [vmem:[#allocation16_spill] sm:$0xff] %v9281_v55  ;;  %13476 = vst [vmem:[#allocation49_spill] sm:$0xff] %v9286_v22  ;;  %v9309_v25 = vld [vmem:[%s12089_s0 + $0x4d0] sm:$0xff]  ;;  %v1609_v45 = vmul.f32 %v9235_v16, %v13465_v3  ;;  %v1610_v12 = vmul.f32 %v9240_v24, %v13465_v3  ;;  %v1611_v27 = vmul.f32 %v9253_v34, %v13465_v3 }
 0x1a7   : > { %13477 = vst [vmem:[#allocation41_spill] sm:$0xff] %v9299_v38  ;;  %13478 = vst [vmem:[#allocation23_spill] sm:$0xff] %v9304_v18  ;;  %v1612_v15 = vmul.f32 %v9258_v32, %v13465_v3  ;;  %v1613_v57 = vmul.f32 %v9263_v19, %v13465_v3  ;;  %v1614_v39 = vmul.f32 %v9276_v8, %v13465_v3 }
 0x1a8   : > { %13479 = vst [vmem:[#allocation42_spill] sm:$0xff] %v9309_v25  ;;  %v1615_v16 = vmul.f32 %v9281_v55, %v13465_v3  ;;  %v1616_v24 = vmul.f32 %v9286_v22, %v13465_v3  ;;  %v1617_v34 = vmul.f32 %v9299_v38, %v13465_v3  ;;  %v1618_v32 = vmul.f32 %v9304_v18, %v13465_v3 }
 0x1a9   : > { %v1619_v62 = vmul.f32 %v9309_v25, %v13465_v3  ;;  %v9346_v19 = vadd.f32 %v1588_v59, %v9028_v7  ;;  %v9353_v55 = vadd.f32 %v1589_v6, %v9031_v53  ;;  %v9356_v22 = vadd.f32 %v1590_v52, %v9034_v21  ;;  %v13504_v6 = vld [vmem:[#allocation48_spill] sm:$0xff] }
 0x1aa   : > { %v9359_v38 = vadd.f32 %v1591_v31, %v9037_v17  ;;  %v9362_v18 = vadd.f32 %v1592_v37, %v9040_v48  ;;  %v9369_v7 = vadd.f32 %v1593_v51, %v9043_v29  ;;  %v9372_v3 = vadd.f32 %v1594_v60, %v9046_v4  ;;  %v13505_v31 = vld [vmem:[#allocation52_spill] sm:$0xff]  ;;  %v13509_v60 = vld [vmem:[#allocation29_spill] sm:$0xff] }
 0x1ab   : > { %v9375_v53 = vadd.f32 %v1595_v33, %v9049_v30  ;;  %v9378_v21 = vadd.f32 %v1596_v14, %v9052_v10  ;;  %v9381_v17 = vadd.f32 %v1597_v46, %v9055_v43  ;;  %v9384_v48 = vadd.f32 %v1598_v5, %v9058_v13  ;;  %v13510_v14 = vld [vmem:[#allocation14_spill] sm:$0xff] }
 0x1ac   : > { %v9387_v59 = vadd.f32 %v1599_v20, %v9061_v35  ;;  %v9390_v29 = vadd.f32 %v1600_v11, %v9064_v36  ;;  %v9393_v4 = vadd.f32 %v1601_v26, %v9070_v23  ;;  %v9396_v30 = vadd.f32 %v1602_v28, %v9073_v9  ;;  %v13483_v11 = vld [vmem:[#allocation27_spill] sm:$0xff]  ;;  %v13487_v20 = vld [vmem:[#allocation57_spill] sm:$0xff] }
 0x1ad   : > { %v9399_v10 = vadd.f32 %v1603_v58, %v9076_v0  ;;  %v9402_v43 = vadd.f32 %v1604_v42, %v9079_v1  ;;  %v9405_v13 = vadd.f32 %v1605_v47, %v9100_v54  ;;  %v9408_v35 = vadd.f32 %v1606_v44, %v9103_v63  ;;  %v13485_v63 = vld [vmem:[#allocation53_spill] sm:$0xff] }
 0x1ae   : > { %v9411_v36 = vadd.f32 %v1607_v56, %v9106_v41  ;;  %v9414_v23 = vadd.f32 %v1608_v61, %v9109_v49  ;;  %v9417_v9 = vadd.f32 %v1609_v45, %v9127_v40  ;;  %v9420_v0 = vadd.f32 %v1610_v12, %v9130_v50  ;;  %v13489_v49 = vld [vmem:[#allocation30_spill] sm:$0xff]  ;;  %v13491_v40 = vld [vmem:[#allocation32_spill] sm:$0xff]  ;;  %v13493_v50 = vld [vmem:[#allocation21_spill] sm:$0xff] }
 0x1af   : > { %v9423_v1 = vadd.f32 %v1611_v27, %v9133_v2  ;;  %v9426_v54 = vadd.f32 %v1612_v15, %v13483_v11  ;;  %v9429_v41 = vadd.f32 %v1613_v57, %v13485_v63  ;;  %v9432_v46 = vadd.f32 %v1614_v39, %v13487_v20  ;;  %v13495_v2 = vld [vmem:[#allocation40_spill] sm:$0xff]  ;;  %v13497_v56 = vld [vmem:[#allocation17_spill] sm:$0xff]  ;;  %v13503_v15 = vld [vmem:[#allocation34_spill] sm:$0xff] }
 0x1b0   : > { %13480 = vst [vmem:[#allocation36_spill] sm:$0xff] %v9417_v9  ;;  %13481 = vst [vmem:[#allocation25_spill] sm:$0xff] %v9420_v0  ;;  %v9435_v5 = vadd.f32 %v1615_v16, %v13489_v49  ;;  %v9438_v45 = vadd.f32 %v1616_v24, %v13491_v40  ;;  %v9441_v12 = vadd.f32 %v1617_v34, %v13493_v50  ;;  %v1654_v28 = vstv %s9348_s19  ;;  %v13499_v42 = vld [vmem:[#allocation33_spill] sm:$0xff]  ;;  %v13507_v16 = vld [vmem:[#allocation35_spill] sm:$0xff]  ;;  %s10158_s19 = sld [smem:[#allocation4 + %s2059_s15]] }
 0x1b1   : > { %13482 = vst [vmem:[#allocation45_spill] sm:$0xff] %v9423_v1  ;;  %13484 = vst [vmem:[#allocation46_spill] sm:$0xff] %v9426_v54  ;;  %v9444_v61 = vadd.f32 %v1618_v32, %v13495_v2  ;;  %v9447_v26 = vadd.f32 %v1619_v62, %v13497_v56  ;;  %v1655_v58 = vmul.f32 %v13499_v42, %v1654_v28  ;;  %v9452_v47 = vstv %s9350_s20  ;;  %v13506_v32 = vld [vmem:[#allocation43_spill] sm:$0xff]  ;;  %v13508_v24 = vld [vmem:[#allocation28_spill] sm:$0xff]  ;;  %s10172_s20 = sld [smem:[#allocation4 + %s2126_s22]] }
 0x1b2   : > { %13486 = vst [vmem:[#allocation38_spill] sm:$0xff] %v9429_v41  ;;  %13488 = vst [vmem:[#allocation26_spill] sm:$0xff] %v9432_v46  ;;  %v9455_v44 = vstv %s9364_s21  ;;  %v9458_v27 = vstv %s9366_s23  ;;  %v1656_v57 = vmul.f32 %v13503_v15, %v1654_v28  ;;  %v1657_v52 = vmul.f32 %v13504_v6, %v1654_v28  ;;  %v13511_v11 = vld [vmem:[#allocation31_spill] sm:$0xff]  ;;  %v13512_v20 = vld [vmem:[#allocation37_spill] sm:$0xff]  ;;  %s10174_s21 = sld [smem:[#allocation4 + %s2193_s25]] }
 0x1b3   : > { %13490 = vst [vmem:[#allocation44_spill] sm:$0xff] %v9435_v5  ;;  %13492 = vst [vmem:[#allocation27_spill] sm:$0xff] %v9438_v45  ;;  %v1658_v37 = vmul.f32 %v13505_v31, %v1654_v28  ;;  %v1659_v39 = vmul.f32 %v13506_v32, %v1654_v28  ;;  %v1660_v62 = vmul.f32 %v13507_v16, %v1654_v28  ;;  %v13513_v40 = vld [vmem:[#allocation20_spill] sm:$0xff]  ;;  %v13514_v2 = vld [vmem:[#allocation39_spill] sm:$0xff] }
 0x1b4   : > { %13494 = vst [vmem:[#allocation53_spill] sm:$0xff] %v9441_v12  ;;  %13496 = vst [vmem:[#allocation57_spill] sm:$0xff] %v9444_v61  ;;  %v1661_v51 = vmul.f32 %v13508_v24, %v1654_v28  ;;  %v1662_v33 = vmul.f32 %v13509_v60, %v1654_v28  ;;  %v1663_v34 = vmul.f32 %v13510_v14, %v1654_v28  ;;  %v13515_v42 = vld [vmem:[#allocation22_spill] sm:$0xff]  ;;  %v13517_v32 = vld [vmem:[#allocation47_spill] sm:$0xff] }
 0x1b5   : > { %13498 = vst [vmem:[#allocation30_spill] sm:$0xff] %v9447_v26  ;;  %13500 = vst [vmem:[#allocation32_spill] sm:$0xff] %v9452_v47  ;;  %v1664_v63 = vmul.f32 %v13511_v11, %v1654_v28  ;;  %v1665_v49 = vmul.f32 %v13512_v20, %v1654_v28  ;;  %v1666_v50 = vmul.f32 %v13513_v40, %v1654_v28  ;;  %v13518_v31 = vld [vmem:[#allocation54_spill] sm:$0xff]  ;;  %v9484_v20 = vld [vmem:[%s12089_s0 + $0x4e8] sm:$0xff] }
 0x1b6   : > { %13501 = vst [vmem:[#allocation21_spill] sm:$0xff] %v9455_v44  ;;  %13502 = vst [vmem:[#allocation40_spill] sm:$0xff] %v9458_v27  ;;  %v1667_v56 = vmul.f32 %v13514_v2, %v1654_v28  ;;  %v1668_v15 = vmul.f32 %v13515_v42, %v1654_v28  ;;  %v13516_v27 = vld [vmem:[#allocation50_spill] sm:$0xff]  ;;  %v1670_v16 = vmul.f32 %v13517_v32, %v1654_v28  ;;  %v13519_v40 = vld [vmem:[#allocation55_spill] sm:$0xff] }
 0x1b7   : > { %v1669_v44 = vmul.f32 %v13516_v27, %v1654_v28  ;;  %v1671_v24 = vmul.f32 %v13518_v31, %v1654_v28  ;;  %v9479_v14 = vld [vmem:[%s12089_s0 + $0x4e0] sm:$0xff]  ;;  %v1672_v2 = vmul.f32 %v13519_v40, %v1654_v28  ;;  %v13520_v11 = vld [vmem:[#allocation56_spill] sm:$0xff]  ;;  %v13522_v6 = vld [vmem:[#allocation19_spill] sm:$0xff]  ;;  %v1679_v5 = vmul.f32 %v9276_v8, %v1654_v28 }
 0x1b8   : > { %v1673_v42 = vmul.f32 %v13520_v11, %v1654_v28  ;;  %v13521_v60 = vld [vmem:[#allocation24_spill] sm:$0xff]  ;;  %v1675_v32 = vmul.f32 %v13522_v6, %v1654_v28  ;;  %v13523_v47 = vld [vmem:[#allocation18_spill] sm:$0xff]  ;;  %v13524_v26 = vld [vmem:[#allocation51_spill] sm:$0xff]  ;;  %v1685_v6 = vmul.f32 %v9479_v14, %v1654_v28 }
 0x1b9   : > { %v1674_v27 = vmul.f32 %v13521_v60, %v1654_v28  ;;  %v1676_v31 = vmul.f32 %v13523_v47, %v1654_v28  ;;  %v1677_v61 = vmul.f32 %v13524_v26, %v1654_v28  ;;  %v13525_v12 = vld [vmem:[#allocation15_spill] sm:$0xff]  ;;  %v13526_v46 = vld [vmem:[#allocation16_spill] sm:$0xff]  ;;  %v13527_v54 = vld [vmem:[#allocation49_spill] sm:$0xff]  ;;  %v1684_v60 = vmul.f32 %v9309_v25, %v1654_v28 }
 0x1ba   : > { %v1678_v45 = vmul.f32 %v13525_v12, %v1654_v28  ;;  %v1680_v41 = vmul.f32 %v13526_v46, %v1654_v28  ;;  %v1681_v1 = vmul.f32 %v13527_v54, %v1654_v28  ;;  %v13528_v0 = vld [vmem:[#allocation41_spill] sm:$0xff]  ;;  %v13529_v9 = vld [vmem:[#allocation23_spill] sm:$0xff]  ;;  %v1686_v47 = vmul.f32 %v9484_v20, %v1654_v28 }
 0x1bb   : > { %v1682_v40 = vmul.f32 %v13528_v0, %v1654_v28  ;;  %v1683_v11 = vmul.f32 %v13529_v9, %v1654_v28  ;;  %v9502_v26 = vadd.f32 %v1655_v58, %v9346_v19  ;;  %v9505_v12 = vadd.f32 %v1656_v57, %v9353_v55 }
 0x1bc   : > { %v9508_v46 = vadd.f32 %v1657_v52, %v9356_v22  ;;  %v9511_v54 = vadd.f32 %v1658_v37, %v9359_v38  ;;  %v9514_v9 = vadd.f32 %v1659_v39, %v9362_v18  ;;  %v9517_v25 = vadd.f32 %v1660_v62, %v9369_v7 }
 0x1bd   : > { %v9520_v28 = vadd.f32 %v1661_v51, %v9372_v3  ;;  %v9523_v19 = vadd.f32 %v1662_v33, %v9375_v53  ;;  %v9526_v55 = vadd.f32 %v1663_v34, %v9378_v21  ;;  %v9529_v22 = vadd.f32 %v1664_v63, %v9381_v17  ;;  %v13551_v51 = vld [vmem:[#allocation48_spill] sm:$0xff]  ;;  %v13553_v63 = vld [vmem:[#allocation43_spill] sm:$0xff] }
 0x1be   : > { %v9532_v38 = vadd.f32 %v1665_v49, %v9384_v48  ;;  %v9535_v18 = vadd.f32 %v1666_v50, %v9387_v59  ;;  %v9538_v7 = vadd.f32 %v1667_v56, %v9390_v29  ;;  %v9541_v3 = vadd.f32 %v1668_v15, %v9393_v4 }
 0x1bf   : > { %v9544_v53 = vadd.f32 %v1669_v44, %v9396_v30  ;;  %v9547_v21 = vadd.f32 %v1670_v16, %v9399_v10  ;;  %v9550_v17 = vadd.f32 %v1671_v24, %v9402_v43  ;;  %v9553_v48 = vadd.f32 %v1672_v2, %v9405_v13  ;;  %v13530_v30 = vld [vmem:[#allocation36_spill] sm:$0xff]  ;;  %v13531_v10 = vld [vmem:[#allocation25_spill] sm:$0xff]  ;;  %v13534_v13 = vld [vmem:[#allocation46_spill] sm:$0xff] }
 0x1c0   : > { %v9556_v59 = vadd.f32 %v1673_v42, %v9408_v35  ;;  %v9559_v29 = vadd.f32 %v1674_v27, %v9411_v36  ;;  %v9562_v4 = vadd.f32 %v1675_v32, %v9414_v23  ;;  %v9565_v58 = vadd.f32 %v1676_v31, %v13530_v30  ;;  %v13532_v43 = vld [vmem:[#allocation45_spill] sm:$0xff]  ;;  %v13536_v35 = vld [vmem:[#allocation38_spill] sm:$0xff]  ;;  %v13540_v23 = vld [vmem:[#allocation44_spill] sm:$0xff] }
 0x1c1   : > { %v9568_v44 = vadd.f32 %v1677_v61, %v13531_v10  ;;  %v9571_v57 = vadd.f32 %v1678_v45, %v13532_v43  ;;  %v9574_v52 = vadd.f32 %v1679_v5, %v13534_v13  ;;  %v9577_v37 = vadd.f32 %v1680_v41, %v13536_v35  ;;  %v13538_v36 = vld [vmem:[#allocation26_spill] sm:$0xff]  ;;  %v13542_v31 = vld [vmem:[#allocation27_spill] sm:$0xff]  ;;  %v13544_v61 = vld [vmem:[#allocation53_spill] sm:$0xff] }
 0x1c2   : > { %v9580_v27 = vadd.f32 %v1681_v1, %v13538_v36  ;;  %v9583_v32 = vadd.f32 %v1682_v40, %v13540_v23  ;;  %v9586_v39 = vadd.f32 %v1683_v11, %v13542_v31  ;;  %v9589_v16 = vadd.f32 %v1684_v60, %v13544_v61  ;;  %v13546_v45 = vld [vmem:[#allocation57_spill] sm:$0xff]  ;;  %v13548_v5 = vld [vmem:[#allocation30_spill] sm:$0xff]  ;;  %v13550_v41 = vld [vmem:[#allocation32_spill] sm:$0xff] }
 0x1c3   : > { %13533 = vst [vmem:[#allocation17_spill] sm:$0xff] %v9571_v57  ;;  %13535 = vst [vmem:[#allocation33_spill] sm:$0xff] %v9574_v52  ;;  %v9592_v62 = vadd.f32 %v1685_v6, %v13546_v45  ;;  %v9595_v24 = vadd.f32 %v1686_v47, %v13548_v5  ;;  %v1722_v33 = vmul.f32 %v13551_v51, %v13550_v41  ;;  %v13552_v1 = vld [vmem:[#allocation52_spill] sm:$0xff]  ;;  %v13554_v11 = vld [vmem:[#allocation35_spill] sm:$0xff] }
 0x1c4   : > { %13537 = vst [vmem:[#allocation34_spill] sm:$0xff] %v9577_v37  ;;  %13539 = vst [vmem:[#allocation41_spill] sm:$0xff] %v9580_v27  ;;  %v1723_v34 = vmul.f32 %v13552_v1, %v13550_v41  ;;  %v1724_v49 = vmul.f32 %v13553_v63, %v13550_v41  ;;  %v1725_v40 = vmul.f32 %v13554_v11, %v13550_v41  ;;  %v13555_v60 = vld [vmem:[#allocation28_spill] sm:$0xff]  ;;  %v13556_v6 = vld [vmem:[#allocation29_spill] sm:$0xff] }
 0x1c5   : > { %13541 = vst [vmem:[#allocation36_spill] sm:$0xff] %v9583_v32  ;;  %13543 = vst [vmem:[#allocation25_spill] sm:$0xff] %v9586_v39  ;;  %v1726_v50 = vmul.f32 %v13555_v60, %v13550_v41  ;;  %v1727_v2 = vmul.f32 %v13556_v6, %v13550_v41  ;;  %v13557_v47 = vld [vmem:[#allocation14_spill] sm:$0xff]  ;;  %v13558_v42 = vld [vmem:[#allocation31_spill] sm:$0xff] }
 0x1c6   : > { %13545 = vst [vmem:[#allocation45_spill] sm:$0xff] %v9589_v16  ;;  %13547 = vst [vmem:[#allocation46_spill] sm:$0xff] %v9592_v62  ;;  %v1728_v56 = vmul.f32 %v13557_v47, %v13550_v41  ;;  %v1729_v15 = vmul.f32 %v13558_v42, %v13550_v41  ;;  %v13559_v30 = vld [vmem:[#allocation37_spill] sm:$0xff]  ;;  %v13560_v43 = vld [vmem:[#allocation20_spill] sm:$0xff]  ;;  %v1744_v16 = vmul.f32 %v9276_v8, %v13550_v41 }
 0x1c7   : > { %13549 = vst [vmem:[#allocation38_spill] sm:$0xff] %v9595_v24  ;;  %v1730_v10 = vmul.f32 %v13559_v30, %v13550_v41  ;;  %v1731_v13 = vmul.f32 %v13560_v43, %v13550_v41  ;;  %v13561_v35 = vld [vmem:[#allocation39_spill] sm:$0xff]  ;;  %v13562_v23 = vld [vmem:[#allocation22_spill] sm:$0xff]  ;;  %v13567_v6 = vld [vmem:[#allocation56_spill] sm:$0xff]  ;;  %v1751_v8 = vmul.f32 %v9484_v20, %v13550_v41  ;;  %v9681_v20 = vadd.f32 %v1727_v2, %v9517_v25 }
 0x1c8   : > { %v1732_v36 = vmul.f32 %v13561_v35, %v13550_v41  ;;  %v1733_v31 = vmul.f32 %v13562_v23, %v13550_v41  ;;  %v13563_v61 = vld [vmem:[#allocation50_spill] sm:$0xff]  ;;  %v13564_v5 = vld [vmem:[#allocation47_spill] sm:$0xff]  ;;  %v1738_v47 = vmul.f32 %v13567_v6, %v13550_v41  ;;  %v4872_v42 = vld [vmem:[%s12089_s0 + $0x4f8] sm:$0xff] }
 0x1c9   : > { %v1734_v45 = vmul.f32 %v13563_v61, %v13550_v41  ;;  %v1735_v51 = vmul.f32 %v13564_v5, %v13550_v41  ;;  %v13565_v1 = vld [vmem:[#allocation54_spill] sm:$0xff]  ;;  %v13566_v11 = vld [vmem:[#allocation55_spill] sm:$0xff]  ;;  %v13568_v43 = vld [vmem:[#allocation24_spill] sm:$0xff] }
 0x1ca   : > { %v1736_v63 = vmul.f32 %v13565_v1, %v13550_v41  ;;  %v1737_v60 = vmul.f32 %v13566_v11, %v13550_v41  ;;  %v4873_v30 = vld [vmem:[%s12089_s0 + $0x500] sm:$0xff]  ;;  %v1739_v35 = vmul.f32 %v13568_v43, %v13550_v41  ;;  %v13569_v23 = vld [vmem:[#allocation19_spill] sm:$0xff]  ;;  %v13573_v39 = vld [vmem:[#allocation16_spill] sm:$0xff] }
 0x1cb   : > { %v1740_v61 = vmul.f32 %v13569_v23, %v13550_v41  ;;  %v13570_v5 = vld [vmem:[#allocation18_spill] sm:$0xff]  ;;  %v13571_v11 = vld [vmem:[#allocation51_spill] sm:$0xff]  ;;  %v1745_v32 = vmul.f32 %v13573_v39, %v13550_v41  ;;  %v13574_v43 = vld [vmem:[#allocation49_spill] sm:$0xff]  ;;  %v1747_v23 = vmul.f32 %v13528_v0, %v13550_v41  ;;  %v1752_v39 = vmul.f32 %v4872_v42, %v13550_v41 }
 0x1cc   : > { %v1741_v1 = vmul.f32 %v13570_v5, %v13550_v41  ;;  %v1742_v6 = vmul.f32 %v13571_v11, %v13550_v41  ;;  %v13572_v24 = vld [vmem:[#allocation15_spill] sm:$0xff]  ;;  %v1746_v27 = vmul.f32 %v13574_v43, %v13550_v41  ;;  %v13576_v11 = vld [vmem:[#allocation42_spill] sm:$0xff]  ;;  %v1753_v57 = vmul.f32 %v4873_v30, %v13550_v41  ;;  %v13584_v2 = vld [vmem:[#allocation33_spill] sm:$0xff] }
 0x1cd   : > { %v1743_v62 = vmul.f32 %v13572_v24, %v13550_v41  ;;  %v13575_v5 = vld [vmem:[#allocation23_spill] sm:$0xff]  ;;  %v1749_v52 = vmul.f32 %v13576_v11, %v13550_v41  ;;  %v1750_v24 = vmul.f32 %v9479_v14, %v13550_v41  ;;  %v9666_v43 = vadd.f32 %v1722_v33, %v9502_v26 }
 0x1ce   : > { %v1748_v37 = vmul.f32 %v13575_v5, %v13550_v41  ;;  %v9669_v0 = vadd.f32 %v1723_v34, %v9505_v12  ;;  %v9672_v5 = vadd.f32 %v1724_v49, %v9508_v46  ;;  %v9675_v11 = vadd.f32 %v1725_v40, %v9511_v54  ;;  %v9752_v49 = vld [vmem:[%s12089_s0 + $0x399] sm:$0xff]  ;;  %v9757_v40 = vld [vmem:[%s12089_s0 + $0x3a9] sm:$0xff] }
 0x1cf   : > { %v9678_v14 = vadd.f32 %v1726_v50, %v9514_v9  ;;  %v9684_v41 = vadd.f32 %v1728_v56, %v9520_v28  ;;  %v9687_v26 = vadd.f32 %v1729_v15, %v9523_v19  ;;  %v9690_v12 = vadd.f32 %v1730_v10, %v9526_v55  ;;  %v4874_v28 = vld [vmem:[%s12089_s0 + $0x361] sm:$0xff]  ;;  %13580 = vst [vmem:[#allocation53_spill] sm:$0xff] %v9752_v49  ;;  %v9784_v10 = vld [vmem:[%s12089_s0 + $0x3c9] sm:$0xff] }
 0x1d0   : > { %v9693_v46 = vadd.f32 %v1731_v13, %v9529_v22  ;;  %v9696_v54 = vadd.f32 %v1732_v36, %v9532_v38  ;;  %v9699_v9 = vadd.f32 %v1733_v31, %v9535_v18  ;;  %v9702_v25 = vadd.f32 %v1734_v45, %v9538_v7  ;;  %v4875_v18 = vld [vmem:[%s12089_s0 + $0x369] sm:$0xff]  ;;  %v9725_v7 = vld [vmem:[%s12089_s0 + $0x379] sm:$0xff]  ;;  %13581 = vst [vmem:[#allocation57_spill] sm:$0xff] %v9757_v40  ;;  %v9779_v15 = vld [vmem:[%s12089_s0 + $0x3c1] sm:$0xff] }
 0x1d1   : > { %v9708_v19 = vadd.f32 %v1735_v51, %v9541_v3  ;;  %v9711_v55 = vadd.f32 %v1736_v63, %v9544_v53  ;;  %v9714_v22 = vadd.f32 %v1737_v60, %v9547_v21  ;;  %v9717_v38 = vadd.f32 %v1738_v47, %v9550_v17  ;;  %13577 = vst [vmem:[#allocation26_spill] sm:$0xff] %v9725_v7  ;;  %v9730_v3 = vld [vmem:[%s12089_s0 + $0x381] sm:$0xff]  ;;  %v9735_v53 = vld [vmem:[%s12089_s0 + $0x391] sm:$0xff] }
 0x1d2   : > { %13578 = vst [vmem:[#allocation44_spill] sm:$0xff] %v9730_v3  ;;  %13579 = vst [vmem:[#allocation27_spill] sm:$0xff] %v9735_v53  ;;  %v9738_v21 = vadd.f32 %v1739_v35, %v9553_v48  ;;  %v9741_v17 = vadd.f32 %v1740_v61, %v9556_v59  ;;  %v9744_v33 = vadd.f32 %v1741_v1, %v9559_v29  ;;  %v9762_v48 = vld [vmem:[%s12089_s0 + $0x3b1] sm:$0xff]  ;;  %v9806_v45 = vld [vmem:[%s12089_s0 + $0x3e1] sm:$0xff] }
 0x1d3   : > { %v9747_v34 = vadd.f32 %v1742_v6, %v9562_v4  ;;  %13582 = vst [vmem:[#allocation30_spill] sm:$0xff] %v9762_v48  ;;  %v9765_v59 = vadd.f32 %v1743_v62, %v9565_v58  ;;  %v9768_v29 = vadd.f32 %v1744_v16, %v9568_v44  ;;  %v13583_v4 = vld [vmem:[#allocation17_spill] sm:$0xff]  ;;  %v9774_v56 = vadd.f32 %v1746_v27, %v13584_v2  ;;  %v13589_v44 = vld [vmem:[#allocation34_spill] sm:$0xff]  ;;  %v13593_v62 = vld [vmem:[#allocation36_spill] sm:$0xff] }
 0x1d4   : > { %v9771_v50 = vadd.f32 %v1745_v32, %v13583_v4  ;;  %13586 = vst [vmem:[#allocation48_spill] sm:$0xff] %v9779_v15  ;;  %13587 = vst [vmem:[#allocation52_spill] sm:$0xff] %v9784_v10  ;;  %v9789_v58 = vld [vmem:[%s12089_s0 + $0x3d9] sm:$0xff]  ;;  %v9792_v32 = vadd.f32 %v1747_v23, %v13589_v44  ;;  %v9798_v13 = vadd.f32 %v1749_v52, %v13593_v62  ;;  %v9811_v51 = vld [vmem:[%s12089_s0 + $0x3f1] sm:$0xff] }
 0x1d5   : > { %13585 = vst [vmem:[#allocation32_spill] sm:$0xff] %v9774_v56  ;;  %13588 = vst [vmem:[#allocation43_spill] sm:$0xff] %v9789_v58  ;;  %v13591_v27 = vld [vmem:[#allocation41_spill] sm:$0xff]  ;;  %v13602_v60 = vld [vmem:[#allocation46_spill] sm:$0xff] }
 0x1d6   : > { %13590 = vst [vmem:[#allocation35_spill] sm:$0xff] %v9792_v32  ;;  %v9795_v16 = vadd.f32 %v1748_v37, %v13591_v27  ;;  %13594 = vst [vmem:[#allocation29_spill] sm:$0xff] %v9798_v13  ;;  %v13595_v36 = vld [vmem:[#allocation25_spill] sm:$0xff]  ;;  %v9822_v47 = vadd.f32 %v1752_v39, %v13602_v60  ;;  %v13604_v42 = vld [vmem:[#allocation38_spill] sm:$0xff] }
 0x1d7   : > { %v9801_v31 = vadd.f32 %v1750_v24, %v13595_v36  ;;  %13597 = vst [vmem:[#allocation31_spill] sm:$0xff] %v9806_v45  ;;  %13598 = vst [vmem:[#allocation37_spill] sm:$0xff] %v9811_v51  ;;  %v9816_v37 = vld [vmem:[%s12089_s0 + $0x3f9] sm:$0xff]  ;;  %v9825_v30 = vadd.f32 %v1753_v57, %v13604_v42  ;;  %v9830_v35 = vld [vmem:[%s12089_s0 + $0x409] sm:$0xff] }
 0x1d8   : > { %13592 = vst [vmem:[#allocation28_spill] sm:$0xff] %v9795_v16  ;;  %13599 = vst [vmem:[#allocation20_spill] sm:$0xff] %v9816_v37  ;;  %v13600_v52 = vld [vmem:[#allocation45_spill] sm:$0xff]  ;;  %v9840_v1 = vld [vmem:[%s12089_s0 + $0x421] sm:$0xff] }
 0x1d9   : > { %13596 = vst [vmem:[#allocation14_spill] sm:$0xff] %v9801_v31  ;;  %v9819_v63 = vadd.f32 %v1751_v8, %v13600_v52  ;;  %13603 = vst [vmem:[#allocation22_spill] sm:$0xff] %v9822_v47  ;;  %v9835_v61 = vld [vmem:[%s12089_s0 + $0x411] sm:$0xff]  ;;  %v9846_v57 = vld [vmem:[%s12089_s0 + $0x429] sm:$0xff] }
 0x1da   : > { %13605 = vst [vmem:[#allocation50_spill] sm:$0xff] %v9825_v30  ;;  %13606 = vst [vmem:[#allocation47_spill] sm:$0xff] %v9830_v35  ;;  %v13609_v6 = vld [vmem:[#allocation21_spill] sm:$0xff]  ;;  %v9856_v8 = vld [vmem:[%s12089_s0 + $0x441] sm:$0xff] }
 0x1db   : > { %13601 = vst [vmem:[#allocation39_spill] sm:$0xff] %v9819_v63  ;;  %13607 = vst [vmem:[#allocation54_spill] sm:$0xff] %v9835_v61  ;;  %v1825_v23 = vmul.f32 %v4874_v28, %v13609_v6  ;;  %v9851_v24 = vld [vmem:[%s12089_s0 + $0x439] sm:$0xff]  ;;  %v1826_v39 = vmul.f32 %v4875_v18, %v13609_v6  ;;  %v1827_v28 = vmul.f32 %v9725_v7, %v13609_v6  ;;  %v9868_v44 = vld [vmem:[%s12089_s0 + $0x451] sm:$0xff] }
 0x1dc   : > { %13608 = vst [vmem:[#allocation55_spill] sm:$0xff] %v9840_v1  ;;  %13610 = vst [vmem:[#allocation56_spill] sm:$0xff] %v9846_v57  ;;  %v1828_v4 = vmul.f32 %v9730_v3, %v13609_v6  ;;  %v1829_v2 = vmul.f32 %v9735_v53, %v13609_v6  ;;  %v9873_v27 = vld [vmem:[%s12089_s0 + $0x459] sm:$0xff]  ;;  %v9878_v18 = vld [vmem:[%s12089_s0 + $0x469] sm:$0xff]  ;;  %v1830_v62 = vmul.f32 %v9752_v49, %v13609_v6 }
 0x1dd   : > { %13611 = vst [vmem:[#allocation24_spill] sm:$0xff] %v9851_v24  ;;  %13612 = vst [vmem:[#allocation19_spill] sm:$0xff] %v9856_v8  ;;  %v1831_v36 = vmul.f32 %v9757_v40, %v13609_v6  ;;  %v1832_v52 = vmul.f32 %v9762_v48, %v13609_v6  ;;  %v1833_v60 = vmul.f32 %v9779_v15, %v13609_v6  ;;  %v9891_v42 = vld [vmem:[%s12089_s0 + $0x471] sm:$0xff]  ;;  %v9896_v53 = vld [vmem:[%s12089_s0 + $0x481] sm:$0xff] }
 0x1de   : > { %13613 = vst [vmem:[#allocation18_spill] sm:$0xff] %v9868_v44  ;;  %13614 = vst [vmem:[#allocation51_spill] sm:$0xff] %v9873_v27  ;;  %v9901_v40 = vld [vmem:[%s12089_s0 + $0x489] sm:$0xff]  ;;  %v1834_v48 = vmul.f32 %v9784_v10, %v13609_v6  ;;  %v1835_v15 = vmul.f32 %v9789_v58, %v13609_v6  ;;  %v1836_v49 = vmul.f32 %v9806_v45, %v13609_v6  ;;  %v9914_v7 = vld [vmem:[%s12089_s0 + $0x499] sm:$0xff] }
 0x1df   : > { %13615 = vst [vmem:[#allocation15_spill] sm:$0xff] %v9878_v18  ;;  %13616 = vst [vmem:[#allocation16_spill] sm:$0xff] %v9891_v42  ;;  %v1837_v3 = vmul.f32 %v9811_v51, %v13609_v6  ;;  %v9919_v30 = vld [vmem:[%s12089_s0 + $0x4a1] sm:$0xff]  ;;  %v9924_v58 = vld [vmem:[%s12089_s0 + $0x4b1] sm:$0xff]  ;;  %v1838_v45 = vmul.f32 %v9816_v37, %v13609_v6  ;;  %v1839_v51 = vmul.f32 %v9830_v35, %v13609_v6 }
 0x1e0   : > { %13617 = vst [vmem:[#allocation49_spill] sm:$0xff] %v9896_v53  ;;  %13618 = vst [vmem:[#allocation23_spill] sm:$0xff] %v9901_v40  ;;  %v1840_v10 = vmul.f32 %v9835_v61, %v13609_v6  ;;  %v1841_v47 = vmul.f32 %v9840_v1, %v13609_v6  ;;  %v9937_v63 = vld [vmem:[%s12089_s0 + $0x4b9] sm:$0xff]  ;;  %v9942_v31 = vld [vmem:[%s12089_s0 + $0x4c9] sm:$0xff]  ;;  %v1842_v61 = vmul.f32 %v9846_v57, %v13609_v6 }
 0x1e1   : > { %13619 = vst [vmem:[#allocation42_spill] sm:$0xff] %v9914_v7  ;;  %13620 = vst [vmem:[#allocation17_spill] sm:$0xff] %v9919_v30  ;;  %v9947_v35 = vld [vmem:[%s12089_s0 + $0x4d1] sm:$0xff]  ;;  %v1843_v1 = vmul.f32 %v9851_v24, %v13609_v6  ;;  %v1844_v37 = vmul.f32 %v9856_v8, %v13609_v6  ;;  %v1845_v13 = vmul.f32 %v9868_v44, %v13609_v6 }
 0x1e2   : > { %13621 = vst [vmem:[#allocation33_spill] sm:$0xff] %v9924_v58  ;;  %13622 = vst [vmem:[#allocation34_spill] sm:$0xff] %v9937_v63  ;;  %v1846_v16 = vmul.f32 %v9873_v27, %v13609_v6  ;;  %v1847_v32 = vmul.f32 %v9878_v18, %v13609_v6  ;;  %v1848_v56 = vmul.f32 %v9891_v42, %v13609_v6 }
 0x1e3   : > { %13623 = vst [vmem:[#allocation41_spill] sm:$0xff] %v9942_v31  ;;  %13624 = vst [vmem:[#allocation36_spill] sm:$0xff] %v9947_v35  ;;  %v1849_v57 = vmul.f32 %v9896_v53, %v13609_v6  ;;  %v1850_v24 = vmul.f32 %v9901_v40, %v13609_v6  ;;  %v1851_v8 = vmul.f32 %v9914_v7, %v13609_v6 }
 0x1e4   : > { %v1852_v44 = vmul.f32 %v9919_v30, %v13609_v6  ;;  %v1853_v27 = vmul.f32 %v9924_v58, %v13609_v6  ;;  %v1854_v18 = vmul.f32 %v9937_v63, %v13609_v6  ;;  %v1855_v42 = vmul.f32 %v9942_v31, %v13609_v6 }
 0x1e5   : > { %v1856_v53 = vmul.f32 %v9947_v35, %v13609_v6  ;;  %v9980_v40 = vadd.f32 %v1825_v23, %v9666_v43  ;;  %v9983_v7 = vadd.f32 %v1826_v39, %v9669_v0  ;;  %v9986_v30 = vadd.f32 %v1827_v28, %v9672_v5  ;;  %v13647_v28 = vld [vmem:[#allocation30_spill] sm:$0xff] }
 0x1e6   : > { %v9989_v58 = vadd.f32 %v1828_v4, %v9675_v11  ;;  %v9992_v63 = vadd.f32 %v1829_v2, %v9678_v14  ;;  %v9995_v31 = vadd.f32 %v1830_v62, %v9681_v20  ;;  %v9998_v6 = vadd.f32 %v1831_v36, %v9684_v41  ;;  %v13651_v36 = vld [vmem:[#allocation31_spill] sm:$0xff] }
 0x1e7   : > { %v10001_v43 = vadd.f32 %v1832_v52, %v9687_v26  ;;  %v10004_v0 = vadd.f32 %v1833_v60, %v9690_v12  ;;  %v10007_v5 = vadd.f32 %v1834_v48, %v9693_v46  ;;  %v10010_v11 = vadd.f32 %v1835_v15, %v9696_v54  ;;  %v13652_v60 = vld [vmem:[#allocation37_spill] sm:$0xff] }
 0x1e8   : > { %v10013_v14 = vadd.f32 %v1836_v49, %v9699_v9  ;;  %v10016_v20 = vadd.f32 %v1837_v3, %v9702_v25  ;;  %v10019_v41 = vadd.f32 %v1838_v45, %v9708_v19  ;;  %v10022_v26 = vadd.f32 %v1839_v51, %v9711_v55  ;;  %v13625_v3 = vld [vmem:[#allocation32_spill] sm:$0xff]  ;;  %v13642_v51 = vld [vmem:[#allocation26_spill] sm:$0xff] }
 0x1e9   : > { %v10025_v12 = vadd.f32 %v1840_v10, %v9714_v22  ;;  %v10028_v46 = vadd.f32 %v1841_v47, %v9717_v38  ;;  %v10031_v54 = vadd.f32 %v1842_v61, %v9738_v21  ;;  %v10034_v9 = vadd.f32 %v1843_v1, %v9741_v17  ;;  %v13627_v17 = vld [vmem:[#allocation35_spill] sm:$0xff]  ;;  %v13641_v45 = vld [vmem:[#allocation40_spill] sm:$0xff] }
 0x1ea   : > { %v10037_v25 = vadd.f32 %v1844_v37, %v9744_v33  ;;  %v10040_v19 = vadd.f32 %v1845_v13, %v9747_v34  ;;  %v10043_v55 = vadd.f32 %v1846_v16, %v9765_v59  ;;  %v10046_v22 = vadd.f32 %v1847_v32, %v9768_v29  ;;  %v13629_v33 = vld [vmem:[#allocation28_spill] sm:$0xff]  ;;  %v13631_v34 = vld [vmem:[#allocation29_spill] sm:$0xff]  ;;  %v13633_v59 = vld [vmem:[#allocation14_spill] sm:$0xff] }
 0x1eb   : > { %v10049_v38 = vadd.f32 %v1848_v56, %v9771_v50  ;;  %v10052_v21 = vadd.f32 %v1849_v57, %v13625_v3  ;;  %v10055_v49 = vadd.f32 %v1850_v24, %v13627_v17  ;;  %v10058_v48 = vadd.f32 %v1851_v8, %v13629_v33  ;;  %v13635_v29 = vld [vmem:[#allocation39_spill] sm:$0xff]  ;;  %v13637_v50 = vld [vmem:[#allocation22_spill] sm:$0xff]  ;;  %v13643_v47 = vld [vmem:[#allocation44_spill] sm:$0xff] }
 0x1ec   : > { %v10061_v15 = vadd.f32 %v1852_v44, %v13631_v34  ;;  %v10064_v10 = vadd.f32 %v1853_v27, %v13633_v59  ;;  %v10067_v32 = vadd.f32 %v1854_v18, %v13635_v29  ;;  %v10070_v56 = vadd.f32 %v1855_v42, %v13637_v50  ;;  %v13639_v16 = vld [vmem:[#allocation50_spill] sm:$0xff]  ;;  %v13644_v1 = vld [vmem:[#allocation27_spill] sm:$0xff]  ;;  %v13645_v57 = vld [vmem:[#allocation53_spill] sm:$0xff] }
 0x1ed   : > { %13626 = vst [vmem:[#allocation25_spill] sm:$0xff] %v10052_v21  ;;  %13628 = vst [vmem:[#allocation45_spill] sm:$0xff] %v10055_v49  ;;  %v10073_v13 = vadd.f32 %v1856_v53, %v13639_v16  ;;  %v1892_v37 = vmul.f32 %v13642_v51, %v13641_v45  ;;  %v1893_v61 = vmul.f32 %v13643_v47, %v13641_v45  ;;  %v13646_v8 = vld [vmem:[#allocation57_spill] sm:$0xff]  ;;  %v13648_v53 = vld [vmem:[#allocation48_spill] sm:$0xff] }
 0x1ee   : > { %13630 = vst [vmem:[#allocation46_spill] sm:$0xff] %v10058_v48  ;;  %13632 = vst [vmem:[#allocation38_spill] sm:$0xff] %v10061_v15  ;;  %v1894_v23 = vmul.f32 %v13644_v1, %v13641_v45  ;;  %v1895_v24 = vmul.f32 %v13645_v57, %v13641_v45  ;;  %v1896_v39 = vmul.f32 %v13646_v8, %v13641_v45  ;;  %v13649_v44 = vld [vmem:[#allocation52_spill] sm:$0xff]  ;;  %v13650_v18 = vld [vmem:[#allocation43_spill] sm:$0xff] }
 0x1ef   : > { %13634 = vst [vmem:[#allocation21_spill] sm:$0xff] %v10064_v10  ;;  %13636 = vst [vmem:[#allocation32_spill] sm:$0xff] %v10067_v32  ;;  %v1897_v4 = vmul.f32 %v13647_v28, %v13641_v45  ;;  %v1898_v2 = vmul.f32 %v13648_v53, %v13641_v45  ;;  %v1899_v27 = vmul.f32 %v13649_v44, %v13641_v45  ;;  %v13653_v3 = vld [vmem:[#allocation20_spill] sm:$0xff]  ;;  %v13654_v33 = vld [vmem:[#allocation47_spill] sm:$0xff] }
 0x1f0   : > { %13638 = vst [vmem:[#allocation35_spill] sm:$0xff] %v10070_v56  ;;  %13640 = vst [vmem:[#allocation28_spill] sm:$0xff] %v10073_v13  ;;  %v1900_v62 = vmul.f32 %v13650_v18, %v13641_v45  ;;  %v1901_v52 = vmul.f32 %v13651_v36, %v13641_v45  ;;  %v1902_v42 = vmul.f32 %v13652_v60, %v13641_v45  ;;  %v13655_v59 = vld [vmem:[#allocation54_spill] sm:$0xff]  ;;  %v13656_v50 = vld [vmem:[#allocation55_spill] sm:$0xff] }
 0x1f1   : > { %v1903_v17 = vmul.f32 %v13653_v3, %v13641_v45  ;;  %v1904_v34 = vmul.f32 %v13654_v33, %v13641_v45  ;;  %v1905_v29 = vmul.f32 %v13655_v59, %v13641_v45  ;;  %v1906_v16 = vmul.f32 %v13656_v50, %v13641_v45  ;;  %v13657_v51 = vld [vmem:[#allocation56_spill] sm:$0xff]  ;;  %v10112_v3 = vld [vmem:[%s12089_s0 + $0x4e1] sm:$0xff]  ;;  %v13665_v1 = vld [vmem:[#allocation49_spill] sm:$0xff] }
 0x1f2   : > { %v1907_v47 = vmul.f32 %v13657_v51, %v13641_v45  ;;  %v13658_v36 = vld [vmem:[#allocation24_spill] sm:$0xff]  ;;  %13659 = vst [vmem:[#allocation29_spill] sm:$0xff] %v10112_v3  ;;  %v13660_v33 = vld [vmem:[#allocation19_spill] sm:$0xff]  ;;  %v13661_v18 = vld [vmem:[#allocation18_spill] sm:$0xff]  ;;  %v1914_v13 = vmul.f32 %v13665_v1, %v13641_v45 }
 0x1f3   : > { %v1908_v60 = vmul.f32 %v13658_v36, %v13641_v45  ;;  %v10117_v59 = vld [vmem:[%s12089_s0 + $0x4e9] sm:$0xff]  ;;  %v1909_v50 = vmul.f32 %v13660_v33, %v13641_v45  ;;  %v1910_v44 = vmul.f32 %v13661_v18, %v13641_v45  ;;  %v13667_v32 = vld [vmem:[#allocation42_spill] sm:$0xff]  ;;  %v13671_v49 = vld [vmem:[#allocation41_spill] sm:$0xff] }
 0x1f4   : > { %v13662_v51 = vld [vmem:[#allocation51_spill] sm:$0xff]  ;;  %v13664_v8 = vld [vmem:[#allocation16_spill] sm:$0xff]  ;;  %v1916_v18 = vmul.f32 %v13667_v32, %v13641_v45  ;;  %v13670_v48 = vld [vmem:[#allocation34_spill] sm:$0xff]  ;;  %v1920_v1 = vmul.f32 %v13671_v49, %v13641_v45  ;;  %v1922_v32 = vmul.f32 %v10112_v3, %v13641_v45  ;;  %v1923_v21 = vmul.f32 %v10117_v59, %v13641_v45 }
 0x1f5   : > { %v1911_v53 = vmul.f32 %v13662_v51, %v13641_v45  ;;  %v13663_v36 = vld [vmem:[#allocation15_spill] sm:$0xff]  ;;  %v1913_v57 = vmul.f32 %v13664_v8, %v13641_v45  ;;  %v13668_v51 = vld [vmem:[#allocation17_spill] sm:$0xff]  ;;  %v1919_v8 = vmul.f32 %v13670_v48, %v13641_v45  ;;  %v10161_v48 = vadd.f32 %v1893_v61, %v9983_v7 }
 0x1f6   : > { %v1912_v28 = vmul.f32 %v13663_v36, %v13641_v45  ;;  %v13666_v56 = vld [vmem:[#allocation23_spill] sm:$0xff]  ;;  %v1917_v10 = vmul.f32 %v13668_v51, %v13641_v45  ;;  %v13669_v36 = vld [vmem:[#allocation33_spill] sm:$0xff]  ;;  %v10154_v51 = vadd.f32 %v1892_v37, %v9980_v40  ;;  %v10164_v49 = vadd.f32 %v1894_v23, %v9986_v30  ;;  %v13680_v23 = vld [vmem:[#allocation46_spill] sm:$0xff] }
 0x1f7   : > { %v1915_v33 = vmul.f32 %v13666_v56, %v13641_v45  ;;  %v1918_v15 = vmul.f32 %v13669_v36, %v13641_v45  ;;  %v1921_v56 = vmul.f32 %v9947_v35, %v13641_v45  ;;  %v10167_v35 = vadd.f32 %v1895_v24, %v9989_v58  ;;  %v13678_v61 = vld [vmem:[#allocation45_spill] sm:$0xff] }
 0x1f8   : > { %v10170_v3 = vadd.f32 %v1896_v39, %v9992_v63  ;;  %v10177_v40 = vadd.f32 %v1897_v4, %v9995_v31  ;;  %v10180_v45 = vadd.f32 %v1898_v2, %v9998_v6  ;;  %v10183_v7 = vadd.f32 %v1899_v27, %v10001_v43  ;;  %v13690_v4 = vld [vmem:[#allocation28_spill] sm:$0xff]  ;;  %v13692_v2 = vld [vmem:[#allocation27_spill] sm:$0xff] }
 0x1f9   : > { %v10186_v30 = vadd.f32 %v1900_v62, %v10004_v0  ;;  %v10189_v58 = vadd.f32 %v1901_v52, %v10007_v5  ;;  %v10192_v63 = vadd.f32 %v1902_v42, %v10010_v11  ;;  %v10195_v37 = vadd.f32 %v1903_v17, %v10013_v14  ;;  %v13697_v62 = vld [vmem:[#allocation57_spill] sm:$0xff]  ;;  %v13698_v52 = vld [vmem:[#allocation30_spill] sm:$0xff]  ;;  %v13700_v17 = vld [vmem:[#allocation52_spill] sm:$0xff] }
 0x1fa   : > { %v10198_v31 = vadd.f32 %v1904_v34, %v10016_v20  ;;  %v10201_v6 = vadd.f32 %v1905_v29, %v10019_v41  ;;  %v10204_v43 = vadd.f32 %v1906_v16, %v10022_v26  ;;  %v10207_v0 = vadd.f32 %v1907_v47, %v10025_v12  ;;  %v13702_v29 = vld [vmem:[#allocation31_spill] sm:$0xff]  ;;  %v13703_v16 = vld [vmem:[#allocation37_spill] sm:$0xff] }
 0x1fb   : > { %v10210_v5 = vadd.f32 %v1908_v60, %v10028_v46  ;;  %v10213_v11 = vadd.f32 %v1909_v50, %v10031_v54  ;;  %v10216_v14 = vadd.f32 %v1910_v44, %v10034_v9  ;;  %v10219_v20 = vadd.f32 %v1911_v53, %v10037_v25  ;;  %v13676_v54 = vld [vmem:[#allocation25_spill] sm:$0xff] }
 0x1fc   : > { %v10222_v41 = vadd.f32 %v1912_v28, %v10040_v19  ;;  %v10225_v26 = vadd.f32 %v1913_v57, %v10043_v55  ;;  %v10228_v12 = vadd.f32 %v1914_v13, %v10046_v22  ;;  %v10231_v46 = vadd.f32 %v1915_v33, %v10049_v38  ;;  %v13682_v19 = vld [vmem:[#allocation38_spill] sm:$0xff]  ;;  %v13684_v55 = vld [vmem:[#allocation21_spill] sm:$0xff]  ;;  %v13686_v22 = vld [vmem:[#allocation32_spill] sm:$0xff] }
 0x1fd   : > { %v10234_v9 = vadd.f32 %v1916_v18, %v13676_v54  ;;  %v10237_v25 = vadd.f32 %v1917_v10, %v13678_v61  ;;  %v10240_v24 = vadd.f32 %v1918_v15, %v13680_v23  ;;  %v10243_v39 = vadd.f32 %v1919_v8, %v13682_v19  ;;  %v13688_v38 = vld [vmem:[#allocation35_spill] sm:$0xff]  ;;  %v13704_v54 = vld [vmem:[#allocation20_spill] sm:$0xff] }
 0x1fe   : > { %13672 = vst [vmem:[#allocation14_spill] sm:$0xff] %v10222_v41  ;;  %13673 = vst [vmem:[#allocation39_spill] sm:$0xff] %v10225_v26  ;;  %v10246_v57 = vadd.f32 %v1920_v1, %v13684_v55  ;;  %v10249_v13 = vadd.f32 %v1921_v56, %v13686_v22  ;;  %v10252_v28 = vadd.f32 %v1922_v32, %v13688_v38  ;;  %v1958_v10 = vstv %s10156_s16  ;;  %v13696_v1 = vld [vmem:[#allocation53_spill] sm:$0xff]  ;;  %v13699_v32 = vld [vmem:[#allocation48_spill] sm:$0xff] }
 0x1ff   : > { %13674 = vst [vmem:[#allocation22_spill] sm:$0xff] %v10228_v12  ;;  %13675 = vst [vmem:[#allocation50_spill] sm:$0xff] %v10231_v46  ;;  %v10255_v53 = vadd.f32 %v1923_v21, %v13690_v4  ;;  %v1959_v44 = vmul.f32 %v13692_v2, %v1958_v10  ;;  %v10260_v15 = vstv %s10158_s19  ;;  %v10263_v27 = vstv %s10172_s20  ;;  %v13701_v33 = vld [vmem:[#allocation43_spill] sm:$0xff]  ;;  %v13706_v55 = vld [vmem:[#allocation54_spill] sm:$0xff] }
 0x200   : > { %13677 = vst [vmem:[#allocation40_spill] sm:$0xff] %v10234_v9  ;;  %13679 = vst [vmem:[#allocation26_spill] sm:$0xff] %v10237_v25  ;;  %v10266_v8 = vstv %s10174_s21  ;;  %v1960_v18 = vmul.f32 %v13696_v1, %v1958_v10  ;;  %v1961_v56 = vmul.f32 %v13697_v62, %v1958_v10  ;;  %v1962_v60 = vmul.f32 %v13698_v52, %v1958_v10  ;;  %v13705_v23 = vld [vmem:[#allocation47_spill] sm:$0xff]  ;;  %v13708_v2 = vld [vmem:[#allocation56_spill] sm:$0xff] }
 0x201   : > { %13681 = vst [vmem:[#allocation44_spill] sm:$0xff] %v10240_v24  ;;  %13683 = vst [vmem:[#allocation33_spill] sm:$0xff] %v10243_v39  ;;  %v1963_v42 = vmul.f32 %v13699_v32, %v1958_v10  ;;  %v1964_v21 = vmul.f32 %v13700_v17, %v1958_v10  ;;  %v1965_v34 = vmul.f32 %v13701_v33, %v1958_v10  ;;  %v13707_v38 = vld [vmem:[#allocation55_spill] sm:$0xff]  ;;  %v13709_v62 = vld [vmem:[#allocation24_spill] sm:$0xff] }
 0x202   : > { %13685 = vst [vmem:[#allocation25_spill] sm:$0xff] %v10246_v57  ;;  %13687 = vst [vmem:[#allocation45_spill] sm:$0xff] %v10249_v13  ;;  %v1966_v50 = vmul.f32 %v13702_v29, %v1958_v10  ;;  %v1967_v47 = vmul.f32 %v13703_v16, %v1958_v10  ;;  %v1968_v61 = vmul.f32 %v13704_v54, %v1958_v10  ;;  %v13710_v32 = vld [vmem:[#allocation19_spill] sm:$0xff]  ;;  %v4908_v29 = vld [vmem:[%s12089_s0 + $0x4f9] sm:$0xff] }
 0x203   : > { %13689 = vst [vmem:[#allocation46_spill] sm:$0xff] %v10252_v28  ;;  %13691 = vst [vmem:[#allocation38_spill] sm:$0xff] %v10255_v53  ;;  %v1969_v19 = vmul.f32 %v13705_v23, %v1958_v10  ;;  %v1970_v22 = vmul.f32 %v13706_v55, %v1958_v10  ;;  %v1971_v4 = vmul.f32 %v13707_v38, %v1958_v10  ;;  %v4909_v16 = vld [vmem:[%s12089_s0 + $0x501] sm:$0xff]  ;;  %v13718_v13 = vld [vmem:[#allocation17_spill] sm:$0xff] }
 0x204   : > { %13693 = vst [vmem:[#allocation21_spill] sm:$0xff] %v10260_v15  ;;  %13694 = vst [vmem:[#allocation32_spill] sm:$0xff] %v10263_v27  ;;  %v1972_v1 = vmul.f32 %v13708_v2, %v1958_v10  ;;  %v1973_v52 = vmul.f32 %v13709_v62, %v1958_v10  ;;  %v1974_v17 = vmul.f32 %v13710_v32, %v1958_v10  ;;  %v13712_v54 = vld [vmem:[#allocation51_spill] sm:$0xff]  ;;  %v13714_v27 = vld [vmem:[#allocation16_spill] sm:$0xff] }
 0x205   : > { %13695 = vst [vmem:[#allocation35_spill] sm:$0xff] %v10266_v8  ;;  %v13711_v8 = vld [vmem:[#allocation18_spill] sm:$0xff]  ;;  %v1976_v23 = vmul.f32 %v13712_v54, %v1958_v10  ;;  %v13713_v55 = vld [vmem:[#allocation15_spill] sm:$0xff]  ;;  %v1978_v2 = vmul.f32 %v13714_v27, %v1958_v10  ;;  %v13715_v15 = vld [vmem:[#allocation49_spill] sm:$0xff]  ;;  %v1982_v57 = vmul.f32 %v13718_v13, %v1958_v10  ;;  %v1983_v39 = vmul.f32 %v13669_v36, %v1958_v10 }
 0x206   : > { %v1975_v33 = vmul.f32 %v13711_v8, %v1958_v10  ;;  %v1977_v38 = vmul.f32 %v13713_v55, %v1958_v10  ;;  %v1979_v62 = vmul.f32 %v13715_v15, %v1958_v10  ;;  %v13716_v53 = vld [vmem:[#allocation23_spill] sm:$0xff]  ;;  %v13717_v28 = vld [vmem:[#allocation42_spill] sm:$0xff]  ;;  %v13720_v9 = vld [vmem:[#allocation41_spill] sm:$0xff]  ;;  %v1988_v27 = vmul.f32 %v10117_v59, %v1958_v10 }
 0x207   : > { %v1980_v32 = vmul.f32 %v13716_v53, %v1958_v10  ;;  %v1981_v8 = vmul.f32 %v13717_v28, %v1958_v10  ;;  %v13719_v24 = vld [vmem:[#allocation34_spill] sm:$0xff]  ;;  %v1985_v46 = vmul.f32 %v13720_v9, %v1958_v10  ;;  %v13721_v12 = vld [vmem:[#allocation36_spill] sm:$0xff]  ;;  %v13722_v26 = vld [vmem:[#allocation29_spill] sm:$0xff]  ;;  %v1989_v41 = vmul.f32 %v4908_v29, %v1958_v10 }
 0x208   : > { %v1984_v25 = vmul.f32 %v13719_v24, %v1958_v10  ;;  %v1986_v54 = vmul.f32 %v13721_v12, %v1958_v10  ;;  %v1987_v55 = vmul.f32 %v13722_v26, %v1958_v10  ;;  %v1990_v15 = vmul.f32 %v4909_v16, %v1958_v10  ;;  %v13726_v13 = vld [vmem:[#allocation14_spill] sm:$0xff]  ;;  %v10449_v16 = vld [vmem:[%s12089_s0 + $0x3f2] sm:$0xff] }
 0x209   : > { %v10304_v53 = vadd.f32 %v1959_v44, %v10154_v51  ;;  %v10307_v28 = vadd.f32 %v1960_v18, %v10161_v48  ;;  %v10310_v36 = vadd.f32 %v1961_v56, %v10164_v49  ;;  %v10313_v24 = vadd.f32 %v1962_v60, %v10167_v35  ;;  %v10390_v44 = vld [vmem:[%s12089_s0 + $0x39a] sm:$0xff]  ;;  %v10395_v18 = vld [vmem:[%s12089_s0 + $0x3aa] sm:$0xff]  ;;  %v10444_v29 = vld [vmem:[%s12089_s0 + $0x3e2] sm:$0xff]  ;;  %13747 = vst [vmem:[#allocation24_spill] sm:$0xff] %v10449_v16 }
 0x20a   : > { %v10316_v12 = vadd.f32 %v1963_v42, %v10170_v3  ;;  %v10319_v26 = vadd.f32 %v1964_v21, %v10177_v40  ;;  %v10322_v59 = vadd.f32 %v1965_v34, %v10180_v45  ;;  %v10325_v51 = vadd.f32 %v1966_v50, %v10183_v7  ;;  %v4910_v45 = vld [vmem:[%s12089_s0 + $0x362] sm:$0xff]  ;;  %13727 = vst [vmem:[#allocation57_spill] sm:$0xff] %v10390_v44  ;;  %v13733_v34 = vld [vmem:[#allocation40_spill] sm:$0xff] }
 0x20b   : > { %v10328_v48 = vadd.f32 %v1967_v47, %v10186_v30  ;;  %v10331_v49 = vadd.f32 %v1968_v61, %v10189_v58  ;;  %v10334_v35 = vadd.f32 %v1969_v19, %v10192_v63  ;;  %v10337_v3 = vadd.f32 %v1970_v22, %v10195_v37  ;;  %v4911_v37 = vld [vmem:[%s12089_s0 + $0x36a] sm:$0xff]  ;;  %13728 = vst [vmem:[#allocation30_spill] sm:$0xff] %v10395_v18  ;;  %v13731_v56 = vld [vmem:[#allocation22_spill] sm:$0xff] }
 0x20c   : > { %v10340_v40 = vadd.f32 %v1971_v4, %v10198_v31  ;;  %v10346_v7 = vadd.f32 %v1972_v1, %v10201_v6  ;;  %v10349_v30 = vadd.f32 %v1973_v52, %v10204_v43  ;;  %v10352_v58 = vadd.f32 %v1974_v17, %v10207_v0  ;;  %v10363_v31 = vld [vmem:[%s12089_s0 + $0x37a] sm:$0xff]  ;;  %v10368_v6 = vld [vmem:[%s12089_s0 + $0x382] sm:$0xff]  ;;  %v10373_v43 = vld [vmem:[%s12089_s0 + $0x392] sm:$0xff]  ;;  %13746 = vst [vmem:[#allocation56_spill] sm:$0xff] %v10444_v29 }
 0x20d   : > { %v10355_v63 = vadd.f32 %v1975_v33, %v10210_v5  ;;  %13723 = vst [vmem:[#allocation28_spill] sm:$0xff] %v10363_v31  ;;  %13724 = vst [vmem:[#allocation27_spill] sm:$0xff] %v10368_v6  ;;  %v10376_v0 = vadd.f32 %v1976_v23, %v10213_v11  ;;  %v10379_v5 = vadd.f32 %v1977_v38, %v10216_v14  ;;  %v10400_v11 = vld [vmem:[%s12089_s0 + $0x3b2] sm:$0xff]  ;;  %v13730_v14 = vld [vmem:[#allocation39_spill] sm:$0xff] }
 0x20e   : > { %13725 = vst [vmem:[#allocation53_spill] sm:$0xff] %v10373_v43  ;;  %v10382_v9 = vadd.f32 %v1978_v2, %v10219_v20  ;;  %v10385_v10 = vadd.f32 %v1979_v62, %v13726_v13  ;;  %13729 = vst [vmem:[#allocation48_spill] sm:$0xff] %v10400_v11  ;;  %v10403_v20 = vadd.f32 %v1980_v32, %v13730_v14  ;;  %v13732_v42 = vld [vmem:[#allocation50_spill] sm:$0xff]  ;;  %v10422_v61 = vld [vmem:[%s12089_s0 + $0x3ca] sm:$0xff] }
 0x20f   : > { %v10406_v60 = vadd.f32 %v1981_v8, %v13731_v56  ;;  %v10409_v21 = vadd.f32 %v1982_v57, %v13732_v42  ;;  %v10412_v50 = vadd.f32 %v1983_v39, %v13733_v34  ;;  %v10417_v47 = vld [vmem:[%s12089_s0 + $0x3c2] sm:$0xff]  ;;  %13736 = vst [vmem:[#allocation31_spill] sm:$0xff] %v10422_v61  ;;  %v10427_v19 = vld [vmem:[%s12089_s0 + $0x3da] sm:$0xff]  ;;  %v13740_v39 = vld [vmem:[#allocation44_spill] sm:$0xff] }
 0x210   : > { %13735 = vst [vmem:[#allocation43_spill] sm:$0xff] %v10417_v47  ;;  %13737 = vst [vmem:[#allocation37_spill] sm:$0xff] %v10427_v19  ;;  %v13738_v57 = vld [vmem:[#allocation26_spill] sm:$0xff]  ;;  %v10433_v4 = vadd.f32 %v1985_v46, %v13740_v39  ;;  %v13742_v1 = vld [vmem:[#allocation33_spill] sm:$0xff] }
 0x211   : > { %13734 = vst [vmem:[#allocation52_spill] sm:$0xff] %v10412_v50  ;;  %v10430_v22 = vadd.f32 %v1984_v25, %v13738_v57  ;;  %v10436_v52 = vadd.f32 %v1986_v54, %v13742_v1  ;;  %v13744_v17 = vld [vmem:[#allocation25_spill] sm:$0xff]  ;;  %v13751_v38 = vld [vmem:[#allocation46_spill] sm:$0xff]  ;;  %v10468_v8 = vld [vmem:[%s12089_s0 + $0x40a] sm:$0xff] }
 0x212   : > { %13741 = vst [vmem:[#allocation47_spill] sm:$0xff] %v10433_v4  ;;  %v10439_v33 = vadd.f32 %v1987_v55, %v13744_v17  ;;  %v10454_v46 = vld [vmem:[%s12089_s0 + $0x3fa] sm:$0xff]  ;;  %v10460_v2 = vadd.f32 %v1989_v41, %v13751_v38  ;;  %13755 = vst [vmem:[#allocation16_spill] sm:$0xff] %v10468_v8  ;;  %v10473_v54 = vld [vmem:[%s12089_s0 + $0x412] sm:$0xff] }
 0x213   : > { %13739 = vst [vmem:[#allocation20_spill] sm:$0xff] %v10430_v22  ;;  %13743 = vst [vmem:[#allocation54_spill] sm:$0xff] %v10436_v52  ;;  %v13749_v25 = vld [vmem:[#allocation45_spill] sm:$0xff]  ;;  %v13753_v62 = vld [vmem:[#allocation38_spill] sm:$0xff] }
 0x214   : > { %13745 = vst [vmem:[#allocation55_spill] sm:$0xff] %v10439_v33  ;;  %13748 = vst [vmem:[#allocation19_spill] sm:$0xff] %v10454_v46  ;;  %v10457_v23 = vadd.f32 %v1988_v27, %v13749_v25  ;;  %v10463_v32 = vadd.f32 %v1990_v15, %v13753_v62  ;;  %v10478_v55 = vld [vmem:[%s12089_s0 + $0x422] sm:$0xff]  ;;  %v13758_v41 = vld [vmem:[#allocation21_spill] sm:$0xff] }
 0x215   : > { %13752 = vst [vmem:[#allocation51_spill] sm:$0xff] %v10460_v2  ;;  %13756 = vst [vmem:[#allocation49_spill] sm:$0xff] %v10473_v54  ;;  %v2062_v27 = vmul.f32 %v4910_v45, %v13758_v41  ;;  %v10484_v15 = vld [vmem:[%s12089_s0 + $0x42a] sm:$0xff]  ;;  %v10489_v13 = vld [vmem:[%s12089_s0 + $0x43a] sm:$0xff]  ;;  %v2063_v56 = vmul.f32 %v4911_v37, %v13758_v41  ;;  %v2064_v45 = vmul.f32 %v10363_v31, %v13758_v41 }
 0x216   : > { %13750 = vst [vmem:[#allocation18_spill] sm:$0xff] %v10457_v23  ;;  %13754 = vst [vmem:[#allocation15_spill] sm:$0xff] %v10463_v32  ;;  %v10494_v14 = vld [vmem:[%s12089_s0 + $0x442] sm:$0xff]  ;;  %v2065_v42 = vmul.f32 %v10368_v6, %v13758_v41  ;;  %v2066_v34 = vmul.f32 %v10373_v43, %v13758_v41  ;;  %v10506_v57 = vld [vmem:[%s12089_s0 + $0x452] sm:$0xff]  ;;  %v2067_v1 = vmul.f32 %v10390_v44, %v13758_v41 }
 0x217   : > { %13757 = vst [vmem:[#allocation23_spill] sm:$0xff] %v10478_v55  ;;  %13759 = vst [vmem:[#allocation42_spill] sm:$0xff] %v10484_v15  ;;  %v10511_v39 = vld [vmem:[%s12089_s0 + $0x45a] sm:$0xff]  ;;  %v10516_v37 = vld [vmem:[%s12089_s0 + $0x46a] sm:$0xff]  ;;  %v2068_v17 = vmul.f32 %v10395_v18, %v13758_v41  ;;  %v2069_v25 = vmul.f32 %v10400_v11, %v13758_v41  ;;  %v2070_v38 = vmul.f32 %v10417_v47, %v13758_v41 }
 0x218   : > { %13760 = vst [vmem:[#allocation17_spill] sm:$0xff] %v10489_v13  ;;  %13761 = vst [vmem:[#allocation34_spill] sm:$0xff] %v10494_v14  ;;  %v10529_v62 = vld [vmem:[%s12089_s0 + $0x472] sm:$0xff]  ;;  %v10534_v43 = vld [vmem:[%s12089_s0 + $0x482] sm:$0xff]  ;;  %v2071_v11 = vmul.f32 %v10422_v61, %v13758_v41  ;;  %v2072_v47 = vmul.f32 %v10427_v19, %v13758_v41  ;;  %v2073_v44 = vmul.f32 %v10444_v29, %v13758_v41 }
 0x219   : > { %13762 = vst [vmem:[#allocation41_spill] sm:$0xff] %v10506_v57  ;;  %13763 = vst [vmem:[#allocation36_spill] sm:$0xff] %v10511_v39  ;;  %v10539_v18 = vld [vmem:[%s12089_s0 + $0x48a] sm:$0xff]  ;;  %v2074_v6 = vmul.f32 %v10449_v16, %v13758_v41  ;;  %v10552_v31 = vld [vmem:[%s12089_s0 + $0x49a] sm:$0xff]  ;;  %v2075_v29 = vmul.f32 %v10454_v46, %v13758_v41  ;;  %v2076_v16 = vmul.f32 %v10468_v8, %v13758_v41 }
 0x21a   : > { %13764 = vst [vmem:[#allocation29_spill] sm:$0xff] %v10516_v37  ;;  %13765 = vst [vmem:[#allocation14_spill] sm:$0xff] %v10529_v62  ;;  %v10557_v32 = vld [vmem:[%s12089_s0 + $0x4a2] sm:$0xff]  ;;  %v10562_v19 = vld [vmem:[%s12089_s0 + $0x4b2] sm:$0xff]  ;;  %v2077_v61 = vmul.f32 %v10473_v54, %v13758_v41  ;;  %v2078_v2 = vmul.f32 %v10478_v55, %v13758_v41  ;;  %v2079_v54 = vmul.f32 %v10484_v15, %v13758_v41 }
 0x21b   : > { %13766 = vst [vmem:[#allocation39_spill] sm:$0xff] %v10534_v43  ;;  %13767 = vst [vmem:[#allocation22_spill] sm:$0xff] %v10539_v18  ;;  %v10575_v23 = vld [vmem:[%s12089_s0 + $0x4ba] sm:$0xff]  ;;  %v10580_v33 = vld [vmem:[%s12089_s0 + $0x4ca] sm:$0xff]  ;;  %v2080_v55 = vmul.f32 %v10489_v13, %v13758_v41  ;;  %v2081_v46 = vmul.f32 %v10494_v14, %v13758_v41  ;;  %v2082_v52 = vmul.f32 %v10506_v57, %v13758_v41 }
 0x21c   : > { %13768 = vst [vmem:[#allocation50_spill] sm:$0xff] %v10552_v31  ;;  %13769 = vst [vmem:[#allocation40_spill] sm:$0xff] %v10557_v32  ;;  %v10585_v8 = vld [vmem:[%s12089_s0 + $0x4d2] sm:$0xff]  ;;  %v2083_v4 = vmul.f32 %v10511_v39, %v13758_v41  ;;  %v2084_v22 = vmul.f32 %v10516_v37, %v13758_v41  ;;  %v2085_v50 = vmul.f32 %v10529_v62, %v13758_v41 }
 0x21d   : > { %13770 = vst [vmem:[#allocation26_spill] sm:$0xff] %v10562_v19  ;;  %13771 = vst [vmem:[#allocation44_spill] sm:$0xff] %v10575_v23  ;;  %v2086_v15 = vmul.f32 %v10534_v43, %v13758_v41  ;;  %v2087_v13 = vmul.f32 %v10539_v18, %v13758_v41  ;;  %v2088_v14 = vmul.f32 %v10552_v31, %v13758_v41 }
 0x21e   : > { %13772 = vst [vmem:[#allocation33_spill] sm:$0xff] %v10580_v33  ;;  %13773 = vst [vmem:[#allocation25_spill] sm:$0xff] %v10585_v8  ;;  %v2089_v57 = vmul.f32 %v10557_v32, %v13758_v41  ;;  %v2090_v39 = vmul.f32 %v10562_v19, %v13758_v41  ;;  %v2091_v37 = vmul.f32 %v10575_v23, %v13758_v41 }
 0x21f   : > { %v2092_v62 = vmul.f32 %v10580_v33, %v13758_v41  ;;  %v2093_v43 = vmul.f32 %v10585_v8, %v13758_v41  ;;  %v10618_v18 = vadd.f32 %v2062_v27, %v10304_v53  ;;  %v10621_v31 = vadd.f32 %v2063_v56, %v10307_v28 }
 0x220   : > { %v10624_v32 = vadd.f32 %v2064_v45, %v10310_v36  ;;  %v10627_v19 = vadd.f32 %v2065_v42, %v10313_v24  ;;  %v10630_v23 = vadd.f32 %v2066_v34, %v10316_v12  ;;  %v10633_v33 = vadd.f32 %v2067_v1, %v10319_v26  ;;  %v13796_v45 = vld [vmem:[#allocation48_spill] sm:$0xff] }
 0x221   : > { %v10636_v41 = vadd.f32 %v2068_v17, %v10322_v59  ;;  %v10639_v53 = vadd.f32 %v2069_v25, %v10325_v51  ;;  %v10642_v28 = vadd.f32 %v2070_v38, %v10328_v48  ;;  %v10645_v36 = vadd.f32 %v2071_v11, %v10331_v49  ;;  %v13800_v17 = vld [vmem:[#allocation56_spill] sm:$0xff] }
 0x222   : > { %v10648_v24 = vadd.f32 %v2072_v47, %v10334_v35  ;;  %v10651_v12 = vadd.f32 %v2073_v44, %v10337_v3  ;;  %v10654_v26 = vadd.f32 %v2074_v6, %v10340_v40  ;;  %v10657_v59 = vadd.f32 %v2075_v29, %v10346_v7  ;;  %v13774_v6 = vld [vmem:[#allocation52_spill] sm:$0xff] }
 0x223   : > { %v10660_v51 = vadd.f32 %v2076_v16, %v10349_v30  ;;  %v10663_v48 = vadd.f32 %v2077_v61, %v10352_v58  ;;  %v10666_v49 = vadd.f32 %v2078_v2, %v10355_v63  ;;  %v10669_v35 = vadd.f32 %v2079_v54, %v10376_v0  ;;  %v13790_v29 = vld [vmem:[#allocation32_spill] sm:$0xff]  ;;  %v13792_v2 = vld [vmem:[#allocation27_spill] sm:$0xff] }
 0x224   : > { %v10672_v3 = vadd.f32 %v2080_v55, %v10379_v5  ;;  %v10675_v40 = vadd.f32 %v2081_v46, %v10382_v9  ;;  %v10678_v7 = vadd.f32 %v2082_v52, %v10385_v10  ;;  %v10681_v30 = vadd.f32 %v2083_v4, %v10403_v20  ;;  %v13776_v5 = vld [vmem:[#allocation20_spill] sm:$0xff]  ;;  %v13778_v9 = vld [vmem:[#allocation47_spill] sm:$0xff]  ;;  %v13780_v10 = vld [vmem:[#allocation54_spill] sm:$0xff] }
 0x225   : > { %v10684_v58 = vadd.f32 %v2084_v22, %v10406_v60  ;;  %v10687_v63 = vadd.f32 %v2085_v50, %v10409_v21  ;;  %v10690_v0 = vadd.f32 %v2086_v15, %v13774_v6  ;;  %v10693_v44 = vadd.f32 %v2087_v13, %v13776_v5  ;;  %v13782_v20 = vld [vmem:[#allocation55_spill] sm:$0xff]  ;;  %v13784_v60 = vld [vmem:[#allocation18_spill] sm:$0xff]  ;;  %v13791_v16 = vld [vmem:[#allocation28_spill] sm:$0xff] }
 0x226   : > { %v10696_v11 = vadd.f32 %v2088_v14, %v13778_v9  ;;  %v10699_v47 = vadd.f32 %v2089_v57, %v13780_v10  ;;  %v10702_v61 = vadd.f32 %v2090_v39, %v13782_v20  ;;  %v10705_v22 = vadd.f32 %v2091_v37, %v13784_v60  ;;  %v13786_v21 = vld [vmem:[#allocation51_spill] sm:$0xff]  ;;  %v13793_v55 = vld [vmem:[#allocation53_spill] sm:$0xff]  ;;  %v13795_v14 = vld [vmem:[#allocation30_spill] sm:$0xff] }
 0x227   : > { %13775 = vst [vmem:[#allocation45_spill] sm:$0xff] %v10690_v0  ;;  %13777 = vst [vmem:[#allocation46_spill] sm:$0xff] %v10693_v44  ;;  %v10708_v50 = vadd.f32 %v2092_v62, %v13786_v21  ;;  %v13788_v4 = vld [vmem:[#allocation15_spill] sm:$0xff]  ;;  %v2129_v46 = vmul.f32 %v13791_v16, %v13790_v29  ;;  %v2130_v54 = vmul.f32 %v13792_v2, %v13790_v29  ;;  %v13794_v15 = vld [vmem:[#allocation57_spill] sm:$0xff] }
 0x228   : > { %13779 = vst [vmem:[#allocation38_spill] sm:$0xff] %v10696_v11  ;;  %13781 = vst [vmem:[#allocation21_spill] sm:$0xff] %v10699_v47  ;;  %v10711_v52 = vadd.f32 %v2093_v43, %v13788_v4  ;;  %v2131_v27 = vmul.f32 %v13793_v55, %v13790_v29  ;;  %v2132_v13 = vmul.f32 %v13794_v15, %v13790_v29  ;;  %v13797_v43 = vld [vmem:[#allocation43_spill] sm:$0xff]  ;;  %v13799_v37 = vld [vmem:[#allocation37_spill] sm:$0xff] }
 0x229   : > { %13783 = vst [vmem:[#allocation52_spill] sm:$0xff] %v10702_v61  ;;  %13785 = vst [vmem:[#allocation20_spill] sm:$0xff] %v10705_v22  ;;  %v2133_v56 = vmul.f32 %v13795_v14, %v13790_v29  ;;  %v2134_v42 = vmul.f32 %v13796_v45, %v13790_v29  ;;  %v2135_v34 = vmul.f32 %v13797_v43, %v13790_v29  ;;  %v13798_v57 = vld [vmem:[#allocation31_spill] sm:$0xff]  ;;  %v13801_v38 = vld [vmem:[#allocation24_spill] sm:$0xff] }
 0x22a   : > { %13787 = vst [vmem:[#allocation47_spill] sm:$0xff] %v10708_v50  ;;  %13789 = vst [vmem:[#allocation54_spill] sm:$0xff] %v10711_v52  ;;  %v2136_v39 = vmul.f32 %v13798_v57, %v13790_v29  ;;  %v2137_v1 = vmul.f32 %v13799_v37, %v13790_v29  ;;  %v2138_v25 = vmul.f32 %v13800_v17, %v13790_v29  ;;  %v13802_v6 = vld [vmem:[#allocation19_spill] sm:$0xff]  ;;  %v13803_v9 = vld [vmem:[#allocation16_spill] sm:$0xff] }
 0x22b   : > { %v2139_v62 = vmul.f32 %v13801_v38, %v13790_v29  ;;  %v2140_v5 = vmul.f32 %v13802_v6, %v13790_v29  ;;  %v2141_v10 = vmul.f32 %v13803_v9, %v13790_v29  ;;  %v13804_v20 = vld [vmem:[#allocation49_spill] sm:$0xff]  ;;  %v13805_v21 = vld [vmem:[#allocation23_spill] sm:$0xff]  ;;  %v13806_v16 = vld [vmem:[#allocation42_spill] sm:$0xff] }
 0x22c   : > { %v2142_v60 = vmul.f32 %v13804_v20, %v13790_v29  ;;  %v2143_v4 = vmul.f32 %v13805_v21, %v13790_v29  ;;  %v2144_v2 = vmul.f32 %v13806_v16, %v13790_v29  ;;  %v13807_v17 = vld [vmem:[#allocation17_spill] sm:$0xff]  ;;  %v10750_v38 = vld [vmem:[%s12089_s0 + $0x4e2] sm:$0xff]  ;;  %v10755_v9 = vld [vmem:[%s12089_s0 + $0x4ea] sm:$0xff] }
 0x22d   : > { %v2145_v37 = vmul.f32 %v13807_v17, %v13790_v29  ;;  %13808 = vst [vmem:[#allocation55_spill] sm:$0xff] %v10750_v38  ;;  %v13809_v20 = vld [vmem:[#allocation34_spill] sm:$0xff]  ;;  %v13810_v21 = vld [vmem:[#allocation41_spill] sm:$0xff]  ;;  %v13811_v16 = vld [vmem:[#allocation36_spill] sm:$0xff] }
 0x22e   : > { %v2146_v6 = vmul.f32 %v13809_v20, %v13790_v29  ;;  %v2147_v57 = vmul.f32 %v13810_v21, %v13790_v29  ;;  %v2148_v43 = vmul.f32 %v13811_v16, %v13790_v29  ;;  %v13812_v17 = vld [vmem:[#allocation29_spill] sm:$0xff]  ;;  %v13813_v14 = vld [vmem:[#allocation14_spill] sm:$0xff]  ;;  %v13814_v55 = vld [vmem:[#allocation39_spill] sm:$0xff] }
 0x22f   : > { %v2149_v45 = vmul.f32 %v13812_v17, %v13790_v29  ;;  %v2150_v15 = vmul.f32 %v13813_v14, %v13790_v29  ;;  %v2151_v52 = vmul.f32 %v13814_v55, %v13790_v29  ;;  %v13815_v50 = vld [vmem:[#allocation22_spill] sm:$0xff]  ;;  %v13817_v21 = vld [vmem:[#allocation40_spill] sm:$0xff]  ;;  %v13820_v14 = vld [vmem:[#allocation33_spill] sm:$0xff]  ;;  %v2158_v55 = vmul.f32 %v10585_v8, %v13790_v29 }
 0x230   : > { %v2152_v22 = vmul.f32 %v13815_v50, %v13790_v29  ;;  %v13816_v20 = vld [vmem:[#allocation50_spill] sm:$0xff]  ;;  %v2154_v47 = vmul.f32 %v13817_v21, %v13790_v29  ;;  %v13819_v17 = vld [vmem:[#allocation44_spill] sm:$0xff]  ;;  %v2157_v0 = vmul.f32 %v13820_v14, %v13790_v29  ;;  %v2159_v50 = vmul.f32 %v10750_v38, %v13790_v29 }
 0x231   : > { %v2153_v61 = vmul.f32 %v13816_v20, %v13790_v29  ;;  %v13818_v16 = vld [vmem:[#allocation26_spill] sm:$0xff]  ;;  %v2156_v44 = vmul.f32 %v13819_v17, %v13790_v29  ;;  %v2160_v20 = vmul.f32 %v10755_v9, %v13790_v29  ;;  %v10788_v21 = vadd.f32 %v2129_v46, %v10618_v18 }
 0x232   : > { %v2155_v11 = vmul.f32 %v13818_v16, %v13790_v29  ;;  %v10791_v16 = vadd.f32 %v2130_v54, %v10621_v31  ;;  %v10794_v17 = vadd.f32 %v2131_v27, %v10624_v32  ;;  %v10797_v14 = vadd.f32 %v2132_v13, %v10627_v19 }
 0x233   : > { %v10800_v8 = vadd.f32 %v2133_v56, %v10630_v23  ;;  %v10803_v38 = vadd.f32 %v2134_v42, %v10633_v33  ;;  %v10806_v29 = vadd.f32 %v2135_v34, %v10636_v41  ;;  %v10809_v18 = vadd.f32 %v2136_v39, %v10639_v53 }
 0x234   : > { %v10812_v31 = vadd.f32 %v2137_v1, %v10642_v28  ;;  %v10815_v32 = vadd.f32 %v2138_v25, %v10645_v36  ;;  %v10818_v19 = vadd.f32 %v2139_v62, %v10648_v24  ;;  %v10821_v23 = vadd.f32 %v2140_v5, %v10651_v12  ;;  %v13847_v1 = vld [vmem:[#allocation37_spill] sm:$0xff]  ;;  %v13848_v62 = vld [vmem:[#allocation56_spill] sm:$0xff] }
 0x235   : > { %v10824_v33 = vadd.f32 %v2141_v10, %v10654_v26  ;;  %v10827_v41 = vadd.f32 %v2142_v60, %v10657_v59  ;;  %v10830_v53 = vadd.f32 %v2143_v4, %v10660_v51  ;;  %v10833_v28 = vadd.f32 %v2144_v2, %v10663_v48  ;;  %v13849_v5 = vld [vmem:[#allocation24_spill] sm:$0xff] }
 0x236   : > { %v10836_v36 = vadd.f32 %v2145_v37, %v10666_v49  ;;  %v10839_v24 = vadd.f32 %v2146_v6, %v10669_v35  ;;  %v10842_v12 = vadd.f32 %v2147_v57, %v10672_v3  ;;  %v10845_v26 = vadd.f32 %v2148_v43, %v10675_v40  ;;  %v13824_v35 = vld [vmem:[#allocation45_spill] sm:$0xff]  ;;  %v13826_v3 = vld [vmem:[#allocation46_spill] sm:$0xff]  ;;  %v13851_v4 = vld [vmem:[#allocation16_spill] sm:$0xff] }
 0x237   : > { %v10848_v59 = vadd.f32 %v2149_v45, %v10678_v7  ;;  %v10851_v51 = vadd.f32 %v2150_v15, %v10681_v30  ;;  %v10854_v48 = vadd.f32 %v2151_v52, %v10684_v58  ;;  %v10857_v49 = vadd.f32 %v2152_v22, %v10687_v63  ;;  %v13828_v40 = vld [vmem:[#allocation38_spill] sm:$0xff]  ;;  %v13830_v7 = vld [vmem:[#allocation21_spill] sm:$0xff]  ;;  %v13832_v30 = vld [vmem:[#allocation52_spill] sm:$0xff] }
 0x238   : > { %v10860_v46 = vadd.f32 %v2153_v61, %v13824_v35  ;;  %v10863_v54 = vadd.f32 %v2154_v47, %v13826_v3  ;;  %v10866_v27 = vadd.f32 %v2155_v11, %v13828_v40  ;;  %v10869_v13 = vadd.f32 %v2156_v44, %v13830_v7  ;;  %v13834_v58 = vld [vmem:[#allocation20_spill] sm:$0xff]  ;;  %v13836_v63 = vld [vmem:[#allocation47_spill] sm:$0xff]  ;;  %v13838_v61 = vld [vmem:[#allocation54_spill] sm:$0xff] }
 0x239   : > { %13821 = vst [vmem:[#allocation18_spill] sm:$0xff] %v10851_v51  ;;  %13822 = vst [vmem:[#allocation51_spill] sm:$0xff] %v10854_v48  ;;  %v10872_v15 = vadd.f32 %v2157_v0, %v13832_v30  ;;  %v10875_v52 = vadd.f32 %v2158_v55, %v13834_v58  ;;  %v10878_v22 = vadd.f32 %v2159_v50, %v13836_v63  ;;  %v13840_v47 = vld [vmem:[#allocation35_spill] sm:$0xff]  ;;  %v13841_v45 = vld [vmem:[#allocation53_spill] sm:$0xff] }
 0x23a   : > { %13823 = vst [vmem:[#allocation15_spill] sm:$0xff] %v10857_v49  ;;  %13825 = vst [vmem:[#allocation32_spill] sm:$0xff] %v10860_v46  ;;  %v10881_v56 = vadd.f32 %v2160_v20, %v13838_v61  ;;  %v2196_v42 = vmul.f32 %v13841_v45, %v13840_v47  ;;  %v13842_v11 = vld [vmem:[#allocation57_spill] sm:$0xff]  ;;  %v13843_v44 = vld [vmem:[#allocation30_spill] sm:$0xff]  ;;  %v2202_v25 = vmul.f32 %v13847_v1, %v13840_v47 }
 0x23b   : > { %13827 = vst [vmem:[#allocation28_spill] sm:$0xff] %v10863_v54  ;;  %13829 = vst [vmem:[#allocation27_spill] sm:$0xff] %v10866_v27  ;;  %v2197_v43 = vmul.f32 %v13842_v11, %v13840_v47  ;;  %v2198_v34 = vmul.f32 %v13843_v44, %v13840_v47  ;;  %v13844_v0 = vld [vmem:[#allocation48_spill] sm:$0xff]  ;;  %v13845_v55 = vld [vmem:[#allocation43_spill] sm:$0xff]  ;;  %v2203_v6 = vmul.f32 %v13848_v62, %v13840_v47 }
 0x23c   : > { %13831 = vst [vmem:[#allocation45_spill] sm:$0xff] %v10869_v13  ;;  %13833 = vst [vmem:[#allocation46_spill] sm:$0xff] %v10872_v15  ;;  %v2199_v57 = vmul.f32 %v13844_v0, %v13840_v47  ;;  %v2200_v39 = vmul.f32 %v13845_v55, %v13840_v47  ;;  %v13846_v50 = vld [vmem:[#allocation31_spill] sm:$0xff]  ;;  %v2204_v10 = vmul.f32 %v13849_v5, %v13840_v47  ;;  %v13852_v35 = vld [vmem:[#allocation49_spill] sm:$0xff] }
 0x23d   : > { %13835 = vst [vmem:[#allocation38_spill] sm:$0xff] %v10875_v52  ;;  %13837 = vst [vmem:[#allocation21_spill] sm:$0xff] %v10878_v22  ;;  %v2201_v37 = vmul.f32 %v13846_v50, %v13840_v47  ;;  %v13850_v20 = vld [vmem:[#allocation19_spill] sm:$0xff]  ;;  %v2206_v2 = vmul.f32 %v13851_v4, %v13840_v47  ;;  %v2207_v3 = vmul.f32 %v13852_v35, %v13840_v47  ;;  %v13854_v30 = vld [vmem:[#allocation42_spill] sm:$0xff] }
 0x23e   : > { %13839 = vst [vmem:[#allocation52_spill] sm:$0xff] %v10881_v56  ;;  %v2205_v60 = vmul.f32 %v13850_v20, %v13840_v47  ;;  %v13853_v40 = vld [vmem:[#allocation23_spill] sm:$0xff]  ;;  %v2209_v58 = vmul.f32 %v13854_v30, %v13840_v47  ;;  %v13855_v63 = vld [vmem:[#allocation17_spill] sm:$0xff]  ;;  %v13856_v45 = vld [vmem:[#allocation34_spill] sm:$0xff]  ;;  %v2230_v48 = vadd.f32 %v2198_v34, %v10794_v17 }
 0x23f   : > { %v2208_v7 = vmul.f32 %v13853_v40, %v13840_v47  ;;  %v2210_v61 = vmul.f32 %v13855_v63, %v13840_v47  ;;  %v2211_v11 = vmul.f32 %v13856_v45, %v13840_v47  ;;  %v13857_v44 = vld [vmem:[#allocation41_spill] sm:$0xff]  ;;  %v4945_v50 = vld [vmem:[%s12089_s0 + $0x502] sm:$0xff]  ;;  %v13858_v1 = vld [vmem:[#allocation36_spill] sm:$0xff]  ;;  %v2233_v51 = vadd.f32 %v2201_v37, %v10803_v38 }
 0x240   : > { %v2212_v0 = vmul.f32 %v13857_v44, %v13840_v47  ;;  %v4944_v55 = vld [vmem:[%s12089_s0 + $0x4fa] sm:$0xff]  ;;  %v2213_v62 = vmul.f32 %v13858_v1, %v13840_v47  ;;  %v13861_v40 = vld [vmem:[#allocation39_spill] sm:$0xff]  ;;  %v13864_v52 = vld [vmem:[#allocation40_spill] sm:$0xff]  ;;  %v2227_v49 = vmul.f32 %v4945_v50, %v13840_v47 }
 0x241   : > { %v13859_v5 = vld [vmem:[#allocation29_spill] sm:$0xff]  ;;  %v13860_v4 = vld [vmem:[#allocation14_spill] sm:$0xff]  ;;  %v2216_v30 = vmul.f32 %v13861_v40, %v13840_v47  ;;  %v2219_v13 = vmul.f32 %v13864_v52, %v13840_v47  ;;  %v2226_v52 = vmul.f32 %v4944_v55, %v13840_v47  ;;  %v2236_v55 = vadd.f32 %v2204_v10, %v10812_v31  ;;  %v13872_v34 = vld [vmem:[#allocation15_spill] sm:$0xff] }
 0x242   : > { %v2214_v20 = vmul.f32 %v13859_v5, %v13840_v47  ;;  %v2215_v35 = vmul.f32 %v13860_v4, %v13840_v47  ;;  %v13862_v63 = vld [vmem:[#allocation22_spill] sm:$0xff]  ;;  %v13866_v5 = vld [vmem:[#allocation44_spill] sm:$0xff]  ;;  %v13867_v4 = vld [vmem:[#allocation33_spill] sm:$0xff]  ;;  %v2240_v17 = vadd.f32 %v2208_v7, %v10824_v33  ;;  %v2243_v38 = vadd.f32 %v2211_v11, %v10833_v28 }
 0x243   : > { %v2217_v45 = vmul.f32 %v13862_v63, %v13840_v47  ;;  %v13863_v44 = vld [vmem:[#allocation50_spill] sm:$0xff]  ;;  %v2221_v15 = vmul.f32 %v13866_v5, %v13840_v47  ;;  %v2222_v27 = vmul.f32 %v13867_v4, %v13840_v47  ;;  %v13868_v40 = vld [vmem:[#allocation25_spill] sm:$0xff]  ;;  %v13869_v63 = vld [vmem:[#allocation55_spill] sm:$0xff]  ;;  %v2229_v5 = vadd.f32 %v2197_v43, %v10791_v16 }
 0x244   : > { %v2218_v56 = vmul.f32 %v13863_v44, %v13840_v47  ;;  %v13865_v1 = vld [vmem:[#allocation26_spill] sm:$0xff]  ;;  %v2223_v54 = vmul.f32 %v13868_v40, %v13840_v47  ;;  %v2224_v46 = vmul.f32 %v13869_v63, %v13840_v47  ;;  %v2225_v44 = vmul.f32 %v10755_v9, %v13840_v47  ;;  %v13871_v43 = vld [vmem:[#allocation51_spill] sm:$0xff]  ;;  %v13878_v10 = vld [vmem:[#allocation45_spill] sm:$0xff] }
 0x245   : > { %v2220_v22 = vmul.f32 %v13865_v1, %v13840_v47  ;;  %v2228_v1 = vadd.f32 %v2196_v42, %v10788_v21  ;;  %v2231_v4 = vadd.f32 %v2199_v57, %v10797_v14  ;;  %v2232_v40 = vadd.f32 %v2200_v39, %v10800_v8  ;;  %v13870_v42 = vld [vmem:[#allocation18_spill] sm:$0xff]  ;;  %v13873_v57 = vld [vmem:[#allocation32_spill] sm:$0xff]  ;;  %v13875_v37 = vld [vmem:[#allocation27_spill] sm:$0xff] }
 0x246   : > { %v2234_v63 = vadd.f32 %v2202_v25, %v10806_v29  ;;  %v2235_v9 = vadd.f32 %v2203_v6, %v10809_v18  ;;  %v2237_v47 = vadd.f32 %v2205_v60, %v10815_v32  ;;  %v2238_v21 = vadd.f32 %v2206_v2, %v10818_v19  ;;  %v13874_v39 = vld [vmem:[#allocation28_spill] sm:$0xff]  ;;  %v13876_v25 = vld [vmem:[#allocation46_spill] sm:$0xff]  ;;  %v13877_v6 = vld [vmem:[#allocation21_spill] sm:$0xff] }
 0x247   : > { %v2239_v16 = vadd.f32 %v2207_v3, %v10821_v23  ;;  %v2241_v14 = vadd.f32 %v2209_v58, %v10827_v41  ;;  %v2242_v8 = vadd.f32 %v2210_v61, %v10830_v53  ;;  %v2244_v29 = vadd.f32 %v2212_v0, %v10836_v36  ;;  %v13879_v60 = vld [vmem:[#allocation38_spill] sm:$0xff]  ;;  %v13880_v7 = vld [vmem:[#allocation52_spill] sm:$0xff] }
 0x248   : > { %v2245_v18 = vadd.f32 %v2213_v62, %v10839_v24  ;;  %v2246_v31 = vadd.f32 %v2214_v20, %v10842_v12  ;;  %v2247_v32 = vadd.f32 %v2215_v35, %v10845_v26  ;;  %v2248_v19 = vadd.f32 %v2216_v30, %v10848_v59 }
 0x249   : > { %v2249_v23 = vadd.f32 %v2217_v45, %v13870_v42  ;;  %v2250_v33 = vadd.f32 %v2218_v56, %v13871_v43  ;;  %v2251_v41 = vadd.f32 %v2219_v13, %v13872_v34  ;;  %v2252_v53 = vadd.f32 %v2220_v22, %v13873_v57 }
 0x24a   : > { %v2253_v28 = vadd.f32 %v2221_v15, %v13874_v39  ;;  %v2254_v36 = vadd.f32 %v2222_v27, %v13875_v37  ;;  %v2256_v24 = vadd.f32 %v2224_v46, %v13876_v25  ;;  %v2258_v12 = vadd.f32 %v2226_v52, %v13877_v6 }
 0x24b   : > { %v2255_v26 = vadd.f32 %v2223_v54, %v13878_v10  ;;  %v2257_v59 = vadd.f32 %v2225_v44, %v13879_v60  ;;  %v2260_v2 = vmax.f32 %v2228_v1, %v2230_v48  ;;  %v2262_v3 = vmax.f32 %v2232_v40, %v2234_v63 }
 0x24c   : > { %v2259_v56 = vadd.f32 %v2227_v49, %v13880_v7  ;;  %v2261_v58 = vmax.f32 %v2229_v5, %v2231_v4  ;;  %v2264_v13 = vmax.f32 %v2236_v55, %v2238_v21  ;;  %v2266_v61 = vmax.f32 %v2240_v17, %v2242_v8 }
 0x24d   : > { %v2263_v22 = vmax.f32 %v2233_v51, %v2235_v9  ;;  %v2265_v11 = vmax.f32 %v2237_v47, %v2239_v16  ;;  %v2268_v15 = vmax.f32 %v2244_v29, %v2246_v31  ;;  %v2270_v0 = vmax.f32 %v2248_v19, %v2250_v33 }
 0x24e   : > { %v2267_v27 = vmax.f32 %v2241_v14, %v2243_v38  ;;  %v2269_v50 = vmax.f32 %v2245_v18, %v2247_v32  ;;  %v2272_v46 = vmax.f32 %v2252_v53, %v2254_v36  ;;  %v2274_v62 = vmax.f32 %v2256_v24, %v2258_v12 }
 0x24f   : > { %v2284_v20 = vrot.slane %v2260_v2, 1  ;;  %v2285_v35 = vrot.slane %v2262_v3, 1  ;;  %v2286_v54 = vrot.slane %v2264_v13, 1  ;;  %v2287_v30 = vrot.slane %v2266_v61, 1 }
 0x250   : > { %v2271_v45 = vmax.f32 %v2249_v23, %v2251_v41  ;;  %v2273_v48 = vmax.f32 %v2253_v28, %v2255_v26  ;;  %v2275_v44 = vmax.f32 %v2257_v59, %v2259_v56  ;;  %v2288_v52 = vrot.slane %v2268_v15, 1 }
 0x251   : > { %v2289_v49 = vrot.slane %v2270_v0, 1  ;;  %v2290_v1 = vrot.slane %v2272_v46, 1  ;;  %v2291_v5 = vrot.slane %v2274_v62, 1  ;;  %v10983_v4 = vmax.f32 %v2260_v2, %v2284_v20 }
 0x252   : > { %v10985_v51 = vmax.f32 %v2262_v3, %v2285_v35  ;;  %v10987_v40 = vmax.f32 %v2264_v13, %v2286_v54  ;;  %v10989_v63 = vmax.f32 %v2266_v61, %v2287_v30  ;;  %v10991_v9 = vmax.f32 %v2268_v15, %v2288_v52 }
 0x253   : > { %v2316_v55 = vrot.slane %v2261_v58, 1  ;;  %v2317_v47 = vrot.slane %v2263_v22, 1  ;;  %v2318_v21 = vrot.slane %v2265_v11, 1  ;;  %v2319_v16 = vrot.slane %v2267_v27, 1 }
 0x254   : > { %v2320_v17 = vrot.slane %v2269_v50, 1  ;;  %v2321_v14 = vrot.slane %v2271_v45, 1  ;;  %v2322_v8 = vrot.slane %v2273_v48, 1  ;;  %v2323_v38 = vrot.slane %v2275_v44, 1 }
 0x255   : > { %v10993_v29 = vmax.f32 %v2270_v0, %v2289_v49  ;;  %v10995_v18 = vmax.f32 %v2272_v46, %v2290_v1  ;;  %v10997_v31 = vmax.f32 %v2274_v62, %v2291_v5  ;;  %v10999_v32 = vmax.f32 %v2261_v58, %v2316_v55 }
 0x256   : > { %v11001_v19 = vmax.f32 %v2263_v22, %v2317_v47  ;;  %v11003_v42 = vmax.f32 %v2265_v11, %v2318_v21  ;;  %v11005_v23 = vmax.f32 %v2267_v27, %v2319_v16  ;;  %v11007_v43 = vmax.f32 %v2269_v50, %v2320_v17 }
 0x257   : > { %v11009_v33 = vmax.f32 %v2271_v45, %v2321_v14  ;;  %v11011_v34 = vmax.f32 %v2273_v48, %v2322_v8  ;;  %v11013_v41 = vmax.f32 %v2275_v44, %v2323_v38  ;;  %v2348_v57 = vrot.slane %v10983_v4, 2 }
 0x258   : > { %v2349_v53 = vrot.slane %v10985_v51, 2  ;;  %v2350_v39 = vrot.slane %v10987_v40, 2  ;;  %v2351_v28 = vrot.slane %v10989_v63, 2  ;;  %v2352_v37 = vrot.slane %v10991_v9, 2 }
 0x259   : > { %v2353_v36 = vrot.slane %v10993_v29, 2  ;;  %v2354_v25 = vrot.slane %v10995_v18, 2  ;;  %v2364_v6 = vrot.slane %v10983_v4, 4  ;;  %v2365_v12 = vrot.slane %v10985_v51, 4 }
 0x25a   : > { %v2366_v10 = vrot.slane %v10987_v40, 4  ;;  %v2367_v26 = vrot.slane %v10989_v63, 4  ;;  %v2368_v60 = vrot.slane %v10991_v9, 4  ;;  %v2369_v59 = vrot.slane %v10993_v29, 4 }
 0x25b   : > { %v2370_v2 = vrot.slane %v10995_v18, 4  ;;  %v2380_v7 = vrot.slane %v10983_v4, 6  ;;  %v2381_v56 = vrot.slane %v10985_v51, 6  ;;  %v2382_v58 = vrot.slane %v10987_v40, 6 }
 0x25c   : > { %v2383_v13 = vrot.slane %v10989_v63, 6  ;;  %v2384_v61 = vrot.slane %v10991_v9, 6  ;;  %v2385_v22 = vrot.slane %v10993_v29, 6  ;;  %v2386_v11 = vrot.slane %v10995_v18, 6 }
 0x25d   : > { %v2404_v0 = vrot.slane %v10999_v32, 2  ;;  %v2405_v27 = vrot.slane %v11001_v19, 2  ;;  %v2406_v50 = vrot.slane %v11003_v42, 2  ;;  %v2407_v46 = vrot.slane %v11005_v23, 2 }
 0x25e   : > { %v2408_v62 = vrot.slane %v11007_v43, 2  ;;  %v2409_v20 = vrot.slane %v11009_v33, 2  ;;  %v2420_v30 = vrot.slane %v10999_v32, 4  ;;  %v2421_v45 = vrot.slane %v11001_v19, 4 }
 0x25f   : > { %v2422_v48 = vrot.slane %v11003_v42, 4  ;;  %v2423_v44 = vrot.slane %v11005_v23, 4  ;;  %v2424_v52 = vrot.slane %v11007_v43, 4  ;;  %v2425_v49 = vrot.slane %v11009_v33, 4 }
 0x260   : > { %v2436_v55 = vrot.slane %v10999_v32, 6  ;;  %v2437_v47 = vrot.slane %v11001_v19, 6  ;;  %v2438_v21 = vrot.slane %v11003_v42, 6  ;;  %v2439_v16 = vrot.slane %v11005_v23, 6 }
 0x261   : > { %v2440_v17 = vrot.slane %v11007_v43, 6  ;;  %v2441_v14 = vrot.slane %v11009_v33, 6  ;;  %v2442_v8 = vrot.slane %v11011_v34, 6  ;;  %v11067_v54 = vstv %s11033_s30 }
 0x262   : > { %v11071_v5 = vadd.f32 %v11067_v54, %v10983_v4  ;;  %v11074_v15 = vadd.f32 %v11067_v54, %v2348_v57  ;;  %v11077_v3 = vadd.f32 %v11067_v54, %v2364_v6  ;;  %v11080_v24 = vadd.f32 %v11067_v54, %v2380_v7 }
 0x263   : > { %v11084_v1 = vadd.f32 %v11067_v54, %v10999_v32  ;;  %v11087_v38 = vadd.f32 %v11067_v54, %v2404_v0  ;;  %v11090_v35 = vadd.f32 %v11067_v54, %v2420_v30  ;;  %v11093_v4 = vadd.f32 %v11067_v54, %v2436_v55 }
 0x264   : > { %v11097_v57 = vadd.f32 %v11067_v54, %v10985_v51  ;;  %v11100_v6 = vadd.f32 %v11067_v54, %v2349_v53  ;;  %v11103_v7 = vadd.f32 %v11067_v54, %v2365_v12  ;;  %v11106_v32 = vadd.f32 %v11067_v54, %v2381_v56 }
 0x265   : > { %v11110_v0 = vadd.f32 %v11067_v54, %v11001_v19  ;;  %v11113_v30 = vadd.f32 %v11067_v54, %v2405_v27  ;;  %v11116_v55 = vadd.f32 %v11067_v54, %v2421_v45  ;;  %v11119_v51 = vadd.f32 %v11067_v54, %v2437_v47 }
 0x266   : > { %v11123_v53 = vadd.f32 %v11067_v54, %v10987_v40  ;;  %v11128_v12 = vadd.f32 %v11067_v54, %v2350_v39  ;;  %v11131_v19 = vadd.f32 %v11067_v54, %v2366_v10  ;;  %v11134_v56 = vadd.f32 %v11067_v54, %v2382_v58 }
 0x267   : > { %v11138_v27 = vadd.f32 %v11067_v54, %v11003_v42  ;;  %v11141_v45 = vadd.f32 %v11067_v54, %v2406_v50  ;;  %v11144_v47 = vadd.f32 %v11067_v54, %v2422_v48  ;;  %v11147_v40 = vadd.f32 %v11067_v54, %v2438_v21 }
 0x268   : > { %v11151_v39 = vadd.f32 %v11067_v54, %v10989_v63  ;;  %v11156_v10 = vadd.f32 %v11067_v54, %v2351_v28  ;;  %v11161_v42 = vadd.f32 %v11067_v54, %v2367_v26  ;;  %v11164_v58 = vadd.f32 %v11067_v54, %v2383_v13 }
 0x269   : > { %v11168_v50 = vadd.f32 %v11067_v54, %v11005_v23  ;;  %v11171_v48 = vadd.f32 %v11067_v54, %v2407_v46  ;;  %v11174_v21 = vadd.f32 %v11067_v54, %v2423_v44  ;;  %v11177_v28 = vadd.f32 %v11067_v54, %v2439_v16 }
 0x26a   : > { %v11181_v63 = vadd.f32 %v11067_v54, %v10991_v9  ;;  %v11186_v26 = vadd.f32 %v11067_v54, %v2352_v37  ;;  %v11191_v23 = vadd.f32 %v11067_v54, %v2368_v60  ;;  %v11196_v13 = vadd.f32 %v11067_v54, %v2384_v61 }
 0x26b   : > { %v11200_v46 = vadd.f32 %v11067_v54, %v11007_v43  ;;  %v11203_v44 = vadd.f32 %v11067_v54, %v2408_v62  ;;  %v11206_v37 = vadd.f32 %v11067_v54, %v2424_v52  ;;  %v11209_v16 = vadd.f32 %v11067_v54, %v2440_v17 }
 0x26c   : > { %v11213_v60 = vadd.f32 %v11067_v54, %v10993_v29  ;;  %v11218_v9 = vadd.f32 %v11067_v54, %v2353_v36  ;;  %v11223_v43 = vadd.f32 %v11067_v54, %v2369_v59  ;;  %v11228_v61 = vadd.f32 %v11067_v54, %v2385_v22 }
 0x26d   : > { %v11232_v62 = vadd.f32 %v11067_v54, %v11009_v33  ;;  %v11237_v52 = vadd.f32 %v11067_v54, %v2409_v20  ;;  %v11240_v36 = vadd.f32 %v11067_v54, %v2425_v49  ;;  %v11243_v59 = vadd.f32 %v11067_v54, %v2441_v14 }
 0x26e   : > { %13881 = vst [vmem:[#allocation20_spill] sm:$0xff] %v11213_v60  ;;  %13882 = vst [vmem:[#allocation47_spill] sm:$0xff] %v11223_v43  ;;  %v11247_v29 = vadd.f32 %v11067_v54, %v10995_v18  ;;  %v11252_v22 = vadd.f32 %v11067_v54, %v2354_v25  ;;  %v11257_v33 = vadd.f32 %v11067_v54, %v2370_v2  ;;  %v13892_v17 = vrot.slane %v11011_v34, 2 }
 0x26f   : > { %13883 = vst [vmem:[#allocation54_spill] sm:$0xff] %v11232_v62  ;;  %13884 = vst [vmem:[#allocation35_spill] sm:$0xff] %v11237_v52  ;;  %v11262_v20 = vadd.f32 %v11067_v54, %v2386_v11  ;;  %v11266_v49 = vadd.f32 %v11067_v54, %v11011_v34  ;;  %v13894_v25 = vrot.slane %v11011_v34, 4  ;;  %v11279_v2 = vadd.f32 %v11067_v54, %v2442_v8 }
 0x270   : > { %13885 = vst [vmem:[#allocation53_spill] sm:$0xff] %v11240_v36  ;;  %13886 = vst [vmem:[#allocation57_spill] sm:$0xff] %v11243_v59  ;;  %v11271_v14 = vadd.f32 %v11067_v54, %v13892_v17  ;;  %v11283_v18 = vadd.f32 %v11067_v54, %v10997_v31  ;;  %v13898_v11 = vrot.slane %v10997_v31, 2  ;;  %v13900_v17 = vrot.slane %v10997_v31, 4 }
 0x271   : > { %13887 = vst [vmem:[#allocation30_spill] sm:$0xff] %v11247_v29  ;;  %13888 = vst [vmem:[#allocation48_spill] sm:$0xff] %v11252_v22  ;;  %v11276_v22 = vadd.f32 %v11067_v54, %v13894_v25  ;;  %v13902_v34 = vrot.slane %v10997_v31, 6  ;;  %v11302_v8 = vadd.f32 %v11067_v54, %v11013_v41 }
 0x272   : > { %13889 = vst [vmem:[#allocation43_spill] sm:$0xff] %v11257_v33  ;;  %13890 = vst [vmem:[#allocation31_spill] sm:$0xff] %v11262_v20 }
 0x273   : > { %13891 = vst [vmem:[#allocation37_spill] sm:$0xff] %v11266_v49  ;;  %13893 = vst [vmem:[#allocation56_spill] sm:$0xff] %v11271_v14  ;;  %v11288_v49 = vadd.f32 %v11067_v54, %v13898_v11  ;;  %v11293_v14 = vadd.f32 %v11067_v54, %v13900_v17  ;;  %v11298_v25 = vadd.f32 %v11067_v54, %v13902_v34  ;;  %v13907_v11 = vrot.slane %v11013_v41, 4 }
 0x274   : > { %13895 = vst [vmem:[#allocation24_spill] sm:$0xff] %v11276_v22  ;;  %13896 = vst [vmem:[#allocation19_spill] sm:$0xff] %v11279_v2  ;;  %v13909_v17 = vrot.slane %v11013_v41, 6 }
 0x275   : > { %13897 = vst [vmem:[#allocation16_spill] sm:$0xff] %v11283_v18  ;;  %13899 = vst [vmem:[#allocation49_spill] sm:$0xff] %v11288_v49  ;;  %v13905_v18 = vrot.slane %v11013_v41, 2  ;;  %v11312_v49 = vadd.f32 %v11067_v54, %v13907_v11  ;;  %v13916_v59 = vmov %v11293_v14  ;;  %v13917_v29 = vmov %v11298_v25 }
 0x276   : > { %13901 = vst [vmem:[#allocation23_spill] sm:$0xff] %v11293_v14  ;;  %13903 = vst [vmem:[#allocation42_spill] sm:$0xff] %v11298_v25  ;;  %v11317_v31 = vadd.f32 %v11067_v54, %v13909_v17  ;;  %v13918_v17 = vmov %v11302_v8  ;;  %v13922_v11 = vmax.f32 %v11077_v3, 0.0  ;;  %v13923_v41 = vmax.f32 %v11080_v24, 0.0 }
 0x277   : > { %13904 = vst [vmem:[#allocation17_spill] sm:$0xff] %v11302_v8  ;;  %v11307_v2 = vadd.f32 %v11067_v54, %v13905_v18  ;;  %13908 = vst [vmem:[#allocation41_spill] sm:$0xff] %v11312_v49  ;;  %v13920_v20 = vmov %v11312_v49  ;;  %v13924_v25 = vmax.f32 %v11084_v1, 0.0  ;;  %v13925_v8 = vmax.f32 %v11087_v38, 0.0 }
 0x278   : > { %v2649_v49 = vrot.slane %v13922_v11, 6  ;;  %v2652_v54 = vrot.slane %v13923_v41, 5  ;;  %v13926_v18 = vmax.f32 %v11090_v35, 0.0  ;;  %v13930_v38 = vmax.f32 %v11103_v7, 0.0 }
 0x279   : > { %13906 = vst [vmem:[#allocation34_spill] sm:$0xff] %v11307_v2  ;;  %v13919_v33 = vmov %v11307_v2  ;;  %v13921_v2 = vmax.f32 %v11074_v15, 0.0  ;;  %v2655_v52 = vrot.slane %v13924_v25, 4  ;;  %v2658_v34 = vrot.slane %v13925_v8, 3 }
 0x27a   : > { %v13911_v60 = vld [vmem:[#allocation37_spill] sm:$0xff]  ;;  %v13912_v43 = vld [vmem:[#allocation56_spill] sm:$0xff]  ;;  %v2661_v14 = vrot.slane %v13926_v18, 2  ;;  %v13927_v15 = vmax.f32 %v11071_v5, 0.0  ;;  %v13929_v25 = vmax.f32 %v11100_v6, 0.0  ;;  %v2669_v8 = vrot.slane %v13930_v38, 6 }
 0x27b   : > { %v13913_v62 = vld [vmem:[#allocation19_spill] sm:$0xff]  ;;  %v2646_v22 = vrot.slane %v13921_v2, 7  ;;  %v13928_v2 = vmax.f32 %v11093_v4, 0.0  ;;  %v13931_v35 = vmax.f32 %v11106_v32, 0.0  ;;  %v13933_v4 = vmax.f32 %v11113_v30, 0.0 }
 0x27c   : > { %v13915_v36 = vld [vmem:[#allocation49_spill] sm:$0xff]  ;;  %v2667_v11 = vrot.slane %v13929_v25, 7  ;;  %v13935_v7 = vmax.f32 %v11097_v57, 0.0  ;;  %v13936_v32 = vmax.f32 %v11119_v51, 0.0  ;;  %v13938_v38 = vmax.f32 %v11131_v19, 0.0 }
 0x27d   : > { %v2648_v3 = vsel %vm2647_vm0, %v2646_v22, %v13927_v15  ;;  %v2664_v24 = vrot.slane %v13928_v2, 1  ;;  %v2671_v18 = vrot.slane %v13931_v35, 5  ;;  %v13932_v22 = vmax.f32 %v11110_v0, 0.0 }
 0x27e   : > { %v2651_v1 = vsel %vm2650_vm1, %v2649_v49, %v2648_v3  ;;  %v2675_v15 = vrot.slane %v13933_v4, 3  ;;  %v13934_v49 = vmax.f32 %v11116_v55, 0.0  ;;  %v2668_v2 = vsel %vm2647_vm0, %v2667_v11, %v13935_v7 }
 0x27f   : > { %v2654_v5 = vsel %vm2653_vm2, %v2652_v54, %v2651_v1  ;;  %v2673_v41 = vrot.slane %v13932_v22, 4  ;;  %v2679_v25 = vrot.slane %v13936_v32, 1  ;;  %v13937_v54 = vmax.f32 %v11128_v12, 0.0 }
 0x280   : > { %v2677_v3 = vrot.slane %v13934_v49, 2  ;;  %v2657_v6 = vsel %vm2656_vm3, %v2655_v52, %v2654_v5  ;;  %v2670_v30 = vsel %vm2650_vm1, %v2669_v8, %v2668_v2  ;;  %v2683_v55 = vrot.slane %v13938_v38, 6 }
 0x281   : > { %v2681_v1 = vrot.slane %v13937_v54, 7  ;;  %v2660_v0 = vsel %vm2659_vm4, %v2658_v34, %v2657_v6  ;;  %v13939_v35 = vmax.f32 %v11134_v56, 0.0  ;;  %v2672_v11 = vsel %vm2653_vm2, %v2671_v18, %v2670_v30 }
 0x282   : > { %v2663_v57 = vsel %vm2662_vm5, %v2661_v14, %v2660_v0  ;;  %v13940_v51 = vmax.f32 %v11123_v53, 0.0  ;;  %v13941_v12 = vmax.f32 %v11138_v27, 0.0  ;;  %v2674_v8 = vsel %vm2656_vm3, %v2673_v41, %v2672_v11 }
 0x283   : > { %v2685_v52 = vrot.slane %v13939_v35, 5  ;;  %v2666_v34 = vsel %vm2665_vm6, %v2664_v24, %v2663_v57  ;;  %v13942_v56 = vmax.f32 %v11141_v45, 0.0  ;;  %v2676_v14 = vsel %vm2659_vm4, %v2675_v15, %v2674_v8 }
 0x284   : > { %v2682_v5 = vsel %vm2647_vm0, %v2681_v1, %v13940_v51  ;;  %v2687_v22 = vrot.slane %v13941_v12, 4  ;;  %v13943_v53 = vmax.f32 %v11144_v47, 0.0  ;;  %v13944_v6 = vmax.f32 %v11147_v40, 0.0  ;;  %2775 = vst [vmem:[%s11447_s17] sm:$0xff] %v2666_v34 }
 0x285   : > { %v2684_v19 = vsel %vm2650_vm1, %v2683_v55, %v2682_v5  ;;  %v2689_v4 = vrot.slane %v13942_v56, 3  ;;  %v2678_v24 = vsel %vm2662_vm5, %v2677_v3, %v2676_v14  ;;  %v13945_v41 = vmax.f32 %v11156_v10, 0.0 }
 0x286   : > { %v2686_v18 = vsel %vm2653_vm2, %v2685_v52, %v2684_v19  ;;  %v2691_v49 = vrot.slane %v13943_v53, 2  ;;  %v2693_v27 = vrot.slane %v13944_v6, 1  ;;  %v13946_v7 = vmax.f32 %v11161_v42, 0.0 }
 0x287   : > { %v2688_v45 = vsel %vm2656_vm3, %v2687_v22, %v2686_v18  ;;  %v2695_v15 = vrot.slane %v13945_v41, 7  ;;  %v2680_v47 = vsel %vm2665_vm6, %v2679_v25, %v2678_v24  ;;  %v13947_v32 = vmax.f32 %v11164_v58, 0.0 }
 0x288   : > { %v2697_v2 = vrot.slane %v13946_v7, 6  ;;  %v2690_v40 = vsel %vm2659_vm4, %v2689_v4, %v2688_v45  ;;  %v13948_v1 = vmax.f32 %v11168_v50, 0.0  ;;  %v13949_v30 = vmax.f32 %v11151_v39, 0.0  ;;  %2776 = vst [vmem:[%s11447_s17 + $0x8] sm:$0xff] %v2680_v47 }
 0x289   : > { %v2699_v54 = vrot.slane %v13947_v32, 5  ;;  %v2692_v3 = vsel %vm2662_vm5, %v2691_v49, %v2690_v40  ;;  %v13950_v42 = vmax.f32 %v11171_v48, 0.0  ;;  %v13951_v25 = vmax.f32 %v11174_v21, 0.0 }
 0x28a   : > { %v2701_v0 = vrot.slane %v13948_v1, 4  ;;  %v2696_v10 = vsel %vm2647_vm0, %v2695_v15, %v13949_v30  ;;  %v2694_v58 = vsel %vm2665_vm6, %v2693_v27, %v2692_v3  ;;  %v13952_v50 = vmax.f32 %v11177_v28, 0.0  ;;  %v13965_v15 = vld [vmem:[#allocation20_spill] sm:$0xff] }
 0x28b   : > { %v2703_v38 = vrot.slane %v13950_v42, 3  ;;  %v2705_v55 = vrot.slane %v13951_v25, 2  ;;  %v2698_v35 = vsel %vm2650_vm1, %v2697_v2, %v2696_v10  ;;  %v13953_v57 = vmax.f32 %v11186_v26, 0.0  ;;  %2777 = vst [vmem:[%s11447_s17 + $0x10] sm:$0xff] %v2694_v58  ;;  %v13975_v58 = vld [vmem:[#allocation48_spill] sm:$0xff] }
 0x28c   : > { %v2707_v52 = vrot.slane %v13952_v50, 1  ;;  %v2700_v39 = vsel %vm2653_vm2, %v2699_v54, %v2698_v35  ;;  %v13954_v51 = vmax.f32 %v11191_v23, 0.0  ;;  %v13955_v5 = vmax.f32 %v11196_v13, 0.0  ;;  %v13969_v54 = vld [vmem:[#allocation35_spill] sm:$0xff] }
 0x28d   : > { %v2709_v11 = vrot.slane %v13953_v57, 7  ;;  %v13956_v12 = vmax.f32 %v11200_v46, 0.0  ;;  %v2702_v34 = vsel %vm2656_vm3, %v2701_v0, %v2700_v39  ;;  %v13957_v28 = vmax.f32 %v11181_v63, 0.0  ;;  %v13971_v0 = vld [vmem:[#allocation53_spill] sm:$0xff] }
 0x28e   : > { %v2711_v48 = vrot.slane %v13954_v51, 6  ;;  %v2713_v21 = vrot.slane %v13955_v5, 5  ;;  %v13958_v26 = vmax.f32 %v11203_v44, 0.0  ;;  %v13959_v56 = vmax.f32 %v11206_v37, 0.0  ;;  %v13962_v44 = vld [vmem:[#allocation47_spill] sm:$0xff] }
 0x28f   : > { %v2715_v22 = vrot.slane %v13956_v12, 4  ;;  %v2710_v8 = vsel %vm2647_vm0, %v2709_v11, %v13957_v28  ;;  %v2704_v4 = vsel %vm2659_vm4, %v2703_v38, %v2702_v34  ;;  %v13960_v46 = vmax.f32 %v11209_v16, 0.0  ;;  %v13973_v38 = vld [vmem:[#allocation57_spill] sm:$0xff]  ;;  %v13977_v11 = vld [vmem:[#allocation43_spill] sm:$0xff] }
 0x290   : > { %v2717_v19 = vrot.slane %v13958_v26, 3  ;;  %v2719_v23 = vrot.slane %v13959_v56, 2  ;;  %v2712_v13 = vsel %vm2650_vm1, %v2711_v48, %v2710_v8  ;;  %v13961_v18 = vmax.f32 %v11218_v9, 0.0  ;;  %v13967_v9 = vld [vmem:[#allocation54_spill] sm:$0xff]  ;;  %v13979_v48 = vld [vmem:[#allocation31_spill] sm:$0xff] }
 0x291   : > { %v2721_v14 = vrot.slane %v13960_v46, 1  ;;  %v2706_v63 = vsel %vm2662_vm5, %v2705_v55, %v2704_v4  ;;  %v2714_v49 = vsel %vm2653_vm2, %v2713_v21, %v2712_v13  ;;  %v13963_v6 = vmax.f32 %v13962_v44, 0.0  ;;  %v13985_v13 = vld [vmem:[#allocation24_spill] sm:$0xff] }
 0x292   : > { %v2723_v53 = vrot.slane %v13961_v18, 7  ;;  %v13964_v37 = vmax.f32 %v11228_v61, 0.0  ;;  %v2708_v45 = vsel %vm2665_vm6, %v2707_v52, %v2706_v63  ;;  %v2716_v41 = vsel %vm2656_vm3, %v2715_v22, %v2714_v49  ;;  %v13981_v22 = vld [vmem:[#allocation30_spill] sm:$0xff] }
 0x293   : > { %v2725_v27 = vrot.slane %v13963_v6, 6  ;;  %v13966_v16 = vmax.f32 %v13965_v15, 0.0  ;;  %v13968_v2 = vmax.f32 %v13967_v9, 0.0  ;;  %v2718_v40 = vsel %vm2659_vm4, %v2717_v19, %v2716_v41  ;;  %2778 = vst [vmem:[%s11447_s17 + $0x18] sm:$0xff] %v2708_v45  ;;  %v13992_v15 = vld [vmem:[#allocation16_spill] sm:$0xff] }
 0x294   : > { %v2727_v24 = vrot.slane %v13964_v37, 5  ;;  %v13970_v1 = vmax.f32 %v13969_v54, 0.0  ;;  %v13972_v3 = vmax.f32 %v13971_v0, 0.0  ;;  %v2720_v10 = vsel %vm2662_vm5, %v2719_v23, %v2718_v40 }
 0x295   : > { %v2724_v7 = vsel %vm2647_vm0, %v2723_v53, %v13966_v16  ;;  %v2729_v47 = vrot.slane %v13968_v2, 4  ;;  %v13974_v25 = vmax.f32 %v13973_v38, 0.0  ;;  %v13976_v35 = vmax.f32 %v13975_v58, 0.0 }
 0x296   : > { %v2726_v32 = vsel %vm2650_vm1, %v2725_v27, %v2724_v7  ;;  %v2731_v61 = vrot.slane %v13970_v1, 3  ;;  %v2733_v30 = vrot.slane %v13972_v3, 2  ;;  %v2722_v52 = vsel %vm2665_vm6, %v2721_v14, %v2720_v10 }
 0x297   : > { %v2728_v42 = vsel %vm2653_vm2, %v2727_v24, %v2726_v32  ;;  %v2735_v55 = vrot.slane %v13974_v25, 1  ;;  %v2737_v50 = vrot.slane %v13976_v35, 7  ;;  %v13978_v39 = vmax.f32 %v13977_v11, 0.0  ;;  %2779 = vst [vmem:[%s11447_s17 + $0x20] sm:$0xff] %v2722_v52 }
 0x298   : > { %v2730_v57 = vsel %vm2656_vm3, %v2729_v47, %v2728_v42  ;;  %v13980_v5 = vmax.f32 %v13979_v48, 0.0  ;;  %v13982_v34 = vmax.f32 %v13981_v22, 0.0  ;;  %v13983_v8 = vmax.f32 %v13911_v60, 0.0 }
 0x299   : > { %v2739_v51 = vrot.slane %v13978_v39, 6  ;;  %v2732_v12 = vsel %vm2659_vm4, %v2731_v61, %v2730_v57  ;;  %v13984_v19 = vmax.f32 %v13912_v43, 0.0  ;;  %v13986_v46 = vmax.f32 %v13985_v13, 0.0 }
 0x29a   : > { %v2741_v21 = vrot.slane %v13980_v5, 5  ;;  %v2738_v28 = vsel %vm2647_vm0, %v2737_v50, %v13982_v34  ;;  %v2743_v26 = vrot.slane %v13983_v8, 4  ;;  %v2734_v23 = vsel %vm2662_vm5, %v2733_v30, %v2732_v12 }
 0x29b   : > { %v2745_v56 = vrot.slane %v13984_v19, 3  ;;  %v2740_v4 = vsel %vm2650_vm1, %v2739_v51, %v2738_v28  ;;  %v2747_v14 = vrot.slane %v13986_v46, 2  ;;  %v13987_v18 = vmax.f32 %v13913_v62, 0.0 }
 0x29c   : > { %v2736_v63 = vsel %vm2665_vm6, %v2735_v55, %v2734_v23  ;;  %v2742_v49 = vsel %vm2653_vm2, %v2741_v21, %v2740_v4  ;;  %v13988_v60 = vmax.f32 %v13915_v36, 0.0  ;;  %v13989_v43 = vmax.f32 %v13916_v59, 0.0 }
 0x29d   : > { %v2749_v53 = vrot.slane %v13987_v18, 1  ;;  %v2744_v27 = vsel %vm2656_vm3, %v2743_v26, %v2742_v49  ;;  %v13990_v37 = vmax.f32 %v13917_v29, 0.0  ;;  %v13991_v45 = vmax.f32 %v13918_v17, 0.0  ;;  %2780 = vst [vmem:[%s11447_s17 + $0x28] sm:$0xff] %v2736_v63 }
 0x29e   : > { %v2751_v44 = vrot.slane %v13988_v60, 7  ;;  %v2753_v6 = vrot.slane %v13989_v43, 6  ;;  %v2746_v41 = vsel %vm2659_vm4, %v2745_v56, %v2744_v27  ;;  %v13993_v16 = vmax.f32 %v13992_v15, 0.0 }
 0x29f   : > { %v2755_v24 = vrot.slane %v13990_v37, 5  ;;  %v2757_v62 = vrot.slane %v13991_v45, 4  ;;  %v13994_v59 = vmax.f32 %v13919_v33, 0.0  ;;  %v2748_v9 = vsel %vm2662_vm5, %v2747_v14, %v2746_v41 }
 0x2a0   : > { %v2752_v36 = vsel %vm2647_vm0, %v2751_v44, %v13993_v16  ;;  %v13995_v29 = vmax.f32 %v13920_v20, 0.0  ;;  %v2750_v17 = vsel %vm2665_vm6, %v2749_v53, %v2748_v9  ;;  %v13996_v32 = vmax.f32 %v11317_v31, 0.0 }
 0x2a1   : > { %v2759_v7 = vrot.slane %v13994_v59, 3  ;;  %v2754_v2 = vsel %vm2650_vm1, %v2753_v6, %v2752_v36  ;;  %2781 = vst [vmem:[%s11447_s17 + $0x30] sm:$0xff] %v2750_v17  ;;  %123 = sbr.rel (!%p121_p6) target bundleno = 68 (0x44), region = 103 }
 0x2a2   : > { %v2761_v47 = vrot.slane %v13995_v29, 2  ;;  %v2756_v40 = vsel %vm2653_vm2, %v2755_v24, %v2754_v2  ;;  %v2763_v54 = vrot.slane %v13996_v32, 1 }
 0x2a3   : > { %v2758_v1 = vsel %vm2656_vm3, %v2757_v62, %v2756_v40 }
 0x2a4   : > { %v2760_v33 = vsel %vm2659_vm4, %v2759_v7, %v2758_v1 }
 0x2a5   : > { %v2762_v61 = vsel %vm2662_vm5, %v2761_v47, %v2760_v33 }
 0x2a6   : > { %v2764_v0 = vsel %vm2665_vm6, %v2763_v54, %v2762_v61 }
 0x2a7   : > { %2782 = vst [vmem:[%s11447_s17 + $0x38] sm:$0xff] %v2764_v0 }
 0x2a8 LB: > { %s11587_s14 = smul.u32 54, %s5272_s13  ;;  %s5272_s13 = sphi %s11581_s13, %s2788_s13  }
 0x2aa   : > { %s2798_s15 = sld [smem:[#allocation8 + %s11587_s14]]  ;;  %s2812_s22 = sadd.s32 3, %s11587_s14 }
 0x2ab   : > { %s2813_s25 = sld [smem:[#allocation8 + %s2812_s22]]  ;;  %s2827_s4 = sadd.s32 6, %s11587_s14 }
 0x2ac   : > { %s2828_s16 = sld [smem:[#allocation8 + %s2827_s4]]  ;;  %s2850_s0 = sadd.s32 1, %s11587_s14 }
 0x2ad   : > { %s2865_s19 = sadd.s32 4, %s11587_s14  ;;  %s11594_s20 = sld [smem:[#allocation8 + %s2850_s0]] }
 0x2ae   : > { %v2789_v20 = vld [vmem:[#allocation2] sm:$0x3f]  ;;  %v2790_v31 = vld [vmem:[#allocation2 + $0x8] sm:$0x3f]  ;;  %v2791_v3 = vld [vmem:[#allocation2 + $0x10] sm:$0x3f] }
 0x2af   : > { %v2792_v30 = vld [vmem:[#allocation2 + $0x18] sm:$0x3f]  ;;  %v2793_v10 = vld [vmem:[#allocation2 + $0x20] sm:$0x3f]  ;;  %v2794_v42 = vld [vmem:[#allocation2 + $0x28] sm:$0x3f] }
 0x2b0   : > { %v2799_v38 = vstv %s2798_s15  ;;  %s11596_s21 = sld [smem:[#allocation8 + %s2865_s19]]  ;;  %v2795_v25 = vld [vmem:[#allocation2 + $0x30] sm:$0x3f]  ;;  %s2880_s23 = sadd.s32 7, %s11587_s14  ;;  %v2796_v12 = vld [vmem:[#allocation2 + $0x38] sm:$0x3f] }
 0x2b1   : > { %v2800_v55 = vmul.f32 %v2799_v38, %v2789_v20  ;;  %v2801_v58 = vmul.f32 %v2799_v38, %v2790_v31  ;;  %v2802_v35 = vmul.f32 %v2799_v38, %v2791_v3  ;;  %v2803_v50 = vmul.f32 %v2799_v38, %v2792_v30  ;;  %s2903_s29 = sadd.s32 2, %s11587_s14  ;;  %v2842_v4 = vld [vmem:[#allocation2 + $0x1] sm:$0x3f]  ;;  %v2843_v53 = vld [vmem:[#allocation2 + $0x9] sm:$0x3f]  ;;  %s11600_s3 = sld [smem:[#allocation8 + %s2880_s23]] }
 0x2b2   : > { %v2804_v52 = vmul.f32 %v2799_v38, %v2793_v10  ;;  %v2805_v57 = vmul.f32 %v2799_v38, %v2794_v42  ;;  %v2814_v11 = vstv %s2813_s25  ;;  %v2829_v39 = vstv %s2828_s16  ;;  %v2844_v63 = vld [vmem:[#allocation2 + $0x11] sm:$0x3f]  ;;  %s11602_s24 = sld [smem:[#allocation8 + %s2903_s29]]  ;;  %v2845_v6 = vld [vmem:[#allocation2 + $0x19] sm:$0x3f]  ;;  %s2918_s18 = sadd.s32 5, %s11587_s14 }
 0x2b3   : > { %v2815_v51 = vmul.f32 %v2814_v11, %v2790_v31  ;;  %v2816_v48 = vmul.f32 %v2814_v11, %v2791_v3  ;;  %v2817_v5 = vmul.f32 %v2814_v11, %v2792_v30  ;;  %v2818_v21 = vmul.f32 %v2814_v11, %v2793_v10  ;;  %v2846_v27 = vld [vmem:[#allocation2 + $0x21] sm:$0x3f]  ;;  %v2847_v37 = vld [vmem:[#allocation2 + $0x29] sm:$0x3f]  ;;  %v2848_v7 = vld [vmem:[#allocation2 + $0x31] sm:$0x3f] }
 0x2b4   : > { %v2819_v22 = vmul.f32 %v2814_v11, %v2794_v42  ;;  %v2820_v34 = vmul.f32 %v2814_v11, %v2795_v25  ;;  %v2830_v28 = vmul.f32 %v2829_v39, %v2791_v3  ;;  %v2831_v8 = vmul.f32 %v2829_v39, %v2792_v30  ;;  %s2933_s28 = sadd.s32 8, %s11587_s14  ;;  %s11608_s2 = sld [smem:[#allocation8 + %s2918_s18]] }
 0x2b5   : > { %v2821_v26 = vadd.f32 %v2815_v51, %v2800_v55  ;;  %v2822_v19 = vadd.f32 %v2816_v48, %v2801_v58  ;;  %v2823_v56 = vadd.f32 %v2817_v5, %v2802_v35  ;;  %v2824_v23 = vadd.f32 %v2818_v21, %v2803_v50  ;;  %s11610_s1 = sld [smem:[#allocation8 + %s2933_s28]]  ;;  %v2895_v55 = vld [vmem:[#allocation2 + $0x2] sm:$0x3f]  ;;  %v2896_v58 = vld [vmem:[#allocation2 + $0xa] sm:$0x3f]  ;;  %s2957_s26 = sadd.s32 9, %s11587_s14 }
 0x2b6   : > { %v2825_v13 = vadd.f32 %v2819_v22, %v2804_v52  ;;  %v2826_v46 = vadd.f32 %v2820_v34, %v2805_v57  ;;  %v2832_v14 = vmul.f32 %v2829_v39, %v2793_v10  ;;  %v2833_v18 = vmul.f32 %v2829_v39, %v2794_v42  ;;  %v2849_v10 = vld [vmem:[#allocation2 + $0x39] sm:$0x3f]  ;;  %v2897_v21 = vld [vmem:[#allocation2 + $0x12] sm:$0x3f]  ;;  %s2972_s27 = sadd.s32 12, %s11587_s14  ;;  %s11616_s30 = sld [smem:[#allocation8 + %s2957_s26]] }
 0x2b7   : > { %v2834_v49 = vmul.f32 %v2829_v39, %v2795_v25  ;;  %v2835_v60 = vmul.f32 %v2829_v39, %v2796_v12  ;;  %v2836_v44 = vadd.f32 %v2830_v28, %v2821_v26  ;;  %v2837_v43 = vadd.f32 %v2831_v8, %v2822_v19  ;;  %v2898_v12 = vld [vmem:[#allocation2 + $0x1a] sm:$0x3f]  ;;  %v2899_v28 = vld [vmem:[#allocation2 + $0x22] sm:$0x3f]  ;;  %v2900_v8 = vld [vmem:[#allocation2 + $0x2a] sm:$0x3f] }
 0x2b8   : > { %v2838_v24 = vadd.f32 %v2832_v14, %v2823_v56  ;;  %v2839_v45 = vadd.f32 %v2833_v18, %v2824_v23  ;;  %v2852_v62 = vstv %s11594_s20  ;;  %v2867_v41 = vstv %s11596_s21  ;;  %s11618_s12 = sld [smem:[#allocation8 + %s2972_s27]]  ;;  %s2987_s17 = sadd.s32 15, %s11587_s14 }
 0x2b9   : > { %v2840_v15 = vadd.f32 %v2834_v49, %v2825_v13  ;;  %v2841_v16 = vadd.f32 %v2835_v60, %v2826_v46  ;;  %v2853_v36 = vmul.f32 %v2852_v62, %v2842_v4  ;;  %v2854_v59 = vmul.f32 %v2852_v62, %v2843_v53  ;;  %s3010_s15 = sadd.s32 10, %s11587_s14  ;;  %s11624_s22 = sld [smem:[#allocation8 + %s2987_s17]] }
 0x2ba   : > { %v2855_v9 = vmul.f32 %v2852_v62, %v2844_v63  ;;  %v2856_v2 = vmul.f32 %v2852_v62, %v2845_v6  ;;  %v2857_v29 = vmul.f32 %v2852_v62, %v2846_v27  ;;  %v2858_v47 = vmul.f32 %v2852_v62, %v2847_v37  ;;  %s11626_s25 = sld [smem:[#allocation8 + %s3010_s15]]  ;;  %s3025_s4 = sadd.s32 13, %s11587_s14 }
 0x2bb   : > { %v2859_v17 = vadd.f32 %v2853_v36, %v2836_v44  ;;  %v2860_v40 = vadd.f32 %v2854_v59, %v2837_v43  ;;  %v2868_v32 = vmul.f32 %v2867_v41, %v2843_v53  ;;  %v2869_v54 = vmul.f32 %v2867_v41, %v2844_v63  ;;  %s3040_s16 = sadd.s32 16, %s11587_s14  ;;  %s11632_s0 = sld [smem:[#allocation8 + %s3025_s4]] }
 0x2bc   : > { %v2861_v1 = vadd.f32 %v2855_v9, %v2838_v24  ;;  %v2862_v33 = vadd.f32 %v2856_v2, %v2839_v45  ;;  %v2863_v61 = vadd.f32 %v2857_v29, %v2840_v15  ;;  %v2864_v0 = vadd.f32 %v2858_v47, %v2841_v16  ;;  %v2902_v16 = vld [vmem:[#allocation2 + $0x3a] sm:$0x3f]  ;;  %s11634_s19 = sld [smem:[#allocation8 + %s3040_s16]]  ;;  %s3063_s20 = sadd.s32 11, %s11587_s14 }
 0x2bd   : > { %v2870_v20 = vmul.f32 %v2867_v41, %v2845_v6  ;;  %v2871_v31 = vmul.f32 %v2867_v41, %v2846_v27  ;;  %v2872_v3 = vmul.f32 %v2867_v41, %v2847_v37  ;;  %v2873_v30 = vmul.f32 %v2867_v41, %v2848_v7  ;;  %s3078_s21 = sadd.s32 14, %s11587_s14  ;;  %s11640_s23 = sld [smem:[#allocation8 + %s3063_s20]] }
 0x2be   : > { %v2874_v42 = vadd.f32 %v2868_v32, %v2859_v17  ;;  %v2875_v38 = vadd.f32 %v2869_v54, %v2860_v40  ;;  %v2882_v25 = vstv %s11600_s3  ;;  %v2905_v35 = vstv %s11602_s24  ;;  %s11642_s29 = sld [smem:[#allocation8 + %s3078_s21]]  ;;  %s3093_s3 = sadd.s32 17, %s11587_s14 }
 0x2bf   : > { %v2876_v50 = vadd.f32 %v2870_v20, %v2861_v1  ;;  %v2877_v52 = vadd.f32 %v2871_v31, %v2862_v33  ;;  %v2878_v57 = vadd.f32 %v2872_v3, %v2863_v61  ;;  %v2879_v11 = vadd.f32 %v2873_v30, %v2864_v0  ;;  %v2949_v33 = vld [vmem:[#allocation2 + $0x40] sm:$0x3f]  ;;  %v2950_v61 = vld [vmem:[#allocation2 + $0x48] sm:$0x3f]  ;;  %v2951_v30 = vld [vmem:[#allocation2 + $0x50] sm:$0x3f] }
 0x2c0   : > { %v2883_v39 = vmul.f32 %v2882_v25, %v2844_v63  ;;  %v2884_v51 = vmul.f32 %v2882_v25, %v2845_v6  ;;  %v2885_v48 = vmul.f32 %v2882_v25, %v2846_v27  ;;  %v2886_v5 = vmul.f32 %v2882_v25, %v2847_v37  ;;  %v2901_v63 = vld [vmem:[#allocation2 + $0x32] sm:$0x3f]  ;;  %s3117_s24 = sadd.s32 18, %s11587_s14  ;;  %s11648_s18 = sld [smem:[#allocation8 + %s3093_s3]] }
 0x2c1   : > { %v2887_v22 = vmul.f32 %v2882_v25, %v2848_v7  ;;  %v2888_v34 = vmul.f32 %v2882_v25, %v2849_v10  ;;  %v2906_v26 = vmul.f32 %v2905_v35, %v2895_v55  ;;  %v2907_v19 = vmul.f32 %v2905_v35, %v2896_v58  ;;  %v2952_v10 = vld [vmem:[#allocation2 + $0x58] sm:$0x3f]  ;;  %v2953_v25 = vld [vmem:[#allocation2 + $0x60] sm:$0x3f]  ;;  %v2954_v55 = vld [vmem:[#allocation2 + $0x68] sm:$0x3f] }
 0x2c2   : > { %v2889_v56 = vadd.f32 %v2883_v39, %v2874_v42  ;;  %v2890_v23 = vadd.f32 %v2884_v51, %v2875_v38  ;;  %v2891_v4 = vadd.f32 %v2885_v48, %v2876_v50  ;;  %v2892_v13 = vadd.f32 %v2886_v5, %v2877_v52  ;;  %s11650_s28 = sld [smem:[#allocation8 + %s3117_s24]] }
 0x2c3   : > { %v2893_v46 = vadd.f32 %v2887_v22, %v2878_v57  ;;  %v2894_v14 = vadd.f32 %v2888_v34, %v2879_v11  ;;  %v2908_v18 = vmul.f32 %v2905_v35, %v2897_v21  ;;  %v2909_v53 = vmul.f32 %v2905_v35, %v2898_v12 }
 0x2c4   : > { %v2910_v49 = vmul.f32 %v2905_v35, %v2899_v28  ;;  %v2911_v60 = vmul.f32 %v2905_v35, %v2900_v8  ;;  %v2912_v44 = vadd.f32 %v2906_v26, %v2889_v56  ;;  %v2913_v43 = vadd.f32 %v2907_v19, %v2890_v23 }
 0x2c5   : > { %v2914_v6 = vadd.f32 %v2908_v18, %v2891_v4  ;;  %v2915_v27 = vadd.f32 %v2909_v53, %v2892_v13  ;;  %v2920_v37 = vstv %s11608_s2  ;;  %v2935_v24 = vstv %s11610_s1  ;;  %s3132_s2 = sadd.s32 21, %s11587_s14  ;;  %s3147_s1 = sadd.s32 24, %s11587_s14 }
 0x2c6   : > { %v2916_v45 = vadd.f32 %v2910_v49, %v2893_v46  ;;  %v2917_v62 = vadd.f32 %v2911_v60, %v2894_v14  ;;  %v2921_v41 = vmul.f32 %v2920_v37, %v2896_v58  ;;  %v2922_v15 = vmul.f32 %v2920_v37, %v2897_v21  ;;  %v2956_v14 = vld [vmem:[#allocation2 + $0x78] sm:$0x3f]  ;;  %s11656_s26 = sld [smem:[#allocation8 + %s3132_s2]] }
 0x2c7   : > { %v2923_v36 = vmul.f32 %v2920_v37, %v2898_v12  ;;  %v2924_v59 = vmul.f32 %v2920_v37, %v2899_v28  ;;  %v2925_v7 = vmul.f32 %v2920_v37, %v2900_v8  ;;  %v2926_v9 = vmul.f32 %v2920_v37, %v2901_v63  ;;  %s11658_s27 = sld [smem:[#allocation8 + %s3147_s1]] }
 0x2c8   : > { %v2927_v2 = vadd.f32 %v2921_v41, %v2912_v44  ;;  %v2928_v29 = vadd.f32 %v2922_v15, %v2913_v43  ;;  %v2936_v47 = vmul.f32 %v2935_v24, %v2897_v21  ;;  %v2937_v17 = vmul.f32 %v2935_v24, %v2898_v12  ;;  %v2955_v21 = vld [vmem:[#allocation2 + $0x70] sm:$0x3f] }
 0x2c9   : > { %v2929_v40 = vadd.f32 %v2923_v36, %v2914_v6  ;;  %v2930_v32 = vadd.f32 %v2924_v59, %v2915_v27  ;;  %v2931_v54 = vadd.f32 %v2925_v7, %v2916_v45  ;;  %v2932_v1 = vadd.f32 %v2926_v9, %v2917_v62  ;;  %v3002_v6 = vld [vmem:[#allocation2 + $0x41] sm:$0x3f]  ;;  %v3003_v27 = vld [vmem:[#allocation2 + $0x49] sm:$0x3f]  ;;  %v3004_v15 = vld [vmem:[#allocation2 + $0x51] sm:$0x3f] }
 0x2ca   : > { %v2938_v0 = vmul.f32 %v2935_v24, %v2899_v28  ;;  %v2939_v20 = vmul.f32 %v2935_v24, %v2900_v8  ;;  %v2940_v31 = vmul.f32 %v2935_v24, %v2901_v63  ;;  %v2941_v3 = vmul.f32 %v2935_v24, %v2902_v16  ;;  %v3005_v16 = vld [vmem:[#allocation2 + $0x59] sm:$0x3f] }
 0x2cb   : > { %v2942_v42 = vadd.f32 %v2936_v47, %v2927_v2  ;;  %v2943_v38 = vadd.f32 %v2937_v17, %v2928_v29  ;;  %v2959_v58 = vstv %s11616_s30  ;;  %v2974_v35 = vstv %s11618_s12  ;;  %v3006_v2 = vld [vmem:[#allocation2 + $0x61] sm:$0x3f]  ;;  %v3007_v29 = vld [vmem:[#allocation2 + $0x69] sm:$0x3f]  ;;  %s3170_s30 = sadd.s32 19, %s11587_s14  ;;  %s3185_s12 = sadd.s32 22, %s11587_s14 }
 0x2cc   : > { %v2944_v50 = vadd.f32 %v2938_v0, %v2929_v40  ;;  %v2945_v52 = vadd.f32 %v2939_v20, %v2930_v32  ;;  %v2946_v57 = vadd.f32 %v2940_v31, %v2931_v54  ;;  %v2947_v11 = vadd.f32 %v2941_v3, %v2932_v1  ;;  %s11664_s17 = sld [smem:[#allocation8 + %s3170_s30]] }
 0x2cd   : > { %v2960_v39 = vmul.f32 %v2959_v58, %v2949_v33  ;;  %v2961_v51 = vmul.f32 %v2959_v58, %v2950_v61  ;;  %v2962_v48 = vmul.f32 %v2959_v58, %v2951_v30  ;;  %v2963_v5 = vmul.f32 %v2959_v58, %v2952_v10  ;;  %s11666_s15 = sld [smem:[#allocation8 + %s3185_s12]] }
 0x2ce   : > { %v2964_v12 = vmul.f32 %v2959_v58, %v2953_v25  ;;  %v2965_v22 = vmul.f32 %v2959_v58, %v2954_v55  ;;  %v2975_v34 = vmul.f32 %v2974_v35, %v2950_v61  ;;  %v2976_v28 = vmul.f32 %v2974_v35, %v2951_v30 }
 0x2cf   : > { %v2966_v8 = vadd.f32 %v2960_v39, %v2942_v42  ;;  %v2967_v26 = vadd.f32 %v2961_v51, %v2943_v38  ;;  %v2968_v19 = vadd.f32 %v2962_v48, %v2944_v50  ;;  %v2969_v56 = vadd.f32 %v2963_v5, %v2945_v52  ;;  %v3009_v51 = vld [vmem:[#allocation2 + $0x79] sm:$0x3f] }
 0x2d0   : > { %v2970_v23 = vadd.f32 %v2964_v12, %v2946_v57  ;;  %v2971_v4 = vadd.f32 %v2965_v22, %v2947_v11  ;;  %v2977_v13 = vmul.f32 %v2974_v35, %v2952_v10  ;;  %v2978_v46 = vmul.f32 %v2974_v35, %v2953_v25 }
 0x2d1   : > { %v2979_v18 = vmul.f32 %v2974_v35, %v2954_v55  ;;  %v2980_v53 = vmul.f32 %v2974_v35, %v2955_v21  ;;  %v2981_v63 = vadd.f32 %v2975_v34, %v2966_v8  ;;  %v2982_v49 = vadd.f32 %v2976_v28, %v2967_v26  ;;  %v3055_v26 = vld [vmem:[#allocation2 + $0x42] sm:$0x3f] }
 0x2d2   : > { %v2983_v60 = vadd.f32 %v2977_v13, %v2968_v19  ;;  %v2984_v44 = vadd.f32 %v2978_v46, %v2969_v56  ;;  %v2989_v43 = vstv %s11624_s22  ;;  %v3012_v37 = vstv %s11626_s25  ;;  %v3056_v13 = vld [vmem:[#allocation2 + $0x4a] sm:$0x3f]  ;;  %v3057_v46 = vld [vmem:[#allocation2 + $0x52] sm:$0x3f]  ;;  %s3200_s22 = sadd.s32 25, %s11587_s14  ;;  %s3223_s25 = sadd.s32 20, %s11587_s14 }
 0x2d3   : > { %v2985_v24 = vadd.f32 %v2979_v18, %v2970_v23  ;;  %v2986_v45 = vadd.f32 %v2980_v53, %v2971_v4  ;;  %v2990_v62 = vmul.f32 %v2989_v43, %v2951_v30  ;;  %v2991_v41 = vmul.f32 %v2989_v43, %v2952_v10  ;;  %v3008_v30 = vld [vmem:[#allocation2 + $0x71] sm:$0x3f]  ;;  %s11672_s4 = sld [smem:[#allocation8 + %s3200_s22]] }
 0x2d4   : > { %v2992_v36 = vmul.f32 %v2989_v43, %v2953_v25  ;;  %v2993_v59 = vmul.f32 %v2989_v43, %v2954_v55  ;;  %v2994_v7 = vmul.f32 %v2989_v43, %v2955_v21  ;;  %v2995_v9 = vmul.f32 %v2989_v43, %v2956_v14  ;;  %s11674_s16 = sld [smem:[#allocation8 + %s3223_s25]] }
 0x2d5   : > { %v2996_v47 = vadd.f32 %v2990_v62, %v2981_v63  ;;  %v2997_v17 = vadd.f32 %v2991_v41, %v2982_v49  ;;  %v3013_v40 = vmul.f32 %v3012_v37, %v3002_v6  ;;  %v3014_v32 = vmul.f32 %v3012_v37, %v3003_v27  ;;  %v3058_v49 = vld [vmem:[#allocation2 + $0x5a] sm:$0x3f] }
 0x2d6   : > { %v2998_v54 = vadd.f32 %v2992_v36, %v2983_v60  ;;  %v2999_v1 = vadd.f32 %v2993_v59, %v2984_v44  ;;  %v3000_v33 = vadd.f32 %v2994_v7, %v2985_v24  ;;  %v3001_v61 = vadd.f32 %v2995_v9, %v2986_v45  ;;  %v3059_v60 = vld [vmem:[#allocation2 + $0x62] sm:$0x3f]  ;;  %v3060_v44 = vld [vmem:[#allocation2 + $0x6a] sm:$0x3f] }
 0x2d7   : > { %v3015_v0 = vmul.f32 %v3012_v37, %v3004_v15  ;;  %v3016_v20 = vmul.f32 %v3012_v37, %v3005_v16  ;;  %v3017_v31 = vmul.f32 %v3012_v37, %v3006_v2  ;;  %v3018_v3 = vmul.f32 %v3012_v37, %v3007_v29 }
 0x2d8   : > { %v3019_v10 = vadd.f32 %v3013_v40, %v2996_v47  ;;  %v3020_v42 = vadd.f32 %v3014_v32, %v2997_v17  ;;  %v3027_v38 = vstv %s11632_s0  ;;  %v3042_v25 = vstv %s11634_s19  ;;  %s3238_s0 = sadd.s32 23, %s11587_s14  ;;  %s3253_s19 = sadd.s32 26, %s11587_s14 }
 0x2d9   : > { %v3021_v55 = vadd.f32 %v3015_v0, %v2998_v54  ;;  %v3022_v58 = vadd.f32 %v3016_v20, %v2999_v1  ;;  %v3023_v35 = vadd.f32 %v3017_v31, %v3000_v33  ;;  %v3024_v50 = vadd.f32 %v3018_v3, %v3001_v61  ;;  %v3062_v20 = vld [vmem:[#allocation2 + $0x7a] sm:$0x3f]  ;;  %s11680_s20 = sld [smem:[#allocation8 + %s3238_s0]] }
 0x2da   : > { %v3028_v52 = vmul.f32 %v3027_v38, %v3003_v27  ;;  %v3029_v57 = vmul.f32 %v3027_v38, %v3004_v15  ;;  %v3030_v11 = vmul.f32 %v3027_v38, %v3005_v16  ;;  %v3031_v39 = vmul.f32 %v3027_v38, %v3006_v2  ;;  %s11682_s21 = sld [smem:[#allocation8 + %s3253_s19]] }
 0x2db   : > { %v3032_v48 = vmul.f32 %v3027_v38, %v3007_v29  ;;  %v3033_v5 = vmul.f32 %v3027_v38, %v3008_v30  ;;  %v3043_v21 = vmul.f32 %v3042_v25, %v3004_v15  ;;  %v3044_v12 = vmul.f32 %v3042_v25, %v3005_v16  ;;  %v3061_v15 = vld [vmem:[#allocation2 + $0x72] sm:$0x3f] }
 0x2dc   : > { %v3034_v22 = vadd.f32 %v3028_v52, %v3019_v10  ;;  %v3035_v34 = vadd.f32 %v3029_v57, %v3020_v42  ;;  %v3036_v28 = vadd.f32 %v3030_v11, %v3021_v55  ;;  %v3037_v8 = vadd.f32 %v3031_v39, %v3022_v58  ;;  %v3109_v10 = vld [vmem:[#allocation2 + $0x80] sm:$0x3f]  ;;  %v3110_v42 = vld [vmem:[#allocation2 + $0x88] sm:$0x3f]  ;;  %v3111_v39 = vld [vmem:[#allocation2 + $0x90] sm:$0x3f] }
 0x2dd   : > { %v3038_v19 = vadd.f32 %v3032_v48, %v3023_v35  ;;  %v3039_v56 = vadd.f32 %v3033_v5, %v3024_v50  ;;  %v3045_v23 = vmul.f32 %v3042_v25, %v3006_v2  ;;  %v3046_v4 = vmul.f32 %v3042_v25, %v3007_v29 }
 0x2de   : > { %v3047_v14 = vmul.f32 %v3042_v25, %v3008_v30  ;;  %v3048_v18 = vmul.f32 %v3042_v25, %v3009_v51  ;;  %v3049_v53 = vadd.f32 %v3043_v21, %v3034_v22  ;;  %v3050_v63 = vadd.f32 %v3044_v12, %v3035_v34  ;;  %v3112_v51 = vld [vmem:[#allocation2 + $0x98] sm:$0x3f]  ;;  %v3113_v21 = vld [vmem:[#allocation2 + $0xa0] sm:$0x3f]  ;;  %v3114_v12 = vld [vmem:[#allocation2 + $0xa8] sm:$0x3f] }
 0x2df   : > { %v3051_v43 = vadd.f32 %v3045_v23, %v3036_v28  ;;  %v3052_v6 = vadd.f32 %v3046_v4, %v3037_v8  ;;  %v3065_v27 = vstv %s11640_s23  ;;  %v3080_v37 = vstv %s11642_s29  ;;  %s3277_s23 = sadd.s32 27, %s11587_s14  ;;  %s3292_s29 = sadd.s32 30, %s11587_s14 }
 0x2e0   : > { %v3053_v24 = vadd.f32 %v3047_v14, %v3038_v19  ;;  %v3054_v45 = vadd.f32 %v3048_v18, %v3039_v56  ;;  %v3066_v62 = vmul.f32 %v3065_v27, %v3055_v26  ;;  %v3067_v41 = vmul.f32 %v3065_v27, %v3056_v13  ;;  %s11688_s3 = sld [smem:[#allocation8 + %s3277_s23]] }
 0x2e1   : > { %v3068_v16 = vmul.f32 %v3065_v27, %v3057_v46  ;;  %v3069_v36 = vmul.f32 %v3065_v27, %v3058_v49  ;;  %v3070_v59 = vmul.f32 %v3065_v27, %v3059_v60  ;;  %v3071_v7 = vmul.f32 %v3065_v27, %v3060_v44  ;;  %s11690_s24 = sld [smem:[#allocation8 + %s3292_s29]] }
 0x2e2   : > { %v3072_v9 = vadd.f32 %v3066_v62, %v3049_v53  ;;  %v3073_v2 = vadd.f32 %v3067_v41, %v3050_v63  ;;  %v3081_v29 = vmul.f32 %v3080_v37, %v3056_v13  ;;  %v3082_v47 = vmul.f32 %v3080_v37, %v3057_v46 }
 0x2e3   : > { %v3074_v17 = vadd.f32 %v3068_v16, %v3051_v43  ;;  %v3075_v40 = vadd.f32 %v3069_v36, %v3052_v6  ;;  %v3076_v32 = vadd.f32 %v3070_v59, %v3053_v24  ;;  %v3077_v54 = vadd.f32 %v3071_v7, %v3054_v45  ;;  %v3116_v45 = vld [vmem:[#allocation2 + $0xb8] sm:$0x3f] }
 0x2e4   : > { %v3083_v1 = vmul.f32 %v3080_v37, %v3058_v49  ;;  %v3084_v33 = vmul.f32 %v3080_v37, %v3059_v60  ;;  %v3085_v61 = vmul.f32 %v3080_v37, %v3060_v44  ;;  %v3086_v0 = vmul.f32 %v3080_v37, %v3061_v15 }
 0x2e5   : > { %v3087_v31 = vadd.f32 %v3081_v29, %v3072_v9  ;;  %v3088_v3 = vadd.f32 %v3082_v47, %v3073_v2  ;;  %v3095_v30 = vstv %s11648_s18  ;;  %v3119_v38 = vstv %s11650_s28  ;;  %s3307_s18 = sadd.s32 33, %s11587_s14  ;;  %s3330_s28 = sadd.s32 28, %s11587_s14 }
 0x2e6   : > { %v3089_v25 = vadd.f32 %v3083_v1, %v3074_v17  ;;  %v3090_v55 = vadd.f32 %v3084_v33, %v3075_v40  ;;  %v3091_v58 = vadd.f32 %v3085_v61, %v3076_v32  ;;  %v3092_v35 = vadd.f32 %v3086_v0, %v3077_v54  ;;  %v3162_v40 = vld [vmem:[#allocation2 + $0x81] sm:$0x3f]  ;;  %v3163_v32 = vld [vmem:[#allocation2 + $0x89] sm:$0x3f]  ;;  %v3164_v0 = vld [vmem:[#allocation2 + $0x91] sm:$0x3f] }
 0x2e7   : > { %v3096_v50 = vmul.f32 %v3095_v30, %v3057_v46  ;;  %v3097_v52 = vmul.f32 %v3095_v30, %v3058_v49  ;;  %v3098_v57 = vmul.f32 %v3095_v30, %v3059_v60  ;;  %v3099_v11 = vmul.f32 %v3095_v30, %v3060_v44  ;;  %v3115_v46 = vld [vmem:[#allocation2 + $0xb0] sm:$0x3f]  ;;  %s11696_s2 = sld [smem:[#allocation8 + %s3307_s18]] }
 0x2e8   : > { %v3100_v48 = vmul.f32 %v3095_v30, %v3061_v15  ;;  %v3101_v5 = vmul.f32 %v3095_v30, %v3062_v20  ;;  %v3120_v22 = vmul.f32 %v3119_v38, %v3109_v10  ;;  %v3121_v34 = vmul.f32 %v3119_v38, %v3110_v42  ;;  %v3165_v20 = vld [vmem:[#allocation2 + $0x99] sm:$0x3f]  ;;  %v3166_v30 = vld [vmem:[#allocation2 + $0xa1] sm:$0x3f]  ;;  %v3167_v10 = vld [vmem:[#allocation2 + $0xa9] sm:$0x3f] }
 0x2e9   : > { %v3102_v28 = vadd.f32 %v3096_v50, %v3087_v31  ;;  %v3103_v8 = vadd.f32 %v3097_v52, %v3088_v3  ;;  %v3104_v26 = vadd.f32 %v3098_v57, %v3089_v25  ;;  %v3105_v19 = vadd.f32 %v3099_v11, %v3090_v55  ;;  %s11698_s1 = sld [smem:[#allocation8 + %s3330_s28]] }
 0x2ea   : > { %v3106_v56 = vadd.f32 %v3100_v48, %v3091_v58  ;;  %v3107_v23 = vadd.f32 %v3101_v5, %v3092_v35  ;;  %v3122_v4 = vmul.f32 %v3119_v38, %v3111_v39  ;;  %v3123_v13 = vmul.f32 %v3119_v38, %v3112_v51 }
 0x2eb   : > { %v3124_v14 = vmul.f32 %v3119_v38, %v3113_v21  ;;  %v3125_v18 = vmul.f32 %v3119_v38, %v3114_v12  ;;  %v3126_v53 = vadd.f32 %v3120_v22, %v3102_v28  ;;  %v3127_v63 = vadd.f32 %v3121_v34, %v3103_v8 }
 0x2ec   : > { %v3128_v49 = vadd.f32 %v3122_v4, %v3104_v26  ;;  %v3129_v60 = vadd.f32 %v3123_v13, %v3105_v19  ;;  %v3134_v44 = vstv %s11656_s26  ;;  %v3149_v43 = vstv %s11658_s27  ;;  %s3345_s26 = sadd.s32 31, %s11587_s14  ;;  %s3360_s27 = sadd.s32 34, %s11587_s14 }
 0x2ed   : > { %v3130_v6 = vadd.f32 %v3124_v14, %v3106_v56  ;;  %v3131_v27 = vadd.f32 %v3125_v18, %v3107_v23  ;;  %v3135_v37 = vmul.f32 %v3134_v44, %v3110_v42  ;;  %v3136_v24 = vmul.f32 %v3134_v44, %v3111_v39  ;;  %v3169_v23 = vld [vmem:[#allocation2 + $0xb9] sm:$0x3f]  ;;  %s11704_s30 = sld [smem:[#allocation8 + %s3345_s26]] }
 0x2ee   : > { %v3137_v62 = vmul.f32 %v3134_v44, %v3112_v51  ;;  %v3138_v41 = vmul.f32 %v3134_v44, %v3113_v21  ;;  %v3139_v15 = vmul.f32 %v3134_v44, %v3114_v12  ;;  %v3140_v16 = vmul.f32 %v3134_v44, %v3115_v46  ;;  %s11706_s12 = sld [smem:[#allocation8 + %s3360_s27]] }
 0x2ef   : > { %v3141_v36 = vadd.f32 %v3135_v37, %v3126_v53  ;;  %v3142_v59 = vadd.f32 %v3136_v24, %v3127_v63  ;;  %v3150_v7 = vmul.f32 %v3149_v43, %v3111_v39  ;;  %v3151_v9 = vmul.f32 %v3149_v43, %v3112_v51  ;;  %v3168_v39 = vld [vmem:[#allocation2 + $0xb1] sm:$0x3f] }
 0x2f0   : > { %v3143_v2 = vadd.f32 %v3137_v62, %v3128_v49  ;;  %v3144_v29 = vadd.f32 %v3138_v41, %v3129_v60  ;;  %v3145_v47 = vadd.f32 %v3139_v15, %v3130_v6  ;;  %v3146_v17 = vadd.f32 %v3140_v16, %v3131_v27  ;;  %v3215_v49 = vld [vmem:[#allocation2 + $0x82] sm:$0x3f]  ;;  %v3216_v60 = vld [vmem:[#allocation2 + $0x8a] sm:$0x3f]  ;;  %v3217_v24 = vld [vmem:[#allocation2 + $0x92] sm:$0x3f] }
 0x2f1   : > { %v3152_v54 = vmul.f32 %v3149_v43, %v3113_v21  ;;  %v3153_v1 = vmul.f32 %v3149_v43, %v3114_v12  ;;  %v3154_v33 = vmul.f32 %v3149_v43, %v3115_v46  ;;  %v3155_v61 = vmul.f32 %v3149_v43, %v3116_v45  ;;  %v3218_v45 = vld [vmem:[#allocation2 + $0x9a] sm:$0x3f] }
 0x2f2   : > { %v3156_v31 = vadd.f32 %v3150_v7, %v3141_v36  ;;  %v3157_v3 = vadd.f32 %v3151_v9, %v3142_v59  ;;  %v3172_v42 = vstv %s11664_s17  ;;  %v3187_v38 = vstv %s11666_s15  ;;  %v3219_v36 = vld [vmem:[#allocation2 + $0xa2] sm:$0x3f]  ;;  %v3220_v59 = vld [vmem:[#allocation2 + $0xaa] sm:$0x3f]  ;;  %s3383_s17 = sadd.s32 29, %s11587_s14  ;;  %s3398_s15 = sadd.s32 32, %s11587_s14 }
 0x2f3   : > { %v3158_v25 = vadd.f32 %v3152_v54, %v3143_v2  ;;  %v3159_v55 = vadd.f32 %v3153_v1, %v3144_v29  ;;  %v3160_v58 = vadd.f32 %v3154_v33, %v3145_v47  ;;  %v3161_v35 = vadd.f32 %v3155_v61, %v3146_v17  ;;  %s11712_s22 = sld [smem:[#allocation8 + %s3383_s17]] }
 0x2f4   : > { %v3173_v50 = vmul.f32 %v3172_v42, %v3162_v40  ;;  %v3174_v52 = vmul.f32 %v3172_v42, %v3163_v32  ;;  %v3175_v57 = vmul.f32 %v3172_v42, %v3164_v0  ;;  %v3176_v11 = vmul.f32 %v3172_v42, %v3165_v20  ;;  %s11714_s25 = sld [smem:[#allocation8 + %s3398_s15]] }
 0x2f5   : > { %v3177_v51 = vmul.f32 %v3172_v42, %v3166_v30  ;;  %v3178_v48 = vmul.f32 %v3172_v42, %v3167_v10  ;;  %v3188_v5 = vmul.f32 %v3187_v38, %v3163_v32  ;;  %v3189_v21 = vmul.f32 %v3187_v38, %v3164_v0 }
 0x2f6   : > { %v3179_v12 = vadd.f32 %v3173_v50, %v3156_v31  ;;  %v3180_v22 = vadd.f32 %v3174_v52, %v3157_v3  ;;  %v3181_v34 = vadd.f32 %v3175_v57, %v3158_v25  ;;  %v3182_v28 = vadd.f32 %v3176_v11, %v3159_v55  ;;  %v3222_v52 = vld [vmem:[#allocation2 + $0xba] sm:$0x3f] }
 0x2f7   : > { %v3183_v8 = vadd.f32 %v3177_v51, %v3160_v58  ;;  %v3184_v26 = vadd.f32 %v3178_v48, %v3161_v35  ;;  %v3190_v19 = vmul.f32 %v3187_v38, %v3165_v20  ;;  %v3191_v56 = vmul.f32 %v3187_v38, %v3166_v30 }
 0x2f8   : > { %v3192_v4 = vmul.f32 %v3187_v38, %v3167_v10  ;;  %v3193_v13 = vmul.f32 %v3187_v38, %v3168_v39  ;;  %v3194_v46 = vadd.f32 %v3188_v5, %v3179_v12  ;;  %v3195_v14 = vadd.f32 %v3189_v21, %v3180_v22  ;;  %v3269_v22 = vld [vmem:[#allocation2 + $0xc0] sm:$0x3f] }
 0x2f9   : > { %v3196_v18 = vadd.f32 %v3190_v19, %v3181_v34  ;;  %v3197_v53 = vadd.f32 %v3191_v56, %v3182_v28  ;;  %v3202_v63 = vstv %s11672_s4  ;;  %v3225_v44 = vstv %s11674_s16  ;;  %v3270_v19 = vld [vmem:[#allocation2 + $0xc8] sm:$0x3f]  ;;  %v3271_v56 = vld [vmem:[#allocation2 + $0xd0] sm:$0x3f]  ;;  %s3413_s4 = sadd.s32 35, %s11587_s14  ;;  %s3437_s16 = sadd.s32 36, %s11587_s14 }
 0x2fa   : > { %v3198_v43 = vadd.f32 %v3192_v4, %v3183_v8  ;;  %v3199_v6 = vadd.f32 %v3193_v13, %v3184_v26  ;;  %v3203_v27 = vmul.f32 %v3202_v63, %v3164_v0  ;;  %v3204_v37 = vmul.f32 %v3202_v63, %v3165_v20  ;;  %v3221_v0 = vld [vmem:[#allocation2 + $0xb2] sm:$0x3f]  ;;  %s11720_s0 = sld [smem:[#allocation8 + %s3413_s4]] }
 0x2fb   : > { %v3205_v62 = vmul.f32 %v3202_v63, %v3166_v30  ;;  %v3206_v41 = vmul.f32 %v3202_v63, %v3167_v10  ;;  %v3207_v15 = vmul.f32 %v3202_v63, %v3168_v39  ;;  %v3208_v16 = vmul.f32 %v3202_v63, %v3169_v23  ;;  %s11722_s19 = sld [smem:[#allocation8 + %s3437_s16]] }
 0x2fc   : > { %v3209_v7 = vadd.f32 %v3203_v27, %v3194_v46  ;;  %v3210_v9 = vadd.f32 %v3204_v37, %v3195_v14  ;;  %v3226_v2 = vmul.f32 %v3225_v44, %v3215_v49  ;;  %v3227_v29 = vmul.f32 %v3225_v44, %v3216_v60  ;;  %v3272_v14 = vld [vmem:[#allocation2 + $0xd8] sm:$0x3f] }
 0x2fd   : > { %v3211_v47 = vadd.f32 %v3205_v62, %v3196_v18  ;;  %v3212_v17 = vadd.f32 %v3206_v41, %v3197_v53  ;;  %v3213_v40 = vadd.f32 %v3207_v15, %v3198_v43  ;;  %v3214_v32 = vadd.f32 %v3208_v16, %v3199_v6  ;;  %v3273_v18 = vld [vmem:[#allocation2 + $0xe0] sm:$0x3f]  ;;  %v3274_v53 = vld [vmem:[#allocation2 + $0xe8] sm:$0x3f] }
 0x2fe   : > { %v3228_v54 = vmul.f32 %v3225_v44, %v3217_v24  ;;  %v3229_v1 = vmul.f32 %v3225_v44, %v3218_v45  ;;  %v3230_v33 = vmul.f32 %v3225_v44, %v3219_v36  ;;  %v3231_v61 = vmul.f32 %v3225_v44, %v3220_v59 }
 0x2ff   : > { %v3232_v20 = vadd.f32 %v3226_v2, %v3209_v7  ;;  %v3233_v31 = vadd.f32 %v3227_v29, %v3210_v9  ;;  %v3240_v3 = vstv %s11680_s20  ;;  %v3255_v30 = vstv %s11682_s21  ;;  %s3452_s20 = sadd.s32 39, %s11587_s14  ;;  %s3467_s21 = sadd.s32 42, %s11587_s14 }
 0x300   : > { %v3234_v10 = vadd.f32 %v3228_v54, %v3211_v47  ;;  %v3235_v42 = vadd.f32 %v3229_v1, %v3212_v17  ;;  %v3236_v38 = vadd.f32 %v3230_v33, %v3213_v40  ;;  %v3237_v25 = vadd.f32 %v3231_v61, %v3214_v32  ;;  %v3276_v1 = vld [vmem:[#allocation2 + $0xf8] sm:$0x3f]  ;;  %s11728_s23 = sld [smem:[#allocation8 + %s3452_s20]] }
 0x301   : > { %v3241_v55 = vmul.f32 %v3240_v3, %v3216_v60  ;;  %v3242_v58 = vmul.f32 %v3240_v3, %v3217_v24  ;;  %v3243_v35 = vmul.f32 %v3240_v3, %v3218_v45  ;;  %v3244_v50 = vmul.f32 %v3240_v3, %v3219_v36  ;;  %s11730_s29 = sld [smem:[#allocation8 + %s3467_s21]] }
 0x302   : > { %v3245_v57 = vmul.f32 %v3240_v3, %v3220_v59  ;;  %v3246_v11 = vmul.f32 %v3240_v3, %v3221_v0  ;;  %v3256_v39 = vmul.f32 %v3255_v30, %v3217_v24  ;;  %v3257_v51 = vmul.f32 %v3255_v30, %v3218_v45  ;;  %v3275_v24 = vld [vmem:[#allocation2 + $0xf0] sm:$0x3f] }
 0x303   : > { %v3247_v48 = vadd.f32 %v3241_v55, %v3232_v20  ;;  %v3248_v5 = vadd.f32 %v3242_v58, %v3233_v31  ;;  %v3249_v21 = vadd.f32 %v3243_v35, %v3234_v10  ;;  %v3250_v12 = vadd.f32 %v3244_v50, %v3235_v42  ;;  %v3322_v20 = vld [vmem:[#allocation2 + $0xc1] sm:$0x3f]  ;;  %v3323_v31 = vld [vmem:[#allocation2 + $0xc9] sm:$0x3f]  ;;  %v3324_v50 = vld [vmem:[#allocation2 + $0xd1] sm:$0x3f] }
 0x304   : > { %v3251_v34 = vadd.f32 %v3245_v57, %v3236_v38  ;;  %v3252_v28 = vadd.f32 %v3246_v11, %v3237_v25  ;;  %v3258_v8 = vmul.f32 %v3255_v30, %v3219_v36  ;;  %v3259_v26 = vmul.f32 %v3255_v30, %v3220_v59 }
 0x305   : > { %v3260_v23 = vmul.f32 %v3255_v30, %v3221_v0  ;;  %v3261_v4 = vmul.f32 %v3255_v30, %v3222_v52  ;;  %v3262_v13 = vadd.f32 %v3256_v39, %v3247_v48  ;;  %v3263_v46 = vadd.f32 %v3257_v51, %v3248_v5  ;;  %v3325_v52 = vld [vmem:[#allocation2 + $0xd9] sm:$0x3f]  ;;  %v3326_v39 = vld [vmem:[#allocation2 + $0xe1] sm:$0x3f]  ;;  %v3327_v51 = vld [vmem:[#allocation2 + $0xe9] sm:$0x3f] }
 0x306   : > { %v3264_v63 = vadd.f32 %v3258_v8, %v3249_v21  ;;  %v3265_v49 = vadd.f32 %v3259_v26, %v3250_v12  ;;  %v3279_v60 = vstv %s11688_s3  ;;  %v3294_v44 = vstv %s11690_s24  ;;  %s3490_s3 = sadd.s32 37, %s11587_s14  ;;  %s3505_s24 = sadd.s32 40, %s11587_s14 }
 0x307   : > { %v3266_v43 = vadd.f32 %v3260_v23, %v3251_v34  ;;  %v3267_v6 = vadd.f32 %v3261_v4, %v3252_v28  ;;  %v3280_v27 = vmul.f32 %v3279_v60, %v3269_v22  ;;  %v3281_v37 = vmul.f32 %v3279_v60, %v3270_v19  ;;  %s11736_s18 = sld [smem:[#allocation8 + %s3490_s3]] }
 0x308   : > { %v3282_v45 = vmul.f32 %v3279_v60, %v3271_v56  ;;  %v3283_v62 = vmul.f32 %v3279_v60, %v3272_v14  ;;  %v3284_v41 = vmul.f32 %v3279_v60, %v3273_v18  ;;  %v3285_v15 = vmul.f32 %v3279_v60, %v3274_v53  ;;  %s11738_s28 = sld [smem:[#allocation8 + %s3505_s24]] }
 0x309   : > { %v3286_v16 = vadd.f32 %v3280_v27, %v3262_v13  ;;  %v3287_v36 = vadd.f32 %v3281_v37, %v3263_v46  ;;  %v3295_v59 = vmul.f32 %v3294_v44, %v3270_v19  ;;  %v3296_v7 = vmul.f32 %v3294_v44, %v3271_v56 }
 0x30a   : > { %v3288_v9 = vadd.f32 %v3282_v45, %v3264_v63  ;;  %v3289_v2 = vadd.f32 %v3283_v62, %v3265_v49  ;;  %v3290_v29 = vadd.f32 %v3284_v41, %v3266_v43  ;;  %v3291_v47 = vadd.f32 %v3285_v15, %v3267_v6  ;;  %v3329_v6 = vld [vmem:[#allocation2 + $0xf9] sm:$0x3f] }
 0x30b   : > { %v3297_v17 = vmul.f32 %v3294_v44, %v3272_v14  ;;  %v3298_v40 = vmul.f32 %v3294_v44, %v3273_v18  ;;  %v3299_v32 = vmul.f32 %v3294_v44, %v3274_v53  ;;  %v3300_v54 = vmul.f32 %v3294_v44, %v3275_v24 }
 0x30c   : > { %v3301_v33 = vadd.f32 %v3295_v59, %v3286_v16  ;;  %v3302_v61 = vadd.f32 %v3296_v7, %v3287_v36  ;;  %v3309_v0 = vstv %s11696_s2  ;;  %v3332_v3 = vstv %s11698_s1  ;;  %s3520_s2 = sadd.s32 43, %s11587_s14  ;;  %s3543_s1 = sadd.s32 38, %s11587_s14 }
 0x30d   : > { %v3303_v30 = vadd.f32 %v3297_v17, %v3288_v9  ;;  %v3304_v10 = vadd.f32 %v3298_v40, %v3289_v2  ;;  %v3305_v42 = vadd.f32 %v3299_v32, %v3290_v29  ;;  %v3306_v38 = vadd.f32 %v3300_v54, %v3291_v47  ;;  %v3375_v2 = vld [vmem:[#allocation2 + $0xc2] sm:$0x3f]  ;;  %v3376_v29 = vld [vmem:[#allocation2 + $0xca] sm:$0x3f]  ;;  %v3377_v54 = vld [vmem:[#allocation2 + $0xd2] sm:$0x3f] }
 0x30e   : > { %v3310_v25 = vmul.f32 %v3309_v0, %v3271_v56  ;;  %v3311_v55 = vmul.f32 %v3309_v0, %v3272_v14  ;;  %v3312_v58 = vmul.f32 %v3309_v0, %v3273_v18  ;;  %v3313_v35 = vmul.f32 %v3309_v0, %v3274_v53  ;;  %v3328_v56 = vld [vmem:[#allocation2 + $0xf1] sm:$0x3f]  ;;  %s11744_s26 = sld [smem:[#allocation8 + %s3520_s2]] }
 0x30f   : > { %v3314_v57 = vmul.f32 %v3309_v0, %v3275_v24  ;;  %v3315_v11 = vmul.f32 %v3309_v0, %v3276_v1  ;;  %v3333_v48 = vmul.f32 %v3332_v3, %v3322_v20  ;;  %v3334_v5 = vmul.f32 %v3332_v3, %v3323_v31  ;;  %v3378_v1 = vld [vmem:[#allocation2 + $0xda] sm:$0x3f]  ;;  %v3379_v0 = vld [vmem:[#allocation2 + $0xe2] sm:$0x3f]  ;;  %v3380_v20 = vld [vmem:[#allocation2 + $0xea] sm:$0x3f] }
 0x310   : > { %v3316_v21 = vadd.f32 %v3310_v25, %v3301_v33  ;;  %v3317_v12 = vadd.f32 %v3311_v55, %v3302_v61  ;;  %v3318_v22 = vadd.f32 %v3312_v58, %v3303_v30  ;;  %v3319_v34 = vadd.f32 %v3313_v35, %v3304_v10  ;;  %s11746_s27 = sld [smem:[#allocation8 + %s3543_s1]] }
 0x311   : > { %v3320_v28 = vadd.f32 %v3314_v57, %v3305_v42  ;;  %v3321_v8 = vadd.f32 %v3315_v11, %v3306_v38  ;;  %v3335_v26 = vmul.f32 %v3332_v3, %v3324_v50  ;;  %v3336_v19 = vmul.f32 %v3332_v3, %v3325_v52 }
 0x312   : > { %v3337_v23 = vmul.f32 %v3332_v3, %v3326_v39  ;;  %v3338_v4 = vmul.f32 %v3332_v3, %v3327_v51  ;;  %v3339_v13 = vadd.f32 %v3333_v48, %v3316_v21  ;;  %v3340_v46 = vadd.f32 %v3334_v5, %v3317_v12 }
 0x313   : > { %v3341_v14 = vadd.f32 %v3335_v26, %v3318_v22  ;;  %v3342_v18 = vadd.f32 %v3336_v19, %v3319_v34  ;;  %v3347_v53 = vstv %s11704_s30  ;;  %v3362_v63 = vstv %s11706_s12  ;;  %s3558_s30 = sadd.s32 41, %s11587_s14  ;;  %s3573_s12 = sadd.s32 44, %s11587_s14 }
 0x314   : > { %v3343_v49 = vadd.f32 %v3337_v23, %v3320_v28  ;;  %v3344_v60 = vadd.f32 %v3338_v4, %v3321_v8  ;;  %v3348_v44 = vmul.f32 %v3347_v53, %v3323_v31  ;;  %v3349_v43 = vmul.f32 %v3347_v53, %v3324_v50  ;;  %v3382_v8 = vld [vmem:[#allocation2 + $0xfa] sm:$0x3f]  ;;  %s11752_s17 = sld [smem:[#allocation8 + %s3558_s30]]  ;;  %s4947_s30 = sshll.u32 %s5272_s13, 4 }
 0x315   : > { %v3350_v27 = vmul.f32 %v3347_v53, %v3325_v52  ;;  %v3351_v37 = vmul.f32 %v3347_v53, %v3326_v39  ;;  %v3352_v24 = vmul.f32 %v3347_v53, %v3327_v51  ;;  %v3353_v45 = vmul.f32 %v3347_v53, %v3328_v56  ;;  %s11754_s15 = sld [smem:[#allocation8 + %s3573_s12]]  ;;  %s3762_s12 = scalar_lea.vmem [#allocation3], %s4947_s30 }
 0x316   : > { %v3354_v62 = vadd.f32 %v3348_v44, %v3339_v13  ;;  %v3355_v41 = vadd.f32 %v3349_v43, %v3340_v46  ;;  %v3363_v15 = vmul.f32 %v3362_v63, %v3324_v50  ;;  %v3364_v16 = vmul.f32 %v3362_v63, %v3325_v52  ;;  %v3381_v50 = vld [vmem:[#allocation2 + $0xf2] sm:$0x3f] }
 0x317   : > { %v3356_v36 = vadd.f32 %v3350_v27, %v3341_v14  ;;  %v3357_v59 = vadd.f32 %v3351_v37, %v3342_v18  ;;  %v3358_v7 = vadd.f32 %v3352_v24, %v3343_v49  ;;  %v3359_v9 = vadd.f32 %v3353_v45, %v3344_v60  ;;  %v3429_v14 = vld [vmem:[#allocation2 + $0x100] sm:$0x3f]  ;;  %v3430_v18 = vld [vmem:[#allocation2 + $0x108] sm:$0x3f]  ;;  %v3431_v43 = vld [vmem:[#allocation2 + $0x110] sm:$0x3f] }
 0x318   : > { %v3365_v47 = vmul.f32 %v3362_v63, %v3326_v39  ;;  %v3366_v17 = vmul.f32 %v3362_v63, %v3327_v51  ;;  %v3367_v40 = vmul.f32 %v3362_v63, %v3328_v56  ;;  %v3368_v32 = vmul.f32 %v3362_v63, %v3329_v6  ;;  %v3432_v6 = vld [vmem:[#allocation2 + $0x118] sm:$0x3f] }
 0x319   : > { %v3369_v33 = vadd.f32 %v3363_v15, %v3354_v62  ;;  %v3370_v61 = vadd.f32 %v3364_v16, %v3355_v41  ;;  %v3385_v31 = vstv %s11712_s22  ;;  %v3400_v3 = vstv %s11714_s25  ;;  %v3433_v62 = vld [vmem:[#allocation2 + $0x120] sm:$0x3f]  ;;  %v3434_v41 = vld [vmem:[#allocation2 + $0x128] sm:$0x3f]  ;;  %s3597_s22 = sadd.s32 45, %s11587_s14  ;;  %s3612_s25 = sadd.s32 48, %s11587_s14 }
 0x31a   : > { %v3371_v30 = vadd.f32 %v3365_v47, %v3356_v36  ;;  %v3372_v10 = vadd.f32 %v3366_v17, %v3357_v59  ;;  %v3373_v42 = vadd.f32 %v3367_v40, %v3358_v7  ;;  %v3374_v38 = vadd.f32 %v3368_v32, %v3359_v9  ;;  %s11760_s4 = sld [smem:[#allocation8 + %s3597_s22]] }
 0x31b   : > { %v3386_v25 = vmul.f32 %v3385_v31, %v3375_v2  ;;  %v3387_v55 = vmul.f32 %v3385_v31, %v3376_v29  ;;  %v3388_v58 = vmul.f32 %v3385_v31, %v3377_v54  ;;  %v3389_v35 = vmul.f32 %v3385_v31, %v3378_v1  ;;  %s11762_s16 = sld [smem:[#allocation8 + %s3612_s25]] }
 0x31c   : > { %v3390_v52 = vmul.f32 %v3385_v31, %v3379_v0  ;;  %v3391_v57 = vmul.f32 %v3385_v31, %v3380_v20  ;;  %v3401_v11 = vmul.f32 %v3400_v3, %v3376_v29  ;;  %v3402_v39 = vmul.f32 %v3400_v3, %v3377_v54 }
 0x31d   : > { %v3392_v51 = vadd.f32 %v3386_v25, %v3369_v33  ;;  %v3393_v48 = vadd.f32 %v3387_v55, %v3370_v61  ;;  %v3394_v5 = vadd.f32 %v3388_v58, %v3371_v30  ;;  %v3395_v21 = vadd.f32 %v3389_v35, %v3372_v10  ;;  %v3436_v55 = vld [vmem:[#allocation2 + $0x138] sm:$0x3f] }
 0x31e   : > { %v3396_v12 = vadd.f32 %v3390_v52, %v3373_v42  ;;  %v3397_v22 = vadd.f32 %v3391_v57, %v3374_v38  ;;  %v3403_v34 = vmul.f32 %v3400_v3, %v3378_v1  ;;  %v3404_v28 = vmul.f32 %v3400_v3, %v3379_v0 }
 0x31f   : > { %v3405_v26 = vmul.f32 %v3400_v3, %v3380_v20  ;;  %v3406_v19 = vmul.f32 %v3400_v3, %v3381_v50  ;;  %v3407_v56 = vadd.f32 %v3401_v11, %v3392_v51  ;;  %v3408_v23 = vadd.f32 %v3402_v39, %v3393_v48  ;;  %v3482_v48 = vld [vmem:[#allocation2 + $0x101] sm:$0x3f] }
 0x320   : > { %v3409_v4 = vadd.f32 %v3403_v34, %v3394_v5  ;;  %v3410_v13 = vadd.f32 %v3404_v28, %v3395_v21  ;;  %v3415_v46 = vstv %s11720_s0  ;;  %v3439_v53 = vstv %s11722_s19  ;;  %v3483_v34 = vld [vmem:[#allocation2 + $0x109] sm:$0x3f]  ;;  %v3484_v28 = vld [vmem:[#allocation2 + $0x111] sm:$0x3f]  ;;  %s3627_s0 = sadd.s32 51, %s11587_s14  ;;  %s3650_s19 = sadd.s32 46, %s11587_s14 }
 0x321   : > { %v3411_v63 = vadd.f32 %v3405_v26, %v3396_v12  ;;  %v3412_v49 = vadd.f32 %v3406_v19, %v3397_v22  ;;  %v3416_v60 = vmul.f32 %v3415_v46, %v3377_v54  ;;  %v3417_v44 = vmul.f32 %v3415_v46, %v3378_v1  ;;  %v3435_v54 = vld [vmem:[#allocation2 + $0x130] sm:$0x3f]  ;;  %s11768_s20 = sld [smem:[#allocation8 + %s3627_s0]] }
 0x322   : > { %v3418_v27 = vmul.f32 %v3415_v46, %v3379_v0  ;;  %v3419_v37 = vmul.f32 %v3415_v46, %v3380_v20  ;;  %v3420_v24 = vmul.f32 %v3415_v46, %v3381_v50  ;;  %v3421_v45 = vmul.f32 %v3415_v46, %v3382_v8  ;;  %s11770_s21 = sld [smem:[#allocation8 + %s3650_s19]] }
 0x323   : > { %v3422_v15 = vadd.f32 %v3416_v60, %v3407_v56  ;;  %v3423_v16 = vadd.f32 %v3417_v44, %v3408_v23  ;;  %v3440_v36 = vmul.f32 %v3439_v53, %v3429_v14  ;;  %v3441_v59 = vmul.f32 %v3439_v53, %v3430_v18  ;;  %v3485_v23 = vld [vmem:[#allocation2 + $0x119] sm:$0x3f] }
 0x324   : > { %v3424_v7 = vadd.f32 %v3418_v27, %v3409_v4  ;;  %v3425_v9 = vadd.f32 %v3419_v37, %v3410_v13  ;;  %v3426_v2 = vadd.f32 %v3420_v24, %v3411_v63  ;;  %v3427_v29 = vadd.f32 %v3421_v45, %v3412_v49  ;;  %v3486_v4 = vld [vmem:[#allocation2 + $0x121] sm:$0x3f]  ;;  %v3487_v13 = vld [vmem:[#allocation2 + $0x129] sm:$0x3f] }
 0x325   : > { %v3442_v47 = vmul.f32 %v3439_v53, %v3431_v43  ;;  %v3443_v17 = vmul.f32 %v3439_v53, %v3432_v6  ;;  %v3444_v40 = vmul.f32 %v3439_v53, %v3433_v62  ;;  %v3445_v32 = vmul.f32 %v3439_v53, %v3434_v41 }
 0x326   : > { %v3446_v1 = vadd.f32 %v3440_v36, %v3422_v15  ;;  %v3447_v33 = vadd.f32 %v3441_v59, %v3423_v16  ;;  %v3454_v61 = vstv %s11728_s23  ;;  %v3469_v0 = vstv %s11730_s29  ;;  %s3665_s23 = sadd.s32 49, %s11587_s14  ;;  %s3680_s29 = sadd.s32 52, %s11587_s14 }
 0x327   : > { %v3448_v20 = vadd.f32 %v3442_v47, %v3424_v7  ;;  %v3449_v31 = vadd.f32 %v3443_v17, %v3425_v9  ;;  %v3450_v3 = vadd.f32 %v3444_v40, %v3426_v2  ;;  %v3451_v30 = vadd.f32 %v3445_v32, %v3427_v29  ;;  %v3489_v17 = vld [vmem:[#allocation2 + $0x139] sm:$0x3f]  ;;  %s11776_s3 = sld [smem:[#allocation8 + %s3665_s23]] }
 0x328   : > { %v3455_v10 = vmul.f32 %v3454_v61, %v3430_v18  ;;  %v3456_v42 = vmul.f32 %v3454_v61, %v3431_v43  ;;  %v3457_v38 = vmul.f32 %v3454_v61, %v3432_v6  ;;  %v3458_v25 = vmul.f32 %v3454_v61, %v3433_v62  ;;  %s11778_s24 = sld [smem:[#allocation8 + %s3680_s29]] }
 0x329   : > { %v3459_v58 = vmul.f32 %v3454_v61, %v3434_v41  ;;  %v3460_v35 = vmul.f32 %v3454_v61, %v3435_v54  ;;  %v3470_v50 = vmul.f32 %v3469_v0, %v3431_v43  ;;  %v3471_v52 = vmul.f32 %v3469_v0, %v3432_v6  ;;  %v3488_v43 = vld [vmem:[#allocation2 + $0x131] sm:$0x3f] }
 0x32a   : > { %v3461_v57 = vadd.f32 %v3455_v10, %v3446_v1  ;;  %v3462_v11 = vadd.f32 %v3456_v42, %v3447_v33  ;;  %v3463_v39 = vadd.f32 %v3457_v38, %v3448_v20  ;;  %v3464_v51 = vadd.f32 %v3458_v25, %v3449_v31  ;;  %v3535_v1 = vld [vmem:[#allocation2 + $0x102] sm:$0x3f]  ;;  %v3536_v33 = vld [vmem:[#allocation2 + $0x10a] sm:$0x3f]  ;;  %v3537_v25 = vld [vmem:[#allocation2 + $0x112] sm:$0x3f] }
 0x32b   : > { %v3465_v5 = vadd.f32 %v3459_v58, %v3450_v3  ;;  %v3466_v21 = vadd.f32 %v3460_v35, %v3451_v30  ;;  %v3472_v12 = vmul.f32 %v3469_v0, %v3433_v62  ;;  %v3473_v22 = vmul.f32 %v3469_v0, %v3434_v41 }
 0x32c   : > { %v3474_v8 = vmul.f32 %v3469_v0, %v3435_v54  ;;  %v3475_v26 = vmul.f32 %v3469_v0, %v3436_v55  ;;  %v3476_v19 = vadd.f32 %v3470_v50, %v3461_v57  ;;  %v3477_v56 = vadd.f32 %v3471_v52, %v3462_v11  ;;  %v3538_v55 = vld [vmem:[#allocation2 + $0x11a] sm:$0x3f]  ;;  %v3539_v50 = vld [vmem:[#allocation2 + $0x122] sm:$0x3f]  ;;  %v3540_v52 = vld [vmem:[#allocation2 + $0x12a] sm:$0x3f] }
 0x32d   : > { %v3478_v46 = vadd.f32 %v3472_v12, %v3463_v39  ;;  %v3479_v14 = vadd.f32 %v3473_v22, %v3464_v51  ;;  %v3492_v18 = vstv %s11736_s18  ;;  %v3507_v53 = vstv %s11738_s28  ;;  %s3703_s18 = sadd.s32 47, %s11587_s14  ;;  %s3718_s28 = sadd.s32 50, %s11587_s14 }
 0x32e   : > { %v3480_v63 = vadd.f32 %v3474_v8, %v3465_v5  ;;  %v3481_v49 = vadd.f32 %v3475_v26, %v3466_v21  ;;  %v3493_v60 = vmul.f32 %v3492_v18, %v3482_v48  ;;  %v3494_v44 = vmul.f32 %v3492_v18, %v3483_v34  ;;  %s11784_s2 = sld [smem:[#allocation8 + %s3703_s18]] }
 0x32f   : > { %v3495_v6 = vmul.f32 %v3492_v18, %v3484_v28  ;;  %v3496_v27 = vmul.f32 %v3492_v18, %v3485_v23  ;;  %v3497_v37 = vmul.f32 %v3492_v18, %v3486_v4  ;;  %v3498_v24 = vmul.f32 %v3492_v18, %v3487_v13  ;;  %s11786_s1 = sld [smem:[#allocation8 + %s3718_s28]] }
 0x330   : > { %v3499_v45 = vadd.f32 %v3493_v60, %v3476_v19  ;;  %v3500_v62 = vadd.f32 %v3494_v44, %v3477_v56  ;;  %v3508_v41 = vmul.f32 %v3507_v53, %v3483_v34  ;;  %v3509_v15 = vmul.f32 %v3507_v53, %v3484_v28 }
 0x331   : > { %v3501_v16 = vadd.f32 %v3495_v6, %v3478_v46  ;;  %v3502_v36 = vadd.f32 %v3496_v27, %v3479_v14  ;;  %v3503_v59 = vadd.f32 %v3497_v37, %v3480_v63  ;;  %v3504_v7 = vadd.f32 %v3498_v24, %v3481_v49  ;;  %v3542_v49 = vld [vmem:[#allocation2 + $0x13a] sm:$0x3f] }
 0x332   : > { %v3510_v9 = vmul.f32 %v3507_v53, %v3485_v23  ;;  %v3511_v2 = vmul.f32 %v3507_v53, %v3486_v4  ;;  %v3512_v29 = vmul.f32 %v3507_v53, %v3487_v13  ;;  %v3513_v47 = vmul.f32 %v3507_v53, %v3488_v43 }
 0x333   : > { %v3514_v40 = vadd.f32 %v3508_v41, %v3499_v45  ;;  %v3515_v32 = vadd.f32 %v3509_v15, %v3500_v62  ;;  %v3522_v54 = vstv %s11744_s26  ;;  %v3545_v61 = vstv %s11746_s27  ;;  %s3733_s26 = sadd.s32 53, %s11587_s14  ;;  %s3748_s14 = sld [smem:[#allocation9 + %s5272_s13]] }
 0x334   : > { %v3516_v0 = vadd.f32 %v3510_v9, %v3501_v16  ;;  %v3517_v20 = vadd.f32 %v3511_v2, %v3502_v36  ;;  %v3518_v31 = vadd.f32 %v3512_v29, %v3503_v59  ;;  %v3519_v3 = vadd.f32 %v3513_v47, %v3504_v7  ;;  %v3589_v36 = vld [vmem:[#allocation2 + $0x140] sm:$0x3f]  ;;  %v3590_v59 = vld [vmem:[#allocation2 + $0x148] sm:$0x3f]  ;;  %v3591_v47 = vld [vmem:[#allocation2 + $0x150] sm:$0x3f] }
 0x335   : > { %v3523_v30 = vmul.f32 %v3522_v54, %v3484_v28  ;;  %v3524_v10 = vmul.f32 %v3522_v54, %v3485_v23  ;;  %v3525_v42 = vmul.f32 %v3522_v54, %v3486_v4  ;;  %v3526_v38 = vmul.f32 %v3522_v54, %v3487_v13  ;;  %v3541_v28 = vld [vmem:[#allocation2 + $0x132] sm:$0x3f]  ;;  %s11791_s27 = sld [smem:[#allocation8 + %s3733_s26]]  ;;  %s2788_s13 = sadd.s32 1, %s5272_s13  }
 0x336   : > { %v3527_v58 = vmul.f32 %v3522_v54, %v3488_v43  ;;  %v3528_v35 = vmul.f32 %v3522_v54, %v3489_v17  ;;  %v3546_v57 = vmul.f32 %v3545_v61, %v3535_v1  ;;  %v3547_v11 = vmul.f32 %v3545_v61, %v3536_v33  ;;  %v3592_v17 = vld [vmem:[#allocation2 + $0x158] sm:$0x3f]  ;;  %v3593_v54 = vld [vmem:[#allocation2 + $0x160] sm:$0x3f]  ;;  %v3594_v1 = vld [vmem:[#allocation2 + $0x168] sm:$0x3f] }
 0x337   : > { %v3529_v39 = vadd.f32 %v3523_v30, %v3514_v40  ;;  %v3530_v51 = vadd.f32 %v3524_v10, %v3515_v32  ;;  %v3531_v48 = vadd.f32 %v3525_v42, %v3516_v0  ;;  %v3532_v5 = vadd.f32 %v3526_v38, %v3517_v20  ;;  %p2785_p7 = scmp.ge.s32.totalorder %s2788_s13, 16  }
 0x338   : > { %v3533_v21 = vadd.f32 %v3527_v58, %v3518_v31  ;;  %v3534_v12 = vadd.f32 %v3528_v35, %v3519_v3  ;;  %v3548_v22 = vmul.f32 %v3545_v61, %v3537_v25  ;;  %v3549_v34 = vmul.f32 %v3545_v61, %v3538_v55 }
 0x339   : > { %v3550_v8 = vmul.f32 %v3545_v61, %v3539_v50  ;;  %v3551_v26 = vmul.f32 %v3545_v61, %v3540_v52  ;;  %v3552_v19 = vadd.f32 %v3546_v57, %v3529_v39  ;;  %v3553_v56 = vadd.f32 %v3547_v11, %v3530_v51 }
 0x33a   : > { %v3554_v23 = vadd.f32 %v3548_v22, %v3531_v48  ;;  %v3555_v4 = vadd.f32 %v3549_v34, %v3532_v5  ;;  %v3560_v13 = vstv %s11752_s17  ;;  %v3575_v46 = vstv %s11754_s15 }
 0x33b   : > { %v3556_v14 = vadd.f32 %v3550_v8, %v3533_v21  ;;  %v3557_v18 = vadd.f32 %v3551_v26, %v3534_v12  ;;  %v3561_v53 = vmul.f32 %v3560_v13, %v3536_v33  ;;  %v3562_v63 = vmul.f32 %v3560_v13, %v3537_v25  ;;  %v3596_v12 = vld [vmem:[#allocation2 + $0x178] sm:$0x3f] }
 0x33c   : > { %v3563_v60 = vmul.f32 %v3560_v13, %v3538_v55  ;;  %v3564_v44 = vmul.f32 %v3560_v13, %v3539_v50  ;;  %v3565_v43 = vmul.f32 %v3560_v13, %v3540_v52  ;;  %v3566_v6 = vmul.f32 %v3560_v13, %v3541_v28 }
 0x33d   : > { %v3567_v27 = vadd.f32 %v3561_v53, %v3552_v19  ;;  %v3568_v37 = vadd.f32 %v3562_v63, %v3553_v56  ;;  %v3576_v24 = vmul.f32 %v3575_v46, %v3537_v25  ;;  %v3577_v45 = vmul.f32 %v3575_v46, %v3538_v55  ;;  %v3595_v25 = vld [vmem:[#allocation2 + $0x170] sm:$0x3f] }
 0x33e   : > { %v3569_v62 = vadd.f32 %v3563_v60, %v3554_v23  ;;  %v3570_v41 = vadd.f32 %v3564_v44, %v3555_v4  ;;  %v3571_v15 = vadd.f32 %v3565_v43, %v3556_v14  ;;  %v3572_v16 = vadd.f32 %v3566_v6, %v3557_v18  ;;  %v3642_v23 = vld [vmem:[#allocation2 + $0x141] sm:$0x3f]  ;;  %v3643_v4 = vld [vmem:[#allocation2 + $0x149] sm:$0x3f]  ;;  %v3644_v63 = vld [vmem:[#allocation2 + $0x151] sm:$0x3f] }
 0x33f   : > { %v3578_v7 = vmul.f32 %v3575_v46, %v3539_v50  ;;  %v3579_v9 = vmul.f32 %v3575_v46, %v3540_v52  ;;  %v3580_v2 = vmul.f32 %v3575_v46, %v3541_v28  ;;  %v3581_v29 = vmul.f32 %v3575_v46, %v3542_v49  ;;  %v3645_v49 = vld [vmem:[#allocation2 + $0x159] sm:$0x3f] }
 0x340   : > { %v3582_v40 = vadd.f32 %v3576_v24, %v3567_v27  ;;  %v3583_v32 = vadd.f32 %v3577_v45, %v3568_v37  ;;  %v3599_v33 = vstv %s11760_s4  ;;  %v3614_v61 = vstv %s11762_s16  ;;  %v3646_v27 = vld [vmem:[#allocation2 + $0x161] sm:$0x3f]  ;;  %v3647_v37 = vld [vmem:[#allocation2 + $0x169] sm:$0x3f] }
 0x341   : > { %v3584_v0 = vadd.f32 %v3578_v7, %v3569_v62  ;;  %v3585_v20 = vadd.f32 %v3579_v9, %v3570_v41  ;;  %v3586_v31 = vadd.f32 %v3580_v2, %v3571_v15  ;;  %v3587_v3 = vadd.f32 %v3581_v29, %v3572_v16 }
 0x342   : > { %v3600_v30 = vmul.f32 %v3599_v33, %v3589_v36  ;;  %v3601_v10 = vmul.f32 %v3599_v33, %v3590_v59  ;;  %v3602_v42 = vmul.f32 %v3599_v33, %v3591_v47  ;;  %v3603_v38 = vmul.f32 %v3599_v33, %v3592_v17 }
 0x343   : > { %v3604_v55 = vmul.f32 %v3599_v33, %v3593_v54  ;;  %v3605_v58 = vmul.f32 %v3599_v33, %v3594_v1  ;;  %v3615_v35 = vmul.f32 %v3614_v61, %v3590_v59  ;;  %v3616_v50 = vmul.f32 %v3614_v61, %v3591_v47 }
 0x344   : > { %v3606_v52 = vadd.f32 %v3600_v30, %v3582_v40  ;;  %v3607_v57 = vadd.f32 %v3601_v10, %v3583_v32  ;;  %v3608_v11 = vadd.f32 %v3602_v42, %v3584_v0  ;;  %v3609_v39 = vadd.f32 %v3603_v38, %v3585_v20  ;;  %v3649_v10 = vld [vmem:[#allocation2 + $0x179] sm:$0x3f] }
 0x345   : > { %v3610_v51 = vadd.f32 %v3604_v55, %v3586_v31  ;;  %v3611_v48 = vadd.f32 %v3605_v58, %v3587_v3  ;;  %v3617_v5 = vmul.f32 %v3614_v61, %v3592_v17  ;;  %v3618_v21 = vmul.f32 %v3614_v61, %v3593_v54 }
 0x346   : > { %v3619_v22 = vmul.f32 %v3614_v61, %v3594_v1  ;;  %v3620_v34 = vmul.f32 %v3614_v61, %v3595_v25  ;;  %v3621_v28 = vadd.f32 %v3615_v35, %v3606_v52  ;;  %v3622_v8 = vadd.f32 %v3616_v50, %v3607_v57  ;;  %v3695_v57 = vld [vmem:[#allocation2 + $0x142] sm:$0x3f] }
 0x347   : > { %v3623_v26 = vadd.f32 %v3617_v5, %v3608_v11  ;;  %v3624_v19 = vadd.f32 %v3618_v21, %v3609_v39  ;;  %v3629_v56 = vstv %s11768_s20  ;;  %v3652_v13 = vstv %s11770_s21  ;;  %v3696_v5 = vld [vmem:[#allocation2 + $0x14a] sm:$0x3f]  ;;  %v3697_v21 = vld [vmem:[#allocation2 + $0x152] sm:$0x3f] }
 0x348   : > { %v3625_v46 = vadd.f32 %v3619_v22, %v3610_v51  ;;  %v3626_v14 = vadd.f32 %v3620_v34, %v3611_v48  ;;  %v3630_v18 = vmul.f32 %v3629_v56, %v3591_v47  ;;  %v3631_v53 = vmul.f32 %v3629_v56, %v3592_v17  ;;  %v3648_v47 = vld [vmem:[#allocation2 + $0x171] sm:$0x3f] }
 0x349   : > { %v3632_v60 = vmul.f32 %v3629_v56, %v3593_v54  ;;  %v3633_v44 = vmul.f32 %v3629_v56, %v3594_v1  ;;  %v3634_v43 = vmul.f32 %v3629_v56, %v3595_v25  ;;  %v3635_v6 = vmul.f32 %v3629_v56, %v3596_v12 }
 0x34a   : > { %v3636_v24 = vadd.f32 %v3630_v18, %v3621_v28  ;;  %v3637_v45 = vadd.f32 %v3631_v53, %v3622_v8  ;;  %v3653_v62 = vmul.f32 %v3652_v13, %v3642_v23  ;;  %v3654_v41 = vmul.f32 %v3652_v13, %v3643_v4  ;;  %v3698_v8 = vld [vmem:[#allocation2 + $0x15a] sm:$0x3f] }
 0x34b   : > { %v3638_v15 = vadd.f32 %v3632_v60, %v3623_v26  ;;  %v3639_v16 = vadd.f32 %v3633_v44, %v3624_v19  ;;  %v3640_v36 = vadd.f32 %v3634_v43, %v3625_v46  ;;  %v3641_v59 = vadd.f32 %v3635_v6, %v3626_v14  ;;  %v3699_v26 = vld [vmem:[#allocation2 + $0x162] sm:$0x3f]  ;;  %v3700_v19 = vld [vmem:[#allocation2 + $0x16a] sm:$0x3f] }
 0x34c   : > { %v3655_v7 = vmul.f32 %v3652_v13, %v3644_v63  ;;  %v3656_v9 = vmul.f32 %v3652_v13, %v3645_v49  ;;  %v3657_v2 = vmul.f32 %v3652_v13, %v3646_v27  ;;  %v3658_v29 = vmul.f32 %v3652_v13, %v3647_v37 }
 0x34d   : > { %v3659_v17 = vadd.f32 %v3653_v62, %v3636_v24  ;;  %v3660_v40 = vadd.f32 %v3654_v41, %v3637_v45  ;;  %v3667_v32 = vstv %s11776_s3  ;;  %v3682_v54 = vstv %s11778_s24 }
 0x34e   : > { %v3661_v1 = vadd.f32 %v3655_v7, %v3638_v15  ;;  %v3662_v33 = vadd.f32 %v3656_v9, %v3639_v16  ;;  %v3663_v61 = vadd.f32 %v3657_v2, %v3640_v36  ;;  %v3664_v0 = vadd.f32 %v3658_v29, %v3641_v59  ;;  %v3702_v9 = vld [vmem:[#allocation2 + $0x17a] sm:$0x3f] }
 0x34f   : > { %v3668_v20 = vmul.f32 %v3667_v32, %v3643_v4  ;;  %v3669_v31 = vmul.f32 %v3667_v32, %v3644_v63  ;;  %v3670_v3 = vmul.f32 %v3667_v32, %v3645_v49  ;;  %v3671_v30 = vmul.f32 %v3667_v32, %v3646_v27 }
 0x350   : > { %v3672_v42 = vmul.f32 %v3667_v32, %v3647_v37  ;;  %v3673_v38 = vmul.f32 %v3667_v32, %v3648_v47  ;;  %v3683_v25 = vmul.f32 %v3682_v54, %v3644_v63  ;;  %v3684_v55 = vmul.f32 %v3682_v54, %v3645_v49  ;;  %v3701_v63 = vld [vmem:[#allocation2 + $0x172] sm:$0x3f] }
 0x351   : > { %v3674_v58 = vadd.f32 %v3668_v20, %v3659_v17  ;;  %v3675_v35 = vadd.f32 %v3669_v31, %v3660_v40  ;;  %v3676_v50 = vadd.f32 %v3670_v3, %v3661_v1  ;;  %v3677_v52 = vadd.f32 %v3671_v30, %v3662_v33 }
 0x352   : > { %v3678_v11 = vadd.f32 %v3672_v42, %v3663_v61  ;;  %v3679_v39 = vadd.f32 %v3673_v38, %v3664_v0  ;;  %v3685_v51 = vmul.f32 %v3682_v54, %v3646_v27  ;;  %v3686_v48 = vmul.f32 %v3682_v54, %v3647_v37 }
 0x353   : > { %v3687_v12 = vmul.f32 %v3682_v54, %v3648_v47  ;;  %v3688_v22 = vmul.f32 %v3682_v54, %v3649_v10  ;;  %v3689_v34 = vadd.f32 %v3683_v25, %v3674_v58  ;;  %v3690_v28 = vadd.f32 %v3684_v55, %v3675_v35 }
 0x354   : > { %v3691_v56 = vadd.f32 %v3685_v51, %v3676_v50  ;;  %v3692_v23 = vadd.f32 %v3686_v48, %v3677_v52  ;;  %v3705_v4 = vstv %s11784_s2  ;;  %v3720_v13 = vstv %s11786_s1 }
 0x355   : > { %v3693_v46 = vadd.f32 %v3687_v12, %v3678_v11  ;;  %v3694_v14 = vadd.f32 %v3688_v22, %v3679_v39  ;;  %v3706_v18 = vmul.f32 %v3705_v4, %v3695_v57  ;;  %v3707_v53 = vmul.f32 %v3705_v4, %v3696_v5 }
 0x356   : > { %v3708_v49 = vmul.f32 %v3705_v4, %v3697_v21  ;;  %v3709_v60 = vmul.f32 %v3705_v4, %v3698_v8  ;;  %v3710_v44 = vmul.f32 %v3705_v4, %v3699_v26  ;;  %v3711_v43 = vmul.f32 %v3705_v4, %v3700_v19 }
 0x357   : > { %v3712_v6 = vadd.f32 %v3706_v18, %v3689_v34  ;;  %v3713_v27 = vadd.f32 %v3707_v53, %v3690_v28  ;;  %v3721_v37 = vmul.f32 %v3720_v13, %v3696_v5  ;;  %v3722_v24 = vmul.f32 %v3720_v13, %v3697_v21 }
 0x358   : > { %v3714_v45 = vadd.f32 %v3708_v49, %v3691_v56  ;;  %v3715_v62 = vadd.f32 %v3709_v60, %v3692_v23  ;;  %v3716_v41 = vadd.f32 %v3710_v44, %v3693_v46  ;;  %v3717_v15 = vadd.f32 %v3711_v43, %v3694_v14 }
 0x359   : > { %v3723_v16 = vmul.f32 %v3720_v13, %v3698_v8  ;;  %v3724_v36 = vmul.f32 %v3720_v13, %v3699_v26  ;;  %v3725_v59 = vmul.f32 %v3720_v13, %v3700_v19  ;;  %v3726_v7 = vmul.f32 %v3720_v13, %v3701_v63 }
 0x35a   : > { %v3727_v2 = vadd.f32 %v3721_v37, %v3712_v6  ;;  %v3728_v29 = vadd.f32 %v3722_v24, %v3713_v27  ;;  %v3735_v47 = vstv %s11791_s27  ;;  %v3758_v5 = vstv %s3748_s14 }
 0x35b   : > { %v3729_v17 = vadd.f32 %v3723_v16, %v3714_v45  ;;  %v3730_v40 = vadd.f32 %v3724_v36, %v3715_v62  ;;  %v3731_v32 = vadd.f32 %v3725_v59, %v3716_v41  ;;  %v3732_v54 = vadd.f32 %v3726_v7, %v3717_v15 }
 0x35c   : > { %v3736_v1 = vmul.f32 %v3735_v47, %v3697_v21  ;;  %v3737_v33 = vmul.f32 %v3735_v47, %v3698_v8  ;;  %v3738_v61 = vmul.f32 %v3735_v47, %v3699_v26  ;;  %v3739_v0 = vmul.f32 %v3735_v47, %v3700_v19 }
 0x35d   : > { %v3740_v20 = vmul.f32 %v3735_v47, %v3701_v63  ;;  %v3741_v31 = vmul.f32 %v3735_v47, %v3702_v9  ;;  %v5279_v60 = vmov (%p2785_p7), 0  }
 0x35e   : > { %v3742_v3 = vadd.f32 %v3736_v1, %v3727_v2  ;;  %v3743_v30 = vadd.f32 %v3737_v33, %v3728_v29  ;;  %v3744_v10 = vadd.f32 %v3738_v61, %v3729_v17  ;;  %v3745_v42 = vadd.f32 %v3739_v0, %v3730_v40  ;;  %5162 = vset.pattern.permute.xlu0 (%p2785_p7), %v5279_v60  ;;  %v5166_v17 = vld [vmem:[%s12094_s5 + $0x4] ss:$8 sps:$4 sm:$0xff] (%p2785_p7)  }
 0x35f   : > { %v3746_v38 = vadd.f32 %v3740_v20, %v3731_v32  ;;  %v3747_v25 = vadd.f32 %v3741_v31, %v3732_v54  ;;  %5163 = vset.pattern.permute.xlu1 (%p2785_p7), %v5279_v60  ;;  %4066 = vmatprep.mubr.bf16.mxu0 (%p2785_p7), %v5166_v17  ;;  %v3858_v0 = vld [vmem:[%s12095_s6] sm:$0xff] (%p2785_p7)  ;;  %v4172_v60 = vld [vmem:[%s12097_s8 + $0x8] sm:$0xff] (%p2785_p7)  ;;  %v5181_v17 = vld [vmem:[%s12094_s5 + $0x50] ss:$8 sps:$4 sm:$0xff] (%p2785_p7)  }
 0x360   : > { %v3750_v55 = vrot.slane %v3742_v3, 1  ;;  %v3754_v58 = vrot.slane %v3743_v30, 1  ;;  %v3767_v35 = vrot.slane %v3744_v10, 1  ;;  %v3771_v50 = vrot.slane %v3745_v42, 1  ;;  %3876 = vperm.xlu0 (%p2785_p7), %5162, %v3858_v0   ;;  %v5185_v0 = vld [vmem:[%s12094_s5 + $0x74] ss:$8 sps:$4 sm:$0xff] (%p2785_p7)  }
 0x361   : > { %v3781_v52 = vrot.slane %v3746_v38, 1  ;;  %v3785_v57 = vrot.slane %v3747_v25, 1 }
 0x362   : > { %v3752_v11 = vmax.f32 %v3742_v3, %v3750_v55  ;;  %v3756_v39 = vmax.f32 %v3743_v30, %v3754_v58  ;;  %v3769_v51 = vmax.f32 %v3744_v10, %v3767_v35  ;;  %v3773_v48 = vmax.f32 %v3745_v42, %v3771_v50  ;;  %v3860_v3 = vld [vmem:[%s12095_s6 + $0x10] sm:$0xff] (%p2785_p7)  ;;  %v3859_v30 = vld [vmem:[%s12095_s6 + $0x8] sm:$0xff] (%p2785_p7)  ;;  %v3861_v55 = vld [vmem:[%s12095_s6 + $0x18] sm:$0xff] (%p2785_p7) }
 0x363   : > { %v3783_v21 = vmax.f32 %v3746_v38, %v3781_v52  ;;  %v3787_v12 = vmax.f32 %v3747_v25, %v3785_v57  ;;  %3886 = vperm.xlu1 (%p2785_p7), %5163, %v3860_v3   ;;  %v3862_v35 = vld [vmem:[%s12095_s6 + $0x20] sm:$0xff] (%p2785_p7) }
 0x364   : > { %v3757_v22 = vmax.f32 %v3752_v11, %v3756_v39  ;;  %v3774_v34 = vmax.f32 %v3769_v51, %v3773_v48  ;;  %3881 = vperm.xlu0 (%p2785_p7), %5162, %v3859_v30   ;;  %v3863_v51 = vld [vmem:[%s12095_s6 + $0x28] sm:$0xff] (%p2785_p7)  ;;  %v4456_v3 = vld [vmem:[%s12099_s10 + $0x20] sm:$0xff] (%p2785_p7) }
 0x365   : > { %v3788_v28 = vmax.f32 %v3783_v21, %v3787_v12  ;;  %v4457_v30 = vld [vmem:[%s12099_s10 + $0x28] sm:$0xff] (%p2785_p7) }
 0x366   : > { %v3759_v8 = vadd.f32 %v3758_v5, %v3757_v22  ;;  %v3775_v26 = vadd.f32 %v3774_v34, %v3758_v5  ;;  %v3865_v34 = vld [vmem:[%s12095_s6 + $0x38] sm:$0xff] (%p2785_p7) }
 0x367   : > { %v3789_v19 = vadd.f32 %v3788_v28, %v3758_v5  ;;  %3891 = vperm.xlu1 (%p2785_p7), %5163, %v3861_v55   ;;  %v3864_v5 = vld [vmem:[%s12095_s6 + $0x30] sm:$0xff] (%p2785_p7)  ;;  %v4461_v55 = vld [vmem:[%s12099_s10 + $0x48] sm:$0xff] (%p2785_p7) }
 0x368   : > { %v3760_v56 = vmax.f32 %v3759_v8, 0.0  ;;  %v3776_v23 = vmax.f32 %v3775_v26, 0.0  ;;  %2787 = sbr.rel (!%p2785_p7) target bundleno = 680 (0x2a8), region = 114  ;;  %3896 = vperm.xlu0 (%p2785_p7), %5162, %v3862_v35   ;;  %v3866_v8 = vld [vmem:[%s12095_s6 + $0x40] sm:$0xff] (%p2785_p7)  ;;  %v3867_v26 = vld [vmem:[%s12095_s6 + $0x48] sm:$0xff] (%p2785_p7)  ;;  %v4463_v35 = vld [vmem:[%s12099_s10 + $0x58] sm:$0xff] (%p2785_p7) }
 0x369   : > { %v3790_v4 = vmax.f32 %v3789_v19, 0.0  ;;  %v5164_v19 = vld [vmem:[%s12094_s5] ss:$8 sps:$4 sm:$0xff] (%p2785_p7)  }
 0x36a   : > { %3763 = vst [vmem:[%s3762_s12] sm:$0x1] %v3760_v56  ;;  %3764 = vst [vmem:[%s3762_s12 - $0x1] sm:$0x4] %v3760_v56 }
 0x36b   : > { %3765 = vst [vmem:[%s3762_s12 - $0x2] sm:$0x10] %v3760_v56  ;;  %3777 = vst [vmem:[%s3762_s12 + $0x3] sm:$0x1] %v3776_v23  ;;  %3901 = vperm.xlu1 (%p2785_p7), %5163, %v3863_v51   ;;  %v5167_v56 = vld [vmem:[%s12094_s5 + $0x14] ss:$8 sps:$4 sm:$0xff] (%p2785_p7)  }
 0x36c   : > { %3778 = vst [vmem:[%s3762_s12 + $0x2] sm:$0x4] %v3776_v23  ;;  %3779 = vst [vmem:[%s3762_s12 + $0x1] sm:$0x10] %v3776_v23  ;;  %3906 = vperm.xlu0 (%p2785_p7), %5162, %v3864_v5   ;;  %v3868_v23 = vld [vmem:[%s12095_s6 + $0x50] sm:$0xff] (%p2785_p7) }
 0x36d   : > { %3791 = vst [vmem:[%s3762_s12 + $0x6] sm:$0x1] %v3790_v4  ;;  %3792 = vst [vmem:[%s3762_s12 + $0x5] sm:$0x4] %v3790_v4 }
 0x36e   : > { %3793 = vst [vmem:[%s3762_s12 + $0x4] sm:$0x10] %v3790_v4  ;;  %v3869_v4 = vld [vmem:[%s12095_s6 + $0x58] sm:$0xff] (%p2785_p7) }
 0x36f   :  { %3911 = vperm.xlu1 %5163, %v3865_v34  }
 0x370   :  { %3916 = vperm.xlu0 %5162, %v3866_v8  }
 0x373   :  { %3921 = vperm.xlu1 %5163, %v3867_v26  }
 0x374   :  { %3926 = vperm.xlu0 %5162, %v3868_v23  }
 0x375   :  { %v3810_v13 = vld [vmem:[#allocation3 + $0x80] sm:$0xff]  ;;  %v3811_v46 = vld [vmem:[#allocation3 + $0x88] sm:$0xff]  ;;  %v3812_v63 = vld [vmem:[#allocation3 + $0x90] sm:$0xff] }
 0x376   :  { %v3794_v14 = vld [vmem:[#allocation3] sm:$0xff]  ;;  %v3834_v18 = vpack.c.bf16 %v3811_v46, %v3810_v13  ;;  %v3795_v53 = vld [vmem:[#allocation3 + $0x8] sm:$0xff]  ;;  %v3813_v49 = vld [vmem:[#allocation3 + $0x98] sm:$0xff] }
 0x377   :  { %v3826_v44 = vpack.c.bf16 %v3795_v53, %v3794_v14  ;;  %v3835_v43 = vpack.c.bf16 %v3813_v49, %v3812_v63  ;;  %v3796_v6 = vld [vmem:[#allocation3 + $0x10] sm:$0xff]  ;;  %v3797_v27 = vld [vmem:[#allocation3 + $0x18] sm:$0xff]  ;;  %v3814_v37 = vld [vmem:[#allocation3 + $0xa0] sm:$0xff]  ;;  %3931 = vperm.xlu1 %5163, %v3869_v4  }
 0x378   :  { %4980 = vmatprep.subr.bf16.mxu0 %v3834_v18  ;;  %v3815_v24 = vld [vmem:[#allocation3 + $0xa8] sm:$0xff]  ;;  %v3827_v45 = vpack.c.bf16 %v3797_v27, %v3796_v6  ;;  %v3798_v41 = vld [vmem:[#allocation3 + $0x20] sm:$0xff]  ;;  %v3816_v16 = vld [vmem:[#allocation3 + $0xb0] sm:$0xff] }
 0x379   :  { %4981 = vmatpush3.bf16.msra.mxu0 %v3826_v44  ;;  %v3836_v62 = vpack.c.bf16 %v3815_v24, %v3814_v37  ;;  %v3799_v15 = vld [vmem:[#allocation3 + $0x28] sm:$0xff]  ;;  %v3817_v36 = vld [vmem:[#allocation3 + $0xb8] sm:$0xff]  ;;  %v3800_v9 = vld [vmem:[#allocation3 + $0x30] sm:$0xff] }
 0x37a   :  { %4982 = vmatprep.subr.bf16.mxu0 %v3835_v43  ;;  %v3828_v59 = vpack.c.bf16 %v3799_v15, %v3798_v41  ;;  %v3837_v7 = vpack.c.bf16 %v3817_v36, %v3816_v16  ;;  %v3801_v2 = vld [vmem:[#allocation3 + $0x38] sm:$0xff]  ;;  %v3818_v29 = vld [vmem:[#allocation3 + $0xc0] sm:$0xff]  ;;  %v3819_v47 = vld [vmem:[#allocation3 + $0xc8] sm:$0xff] }
 0x37b   :  { %v3829_v40 = vpack.c.bf16 %v3801_v2, %v3800_v9  ;;  %v3802_v32 = vld [vmem:[#allocation3 + $0x40] sm:$0xff]  ;;  %v3838_v54 = vpack.c.bf16 %v3819_v47, %v3818_v29  ;;  %v3803_v1 = vld [vmem:[#allocation3 + $0x48] sm:$0xff]  ;;  %v3820_v33 = vld [vmem:[#allocation3 + $0xd0] sm:$0xff] }
 0x37c   :  { %v3821_v61 = vld [vmem:[#allocation3 + $0xd8] sm:$0xff]  ;;  %v3830_v20 = vpack.c.bf16 %v3803_v1, %v3802_v32  ;;  %v3804_v31 = vld [vmem:[#allocation3 + $0x50] sm:$0xff]  ;;  %v3822_v38 = vld [vmem:[#allocation3 + $0xe0] sm:$0xff] }
 0x37d   :  { %4983 = vmatpush3.bf16.msra.mxu0 %v3827_v45  ;;  %v3839_v10 = vpack.c.bf16 %v3821_v61, %v3820_v33  ;;  %v3805_v42 = vld [vmem:[#allocation3 + $0x58] sm:$0xff]  ;;  %v3823_v25 = vld [vmem:[#allocation3 + $0xe8] sm:$0xff]  ;;  %v3806_v52 = vld [vmem:[#allocation3 + $0x60] sm:$0xff] }
 0x37e   :  { %4984 = vmatprep.subr.bf16.mxu0 %v3836_v62  ;;  %v3831_v58 = vpack.c.bf16 %v3805_v42, %v3804_v31  ;;  %v3840_v50 = vpack.c.bf16 %v3823_v25, %v3822_v38  ;;  %v3807_v57 = vld [vmem:[#allocation3 + $0x68] sm:$0xff]  ;;  %v3824_v11 = vld [vmem:[#allocation3 + $0xf0] sm:$0xff]  ;;  %v3825_v39 = vld [vmem:[#allocation3 + $0xf8] sm:$0xff] }
 0x37f   :  { %v3832_v48 = vpack.c.bf16 %v3807_v57, %v3806_v52  ;;  %v3841_v21 = vpack.c.bf16 %v3825_v39, %v3824_v11  ;;  %v3808_v12 = vld [vmem:[#allocation3 + $0x70] sm:$0xff]  ;;  %v3809_v22 = vld [vmem:[#allocation3 + $0x78] sm:$0xff]  ;;  %v3870_v13 = vld [vmem:[%s12095_s6 + $0x60] sm:$0xff] }
 0x380   :  { %v3833_v28 = vpack.c.bf16 %v3809_v22, %v3808_v12  ;;  %v5169_v46 = vld [vmem:[%s12094_s5 + $0x10] ss:$8 sps:$4 sm:$0xff]   ;;  %v3871_v14 = vld [vmem:[%s12095_s6 + $0x68] sm:$0xff]  ;;  %3936 = vperm.xlu0 %5162, %v3870_v13   ;;  %v4171_v49 = vld [vmem:[%s12097_s8] sm:$0xff] }
 0x381   :  { %4985 = vmatpush3.bf16.msra.mxu0 %v3828_v59  ;;  %v5170_v18 = vld [vmem:[%s12094_s5 + $0x24] ss:$8 sps:$4 sm:$0xff]   ;;  %v3872_v53 = vld [vmem:[%s12095_s6 + $0x70] sm:$0xff]  ;;  %v3873_v63 = vld [vmem:[%s12095_s6 + $0x78] sm:$0xff]  ;;  %3941 = vperm.xlu1 %5163, %v3871_v14  }
 0x382   :  { %4986 = vmatprep.subr.bf16.mxu0 %v3837_v7  ;;  %v5172_v44 = vld [vmem:[%s12094_s5 + $0x20] ss:$8 sps:$4 sm:$0xff]   ;;  %v5173_v43 = vld [vmem:[%s12094_s5 + $0x34] ss:$8 sps:$4 sm:$0xff]   ;;  %v5175_v45 = vld [vmem:[%s12094_s5 + $0x30] ss:$8 sps:$4 sm:$0xff]  }
 0x383   :  { %v4173_v6 = vld [vmem:[%s12097_s8 + $0x10] sm:$0xff]  ;;  %v4174_v27 = vld [vmem:[%s12097_s8 + $0x18] sm:$0xff]  ;;  %v4175_v37 = vld [vmem:[%s12097_s8 + $0x20] sm:$0xff] }
 0x384   :  { %3946 = vperm.xlu0 %5162, %v3872_v53   ;;  %v4176_v24 = vld [vmem:[%s12097_s8 + $0x28] sm:$0xff]  ;;  %v4177_v41 = vld [vmem:[%s12097_s8 + $0x30] sm:$0xff]  ;;  %v4178_v15 = vld [vmem:[%s12097_s8 + $0x38] sm:$0xff] }
 0x385   :  { %4987 = vmatpush3.bf16.msra.mxu0 %v3829_v40  ;;  %3951 = vperm.xlu1 %5163, %v3873_v63   ;;  %v5176_v62 = vld [vmem:[%s12094_s5 + $0x44] ss:$8 sps:$4 sm:$0xff]   ;;  %v5178_v59 = vld [vmem:[%s12094_s5 + $0x40] ss:$8 sps:$4 sm:$0xff]   ;;  %v5179_v7 = vld [vmem:[%s12094_s5 + $0x54] ss:$8 sps:$4 sm:$0xff]  }
 0x386   :  { %4988 = vmatprep.subr.bf16.mxu0 %v3838_v54  ;;  %v4179_v16 = vld [vmem:[%s12097_s8 + $0x40] sm:$0xff]  ;;  %v4180_v36 = vld [vmem:[%s12097_s8 + $0x48] sm:$0xff]  ;;  %v4181_v9 = vld [vmem:[%s12097_s8 + $0x50] sm:$0xff] }
 0x387   :  { %v4182_v2 = vld [vmem:[%s12097_s8 + $0x58] sm:$0xff]  ;;  %v4183_v29 = vld [vmem:[%s12097_s8 + $0x60] sm:$0xff]  ;;  %v4184_v47 = vld [vmem:[%s12097_s8 + $0x68] sm:$0xff] }
 0x388   :  { %4189 = vperm.xlu0 %5162, %v4171_v49   ;;  %v5182_v40 = vld [vmem:[%s12094_s5 + $0x64] ss:$8 sps:$4 sm:$0xff]   ;;  %v4185_v32 = vld [vmem:[%s12097_s8 + $0x70] sm:$0xff]  ;;  %v4186_v54 = vld [vmem:[%s12097_s8 + $0x78] sm:$0xff] }
 0x389   :  { %4989 = vmatpush3.bf16.msra.mxu0 %v3830_v20  ;;  %4194 = vperm.xlu1 %5163, %v4172_v60   ;;  %v4452_v1 = vld [vmem:[%s12099_s10] sm:$0xff]  ;;  %v4453_v33 = vld [vmem:[%s12099_s10 + $0x8] sm:$0xff]  ;;  %v4454_v20 = vld [vmem:[%s12099_s10 + $0x10] sm:$0xff] }
 0x38a   :  { %4990 = vmatprep.subr.bf16.mxu0 %v3839_v10  ;;  %v5184_v61 = vld [vmem:[%s12094_s5 + $0x60] ss:$8 sps:$4 sm:$0xff]   ;;  %v4455_v31 = vld [vmem:[%s12099_s10 + $0x18] sm:$0xff]  ;;  %v4458_v42 = vld [vmem:[%s12099_s10 + $0x30] sm:$0xff] }
 0x38b   :  { %v5187_v10 = vld [vmem:[%s12094_s5 + $0x70] ss:$8 sps:$4 sm:$0xff]   ;;  %v4460_v25 = vld [vmem:[%s12099_s10 + $0x40] sm:$0xff]  ;;  %v4465_v52 = vld [vmem:[%s12099_s10 + $0x68] sm:$0xff] }
 0x38c   :  { %4199 = vperm.xlu0 %5162, %v4173_v6   ;;  %v4459_v38 = vld [vmem:[%s12099_s10 + $0x38] sm:$0xff]  ;;  %v4466_v57 = vld [vmem:[%s12099_s10 + $0x70] sm:$0xff]  ;;  %v5188_v39 = vld [vmem:[%s12096_s7] sm:$0xff]  }
 0x38d   :  { %4991 = vmatpush3.bf16.msra.mxu0 %v3831_v58  ;;  %4204 = vperm.xlu1 %5163, %v4174_v27   ;;  %v4462_v58 = vld [vmem:[%s12099_s10 + $0x50] sm:$0xff]  ;;  %v4467_v11 = vld [vmem:[%s12099_s10 + $0x78] sm:$0xff] }
 0x38e   :  { %4992 = vmatprep.subr.bf16.mxu0 %v3840_v50  ;;  %v4464_v50 = vld [vmem:[%s12099_s10 + $0x60] sm:$0xff]  ;;  %5092 = vmatprep.mubr.bf16.mxu1 %v5188_v39 }
 0x390   :  { %4209 = vperm.xlu0 %5162, %v4175_v37  }
 0x391   :  { %4993 = vmatpush3.bf16.msra.mxu0 %v3832_v48  ;;  %4214 = vperm.xlu1 %5163, %v4176_v24  }
 0x392   :  { %4994 = vmatprep.subr.bf16.mxu0 %v3841_v21 }
 0x394   :  { %4219 = vperm.xlu0 %5162, %v4177_v41  }
 0x395   :  { %4995 = vmatpush3.bf16.msra.mxu0 %v3833_v28  ;;  %4224 = vperm.xlu1 %5163, %v4178_v15  }
 0x398   :  { %4067 = vmatmul.mubr.bf16.vlgmr.msra.gmra.mrb[0].mxu0 %v5164_v19  ;;  %4229 = vperm.xlu0 %5162, %v4179_v16  }
 0x399   :  { %4074 = vmatprep.mubr.bf16.mxu0 %v5167_v56  ;;  %4234 = vperm.xlu1 %5163, %v4180_v36  }
 0x39c   :  { %4239 = vperm.xlu0 %5162, %v4181_v9  }
 0x39d   :  { %4244 = vperm.xlu1 %5163, %v4182_v2  }
 0x3a0   :  { %4075 = vmatmul.mubr.bf16.gmra.mrb[4].mxu0 %v5169_v46  ;;  %4249 = vperm.xlu0 %5162, %v4183_v29  }
 0x3a1   :  { %4082 = vmatprep.mubr.bf16.mxu0 %v5170_v18  ;;  %4254 = vperm.xlu1 %5163, %v4184_v47  }
 0x3a4   :  { %4259 = vperm.xlu0 %5162, %v4185_v32  }
 0x3a5   :  { %4264 = vperm.xlu1 %5163, %v4186_v54  }
 0x3a8   :  { %4083 = vmatmul.mubr.bf16.gmra.mrb[8].mxu0 %v5172_v44  ;;  %4470 = vperm.xlu0 %5162, %v4452_v1  }
 0x3a9   :  { %4090 = vmatprep.mubr.bf16.mxu0 %v5173_v43  ;;  %4475 = vperm.xlu1 %5163, %v4453_v33  }
 0x3ac   :  { %4480 = vperm.xlu0 %5162, %v4454_v20  }
 0x3ad   :  { %4485 = vperm.xlu1 %5163, %v4455_v31  }
 0x3b0   :  { %4091 = vmatmul.mubr.bf16.gmra.mrb[12].mxu0 %v5175_v45  ;;  %4490 = vperm.xlu0 %5162, %v4456_v3  }
 0x3b1   :  { %4098 = vmatprep.mubr.bf16.mxu0 %v5176_v62  ;;  %4495 = vperm.xlu1 %5163, %v4457_v30  }
 0x3b4   :  { %4500 = vperm.xlu0 %5162, %v4458_v42  }
 0x3b5   :  { %4505 = vperm.xlu1 %5163, %v4459_v38  }
 0x3b8   :  { %4099 = vmatmul.mubr.bf16.gmra.mrb[16].mxu0 %v5178_v59  ;;  %4510 = vperm.xlu0 %5162, %v4460_v25  }
 0x3b9   :  { %4106 = vmatprep.mubr.bf16.mxu0 %v5179_v7  ;;  %4515 = vperm.xlu1 %5163, %v4461_v55  }
 0x3bc   :  { %4520 = vperm.xlu0 %5162, %v4462_v58  }
 0x3bd   :  { %4525 = vperm.xlu1 %5163, %v4463_v35  }
 0x3c0   :  { %4107 = vmatmul.mubr.bf16.gmra.mrb[20].mxu0 %v5181_v17  ;;  %4530 = vperm.xlu0 %5162, %v4464_v50  }
 0x3c1   :  { %4114 = vmatprep.mubr.bf16.mxu0 %v5182_v40  ;;  %4535 = vperm.xlu1 %5163, %v4465_v52  }
 0x3c4   :  { %4540 = vperm.xlu0 %5162, %v4466_v57  }
 0x3c5   :  { %4545 = vperm.xlu1 %5163, %v4467_v11  }
 0x3c8   :  { %4115 = vmatmul.mubr.bf16.gmra.mrb[24].mxu0 %v5184_v61 }
 0x3c9   :  { %4122 = vmatprep.mubr.bf16.mxu0 %v5185_v0 }
 0x3d0   :  { %4123 = vmatmul.mubr.bf16.gmra.mrb[28].mxu0 %v5187_v10 }
 0x3df   :  { %v3877_v51 = vpop.permute.xlu0 %3876 }
 0x3e2   :  { %v3887_v19 = vpop.permute.xlu1 %3886 }
 0x3e3   :  { %v3882_v8 = vpop.permute.xlu0 %3881 }
 0x3e6   :  { %v3892_v60 = vpop.permute.xlu1 %3891 }
 0x3e7   :  { %v3897_v41 = vpop.permute.xlu0 %3896 }
 0x3ea   :  { %v3902_v59 = vpop.permute.xlu1 %3901 }
 0x3eb   :  { %v3907_v54 = vpop.permute.xlu0 %3906 }
 0x3ee   :  { %v3912_v0 = vpop.permute.xlu1 %3911 }
 0x3ef   :  { %v3917_v55 = vpop.permute.xlu0 %3916 }
 0x3f2   :  { %v3922_v52 = vpop.permute.xlu1 %3921 }
 0x46b   :  { %v4996_v48 = vpop.f32.mrb[0].mxu0 }
 0x46c   :  { %v4997_v5 = vpop.f32.mrb[1].mxu0 }
 0x46d   :  { %v4998_v21 = vadd.f32 %v4997_v5, %v4996_v48  ;;  %v4999_v12 = vpop.f32.mrb[2].mxu0 }
 0x46e   :  { %v5000_v22 = vpop.f32.mrb[3].mxu0 }
 0x46f   :  { %v4069_v34 = vadd.f32 %v4998_v21, %v3877_v51  ;;  %v5001_v28 = vadd.f32 %v5000_v22, %v4999_v12  ;;  %v3927_v22 = vpop.permute.xlu0 %3926 }
 0x471   :  { %v4072_v26 = vadd.f32 %v5001_v28, %v3882_v8  ;;  %v4131_v56 = vmax.f32 %v4069_v34, 0.0 }
 0x473   :  { %v4132_v23 = vmax.f32 %v4072_v26, 0.0  ;;  %v5002_v4 = vpop.f32.mrb[4].mxu0  ;;  %v3932_v26 = vpop.permute.xlu1 %3931 }
 0x474   :  { %v5003_v13 = vpop.f32.mrb[5].mxu0 }
 0x475   :  { %v5004_v46 = vadd.f32 %v5003_v13, %v5002_v4  ;;  %v5005_v14 = vpop.f32.mrb[6].mxu0  ;;  %v4163_v18 = vpack.c.bf16 %v4132_v23, %v4131_v56 }
 0x476   :  { %v5006_v53 = vpop.f32.mrb[7].mxu0 }
 0x477   :  { %v4077_v63 = vadd.f32 %v5004_v46, %v3887_v19  ;;  %v5007_v49 = vadd.f32 %v5006_v53, %v5005_v14  ;;  %5076 = vmatprep.subr.bf16.mxu1 %v4163_v18  ;;  %v3937_v53 = vpop.permute.xlu0 %3936 }
 0x478   :  { %5077 = vmatpush3.bf16.msra.mxu1 %v4163_v18 }
 0x479   :  { %v4080_v44 = vadd.f32 %v5007_v49, %v3892_v60  ;;  %v4133_v43 = vmax.f32 %v4077_v63, 0.0 }
 0x47b   :  { %v4134_v6 = vmax.f32 %v4080_v44, 0.0  ;;  %v5008_v27 = vpop.f32.mrb[8].mxu0  ;;  %v3942_v44 = vpop.permute.xlu1 %3941 }
 0x47c   :  { %v5009_v37 = vpop.f32.mrb[9].mxu0 }
 0x47d   :  { %v5010_v24 = vadd.f32 %v5009_v37, %v5008_v27  ;;  %v5011_v45 = vpop.f32.mrb[10].mxu0  ;;  %v4164_v62 = vpack.c.bf16 %v4134_v6, %v4133_v43 }
 0x47e   :  { %v5012_v15 = vpop.f32.mrb[11].mxu0 }
 0x47f   :  { %v4085_v16 = vadd.f32 %v5010_v24, %v3897_v41  ;;  %v5013_v36 = vadd.f32 %v5012_v15, %v5011_v45  ;;  %5078 = vmatprep.subr.bf16.mxu1 %v4164_v62  ;;  %v3947_v15 = vpop.permute.xlu0 %3946 }
 0x480   :  { %5079 = vmatpush3.bf16.msra.mxu1 %v4164_v62 }
 0x481   :  { %v4088_v7 = vadd.f32 %v5013_v36, %v3902_v59  ;;  %v4135_v9 = vmax.f32 %v4085_v16, 0.0 }
 0x483   :  { %v4136_v2 = vmax.f32 %v4088_v7, 0.0  ;;  %v5014_v29 = vpop.f32.mrb[12].mxu0  ;;  %v3952_v7 = vpop.permute.xlu1 %3951 }
 0x484   :  { %v5015_v47 = vpop.f32.mrb[13].mxu0 }
 0x485   :  { %v5016_v17 = vadd.f32 %v5015_v47, %v5014_v29  ;;  %v5017_v40 = vpop.f32.mrb[14].mxu0  ;;  %v4165_v32 = vpack.c.bf16 %v4136_v2, %v4135_v9 }
 0x486   :  { %v5018_v1 = vpop.f32.mrb[15].mxu0 }
 0x487   :  { %v4093_v33 = vadd.f32 %v5016_v17, %v3907_v54  ;;  %v5019_v61 = vadd.f32 %v5018_v1, %v5017_v40  ;;  %5080 = vmatprep.subr.bf16.mxu1 %v4165_v32  ;;  %v5189_v17 = vld [vmem:[%s12096_s7 + $0x8] sm:$0xff]   ;;  %v5190_v40 = vld [vmem:[%s12096_s7 + $0x10] sm:$0xff]   ;;  %v5192_v54 = vld [vmem:[%s12096_s7 + $0x20] sm:$0xff]  }
 0x488   :  { %5081 = vmatpush3.bf16.msra.mxu1 %v4165_v32  ;;  %v5191_v32 = vld [vmem:[%s12096_s7 + $0x18] sm:$0xff]   ;;  %v5193_v1 = vld [vmem:[%s12096_s7 + $0x28] sm:$0xff]  }
 0x489   :  { %v4096_v20 = vadd.f32 %v5019_v61, %v3912_v0  ;;  %v4137_v31 = vmax.f32 %v4093_v33, 0.0  ;;  %v5194_v33 = vld [vmem:[%s12096_s7 + $0x30] sm:$0xff]   ;;  %v5195_v61 = vld [vmem:[%s12096_s7 + $0x38] sm:$0xff]   ;;  %v5196_v0 = vld [vmem:[%s12098_s9] sm:$0xff]  }
 0x48b   :  { %v4138_v3 = vmax.f32 %v4096_v20, 0.0  ;;  %v5020_v30 = vpop.f32.mrb[16].mxu0  ;;  %v4190_v20 = vpop.permute.xlu0 %4189 }
 0x48c   :  { %v5021_v10 = vpop.f32.mrb[17].mxu0 }
 0x48d   :  { %v5022_v42 = vadd.f32 %v5021_v10, %v5020_v30  ;;  %v5023_v38 = vpop.f32.mrb[18].mxu0  ;;  %v4166_v25 = vpack.c.bf16 %v4138_v3, %v4137_v31  ;;  %v4195_v31 = vpop.permute.xlu1 %4194 }
 0x48e   :  { %v5024_v58 = vpop.f32.mrb[19].mxu0 }
 0x48f   :  { %v4101_v35 = vadd.f32 %v5022_v42, %v3917_v55  ;;  %v5025_v50 = vadd.f32 %v5024_v58, %v5023_v38  ;;  %5082 = vmatprep.subr.bf16.mxu1 %v4166_v25  ;;  %v4200_v3 = vpop.permute.xlu0 %4199 }
 0x490   :  { %5083 = vmatpush3.bf16.msra.mxu1 %v4166_v25 }
 0x491   :  { %v4104_v57 = vadd.f32 %v5025_v50, %v3922_v52  ;;  %v4139_v11 = vmax.f32 %v4101_v35, 0.0  ;;  %v4205_v30 = vpop.permute.xlu1 %4204 }
 0x493   :  { %v4140_v39 = vmax.f32 %v4104_v57, 0.0  ;;  %v5026_v51 = vpop.f32.mrb[20].mxu0  ;;  %v4210_v10 = vpop.permute.xlu0 %4209 }
 0x494   :  { %v5027_v48 = vpop.f32.mrb[21].mxu0 }
 0x495   :  { %v5028_v5 = vadd.f32 %v5027_v48, %v5026_v51  ;;  %v5029_v21 = vpop.f32.mrb[22].mxu0  ;;  %v4167_v12 = vpack.c.bf16 %v4140_v39, %v4139_v11  ;;  %v4215_v42 = vpop.permute.xlu1 %4214 }
 0x496   :  { %v5030_v34 = vpop.f32.mrb[23].mxu0 }
 0x497   :  { %v4109_v28 = vadd.f32 %v5028_v5, %v3927_v22  ;;  %v5031_v8 = vadd.f32 %v5030_v34, %v5029_v21  ;;  %5084 = vmatprep.subr.bf16.mxu1 %v4167_v12  ;;  %v4220_v38 = vpop.permute.xlu0 %4219 }
 0x498   :  { %5085 = vmatpush3.bf16.msra.mxu1 %v4167_v12 }
 0x499   :  { %v4112_v19 = vadd.f32 %v5031_v8, %v3932_v26  ;;  %v4141_v56 = vmax.f32 %v4109_v28, 0.0  ;;  %v4225_v35 = vpop.permute.xlu1 %4224 }
 0x49b   :  { %v4142_v23 = vmax.f32 %v4112_v19, 0.0  ;;  %v5032_v4 = vpop.f32.mrb[24].mxu0  ;;  %v4230_v5 = vpop.permute.xlu0 %4229 }
 0x49c   :  { %v5033_v13 = vpop.f32.mrb[25].mxu0 }
 0x49d   :  { %v5034_v46 = vadd.f32 %v5033_v13, %v5032_v4  ;;  %v5035_v14 = vpop.f32.mrb[26].mxu0  ;;  %v4168_v18 = vpack.c.bf16 %v4142_v23, %v4141_v56  ;;  %v4235_v34 = vpop.permute.xlu1 %4234 }
 0x49e   :  { %v5036_v63 = vpop.f32.mrb[27].mxu0 }
 0x49f   :  { %v4117_v49 = vadd.f32 %v5034_v46, %v3937_v53  ;;  %v5037_v60 = vadd.f32 %v5036_v63, %v5035_v14  ;;  %5086 = vmatprep.subr.bf16.mxu1 %v4168_v18  ;;  %v4240_v46 = vpop.permute.xlu0 %4239 }
 0x4a0   :  { %5087 = vmatpush3.bf16.msra.mxu1 %v4168_v18 }
 0x4a1   :  { %v4120_v43 = vadd.f32 %v5037_v60, %v3942_v44  ;;  %v4143_v6 = vmax.f32 %v4117_v49, 0.0  ;;  %v4245_v63 = vpop.permute.xlu1 %4244 }
 0x4a3   :  { %v4144_v27 = vmax.f32 %v4120_v43, 0.0  ;;  %v5038_v37 = vpop.f32.mrb[28].mxu0 }
 0x4a4   :  { %v5039_v24 = vpop.f32.mrb[29].mxu0 }
 0x4a5   :  { %v5040_v45 = vadd.f32 %v5039_v24, %v5038_v37  ;;  %v5041_v62 = vpop.f32.mrb[30].mxu0  ;;  %v4169_v41 = vpack.c.bf16 %v4144_v27, %v4143_v6  ;;  %v4250_v24 = vpop.permute.xlu0 %4249 }
 0x4a6   :  { %v5042_v16 = vpop.f32.mrb[31].mxu0 }
 0x4a7   :  { %v4125_v36 = vadd.f32 %v5040_v45, %v3947_v15  ;;  %v5043_v59 = vadd.f32 %v5042_v16, %v5041_v62  ;;  %5088 = vmatprep.subr.bf16.mxu1 %v4169_v41  ;;  %v4255_v16 = vpop.permute.xlu1 %4254 }
 0x4a8   :  { %5089 = vmatpush3.bf16.msra.mxu1 %v4169_v41 }
 0x4a9   :  { %v4128_v9 = vadd.f32 %v5043_v59, %v3952_v7  ;;  %v4145_v2 = vmax.f32 %v4125_v36, 0.0 }
 0x4ab   :  { %v4146_v29 = vmax.f32 %v4128_v9, 0.0 }
 0x4ad   :  { %v4170_v47 = vpack.c.bf16 %v4146_v29, %v4145_v2 }
 0x4af   :  { %5090 = vmatprep.subr.bf16.mxu1 %v4170_v47 }
 0x4b0   :  { %5091 = vmatpush3.bf16.msra.mxu1 %v4170_v47  ;;  %v4260_v47 = vpop.permute.xlu0 %4259 }
 0x4b3   :  { %5093 = vmatmul.mubr.bf16.vlgmr.msra.gmra.mrb[0].mxu1 %v5189_v17 }
 0x4b4   :  { %5096 = vmatprep.mubr.bf16.mxu1 %v5190_v40 }
 0x4bb   :  { %5097 = vmatmul.mubr.bf16.gmra.mrb[4].mxu1 %v5191_v32 }
 0x4bc   :  { %5100 = vmatprep.mubr.bf16.mxu1 %v5192_v54 }
 0x4c3   :  { %5101 = vmatmul.mubr.bf16.gmra.mrb[8].mxu1 %v5193_v1  ;;  %v4265_v1 = vpop.permute.xlu1 %4264 }
 0x4c4   :  { %5104 = vmatprep.mubr.bf16.mxu1 %v5194_v33 }
 0x4cb   :  { %5105 = vmatmul.mubr.bf16.gmra.mrb[12].mxu1 %v5195_v61 }
 0x4cc   :  { %5124 = vmatprep.mubr.bf16.mxu1 %v5196_v0 }
 0x586   :  { %v5094_v25 = vpop.f32.mrb[0].mxu1 }
 0x587   :  { %v4358_v55 = vadd.f32 %v5094_v25, %v4200_v3  ;;  %v4349_v58 = vpop.f32.mrb[1].mxu1 }
 0x588   :  { %v4350_v50 = vadd.f32 %v4349_v58, %v4190_v20  ;;  %v5095_v52 = vpop.f32.mrb[2].mxu1  ;;  %v5198_v58 = vld [vmem:[%s12098_s9 + $0x10] sm:$0xff]  }
 0x589   :  { %v4361_v57 = vadd.f32 %v5095_v52, %v4205_v30  ;;  %v4352_v11 = vpop.f32.mrb[3].mxu1  ;;  %v4414_v51 = vmax.f32 %v4358_v55, 0.0  ;;  %v5197_v55 = vld [vmem:[%s12098_s9 + $0x8] sm:$0xff]  }
 0x58a   :  { %v4353_v39 = vadd.f32 %v4352_v11, %v4195_v31  ;;  %v4412_v21 = vmax.f32 %v4350_v50, 0.0  ;;  %v5200_v50 = vld [vmem:[%s12098_s9 + $0x20] sm:$0xff]   ;;  %v5201_v52 = vld [vmem:[%s12098_s9 + $0x28] sm:$0xff]   ;;  %v5203_v11 = vld [vmem:[%s12098_s9 + $0x38] sm:$0xff]  }
 0x58b   :  { %v4415_v48 = vmax.f32 %v4361_v57, 0.0  ;;  %v5202_v57 = vld [vmem:[%s12098_s9 + $0x30] sm:$0xff]  }
 0x58c   :  { %v4413_v12 = vmax.f32 %v4353_v39, 0.0  ;;  %v4471_v39 = vpop.permute.xlu0 %4470 }
 0x58d   :  { %v4445_v22 = vpack.c.bf16 %v4415_v48, %v4414_v51  ;;  %v4476_v51 = vpop.permute.xlu1 %4475 }
 0x58e   :  { %v4444_v28 = vpack.c.bf16 %v4413_v12, %v4412_v21  ;;  %v5098_v8 = vpop.f32.mrb[4].mxu1 }
 0x58f   :  { %v4374_v26 = vadd.f32 %v5098_v8, %v4220_v38  ;;  %v4365_v19 = vpop.f32.mrb[5].mxu1 }
 0x590   :  { %v4366_v56 = vadd.f32 %v4365_v19, %v4210_v10  ;;  %v5099_v23 = vpop.f32.mrb[6].mxu1  ;;  %5108 = vmatprep.subr.bf16.mxu1 %v4444_v28  ;;  %v4481_v48 = vpop.permute.xlu0 %4480 }
 0x591   :  { %v4377_v4 = vadd.f32 %v5099_v23, %v4225_v35  ;;  %v4368_v13 = vpop.f32.mrb[7].mxu1  ;;  %5109 = vmatpush3.bf16.msra.mxu1 %v4444_v28  ;;  %v4418_v18 = vmax.f32 %v4374_v26, 0.0  ;;  %v5199_v35 = vld [vmem:[%s12098_s9 + $0x18] sm:$0xff]  }
 0x592   :  { %v4369_v14 = vadd.f32 %v4368_v13, %v4215_v42  ;;  %5110 = vmatprep.subr.bf16.mxu1 %v4445_v22  ;;  %v4416_v49 = vmax.f32 %v4366_v56, 0.0 }
 0x593   :  { %v4419_v53 = vmax.f32 %v4377_v4, 0.0 }
 0x594   :  { %v4417_v60 = vmax.f32 %v4369_v14, 0.0  ;;  %v4491_v21 = vpop.permute.xlu0 %4490 }
 0x595   :  { %v4447_v44 = vpack.c.bf16 %v4419_v53, %v4418_v18  ;;  %5111 = vmatpush3.bf16.msra.mxu1 %v4445_v22 }
 0x596   :  { %v4446_v43 = vpack.c.bf16 %v4417_v60, %v4416_v49  ;;  %v5102_v6 = vpop.f32.mrb[8].mxu1 }
 0x597   :  { %v4390_v27 = vadd.f32 %v5102_v6, %v4240_v46  ;;  %v4381_v37 = vpop.f32.mrb[9].mxu1 }
 0x598   :  { %v4382_v45 = vadd.f32 %v4381_v37, %v4230_v5  ;;  %v5103_v62 = vpop.f32.mrb[10].mxu1  ;;  %5112 = vmatprep.subr.bf16.mxu1 %v4446_v43  ;;  %v4486_v5 = vpop.permute.xlu1 %4485 }
 0x599   :  { %v4393_v41 = vadd.f32 %v5103_v62, %v4245_v63  ;;  %v4384_v15 = vpop.f32.mrb[11].mxu1  ;;  %5113 = vmatpush3.bf16.msra.mxu1 %v4446_v43  ;;  %v4422_v59 = vmax.f32 %v4390_v27, 0.0  ;;  %v4501_v22 = vpop.permute.xlu0 %4500 }
 0x59a   :  { %v4385_v36 = vadd.f32 %v4384_v15, %v4235_v34  ;;  %5114 = vmatprep.subr.bf16.mxu1 %v4447_v44  ;;  %v4420_v9 = vmax.f32 %v4382_v45, 0.0 }
 0x59b   :  { %v4423_v7 = vmax.f32 %v4393_v41, 0.0 }
 0x59c   :  { %v4421_v2 = vmax.f32 %v4385_v36, 0.0  ;;  %v4496_v12 = vpop.permute.xlu1 %4495 }
 0x59d   :  { %v4449_v29 = vpack.c.bf16 %v4423_v7, %v4422_v59  ;;  %5115 = vmatpush3.bf16.msra.mxu1 %v4447_v44  ;;  %v4511_v46 = vpop.permute.xlu0 %4510 }
 0x59e   :  { %v4448_v17 = vpack.c.bf16 %v4421_v2, %v4420_v9  ;;  %v5106_v40 = vpop.f32.mrb[12].mxu1 }
 0x59f   :  { %v4406_v32 = vadd.f32 %v5106_v40, %v4260_v47  ;;  %v4397_v54 = vpop.f32.mrb[13].mxu1 }
 0x5a0   :  { %v4398_v33 = vadd.f32 %v4397_v54, %v4250_v24  ;;  %v5107_v61 = vpop.f32.mrb[14].mxu1  ;;  %5116 = vmatprep.subr.bf16.mxu1 %v4448_v17  ;;  %v4506_v26 = vpop.permute.xlu1 %4505 }
 0x5a1   :  { %v4409_v0 = vadd.f32 %v5107_v61, %v4265_v1  ;;  %v4400_v20 = vpop.f32.mrb[15].mxu1  ;;  %5117 = vmatpush3.bf16.msra.mxu1 %v4448_v17  ;;  %v4426_v3 = vmax.f32 %v4406_v32, 0.0  ;;  %v4521_v6 = vpop.permute.xlu0 %4520 }
 0x5a2   :  { %v4401_v31 = vadd.f32 %v4400_v20, %v4255_v16  ;;  %5118 = vmatprep.subr.bf16.mxu1 %v4449_v29  ;;  %v4424_v10 = vmax.f32 %v4398_v33, 0.0 }
 0x5a3   :  { %v4427_v30 = vmax.f32 %v4409_v0, 0.0 }
 0x5a4   :  { %v4425_v42 = vmax.f32 %v4401_v31, 0.0  ;;  %v4516_v14 = vpop.permute.xlu1 %4515 }
 0x5a5   :  { %v4451_v38 = vpack.c.bf16 %v4427_v30, %v4426_v3  ;;  %5119 = vmatpush3.bf16.msra.mxu1 %v4449_v29  ;;  %v4531_v41 = vpop.permute.xlu0 %4530 }
 0x5a6   :  { %v4450_v25 = vpack.c.bf16 %v4425_v42, %v4424_v10 }
 0x5a8   :  { %5120 = vmatprep.subr.bf16.mxu1 %v4450_v25  ;;  %v4526_v37 = vpop.permute.xlu1 %4525 }
 0x5a9   :  { %5121 = vmatpush3.bf16.msra.mxu1 %v4450_v25  ;;  %v4541_v2 = vpop.permute.xlu0 %4540 }
 0x5aa   :  { %5122 = vmatprep.subr.bf16.mxu1 %v4451_v38 }
 0x5ac   :  { %v4536_v7 = vpop.permute.xlu1 %4535 }
 0x5ad   :  { %5123 = vmatpush3.bf16.msra.mxu1 %v4451_v38 }
 0x5b0   :  { %5125 = vmatmul.mubr.bf16.vlgmr.msra.gmra.mrb[16].mxu1 %v5197_v55  ;;  %v4546_v40 = vpop.permute.xlu1 %4545 }
 0x5b1   :  { %5128 = vmatprep.mubr.bf16.mxu1 %v5198_v58 }
 0x5b8   :  { %5129 = vmatmul.mubr.bf16.gmra.mrb[20].mxu1 %v5199_v35 }
 0x5b9   :  { %5132 = vmatprep.mubr.bf16.mxu1 %v5200_v50 }
 0x5c0   :  { %5133 = vmatmul.mubr.bf16.gmra.mrb[24].mxu1 %v5201_v52 }
 0x5c1   :  { %5136 = vmatprep.mubr.bf16.mxu1 %v5202_v57 }
 0x5c8   :  { %5137 = vmatmul.mubr.bf16.gmra.mrb[28].mxu1 %v5203_v11 }
 0x683   :  { %v5126_v34 = vpop.f32.mrb[16].mxu1 }
 0x684   :  { %v4639_v28 = vadd.f32 %v5126_v34, %v4481_v48  ;;  %v4630_v8 = vpop.f32.mrb[17].mxu1 }
 0x685   :  { %v4631_v19 = vadd.f32 %v4630_v8, %v4471_v39  ;;  %v5127_v56 = vpop.f32.mrb[18].mxu1 }
 0x686   :  { %4695 = vst [vmem:[%s12100_s11 + $0x10] sm:$0xff] %v4639_v28  ;;  %v4642_v23 = vadd.f32 %v5127_v56, %v4486_v5  ;;  %v4633_v4 = vpop.f32.mrb[19].mxu1 }
 0x687   :  { %4693 = vst [vmem:[%s12100_s11] sm:$0xff] %v4631_v19  ;;  %v4634_v13 = vadd.f32 %v4633_v4, %v4476_v51 }
 0x688   :  { %4696 = vst [vmem:[%s12100_s11 + $0x18] sm:$0xff] %v4642_v23 }
 0x689   :  { %4694 = vst [vmem:[%s12100_s11 + $0x8] sm:$0xff] %v4634_v13 }
 0x68b   :  { %v5130_v18 = vpop.f32.mrb[20].mxu1 }
 0x68c   :  { %v4655_v53 = vadd.f32 %v5130_v18, %v4501_v22  ;;  %v4646_v63 = vpop.f32.mrb[21].mxu1 }
 0x68d   :  { %v4647_v49 = vadd.f32 %v4646_v63, %v4491_v21  ;;  %v5131_v60 = vpop.f32.mrb[22].mxu1 }
 0x68e   :  { %4699 = vst [vmem:[%s12100_s11 + $0x30] sm:$0xff] %v4655_v53  ;;  %v4658_v44 = vadd.f32 %v5131_v60, %v4506_v26  ;;  %v4649_v43 = vpop.f32.mrb[23].mxu1 }
 0x68f   :  { %4697 = vst [vmem:[%s12100_s11 + $0x20] sm:$0xff] %v4647_v49  ;;  %v4650_v27 = vadd.f32 %v4649_v43, %v4496_v12 }
 0x690   :  { %4700 = vst [vmem:[%s12100_s11 + $0x38] sm:$0xff] %v4658_v44 }
 0x691   :  { %4698 = vst [vmem:[%s12100_s11 + $0x28] sm:$0xff] %v4650_v27 }
 0x693   :  { %v5134_v24 = vpop.f32.mrb[24].mxu1 }
 0x694   :  { %v4671_v45 = vadd.f32 %v5134_v24, %v4521_v6  ;;  %v4662_v62 = vpop.f32.mrb[25].mxu1 }
 0x695   :  { %v4663_v15 = vadd.f32 %v4662_v62, %v4511_v46  ;;  %v5135_v16 = vpop.f32.mrb[26].mxu1 }
 0x696   :  { %4703 = vst [vmem:[%s12100_s11 + $0x50] sm:$0xff] %v4671_v45  ;;  %v4674_v36 = vadd.f32 %v5135_v16, %v4526_v37  ;;  %v4665_v59 = vpop.f32.mrb[27].mxu1 }
 0x697   :  { %4701 = vst [vmem:[%s12100_s11 + $0x40] sm:$0xff] %v4663_v15  ;;  %v4666_v9 = vadd.f32 %v4665_v59, %v4516_v14 }
 0x698   :  { %4704 = vst [vmem:[%s12100_s11 + $0x58] sm:$0xff] %v4674_v36 }
 0x699   :  { %4702 = vst [vmem:[%s12100_s11 + $0x48] sm:$0xff] %v4666_v9 }
 0x69b   :  { %v5138_v29 = vpop.f32.mrb[28].mxu1 }
 0x69c   :  { %v4687_v47 = vadd.f32 %v5138_v29, %v4541_v2  ;;  %v4678_v17 = vpop.f32.mrb[29].mxu1 }
 0x69d   :  { %v4679_v32 = vadd.f32 %v4678_v17, %v4531_v41  ;;  %v5139_v54 = vpop.f32.mrb[30].mxu1 }
 0x69e   :  { %4707 = vst [vmem:[%s12100_s11 + $0x70] sm:$0xff] %v4687_v47  ;;  %v4690_v1 = vadd.f32 %v5139_v54, %v4546_v40  ;;  %v4681_v33 = vpop.f32.mrb[31].mxu1 }
 0x69f   :  { %4705 = vst [vmem:[%s12100_s11 + $0x60] sm:$0xff] %v4679_v32  ;;  %v4682_v61 = vadd.f32 %v4681_v33, %v4536_v7 }
 0x6a0   :  { %4708 = vst [vmem:[%s12100_s11 + $0x78] sm:$0xff] %v4690_v1 }
 0x6a1   :  { %4706 = vst [vmem:[%s12100_s11 + $0x68] sm:$0xff] %v4682_v61 }
 0x6a2   :  { %4713 = vsyncpa [#allocation5], 1 }
 0x6a3   :  { %4714 = vsyncpa [#allocation7], 1 }
 0x6a4   :  { %4715 = vsyncpa [#allocation10], 1 }

</bundles_post_ra>
